<compile_context>
chip_gen: v5e
topology: v5e:2x2
jax: 0.10.0
libtpu: 0.0.40
codegen_flags: <defaults>
</compile_context>

<pallas_src>
import functools
import itertools
import math

import jax
import jax.numpy as jnp
from jax.experimental import pallas as pl
from jax.experimental.pallas import tpu as pltpu


# =============================================================================
# Utilities
# =============================================================================

def _rup(x, m):
    return ((x + m - 1) // m) * m


def cpad(c):
    """Channel count carried by activations between layers (lane-dense, 128-multiple)."""
    return _rup(c, 128)


def _pick_tile(Mp, cands):
    for t in cands:
        if Mp % t == 0:
            return t
    return cands[-1]


def _pick_tk(Kp, tm, tn, budget_bytes=16 * 1024 * 1024):
    """Largest tk (multiple of 128, dividing Kp) whose double-buffered A+W tiles fit budget."""
    q = Kp // 128
    for d in range(q, 0, -1):
        if q % d:
            continue
        tk = 128 * d
        if 4 * (tm + tn) * tk <= budget_bytes or d == 1:
            return tk
    return 128


# =============================================================================
# Pallas fused matmul kernel (conv / pooled-conv / conv-transpose / 1x1 conv)
# =============================================================================

def _mm_fused_kernel(*refs, n_res, relu, post_relu, input_relu, multi_k):
    """refs = (a, w, bias, res_0..res_{n_res-1}, out, [acc_scratch])."""
    a_ref, w_ref, b_ref = refs[0], refs[1], refs[2]
    res_refs = refs[3:3 + n_res]
    o_ref = refs[3 + n_res]

    a = a_ref[...]
    if input_relu:
        a = jnp.maximum(a, 0)                       # relu commutes with im2col
    part = jnp.dot(a, w_ref[...], preferred_element_type=jnp.float32)

    def epilogue(acc):
        acc = acc + b_ref[...]                      # BN scale already folded into W
        if relu:
            acc = jnp.maximum(acc, 0.0)
        for r in res_refs:
            acc = acc + r[...].astype(jnp.float32)
        if post_relu:
            acc = jnp.maximum(acc, 0.0)
        o_ref[...] = acc.astype(o_ref.dtype)

    if multi_k:
        acc_ref = refs[4 + n_res]
        k = pl.program_id(3)

        @pl.when(k == 0)
        def _():
            acc_ref[...] = jnp.zeros_like(acc_ref)

        acc_ref[...] += part

        @pl.when(k == pl.num_programs(3) - 1)
        def _():
            epilogue(acc_ref[...])
    else:
        epilogue(part)


def matmul_fused(a, prep, residuals=(), relu=False, post_relu=False, input_relu=False):
    """out[g] = post_relu(relu(relu?(a[g]) @ W[g] + bias[g]) + sum(res[g])).

    a: (G, M, K); residuals: (G, M, Np) bf16 (padded channel width).  Returns (G, M, Np) bf16.
    """
    G, M, K = a.shape
    Gw, Kp, Np = prep['w'].shape
    assert G == Gw and K == prep['k'], (a.shape, prep['w'].shape, prep['k'])

    Mp = _rup(M, 16)                                 # bf16 packs 16 rows per vreg sublane group
    tm = _pick_tile(Mp, (256, 128, 64, 32, 16))
    tn = 256 if Np % 256 == 0 else 128
    tk = _pick_tk(Kp, tm, tn)
    nk = Kp // tk
    multi_k = nk > 1

    a_p = a if a.dtype == jnp.bfloat16 else a.astype(jnp.bfloat16)
    if Mp != M or Kp != K:
        a_p = jnp.pad(a_p, ((0, 0), (0, Mp - M), (0, Kp - K)))

    res_p = []
    for r in residuals:
        assert r.shape == (G, M, Np), (r.shape, (G, M, Np))
        rp = r if r.dtype == jnp.bfloat16 else r.astype(jnp.bfloat16)
        if Mp != M:
            rp = jnp.pad(rp, ((0, 0), (0, Mp - M), (0, 0)))
        res_p.append(rp)
    n_res = len(res_p)

    in_specs = [
        pl.BlockSpec((None, tm, tk), lambda g, i, j, k: (g, i, k)),
        pl.BlockSpec((None, tk, tn), lambda g, i, j, k: (g, k, j)),
        pl.BlockSpec((None, 1, tn), lambda g, i, j, k: (g, 0, j)),
    ] + [pl.BlockSpec((None, tm, tn), lambda g, i, j, k: (g, i, j)) for _ in res_p]
    out_specs = pl.BlockSpec((None, tm, tn), lambda g, i, j, k: (g, i, j))
    scratch = [pltpu.VMEM((tm, tn), jnp.float32)] if multi_k else []

    # Explicit VMEM budget derived from the chosen tiles (double-buffered inputs/output +
    # f32 accumulator), with headroom, capped well under v7x's 64 MiB physical VMEM.
    need = (2 * (tm * tk * 2) + 2 * (tk * tn * 2) + 2 * (tn * 4)
            + n_res * 2 * (tm * tn * 2) + 2 * (tm * tn * 2)
            + (tm * tn * 4 if multi_k else 0))
    vmem_limit = int(min(max(4 * need, 32 * 1024 * 1024), 56 * 1024 * 1024))

    out = pl.pallas_call(
        functools.partial(_mm_fused_kernel, n_res=n_res, relu=relu,
                          post_relu=post_relu, input_relu=input_relu, multi_k=multi_k),
        out_shape=jax.ShapeDtypeStruct((G, Mp, Np), jnp.bfloat16),
        grid=(G, Mp // tm, Np // tn, nk),
        in_specs=in_specs,
        out_specs=out_specs,
        scratch_shapes=scratch,
        compiler_params=pltpu.CompilerParams(
            dimension_semantics=("parallel", "parallel", "parallel", "arbitrary"),
            vmem_limit_bytes=vmem_limit),
    )(a_p, prep['w'], prep['b'], *res_p)

    if Mp != M:
        out = out[:, :M, :]
    return out


# =============================================================================
# Parameter preparation (done ONCE at init: reorder, fold BN scale into W, pad, cast bf16)
# =============================================================================

def prep_mm(w_mat, bias):
    """w_mat:(K,N) f32 (BN scale already folded); bias:(N,) -> padded bf16 weight + f32 bias."""
    K, N = w_mat.shape
    Kp, Np = _rup(K, 128), _rup(N, 128)
    w_p = jnp.pad(w_mat, ((0, Kp - K), (0, Np - N))).astype(jnp.bfloat16)[None]   # (1,Kp,Np)
    b_p = jnp.pad(bias.astype(jnp.float32), (0, Np - N)).reshape(1, 1, Np)
    return dict(w=w_p, b=b_p, k=K, n=N, np=Np)


def stack_preps(pa, pb):
    """Stack two shape-identical preps along a leading G axis (batched pallas_call)."""
    out = dict(pa)
    out['w'] = jnp.concatenate([pa['w'], pb['w']], axis=0)
    out['b'] = jnp.concatenate([pa['b'], pb['b']], axis=0)
    return out


def prep_conv(w, bn_scale, bn_bias, conv_bias=None, cin_eff=None):
    """w:(cout,cin,kx,ky,kz) -> matmul weight, tap-major / channel-minor K, cin padded to cin_eff."""
    cout, cin, kx, ky, kz = w.shape
    cin_eff = cin if cin_eff is None else cin_eff
    w = jnp.pad(w, ((0, 0), (0, cin_eff - cin), (0, 0), (0, 0), (0, 0)))
    W = w.transpose(2, 3, 4, 1, 0).reshape(kx * ky * kz * cin_eff, cout)
    W = W * bn_scale[None, :]
    bias = bn_bias if conv_bias is None else conv_bias * bn_scale + bn_bias
    p = prep_mm(W, bias)
    p['kdims'] = (kx, ky, kz)
    return p


def prep_pool_conv(w1x1, bn_scale, bn_bias, kdims, cin_eff):
    """AvgPool3d(kdims) -> Conv1x1 -> BN folded into a single pooled-conv matmul."""
    cout, cin = w1x1.shape
    kk = kdims[0] * kdims[1] * kdims[2]
    Wt = jnp.pad(w1x1.T, ((0, cin_eff - cin), (0, 0))) / kk        # (cin_eff, cout)
    W = jnp.tile(Wt, (kk, 1)) * bn_scale[None, :]                  # (kk*cin_eff, cout)
    p = prep_mm(W, bn_bias)
    p['kdims'] = tuple(kdims)
    return p


def prep_conv_transpose(w_t, conv_bias, bn_scale, bn_bias, cin_eff):
    """ConvTranspose3d(k=3,s=2,p=1,op=1)+BN as 8 sub-pixel phase convs packed along N.

    w_t: (cin, cout, 3, 3, 3).  K = 8 taps (2x2x2 window) * cin_eff,  N = 8 phases * cpad(cout).
    Per-axis mapping: phase 0 tap 0 -> k=1; phase 1 tap 0 -> k=2; phase 1 tap 1 -> k=0.
    """
    cin, cout = w_t.shape[0], w_t.shape[1]
    coutp = cpad(cout)
    w_t = jnp.pad(w_t, ((0, cin_eff - cin), (0, 0), (0, 0), (0, 0), (0, 0)))
    A = jnp.zeros((2, 2, 3), jnp.float32)                          # [phase, tap, kernel_index]
    A = A.at[0, 0, 1].set(1.0).at[1, 0, 2].set(1.0).at[1, 1, 0].set(1.0)
    W = jnp.einsum('axi,byj,czk,nmijk->xyznabcm', A, A, A, w_t)    # (tap_x,y,z,cin,ph_x,y,z,cout)
    W = W * bn_scale                                               # fold BN into weight
    W = W.reshape(8 * cin_eff, 8, cout)
    W = jnp.pad(W, ((0, 0), (0, 0), (0, coutp - cout))).reshape(8 * cin_eff, 8 * coutp)
    bias = conv_bias * bn_scale + bn_bias
    bias8 = jnp.tile(jnp.pad(bias, (0, coutp - cout)), 8)
    p = prep_mm(W, bias8)
    p['coutp'] = coutp
    return p


# =============================================================================
# Conv / resize wrappers (channel-last im2col glue; matmul hot path in Pallas)
# =============================================================================

def _im2col3d(x, kdims, stride, dilation, pad_lo, pad_hi):
    """x: (b, X, Y, Z, C) channel-last -> patches (b*oX*oY*oZ, kk*C), tap-major/channel-minor."""
    b, X, Y, Z, C = x.shape
    kx, ky, kz = kdims
    sx, sy, sz = stride
    dx, dy, dz = dilation
    xp = jnp.pad(x, ((0, 0), (pad_lo[0], pad_hi[0]), (pad_lo[1], pad_hi[1]),
                     (pad_lo[2], pad_hi[2]), (0, 0)))
    Xe = X + pad_lo[0] + pad_hi[0]
    Ye = Y + pad_lo[1] + pad_hi[1]
    Ze = Z + pad_lo[2] + pad_hi[2]
    oX = (Xe - dx * (kx - 1) - 1) // sx + 1
    oY = (Ye - dy * (ky - 1) - 1) // sy + 1
    oZ = (Ze - dz * (kz - 1) - 1) // sz + 1
    cols = []
    for ix in range(kx):
        for iy in range(ky):
            for iz in range(kz):
                cols.append(xp[:,
                               ix * dx: ix * dx + sx * (oX - 1) + 1: sx,
                               iy * dy: iy * dy + sy * (oY - 1) + 1: sy,
                               iz * dz: iz * dz + sz * (oZ - 1) + 1: sz, :])
    p = jnp.stack(cols, axis=4)                                    # (b, oX, oY, oZ, kk, C)
    p = p.reshape(b * oX * oY * oZ, kx * ky * kz * C)
    return p, (oX, oY, oZ)


def conv3d(x, prep, stride=(1, 1, 1), dilation=(1, 1, 1), padding=(0, 0, 0),
           relu=False, post_relu=False, residuals=(), input_relu=False):
    """Channel-padded bf16 conv + folded BN, with fused (input-relu, relu, +res, post-relu)."""
    b = x.shape[0]
    patches, odims = _im2col3d(x, prep['kdims'], stride, dilation, padding, padding)
    res3d = tuple(r.reshape(1, -1, r.shape[-1]) for r in residuals)
    out = matmul_fused(patches[None], prep, residuals=res3d, relu=relu,
                       post_relu=post_relu, input_relu=input_relu)
    return out[0].reshape(b, *odims, prep['np'])


def conv_transpose3d_s2(x, prep):
    """ConvTranspose3d(k=3,s=2,p=1,op=1)+BN+ReLU via phase-packed matmul, then phase unpack."""
    b, X, Y, Z, _ = x.shape
    coutp = prep['coutp']
    patches, _ = _im2col3d(x, (2, 2, 2), (1, 1, 1), (1, 1, 1), (0, 0, 0), (1, 1, 1))
    out = matmul_fused(patches[None], prep, relu=True)[0]          # (b*X*Y*Z, 8*coutp)
    out = out.reshape(b, X, Y, Z, 2, 2, 2, coutp)
    out = out.transpose(0, 1, 4, 2, 5, 3, 6, 7).reshape(b, 2 * X, 2 * Y, 2 * Z, coutp)
    return out


def _interp_matrix(n_in, n_out):
    if n_in == 1:
        return jnp.ones((n_out, 1), jnp.float32)
    pos = jnp.arange(n_out, dtype=jnp.float32) * (n_in - 1) / (n_out - 1)
    lo = jnp.clip(jnp.floor(pos), 0, n_in - 2).astype(jnp.int32)
    frac = pos - lo.astype(jnp.float32)
    m = (jax.nn.one_hot(lo, n_in) * (1.0 - frac)[:, None]
         + jax.nn.one_hot(lo + 1, n_in) * frac[:, None])
    return m.astype(jnp.float32)


def avgpool3_same(x):
    """3x3x3 AvgPool, stride 1, pad 1, count_include_pad=True (XLA sum-of-shifted-slices)."""
    b, X, Y, Z, C = x.shape
    xp = jnp.pad(x.astype(jnp.float32), ((0, 0), (1, 1), (1, 1), (1, 1), (0, 0)))
    acc = jnp.zeros((b, X, Y, Z, C), jnp.float32)
    for ix in range(3):
        for iy in range(3):
            for iz in range(3):
                acc = acc + xp[:, ix:ix + X, iy:iy + Y, iz:iz + Z, :]
    return acc * (1.0 / 27.0)


def project_2d_to_3d(x_cl, depth_mapping_3d, out_dims):
    """Gather 2D features into a 3D grid; index == H*W means 'no hit' -> zero feature."""
    b, H, W, c = x_cl.shape
    src = x_cl.reshape(b, H * W, c)
    src = jnp.concatenate([src, jnp.zeros((b, 1, c), src.dtype)], axis=1)
    idx = depth_mapping_3d.reshape(b, -1)[..., None]
    idx = jnp.broadcast_to(idx, (b, idx.shape[1], c))
    x3d = jnp.take_along_axis(src, idx, axis=1)
    return x3d.reshape(b, *out_dims, c)


# =============================================================================
# Parameter init (deterministic, synthetic; BN folded to eval-mode scale/bias)
# =============================================================================

def make_keygen(seed):
    base = jax.random.PRNGKey(seed)
    counter = itertools.count()
    return lambda: jax.random.fold_in(base, next(counter))


def randn(key, shape, std):
    return std * jax.random.normal(key, shape, jnp.float32)


def conv_w3d(key, cout, cin, k):
    fan_in = cin * k[0] * k[1] * k[2]
    return randn(key, (cout, cin) + tuple(k), math.sqrt(2.0 / fan_in))


def bn_fold(key, c, eps=1e-5):
    kg, kb = jax.random.split(key)
    gamma = 1.0 + 0.05 * jax.random.normal(kg, (c,), jnp.float32)
    beta = 0.05 * jax.random.normal(kb, (c,), jnp.float32)
    scale = gamma / jnp.sqrt(1.0 + eps)     # running_mean=0, running_var=1 (eval mode)
    return scale, beta


def init_bottleneck(kg, inplanes, planes, expansion, stride, has_downsample):
    ip, pp = cpad(inplanes), cpad(planes)
    p = {}
    p['c1'] = prep_conv(conv_w3d(kg(), planes, inplanes, (1, 1, 1)), *bn_fold(kg(), planes),
                        cin_eff=ip)
    p['c2'] = prep_conv(conv_w3d(kg(), planes, planes, (1, 1, 3)), *bn_fold(kg(), planes),
                        cin_eff=pp)
    p['c3'] = prep_conv(conv_w3d(kg(), planes, planes, (1, 3, 1)), *bn_fold(kg(), planes),
                        cin_eff=pp)
    p['c4'] = prep_conv(conv_w3d(kg(), planes, planes, (3, 1, 1)), *bn_fold(kg(), planes),
                        cin_eff=pp)
    p['c5'] = prep_conv(conv_w3d(kg(), planes * expansion, planes, (1, 1, 1)),
                        *bn_fold(kg(), planes * expansion), cin_eff=pp)
    if stride != 1:
        p['ds2'] = prep_pool_conv(conv_w3d(kg(), planes, planes, (1, 1, 1))[:, :, 0, 0, 0],
                                  *bn_fold(kg(), planes), kdims=(1, stride, 1), cin_eff=pp)
        p['ds3'] = prep_pool_conv(conv_w3d(kg(), planes, planes, (1, 1, 1))[:, :, 0, 0, 0],
                                  *bn_fold(kg(), planes), kdims=(stride, 1, 1), cin_eff=pp)
        p['ds4'] = prep_pool_conv(conv_w3d(kg(), planes, planes, (1, 1, 1))[:, :, 0, 0, 0],
                                  *bn_fold(kg(), planes), kdims=(stride, 1, 1), cin_eff=pp)
    if has_downsample:
        p['ds'] = prep_pool_conv(
            conv_w3d(kg(), planes * expansion, inplanes, (1, 1, 1))[:, :, 0, 0, 0],
            *bn_fold(kg(), planes * expansion), kdims=(2, 2, 2), cin_eff=ip)
    return p


def init_oper_sketch(kg, feature_oper, feature):
    return dict(
        c1=prep_conv(conv_w3d(kg(), 3, 2, (3, 3, 3)), *bn_fold(kg(), 3), cin_eff=2),
        c2=prep_conv(conv_w3d(kg(), feature_oper, 3, (3, 3, 3)),
                     *bn_fold(kg(), feature_oper), cin_eff=cpad(3)),
        c3=prep_conv(conv_w3d(kg(), feature, feature_oper, (3, 3, 3)),
                     *bn_fold(kg(), feature), cin_eff=cpad(feature_oper)),
    )


def init_stage2(seed, cfg):
    kg = make_keygen(seed)
    f, fo, ro, cn = cfg['feature'], cfg['feature_oper'], cfg['resnet_out'], cfg['class_num']
    P = {}
    # 2D downsample: 1x1 conv + BN (scale folded) -- wrapper pads K (ro) once at the boundary.
    scale_d, bias_d = bn_fold(kg(), f)
    P['down'] = prep_mm(randn(kg(), (ro, f), math.sqrt(2.0 / ro)) * scale_d[None, :], bias_d)
    P['sem1'] = [init_bottleneck(kg, f, f // 4, 4, 2, True)] + \
                [init_bottleneck(kg, f, f // 4, 4, 1, False) for _ in range(3)]
    P['sem2'] = [init_bottleneck(kg, f, f // 4, 8, 2, True)] + \
                [init_bottleneck(kg, 2 * f, f // 2, 4, 1, False) for _ in range(3)]
    P['ct1'] = prep_conv_transpose(
        randn(kg(), (2 * f, f, 3, 3, 3), math.sqrt(2.0 / (2 * f * 27))),
        0.01 * jax.random.normal(kg(), (f,), jnp.float32), *bn_fold(kg(), f),
        cin_eff=cpad(2 * f))
    P['ct2'] = prep_conv_transpose(
        randn(kg(), (f, f, 3, 3, 3), math.sqrt(2.0 / (f * 27))),
        0.01 * jax.random.normal(kg(), (f,), jnp.float32), *bn_fold(kg(), f),
        cin_eff=cpad(f))
    P['cls'] = prep_conv(conv_w3d(kg(), cn, f, (1, 1, 1)),
                         jnp.ones((cn,), jnp.float32), jnp.zeros((cn,), jnp.float32),
                         conv_bias=0.01 * jax.random.normal(kg(), (cn,), jnp.float32),
                         cin_eff=cpad(f))
    # sketch branches are shape-identical -> stack their weights along a leading G=2 axis
    sk_raw = init_oper_sketch(kg, fo, f)
    sk_cvae = init_oper_sketch(kg, fo, f)
    P['sk'] = {name: stack_preps(sk_raw[name], sk_cvae[name]) for name in ('c1', 'c2', 'c3')}
    # separable bilinear x16 (align_corners=True) interpolation matrices, precomputed once
    h0, w0 = cfg['img_feat_hw']
    P['interp_h'] = _interp_matrix(h0, 16 * h0)
    P['interp_w'] = _interp_matrix(w0, 16 * w0)
    return P


# =============================================================================
# Forward pass
# =============================================================================

def bottleneck3d(x, p, stride, dilation):
    s = stride
    d1, d2, d3 = dilation
    out1 = conv3d(x, p['c1'], relu=True)
    out2 = conv3d(out1, p['c2'], stride=(1, 1, s), dilation=(1, 1, d1), padding=(0, 0, d1))
    out2_ds = conv3d(out2, p['ds2'], stride=(1, s, 1)) if s != 1 else out2
    # out3 = bn3(conv3(relu(out2))) + out2_ds   (relu on A and the add fused in the epilogue)
    out3 = conv3d(out2, p['c3'], stride=(1, s, 1), dilation=(1, d2, 1), padding=(0, d2, 0),
                  input_relu=True, residuals=(out2_ds,))
    if s != 1:
        out2_ds = conv3d(out2_ds, p['ds3'], stride=(s, 1, 1))
        out3_ds = conv3d(out3, p['ds4'], stride=(s, 1, 1))
    else:
        out3_ds = out3
    # out4 = bn4(conv4(relu(out3))) + out2_ds + out3_ds
    out4 = conv3d(out3, p['c4'], stride=(s, 1, 1), dilation=(d3, 1, 1), padding=(d3, 0, 0),
                  input_relu=True, residuals=(out2_ds, out3_ds))
    residual = conv3d(x, p['ds'], stride=(2, 2, 2)) if 'ds' in p else x
    # out = relu(bn5(conv5(relu(out4))) + residual)
    return conv3d(out4, p['c5'], input_relu=True, residuals=(residual,), post_relu=True)


def oper_sketch_batched(x, P):
    """Both sketch branches (G=2) in single batched pallas_calls per layer.  x:(2,b,X,Y,Z,C)."""
    g, b = x.shape[0], x.shape[1]

    def layer(x, prep):
        xb = x.reshape((g * b,) + x.shape[2:])
        patches, odims = _im2col3d(xb, prep['kdims'], (1, 1, 1), (1, 1, 1), (1, 1, 1), (1, 1, 1))
        M = b * odims[0] * odims[1] * odims[2]
        a = patches.reshape(g, M, patches.shape[-1])
        out = matmul_fused(a, prep, relu=True)
        return out.reshape(g, b, *odims, prep['np'])

    x = layer(x, P['c1'])
    x = layer(x, P['c2'])
    x = layer(x, P['c3'])
    return x


def stage2_forward(P, cfg, feature2d, depth_mapping_3d, pred_sketch_raw, pred_sketch_gsnn):
    b, ro, h, w = feature2d.shape
    f = cfg['feature']
    fpad = cpad(f)
    cn = cfg['class_num']

    # ---- 2D downsample: 1x1 conv + BN + ReLU (NCHW -> channel-last once at the boundary)
    x2d = feature2d.transpose(0, 2, 3, 1).reshape(1, b * h * w, ro)
    x2d = matmul_fused(x2d, P['down'], relu=True)[0].reshape(b, h, w, fpad)

    # ---- separable bilinear x16 upsample (align_corners=True), matrices precomputed at init
    x2d = x2d.astype(jnp.float32)
    x2d = jnp.einsum('ph,bhwc->bpwc', P['interp_h'], x2d)
    x2d = jnp.einsum('qw,bpwc->bpqc', P['interp_w'], x2d)
    x2d = x2d.astype(jnp.bfloat16)

    # ---- project 2D features to the 3D grid (data-dependent gather, plain JAX)
    dims3d = tuple(s // 4 for s in cfg['full_scene_size'])
    segres = project_2d_to_3d(x2d, depth_mapping_3d, dims3d)          # (b,X,Y,Z,fpad) bf16

    # ---- 3D init: fill empty voxels with the local 3x3x3 average (inline, no micro-kernel)
    pool = avgpool3_same(segres)
    segres = jnp.where(segres == 0, pool.astype(segres.dtype), segres)

    # ---- sketch branches (both at once, G=2 batched matmuls), then seg_fea
    sk_in = jnp.stack([pred_sketch_raw.transpose(0, 2, 3, 4, 1),
                       pred_sketch_gsnn.transpose(0, 2, 3, 4, 1)], axis=0).astype(jnp.bfloat16)
    sk = oper_sketch_batched(sk_in, P['sk'])                          # (2,b,X,Y,Z,fpad)
    seg_fea = segres + sk[0] + sk[1]

    # ---- semantic layers
    dils = [(1, 1, 1), (1, 1, 1), (2, 2, 2), (3, 3, 3)]
    strides = [2, 1, 1, 1]
    x = seg_fea
    for p, s, d in zip(P['sem1'], strides, dils):
        x = bottleneck3d(x, p, s, d)
    semantic1 = x
    for p, s, d in zip(P['sem2'], strides, dils):
        x = bottleneck3d(x, p, s, d)
    semantic2 = x

    # ---- classifier head ("else" branch): two ConvTranspose3d+BN+ReLU, then 1x1 Conv3d+bias
    # residual add kept after the phase unpack so semantic1 needs no HBM repack transpose
    up_sem1 = conv_transpose3d_s2(semantic2, P['ct1']) + semantic1
    up_sem2 = conv_transpose3d_s2(up_sem1, P['ct2'])
    # TODO(synk): Dropout3d(0.1) treated as identity (eval mode).
    pred = conv3d(up_sem2, P['cls'])
    pred = pred[..., :cn].astype(jnp.float32).transpose(0, 4, 1, 2, 3)
    return pred, None


# =============================================================================
# Main
# =============================================================================

if __name__ == "__main__":
    cfg = dict(class_num=5, feature=16, feature_oper=8, resnet_out=32,
               full_scene_size=(16, 16, 16), output_scene_size=(4, 4, 4),
               img_feat_hw=(2, 2))
    b = 1
    key = jax.random.PRNGKey(0)
    k1, k2, k3, k4 = jax.random.split(key, 4)

    feature2d = jax.random.normal(k1, (b, cfg['resnet_out'], 2, 2), jnp.float32)
    n_vox = (cfg['full_scene_size'][0] // 4) * (cfg['full_scene_size'][1] // 4) * \
            (cfg['full_scene_size'][2] // 4)
    hw = (2 * 16) * (2 * 16)   # image size after x16 bilinear upsample
    depth_mapping_3d = jax.random.randint(k2, (b, n_vox), 0, hw + 1).astype(jnp.int32)
    pred_sketch_raw = jax.random.normal(k3, (b, 2, 4, 4, 4), jnp.float32)
    pred_sketch_gsnn = jax.random.normal(k4, (b, 2, 4, 4, 4), jnp.float32)

    params = init_stage2(0, cfg)

    # params carry static metadata (K/N/kernel dims), so close over them instead of jit args.
    fwd = jax.jit(lambda f2d, dmap, sr, sg: stage2_forward(params, cfg, f2d, dmap, sr, sg))
    pred_semantic, _ = fwd(feature2d, depth_mapping_3d, pred_sketch_raw, pred_sketch_gsnn)
    pred_semantic = jax.block_until_ready(pred_semantic)
    assert pred_semantic.shape == (b, cfg['class_num'], 4, 4, 4), pred_semantic.shape
    assert bool(jnp.all(jnp.isfinite(pred_semantic)))
    print("KERNEL_OK")
</pallas_src>

<mosaic_0001>
module attributes {stable_mosaic.version = 11 : i64} {
  func.func @_mm_fused_kernel(%arg0: i32, %arg1: i32, %arg2: i32, %arg3: i32, %arg4: memref<1x64x128xbf16, #tpu.memory_space<vmem>>, %arg5: memref<1x128x128xbf16, #tpu.memory_space<vmem>>, %arg6: memref<1x1x128xf32, #tpu.memory_space<vmem>>, %arg7: memref<1x64x128xbf16, #tpu.memory_space<vmem>>) attributes {dimension_semantics = [#tpu.dimension_semantics<parallel>, #tpu.dimension_semantics<parallel>, #tpu.dimension_semantics<parallel>, #tpu.dimension_semantics<arbitrary>], iteration_bounds = array<i64: 2, 1, 1, 1>, scalar_prefetch = 0 : i64, scratch_operands = 0 : i64, tpu.core_type = #tpu.core_type<tc>, window_params = [{transform_indices = @transform_0, window_bounds = array<i64: 1, 64, 128>}, {transform_indices = @transform_1, window_bounds = array<i64: 1, 128, 128>}, {transform_indices = @transform_2, window_bounds = array<i64: 1, 1, 128>}, {transform_indices = @transform_3, window_bounds = array<i64: 1, 64, 128>}]} {
    %c0 = arith.constant 0 : index
    %c0_0 = arith.constant 0 : index
    %c0_1 = arith.constant 0 : index
    %0 = vector.load %arg4[%c0, %c0_0, %c0_1] : memref<1x64x128xbf16, #tpu.memory_space<vmem>>, vector<1x64x128xbf16>
    %1 = vector.shape_cast %0 : vector<1x64x128xbf16> to vector<64x128xbf16>
    %c0_2 = arith.constant 0 : index
    %c0_3 = arith.constant 0 : index
    %c0_4 = arith.constant 0 : index
    %2 = vector.load %arg5[%c0_2, %c0_3, %c0_4] : memref<1x128x128xbf16, #tpu.memory_space<vmem>>, vector<1x128x128xbf16>
    %3 = vector.shape_cast %2 : vector<1x128x128xbf16> to vector<128x128xbf16>
    %cst = arith.constant dense<0.000000e+00> : vector<64x128xf32>
    %4 = tpu.matmul %1, %3, %cst {dimension_numbers = #tpu.dot_dimension_numbers<[1], [0], [0], [1], [0, 0, 1, 1], [], []>} : vector<64x128xbf16>, vector<128x128xbf16>, vector<64x128xf32> -> vector<64x128xf32>
    %c0_5 = arith.constant 0 : index
    %c0_6 = arith.constant 0 : index
    %c0_7 = arith.constant 0 : index
    %5 = vector.load %arg6[%c0_5, %c0_6, %c0_7] : memref<1x1x128xf32, #tpu.memory_space<vmem>>, vector<1x1x128xf32>
    %6 = vector.shape_cast %5 : vector<1x1x128xf32> to vector<1x128xf32>
    %7 = vector.broadcast %6 : vector<1x128xf32> to vector<64x128xf32>
    %8 = arith.addf %4, %7 : vector<64x128xf32>
    %cst_8 = arith.constant 0.000000e+00 : f32
    %9 = vector.broadcast %cst_8 : f32 to vector<64x128xf32>
    %10 = arith.maximumf %8, %9 : vector<64x128xf32>
    %11 = arith.truncf %10 : vector<64x128xf32> to vector<64x128xbf16>
    %c0_9 = arith.constant 0 : index
    %c0_10 = arith.constant 0 : index
    %c0_11 = arith.constant 0 : index
    %12 = vector.load %arg7[%c0_9, %c0_10, %c0_11] : memref<1x64x128xbf16, #tpu.memory_space<vmem>>, vector<1x64x128xbf16>
    %13 = vector.shape_cast %12 : vector<1x64x128xbf16> to vector<64x128xbf16>
    %14 = vector.shape_cast %11 : vector<64x128xbf16> to vector<1x64x128xbf16>
    tpu.vector_store %arg7[%c0_9, %c0_10, %c0_11], %14 {strides = array<i32>} : memref<1x64x128xbf16, #tpu.memory_space<vmem>>, vector<1x64x128xbf16>,
    return
  }
  func.func @transform_0(%arg0: i32, %arg1: i32, %arg2: i32, %arg3: i32) -> (i32, i32, i32) {
    %c0_i32 = arith.constant 0 : i32
    return %arg0, %arg1, %arg3 : i32, i32, i32
  }
  func.func @transform_1(%arg0: i32, %arg1: i32, %arg2: i32, %arg3: i32) -> (i32, i32, i32) {
    %c0_i32 = arith.constant 0 : i32
    return %arg0, %arg3, %arg2 : i32, i32, i32
  }
  func.func @transform_2(%arg0: i32, %arg1: i32, %arg2: i32, %arg3: i32) -> (i32, i32, i32) {
    %c0_i32 = arith.constant 0 : i32
    %c0_i32_0 = arith.constant 0 : i32
    return %arg0, %c0_i32, %arg2 : i32, i32, i32
  }
  func.func @transform_3(%arg0: i32, %arg1: i32, %arg2: i32, %arg3: i32) -> (i32, i32, i32) {
    %c0_i32 = arith.constant 0 : i32
    return %arg0, %arg1, %arg2 : i32, i32, i32
  }
}

module attributes {stable_mosaic.version = 11 : i64} {
  func.func @_mm_fused_kernel(%arg0: i32, %arg1: i32, %arg2: i32, %arg3: i32, %arg4: memref<1x64x3456xbf16, #tpu.memory_space<vmem>>, %arg5: memref<1x3456x128xbf16, #tpu.memory_space<vmem>>, %arg6: memref<1x1x128xf32, #tpu.memory_space<vmem>>, %arg7: memref<1x64x128xbf16, #tpu.memory_space<vmem>>) attributes {dimension_semantics = [#tpu.dimension_semantics<parallel>, #tpu.dimension_semantics<parallel>, #tpu.dimension_semantics<parallel>, #tpu.dimension_semantics<arbitrary>], iteration_bounds = array<i64: 2, 1, 1, 1>, scalar_prefetch = 0 : i64, scratch_operands = 0 : i64, tpu.core_type = #tpu.core_type<tc>, window_params = [{transform_indices = @transform_0, window_bounds = array<i64: 1, 64, 3456>}, {transform_indices = @transform_1, window_bounds = array<i64: 1, 3456, 128>}, {transform_indices = @transform_2, window_bounds = array<i64: 1, 1, 128>}, {transform_indices = @transform_3, window_bounds = array<i64: 1, 64, 128>}]} {
    %c0 = arith.constant 0 : index
    %c0_0 = arith.constant 0 : index
    %c0_1 = arith.constant 0 : index
    %0 = vector.load %arg4[%c0, %c0_0, %c0_1] : memref<1x64x3456xbf16, #tpu.memory_space<vmem>>, vector<1x64x3456xbf16>
    %1 = vector.shape_cast %0 : vector<1x64x3456xbf16> to vector<64x3456xbf16>
    %c0_2 = arith.constant 0 : index
    %c0_3 = arith.constant 0 : index
    %c0_4 = arith.constant 0 : index
    %2 = vector.load %arg5[%c0_2, %c0_3, %c0_4] : memref<1x3456x128xbf16, #tpu.memory_space<vmem>>, vector<1x3456x128xbf16>
    %3 = vector.shape_cast %2 : vector<1x3456x128xbf16> to vector<3456x128xbf16>
    %cst = arith.constant dense<0.000000e+00> : vector<64x128xf32>
    %4 = tpu.matmul %1, %3, %cst {dimension_numbers = #tpu.dot_dimension_numbers<[1], [0], [0], [1], [0, 0, 1, 1], [], []>} : vector<64x3456xbf16>, vector<3456x128xbf16>, vector<64x128xf32> -> vector<64x128xf32>
    %c0_5 = arith.constant 0 : index
    %c0_6 = arith.constant 0 : index
    %c0_7 = arith.constant 0 : index
    %5 = vector.load %arg6[%c0_5, %c0_6, %c0_7] : memref<1x1x128xf32, #tpu.memory_space<vmem>>, vector<1x1x128xf32>
    %6 = vector.shape_cast %5 : vector<1x1x128xf32> to vector<1x128xf32>
    %7 = vector.broadcast %6 : vector<1x128xf32> to vector<64x128xf32>
    %8 = arith.addf %4, %7 : vector<64x128xf32>
    %cst_8 = arith.constant 0.000000e+00 : f32
    %9 = vector.broadcast %cst_8 : f32 to vector<64x128xf32>
    %10 = arith.maximumf %8, %9 : vector<64x128xf32>
    %11 = arith.truncf %10 : vector<64x128xf32> to vector<64x128xbf16>
    %c0_9 = arith.constant 0 : index
    %c0_10 = arith.constant 0 : index
    %c0_11 = arith.constant 0 : index
    %12 = vector.load %arg7[%c0_9, %c0_10, %c0_11] : memref<1x64x128xbf16, #tpu.memory_space<vmem>>, vector<1x64x128xbf16>
    %13 = vector.shape_cast %12 : vector<1x64x128xbf16> to vector<64x128xbf16>
    %14 = vector.shape_cast %11 : vector<64x128xbf16> to vector<1x64x128xbf16>
    tpu.vector_store %arg7[%c0_9, %c0_10, %c0_11], %14 {strides = array<i32>} : memref<1x64x128xbf16, #tpu.memory_space<vmem>>, vector<1x64x128xbf16>,
    return
  }
  func.func @transform_0(%arg0: i32, %arg1: i32, %arg2: i32, %arg3: i32) -> (i32, i32, i32) {
    %c0_i32 = arith.constant 0 : i32
    return %arg0, %arg1, %arg3 : i32, i32, i32
  }
  func.func @transform_1(%arg0: i32, %arg1: i32, %arg2: i32, %arg3: i32) -> (i32, i32, i32) {
    %c0_i32 = arith.constant 0 : i32
    return %arg0, %arg3, %arg2 : i32, i32, i32
  }
  func.func @transform_2(%arg0: i32, %arg1: i32, %arg2: i32, %arg3: i32) -> (i32, i32, i32) {
    %c0_i32 = arith.constant 0 : i32
    %c0_i32_0 = arith.constant 0 : i32
    return %arg0, %c0_i32, %arg2 : i32, i32, i32
  }
  func.func @transform_3(%arg0: i32, %arg1: i32, %arg2: i32, %arg3: i32) -> (i32, i32, i32) {
    %c0_i32 = arith.constant 0 : i32
    return %arg0, %arg1, %arg2 : i32, i32, i32
  }
}

module attributes {stable_mosaic.version = 11 : i64} {
  func.func @_mm_fused_kernel(%arg0: i32, %arg1: i32, %arg2: i32, %arg3: i32, %arg4: memref<1x16x128xbf16, #tpu.memory_space<vmem>>, %arg5: memref<1x128x128xbf16, #tpu.memory_space<vmem>>, %arg6: memref<1x1x128xf32, #tpu.memory_space<vmem>>, %arg7: memref<1x16x128xbf16, #tpu.memory_space<vmem>>) attributes {dimension_semantics = [#tpu.dimension_semantics<parallel>, #tpu.dimension_semantics<parallel>, #tpu.dimension_semantics<parallel>, #tpu.dimension_semantics<arbitrary>], iteration_bounds = array<i64: 1, 1, 1, 1>, scalar_prefetch = 0 : i64, scratch_operands = 0 : i64, tpu.core_type = #tpu.core_type<tc>, window_params = [{transform_indices = @transform_0, window_bounds = array<i64: 1, 16, 128>}, {transform_indices = @transform_1, window_bounds = array<i64: 1, 128, 128>}, {transform_indices = @transform_2, window_bounds = array<i64: 1, 1, 128>}, {transform_indices = @transform_3, window_bounds = array<i64: 1, 16, 128>}]} {
    %c0 = arith.constant 0 : index
    %c0_0 = arith.constant 0 : index
    %c0_1 = arith.constant 0 : index
    %0 = vector.load %arg4[%c0, %c0_0, %c0_1] : memref<1x16x128xbf16, #tpu.memory_space<vmem>>, vector<1x16x128xbf16>
    %1 = vector.shape_cast %0 : vector<1x16x128xbf16> to vector<16x128xbf16>
    %c0_2 = arith.constant 0 : index
    %c0_3 = arith.constant 0 : index
    %c0_4 = arith.constant 0 : index
    %2 = vector.load %arg5[%c0_2, %c0_3, %c0_4] : memref<1x128x128xbf16, #tpu.memory_space<vmem>>, vector<1x128x128xbf16>
    %3 = vector.shape_cast %2 : vector<1x128x128xbf16> to vector<128x128xbf16>
    %cst = arith.constant dense<0.000000e+00> : vector<16x128xf32>
    %4 = tpu.matmul %1, %3, %cst {dimension_numbers = #tpu.dot_dimension_numbers<[1], [0], [0], [1], [0, 0, 1, 1], [], []>} : vector<16x128xbf16>, vector<128x128xbf16>, vector<16x128xf32> -> vector<16x128xf32>
    %c0_5 = arith.constant 0 : index
    %c0_6 = arith.constant 0 : index
    %c0_7 = arith.constant 0 : index
    %5 = vector.load %arg6[%c0_5, %c0_6, %c0_7] : memref<1x1x128xf32, #tpu.memory_space<vmem>>, vector<1x1x128xf32>
    %6 = vector.shape_cast %5 : vector<1x1x128xf32> to vector<1x128xf32>
    %7 = vector.broadcast %6 : vector<1x128xf32> to vector<16x128xf32>
    %8 = arith.addf %4, %7 : vector<16x128xf32>
    %cst_8 = arith.constant 0.000000e+00 : f32
    %9 = vector.broadcast %cst_8 : f32 to vector<16x128xf32>
    %10 = arith.maximumf %8, %9 : vector<16x128xf32>
    %11 = arith.truncf %10 : vector<16x128xf32> to vector<16x128xbf16>
    %c0_9 = arith.constant 0 : index
    %c0_10 = arith.constant 0 : index
    %c0_11 = arith.constant 0 : index
    %12 = vector.load %arg7[%c0_9, %c0_10, %c0_11] : memref<1x16x128xbf16, #tpu.memory_space<vmem>>, vector<1x16x128xbf16>
    %13 = vector.shape_cast %12 : vector<1x16x128xbf16> to vector<16x128xbf16>
    %14 = vector.shape_cast %11 : vector<16x128xbf16> to vector<1x16x128xbf16>
    tpu.vector_store %arg7[%c0_9, %c0_10, %c0_11], %14 {strides = array<i32>} : memref<1x16x128xbf16, #tpu.memory_space<vmem>>, vector<1x16x128xbf16>,
    return
  }
  func.func @transform_0(%arg0: i32, %arg1: i32, %arg2: i32, %arg3: i32) -> (i32, i32, i32) {
    %c0_i32 = arith.constant 0 : i32
    return %arg0, %arg1, %arg3 : i32, i32, i32
  }
  func.func @transform_1(%arg0: i32, %arg1: i32, %arg2: i32, %arg3: i32) -> (i32, i32, i32) {
    %c0_i32 = arith.constant 0 : i32
    return %arg0, %arg3, %arg2 : i32, i32, i32
  }
  func.func @transform_2(%arg0: i32, %arg1: i32, %arg2: i32, %arg3: i32) -> (i32, i32, i32) {
    %c0_i32 = arith.constant 0 : i32
    %c0_i32_0 = arith.constant 0 : i32
    return %arg0, %c0_i32, %arg2 : i32, i32, i32
  }
  func.func @transform_3(%arg0: i32, %arg1: i32, %arg2: i32, %arg3: i32) -> (i32, i32, i32) {
    %c0_i32 = arith.constant 0 : i32
    return %arg0, %arg1, %arg2 : i32, i32, i32
  }
}

module attributes {stable_mosaic.version = 11 : i64} {
  func.func @_mm_fused_kernel(%arg0: i32, %arg1: i32, %arg2: i32, %arg3: i32, %arg4: memref<1x64x128xbf16, #tpu.memory_space<vmem>>, %arg5: memref<1x128x128xbf16, #tpu.memory_space<vmem>>, %arg6: memref<1x1x128xf32, #tpu.memory_space<vmem>>, %arg7: memref<1x64x128xbf16, #tpu.memory_space<vmem>>) attributes {dimension_semantics = [#tpu.dimension_semantics<parallel>, #tpu.dimension_semantics<parallel>, #tpu.dimension_semantics<parallel>, #tpu.dimension_semantics<arbitrary>], iteration_bounds = array<i64: 1, 1, 1, 1>, scalar_prefetch = 0 : i64, scratch_operands = 0 : i64, tpu.core_type = #tpu.core_type<tc>, window_params = [{transform_indices = @transform_0, window_bounds = array<i64: 1, 64, 128>}, {transform_indices = @transform_1, window_bounds = array<i64: 1, 128, 128>}, {transform_indices = @transform_2, window_bounds = array<i64: 1, 1, 128>}, {transform_indices = @transform_3, window_bounds = array<i64: 1, 64, 128>}]} {
    %c0 = arith.constant 0 : index
    %c0_0 = arith.constant 0 : index
    %c0_1 = arith.constant 0 : index
    %0 = vector.load %arg4[%c0, %c0_0, %c0_1] : memref<1x64x128xbf16, #tpu.memory_space<vmem>>, vector<1x64x128xbf16>
    %1 = vector.shape_cast %0 : vector<1x64x128xbf16> to vector<64x128xbf16>
    %c0_2 = arith.constant 0 : index
    %c0_3 = arith.constant 0 : index
    %c0_4 = arith.constant 0 : index
    %2 = vector.load %arg5[%c0_2, %c0_3, %c0_4] : memref<1x128x128xbf16, #tpu.memory_space<vmem>>, vector<1x128x128xbf16>
    %3 = vector.shape_cast %2 : vector<1x128x128xbf16> to vector<128x128xbf16>
    %cst = arith.constant dense<0.000000e+00> : vector<64x128xf32>
    %4 = tpu.matmul %1, %3, %cst {dimension_numbers = #tpu.dot_dimension_numbers<[1], [0], [0], [1], [0, 0, 1, 1], [], []>} : vector<64x128xbf16>, vector<128x128xbf16>, vector<64x128xf32> -> vector<64x128xf32>
    %c0_5 = arith.constant 0 : index
    %c0_6 = arith.constant 0 : index
    %c0_7 = arith.constant 0 : index
    %5 = vector.load %arg6[%c0_5, %c0_6, %c0_7] : memref<1x1x128xf32, #tpu.memory_space<vmem>>, vector<1x1x128xf32>
    %6 = vector.shape_cast %5 : vector<1x1x128xf32> to vector<1x128xf32>
    %7 = vector.broadcast %6 : vector<1x128xf32> to vector<64x128xf32>
    %8 = arith.addf %4, %7 : vector<64x128xf32>
    %cst_8 = arith.constant 0.000000e+00 : f32
    %9 = vector.broadcast %cst_8 : f32 to vector<64x128xf32>
    %10 = arith.maximumf %8, %9 : vector<64x128xf32>
    %11 = arith.truncf %10 : vector<64x128xf32> to vector<64x128xbf16>
    %c0_9 = arith.constant 0 : index
    %c0_10 = arith.constant 0 : index
    %c0_11 = arith.constant 0 : index
    %12 = vector.load %arg7[%c0_9, %c0_10, %c0_11] : memref<1x64x128xbf16, #tpu.memory_space<vmem>>, vector<1x64x128xbf16>
    %13 = vector.shape_cast %12 : vector<1x64x128xbf16> to vector<64x128xbf16>
    %14 = vector.shape_cast %11 : vector<64x128xbf16> to vector<1x64x128xbf16>
    tpu.vector_store %arg7[%c0_9, %c0_10, %c0_11], %14 {strides = array<i32>} : memref<1x64x128xbf16, #tpu.memory_space<vmem>>, vector<1x64x128xbf16>,
    return
  }
  func.func @transform_0(%arg0: i32, %arg1: i32, %arg2: i32, %arg3: i32) -> (i32, i32, i32) {
    %c0_i32 = arith.constant 0 : i32
    return %arg0, %arg1, %arg3 : i32, i32, i32
  }
  func.func @transform_1(%arg0: i32, %arg1: i32, %arg2: i32, %arg3: i32) -> (i32, i32, i32) {
    %c0_i32 = arith.constant 0 : i32
    return %arg0, %arg3, %arg2 : i32, i32, i32
  }
  func.func @transform_2(%arg0: i32, %arg1: i32, %arg2: i32, %arg3: i32) -> (i32, i32, i32) {
    %c0_i32 = arith.constant 0 : i32
    %c0_i32_0 = arith.constant 0 : i32
    return %arg0, %c0_i32, %arg2 : i32, i32, i32
  }
  func.func @transform_3(%arg0: i32, %arg1: i32, %arg2: i32, %arg3: i32) -> (i32, i32, i32) {
    %c0_i32 = arith.constant 0 : i32
    return %arg0, %arg1, %arg2 : i32, i32, i32
  }
}

module attributes {stable_mosaic.version = 11 : i64} {
  func.func @_mm_fused_kernel(%arg0: i32, %arg1: i32, %arg2: i32, %arg3: i32, %arg4: memref<1x32x384xbf16, #tpu.memory_space<vmem>>, %arg5: memref<1x384x128xbf16, #tpu.memory_space<vmem>>, %arg6: memref<1x1x128xf32, #tpu.memory_space<vmem>>, %arg7: memref<1x32x128xbf16, #tpu.memory_space<vmem>>) attributes {dimension_semantics = [#tpu.dimension_semantics<parallel>, #tpu.dimension_semantics<parallel>, #tpu.dimension_semantics<parallel>, #tpu.dimension_semantics<arbitrary>], iteration_bounds = array<i64: 1, 1, 1, 1>, scalar_prefetch = 0 : i64, scratch_operands = 0 : i64, tpu.core_type = #tpu.core_type<tc>, window_params = [{transform_indices = @transform_0, window_bounds = array<i64: 1, 32, 384>}, {transform_indices = @transform_1, window_bounds = array<i64: 1, 384, 128>}, {transform_indices = @transform_2, window_bounds = array<i64: 1, 1, 128>}, {transform_indices = @transform_3, window_bounds = array<i64: 1, 32, 128>}]} {
    %c0 = arith.constant 0 : index
    %c0_0 = arith.constant 0 : index
    %c0_1 = arith.constant 0 : index
    %0 = vector.load %arg4[%c0, %c0_0, %c0_1] : memref<1x32x384xbf16, #tpu.memory_space<vmem>>, vector<1x32x384xbf16>
    %1 = vector.shape_cast %0 : vector<1x32x384xbf16> to vector<32x384xbf16>
    %c0_2 = arith.constant 0 : index
    %c0_3 = arith.constant 0 : index
    %c0_4 = arith.constant 0 : index
    %2 = vector.load %arg5[%c0_2, %c0_3, %c0_4] : memref<1x384x128xbf16, #tpu.memory_space<vmem>>, vector<1x384x128xbf16>
    %3 = vector.shape_cast %2 : vector<1x384x128xbf16> to vector<384x128xbf16>
    %cst = arith.constant dense<0.000000e+00> : vector<32x128xf32>
    %4 = tpu.matmul %1, %3, %cst {dimension_numbers = #tpu.dot_dimension_numbers<[1], [0], [0], [1], [0, 0, 1, 1], [], []>} : vector<32x384xbf16>, vector<384x128xbf16>, vector<32x128xf32> -> vector<32x128xf32>
    %c0_5 = arith.constant 0 : index
    %c0_6 = arith.constant 0 : index
    %c0_7 = arith.constant 0 : index
    %5 = vector.load %arg6[%c0_5, %c0_6, %c0_7] : memref<1x1x128xf32, #tpu.memory_space<vmem>>, vector<1x1x128xf32>
    %6 = vector.shape_cast %5 : vector<1x1x128xf32> to vector<1x128xf32>
    %7 = vector.broadcast %6 : vector<1x128xf32> to vector<32x128xf32>
    %8 = arith.addf %4, %7 : vector<32x128xf32>
    %9 = arith.truncf %8 : vector<32x128xf32> to vector<32x128xbf16>
    %c0_8 = arith.constant 0 : index
    %c0_9 = arith.constant 0 : index
    %c0_10 = arith.constant 0 : index
    %10 = vector.load %arg7[%c0_8, %c0_9, %c0_10] : memref<1x32x128xbf16, #tpu.memory_space<vmem>>, vector<1x32x128xbf16>
    %11 = vector.shape_cast %10 : vector<1x32x128xbf16> to vector<32x128xbf16>
    %12 = vector.shape_cast %9 : vector<32x128xbf16> to vector<1x32x128xbf16>
    tpu.vector_store %arg7[%c0_8, %c0_9, %c0_10], %12 {strides = array<i32>} : memref<1x32x128xbf16, #tpu.memory_space<vmem>>, vector<1x32x128xbf16>,
    return
  }
  func.func @transform_0(%arg0: i32, %arg1: i32, %arg2: i32, %arg3: i32) -> (i32, i32, i32) {
    %c0_i32 = arith.constant 0 : i32
    return %arg0, %arg1, %arg3 : i32, i32, i32
  }
  func.func @transform_1(%arg0: i32, %arg1: i32, %arg2: i32, %arg3: i32) -> (i32, i32, i32) {
    %c0_i32 = arith.constant 0 : i32
    return %arg0, %arg3, %arg2 : i32, i32, i32
  }
  func.func @transform_2(%arg0: i32, %arg1: i32, %arg2: i32, %arg3: i32) -> (i32, i32, i32) {
    %c0_i32 = arith.constant 0 : i32
    %c0_i32_0 = arith.constant 0 : i32
    return %arg0, %c0_i32, %arg2 : i32, i32, i32
  }
  func.func @transform_3(%arg0: i32, %arg1: i32, %arg2: i32, %arg3: i32) -> (i32, i32, i32) {
    %c0_i32 = arith.constant 0 : i32
    return %arg0, %arg1, %arg2 : i32, i32, i32
  }
}

module attributes {stable_mosaic.version = 11 : i64} {
  func.func @_mm_fused_kernel(%arg0: i32, %arg1: i32, %arg2: i32, %arg3: i32, %arg4: memref<1x16x256xbf16, #tpu.memory_space<vmem>>, %arg5: memref<1x256x128xbf16, #tpu.memory_space<vmem>>, %arg6: memref<1x1x128xf32, #tpu.memory_space<vmem>>, %arg7: memref<1x16x128xbf16, #tpu.memory_space<vmem>>) attributes {dimension_semantics = [#tpu.dimension_semantics<parallel>, #tpu.dimension_semantics<parallel>, #tpu.dimension_semantics<parallel>, #tpu.dimension_semantics<arbitrary>], iteration_bounds = array<i64: 1, 1, 1, 1>, scalar_prefetch = 0 : i64, scratch_operands = 0 : i64, tpu.core_type = #tpu.core_type<tc>, window_params = [{transform_indices = @transform_0, window_bounds = array<i64: 1, 16, 256>}, {transform_indices = @transform_1, window_bounds = array<i64: 1, 256, 128>}, {transform_indices = @transform_2, window_bounds = array<i64: 1, 1, 128>}, {transform_indices = @transform_3, window_bounds = array<i64: 1, 16, 128>}]} {
    %c0 = arith.constant 0 : index
    %c0_0 = arith.constant 0 : index
    %c0_1 = arith.constant 0 : index
    %0 = vector.load %arg4[%c0, %c0_0, %c0_1] : memref<1x16x256xbf16, #tpu.memory_space<vmem>>, vector<1x16x256xbf16>
    %1 = vector.shape_cast %0 : vector<1x16x256xbf16> to vector<16x256xbf16>
    %c0_2 = arith.constant 0 : index
    %c0_3 = arith.constant 0 : index
    %c0_4 = arith.constant 0 : index
    %2 = vector.load %arg5[%c0_2, %c0_3, %c0_4] : memref<1x256x128xbf16, #tpu.memory_space<vmem>>, vector<1x256x128xbf16>
    %3 = vector.shape_cast %2 : vector<1x256x128xbf16> to vector<256x128xbf16>
    %cst = arith.constant dense<0.000000e+00> : vector<16x128xf32>
    %4 = tpu.matmul %1, %3, %cst {dimension_numbers = #tpu.dot_dimension_numbers<[1], [0], [0], [1], [0, 0, 1, 1], [], []>} : vector<16x256xbf16>, vector<256x128xbf16>, vector<16x128xf32> -> vector<16x128xf32>
    %c0_5 = arith.constant 0 : index
    %c0_6 = arith.constant 0 : index
    %c0_7 = arith.constant 0 : index
    %5 = vector.load %arg6[%c0_5, %c0_6, %c0_7] : memref<1x1x128xf32, #tpu.memory_space<vmem>>, vector<1x1x128xf32>
    %6 = vector.shape_cast %5 : vector<1x1x128xf32> to vector<1x128xf32>
    %7 = vector.broadcast %6 : vector<1x128xf32> to vector<16x128xf32>
    %8 = arith.addf %4, %7 : vector<16x128xf32>
    %9 = arith.truncf %8 : vector<16x128xf32> to vector<16x128xbf16>
    %c0_8 = arith.constant 0 : index
    %c0_9 = arith.constant 0 : index
    %c0_10 = arith.constant 0 : index
    %10 = vector.load %arg7[%c0_8, %c0_9, %c0_10] : memref<1x16x128xbf16, #tpu.memory_space<vmem>>, vector<1x16x128xbf16>
    %11 = vector.shape_cast %10 : vector<1x16x128xbf16> to vector<16x128xbf16>
    %12 = vector.shape_cast %9 : vector<16x128xbf16> to vector<1x16x128xbf16>
    tpu.vector_store %arg7[%c0_8, %c0_9, %c0_10], %12 {strides = array<i32>} : memref<1x16x128xbf16, #tpu.memory_space<vmem>>, vector<1x16x128xbf16>,
    return
  }
  func.func @transform_0(%arg0: i32, %arg1: i32, %arg2: i32, %arg3: i32) -> (i32, i32, i32) {
    %c0_i32 = arith.constant 0 : i32
    return %arg0, %arg1, %arg3 : i32, i32, i32
  }
  func.func @transform_1(%arg0: i32, %arg1: i32, %arg2: i32, %arg3: i32) -> (i32, i32, i32) {
    %c0_i32 = arith.constant 0 : i32
    return %arg0, %arg3, %arg2 : i32, i32, i32
  }
  func.func @transform_2(%arg0: i32, %arg1: i32, %arg2: i32, %arg3: i32) -> (i32, i32, i32) {
    %c0_i32 = arith.constant 0 : i32
    %c0_i32_0 = arith.constant 0 : i32
    return %arg0, %c0_i32, %arg2 : i32, i32, i32
  }
  func.func @transform_3(%arg0: i32, %arg1: i32, %arg2: i32, %arg3: i32) -> (i32, i32, i32) {
    %c0_i32 = arith.constant 0 : i32
    return %arg0, %arg1, %arg2 : i32, i32, i32
  }
}

module attributes {stable_mosaic.version = 11 : i64} {
  func.func @_mm_fused_kernel(%arg0: i32, %arg1: i32, %arg2: i32, %arg3: i32, %arg4: memref<1x16x384xbf16, #tpu.memory_space<vmem>>, %arg5: memref<1x384x128xbf16, #tpu.memory_space<vmem>>, %arg6: memref<1x1x128xf32, #tpu.memory_space<vmem>>, %arg7: memref<1x16x128xbf16, #tpu.memory_space<vmem>>, %arg8: memref<1x16x128xbf16, #tpu.memory_space<vmem>>) attributes {dimension_semantics = [#tpu.dimension_semantics<parallel>, #tpu.dimension_semantics<parallel>, #tpu.dimension_semantics<parallel>, #tpu.dimension_semantics<arbitrary>], iteration_bounds = array<i64: 1, 1, 1, 1>, scalar_prefetch = 0 : i64, scratch_operands = 0 : i64, tpu.core_type = #tpu.core_type<tc>, window_params = [{transform_indices = @transform_0, window_bounds = array<i64: 1, 16, 384>}, {transform_indices = @transform_1, window_bounds = array<i64: 1, 384, 128>}, {transform_indices = @transform_2, window_bounds = array<i64: 1, 1, 128>}, {transform_indices = @transform_3, window_bounds = array<i64: 1, 16, 128>}, {transform_indices = @transform_4, window_bounds = array<i64: 1, 16, 128>}]} {
    %c0 = arith.constant 0 : index
    %c0_0 = arith.constant 0 : index
    %c0_1 = arith.constant 0 : index
    %0 = vector.load %arg4[%c0, %c0_0, %c0_1] : memref<1x16x384xbf16, #tpu.memory_space<vmem>>, vector<1x16x384xbf16>
    %1 = vector.shape_cast %0 : vector<1x16x384xbf16> to vector<16x384xbf16>
    %cst = arith.constant 0.000000e+00 : bf16
    %2 = vector.broadcast %cst : bf16 to vector<16x384xbf16>
    %3 = arith.maximumf %1, %2 : vector<16x384xbf16>
    %c0_2 = arith.constant 0 : index
    %c0_3 = arith.constant 0 : index
    %c0_4 = arith.constant 0 : index
    %4 = vector.load %arg5[%c0_2, %c0_3, %c0_4] : memref<1x384x128xbf16, #tpu.memory_space<vmem>>, vector<1x384x128xbf16>
    %5 = vector.shape_cast %4 : vector<1x384x128xbf16> to vector<384x128xbf16>
    %cst_5 = arith.constant dense<0.000000e+00> : vector<16x128xf32>
    %6 = tpu.matmul %3, %5, %cst_5 {dimension_numbers = #tpu.dot_dimension_numbers<[1], [0], [0], [1], [0, 0, 1, 1], [], []>} : vector<16x384xbf16>, vector<384x128xbf16>, vector<16x128xf32> -> vector<16x128xf32>
    %c0_6 = arith.constant 0 : index
    %c0_7 = arith.constant 0 : index
    %c0_8 = arith.constant 0 : index
    %7 = vector.load %arg6[%c0_6, %c0_7, %c0_8] : memref<1x1x128xf32, #tpu.memory_space<vmem>>, vector<1x1x128xf32>
    %8 = vector.shape_cast %7 : vector<1x1x128xf32> to vector<1x128xf32>
    %9 = vector.broadcast %8 : vector<1x128xf32> to vector<16x128xf32>
    %10 = arith.addf %6, %9 : vector<16x128xf32>
    %c0_9 = arith.constant 0 : index
    %c0_10 = arith.constant 0 : index
    %c0_11 = arith.constant 0 : index
    %11 = vector.load %arg7[%c0_9, %c0_10, %c0_11] : memref<1x16x128xbf16, #tpu.memory_space<vmem>>, vector<1x16x128xbf16>
    %12 = vector.shape_cast %11 : vector<1x16x128xbf16> to vector<16x128xbf16>
    %13 = arith.extf %12 : vector<16x128xbf16> to vector<16x128xf32>
    %14 = arith.addf %10, %13 : vector<16x128xf32>
    %15 = arith.truncf %14 : vector<16x128xf32> to vector<16x128xbf16>
    %c0_12 = arith.constant 0 : index
    %c0_13 = arith.constant 0 : index
    %c0_14 = arith.constant 0 : index
    %16 = vector.load %arg8[%c0_12, %c0_13, %c0_14] : memref<1x16x128xbf16, #tpu.memory_space<vmem>>, vector<1x16x128xbf16>
    %17 = vector.shape_cast %16 : vector<1x16x128xbf16> to vector<16x128xbf16>
    %18 = vector.shape_cast %15 : vector<16x128xbf16> to vector<1x16x128xbf16>
    tpu.vector_store %arg8[%c0_12, %c0_13, %c0_14], %18 {strides = array<i32>} : memref<1x16x128xbf16, #tpu.memory_space<vmem>>, vector<1x16x128xbf16>,
    return
  }
  func.func @transform_0(%arg0: i32, %arg1: i32, %arg2: i32, %arg3: i32) -> (i32, i32, i32) {
    %c0_i32 = arith.constant 0 : i32
    return %arg0, %arg1, %arg3 : i32, i32, i32
  }
  func.func @transform_1(%arg0: i32, %arg1: i32, %arg2: i32, %arg3: i32) -> (i32, i32, i32) {
    %c0_i32 = arith.constant 0 : i32
    return %arg0, %arg3, %arg2 : i32, i32, i32
  }
  func.func @transform_2(%arg0: i32, %arg1: i32, %arg2: i32, %arg3: i32) -> (i32, i32, i32) {
    %c0_i32 = arith.constant 0 : i32
    %c0_i32_0 = arith.constant 0 : i32
    return %arg0, %c0_i32, %arg2 : i32, i32, i32
  }
  func.func @transform_3(%arg0: i32, %arg1: i32, %arg2: i32, %arg3: i32) -> (i32, i32, i32) {
    %c0_i32 = arith.constant 0 : i32
    return %arg0, %arg1, %arg2 : i32, i32, i32
  }
  func.func @transform_4(%arg0: i32, %arg1: i32, %arg2: i32, %arg3: i32) -> (i32, i32, i32) {
    %c0_i32 = arith.constant 0 : i32
    return %arg0, %arg1, %arg2 : i32, i32, i32
  }
}

module attributes {stable_mosaic.version = 11 : i64} {
  func.func @_mm_fused_kernel(%arg0: i32, %arg1: i32, %arg2: i32, %arg3: i32, %arg4: memref<1x16x384xbf16, #tpu.memory_space<vmem>>, %arg5: memref<1x384x128xbf16, #tpu.memory_space<vmem>>, %arg6: memref<1x1x128xf32, #tpu.memory_space<vmem>>, %arg7: memref<1x16x128xbf16, #tpu.memory_space<vmem>>, %arg8: memref<1x16x128xbf16, #tpu.memory_space<vmem>>, %arg9: memref<1x16x128xbf16, #tpu.memory_space<vmem>>) attributes {dimension_semantics = [#tpu.dimension_semantics<parallel>, #tpu.dimension_semantics<parallel>, #tpu.dimension_semantics<parallel>, #tpu.dimension_semantics<arbitrary>], iteration_bounds = array<i64: 1, 1, 1, 1>, scalar_prefetch = 0 : i64, scratch_operands = 0 : i64, tpu.core_type = #tpu.core_type<tc>, window_params = [{transform_indices = @transform_0, window_bounds = array<i64: 1, 16, 384>}, {transform_indices = @transform_1, window_bounds = array<i64: 1, 384, 128>}, {transform_indices = @transform_2, window_bounds = array<i64: 1, 1, 128>}, {transform_indices = @transform_3, window_bounds = array<i64: 1, 16, 128>}, {transform_indices = @transform_4, window_bounds = array<i64: 1, 16, 128>}, {transform_indices = @transform_5, window_bounds = array<i64: 1, 16, 128>}]} {
    %c0 = arith.constant 0 : index
    %c0_0 = arith.constant 0 : index
    %c0_1 = arith.constant 0 : index
    %0 = vector.load %arg4[%c0, %c0_0, %c0_1] : memref<1x16x384xbf16, #tpu.memory_space<vmem>>, vector<1x16x384xbf16>
    %1 = vector.shape_cast %0 : vector<1x16x384xbf16> to vector<16x384xbf16>
    %cst = arith.constant 0.000000e+00 : bf16
    %2 = vector.broadcast %cst : bf16 to vector<16x384xbf16>
    %3 = arith.maximumf %1, %2 : vector<16x384xbf16>
    %c0_2 = arith.constant 0 : index
    %c0_3 = arith.constant 0 : index
    %c0_4 = arith.constant 0 : index
    %4 = vector.load %arg5[%c0_2, %c0_3, %c0_4] : memref<1x384x128xbf16, #tpu.memory_space<vmem>>, vector<1x384x128xbf16>
    %5 = vector.shape_cast %4 : vector<1x384x128xbf16> to vector<384x128xbf16>
    %cst_5 = arith.constant dense<0.000000e+00> : vector<16x128xf32>
    %6 = tpu.matmul %3, %5, %cst_5 {dimension_numbers = #tpu.dot_dimension_numbers<[1], [0], [0], [1], [0, 0, 1, 1], [], []>} : vector<16x384xbf16>, vector<384x128xbf16>, vector<16x128xf32> -> vector<16x128xf32>
    %c0_6 = arith.constant 0 : index
    %c0_7 = arith.constant 0 : index
    %c0_8 = arith.constant 0 : index
    %7 = vector.load %arg6[%c0_6, %c0_7, %c0_8] : memref<1x1x128xf32, #tpu.memory_space<vmem>>, vector<1x1x128xf32>
    %8 = vector.shape_cast %7 : vector<1x1x128xf32> to vector<1x128xf32>
    %9 = vector.broadcast %8 : vector<1x128xf32> to vector<16x128xf32>
    %10 = arith.addf %6, %9 : vector<16x128xf32>
    %c0_9 = arith.constant 0 : index
    %c0_10 = arith.constant 0 : index
    %c0_11 = arith.constant 0 : index
    %11 = vector.load %arg7[%c0_9, %c0_10, %c0_11] : memref<1x16x128xbf16, #tpu.memory_space<vmem>>, vector<1x16x128xbf16>
    %12 = vector.shape_cast %11 : vector<1x16x128xbf16> to vector<16x128xbf16>
    %13 = arith.extf %12 : vector<16x128xbf16> to vector<16x128xf32>
    %14 = arith.addf %10, %13 : vector<16x128xf32>
    %c0_12 = arith.constant 0 : index
    %c0_13 = arith.constant 0 : index
    %c0_14 = arith.constant 0 : index
    %15 = vector.load %arg8[%c0_12, %c0_13, %c0_14] : memref<1x16x128xbf16, #tpu.memory_space<vmem>>, vector<1x16x128xbf16>
    %16 = vector.shape_cast %15 : vector<1x16x128xbf16> to vector<16x128xbf16>
    %17 = arith.extf %16 : vector<16x128xbf16> to vector<16x128xf32>
    %18 = arith.addf %14, %17 : vector<16x128xf32>
    %19 = arith.truncf %18 : vector<16x128xf32> to vector<16x128xbf16>
    %c0_15 = arith.constant 0 : index
    %c0_16 = arith.constant 0 : index
    %c0_17 = arith.constant 0 : index
    %20 = vector.load %arg9[%c0_15, %c0_16, %c0_17] : memref<1x16x128xbf16, #tpu.memory_space<vmem>>, vector<1x16x128xbf16>
    %21 = vector.shape_cast %20 : vector<1x16x128xbf16> to vector<16x128xbf16>
    %22 = vector.shape_cast %19 : vector<16x128xbf16> to vector<1x16x128xbf16>
    tpu.vector_store %arg9[%c0_15, %c0_16, %c0_17], %22 {strides = array<i32>} : memref<1x16x128xbf16, #tpu.memory_space<vmem>>, vector<1x16x128xbf16>,
    return
  }
  func.func @transform_0(%arg0: i32, %arg1: i32, %arg2: i32, %arg3: i32) -> (i32, i32, i32) {
    %c0_i32 = arith.constant 0 : i32
    return %arg0, %arg1, %arg3 : i32, i32, i32
  }
  func.func @transform_1(%arg0: i32, %arg1: i32, %arg2: i32, %arg3: i32) -> (i32, i32, i32) {
    %c0_i32 = arith.constant 0 : i32
    return %arg0, %arg3, %arg2 : i32, i32, i32
  }
  func.func @transform_2(%arg0: i32, %arg1: i32, %arg2: i32, %arg3: i32) -> (i32, i32, i32) {
    %c0_i32 = arith.constant 0 : i32
    %c0_i32_0 = arith.constant 0 : i32
    return %arg0, %c0_i32, %arg2 : i32, i32, i32
  }
  func.func @transform_3(%arg0: i32, %arg1: i32, %arg2: i32, %arg3: i32) -> (i32, i32, i32) {
    %c0_i32 = arith.constant 0 : i32
    return %arg0, %arg1, %arg2 : i32, i32, i32
  }
  func.func @transform_4(%arg0: i32, %arg1: i32, %arg2: i32, %arg3: i32) -> (i32, i32, i32) {
    %c0_i32 = arith.constant 0 : i32
    return %arg0, %arg1, %arg2 : i32, i32, i32
  }
  func.func @transform_5(%arg0: i32, %arg1: i32, %arg2: i32, %arg3: i32) -> (i32, i32, i32) {
    %c0_i32 = arith.constant 0 : i32
    return %arg0, %arg1, %arg2 : i32, i32, i32
  }
}

module attributes {stable_mosaic.version = 11 : i64} {
  func.func @_mm_fused_kernel(%arg0: i32, %arg1: i32, %arg2: i32, %arg3: i32, %arg4: memref<1x16x128xbf16, #tpu.memory_space<vmem>>, %arg5: memref<1x128x128xbf16, #tpu.memory_space<vmem>>, %arg6: memref<1x1x128xf32, #tpu.memory_space<vmem>>, %arg7: memref<1x16x128xbf16, #tpu.memory_space<vmem>>, %arg8: memref<1x16x128xbf16, #tpu.memory_space<vmem>>) attributes {dimension_semantics = [#tpu.dimension_semantics<parallel>, #tpu.dimension_semantics<parallel>, #tpu.dimension_semantics<parallel>, #tpu.dimension_semantics<arbitrary>], iteration_bounds = array<i64: 1, 1, 1, 1>, scalar_prefetch = 0 : i64, scratch_operands = 0 : i64, tpu.core_type = #tpu.core_type<tc>, window_params = [{transform_indices = @transform_0, window_bounds = array<i64: 1, 16, 128>}, {transform_indices = @transform_1, window_bounds = array<i64: 1, 128, 128>}, {transform_indices = @transform_2, window_bounds = array<i64: 1, 1, 128>}, {transform_indices = @transform_3, window_bounds = array<i64: 1, 16, 128>}, {transform_indices = @transform_4, window_bounds = array<i64: 1, 16, 128>}]} {
    %c0 = arith.constant 0 : index
    %c0_0 = arith.constant 0 : index
    %c0_1 = arith.constant 0 : index
    %0 = vector.load %arg4[%c0, %c0_0, %c0_1] : memref<1x16x128xbf16, #tpu.memory_space<vmem>>, vector<1x16x128xbf16>
    %1 = vector.shape_cast %0 : vector<1x16x128xbf16> to vector<16x128xbf16>
    %cst = arith.constant 0.000000e+00 : bf16
    %2 = vector.broadcast %cst : bf16 to vector<16x128xbf16>
    %3 = arith.maximumf %1, %2 : vector<16x128xbf16>
    %c0_2 = arith.constant 0 : index
    %c0_3 = arith.constant 0 : index
    %c0_4 = arith.constant 0 : index
    %4 = vector.load %arg5[%c0_2, %c0_3, %c0_4] : memref<1x128x128xbf16, #tpu.memory_space<vmem>>, vector<1x128x128xbf16>
    %5 = vector.shape_cast %4 : vector<1x128x128xbf16> to vector<128x128xbf16>
    %cst_5 = arith.constant dense<0.000000e+00> : vector<16x128xf32>
    %6 = tpu.matmul %3, %5, %cst_5 {dimension_numbers = #tpu.dot_dimension_numbers<[1], [0], [0], [1], [0, 0, 1, 1], [], []>} : vector<16x128xbf16>, vector<128x128xbf16>, vector<16x128xf32> -> vector<16x128xf32>
    %c0_6 = arith.constant 0 : index
    %c0_7 = arith.constant 0 : index
    %c0_8 = arith.constant 0 : index
    %7 = vector.load %arg6[%c0_6, %c0_7, %c0_8] : memref<1x1x128xf32, #tpu.memory_space<vmem>>, vector<1x1x128xf32>
    %8 = vector.shape_cast %7 : vector<1x1x128xf32> to vector<1x128xf32>
    %9 = vector.broadcast %8 : vector<1x128xf32> to vector<16x128xf32>
    %10 = arith.addf %6, %9 : vector<16x128xf32>
    %c0_9 = arith.constant 0 : index
    %c0_10 = arith.constant 0 : index
    %c0_11 = arith.constant 0 : index
    %11 = vector.load %arg7[%c0_9, %c0_10, %c0_11] : memref<1x16x128xbf16, #tpu.memory_space<vmem>>, vector<1x16x128xbf16>
    %12 = vector.shape_cast %11 : vector<1x16x128xbf16> to vector<16x128xbf16>
    %13 = arith.extf %12 : vector<16x128xbf16> to vector<16x128xf32>
    %14 = arith.addf %10, %13 : vector<16x128xf32>
    %cst_12 = arith.constant 0.000000e+00 : f32
    %15 = vector.broadcast %cst_12 : f32 to vector<16x128xf32>
    %16 = arith.maximumf %14, %15 : vector<16x128xf32>
    %17 = arith.truncf %16 : vector<16x128xf32> to vector<16x128xbf16>
    %c0_13 = arith.constant 0 : index
    %c0_14 = arith.constant 0 : index
    %c0_15 = arith.constant 0 : index
    %18 = vector.load %arg8[%c0_13, %c0_14, %c0_15] : memref<1x16x128xbf16, #tpu.memory_space<vmem>>, vector<1x16x128xbf16>
    %19 = vector.shape_cast %18 : vector<1x16x128xbf16> to vector<16x128xbf16>
    %20 = vector.shape_cast %17 : vector<16x128xbf16> to vector<1x16x128xbf16>
    tpu.vector_store %arg8[%c0_13, %c0_14, %c0_15], %20 {strides = array<i32>} : memref<1x16x128xbf16, #tpu.memory_space<vmem>>, vector<1x16x128xbf16>,
    return
  }
  func.func @transform_0(%arg0: i32, %arg1: i32, %arg2: i32, %arg3: i32) -> (i32, i32, i32) {
    %c0_i32 = arith.constant 0 : i32
    return %arg0, %arg1, %arg3 : i32, i32, i32
  }
  func.func @transform_1(%arg0: i32, %arg1: i32, %arg2: i32, %arg3: i32) -> (i32, i32, i32) {
    %c0_i32 = arith.constant 0 : i32
    return %arg0, %arg3, %arg2 : i32, i32, i32
  }
  func.func @transform_2(%arg0: i32, %arg1: i32, %arg2: i32, %arg3: i32) -> (i32, i32, i32) {
    %c0_i32 = arith.constant 0 : i32
    %c0_i32_0 = arith.constant 0 : i32
    return %arg0, %c0_i32, %arg2 : i32, i32, i32
  }
  func.func @transform_3(%arg0: i32, %arg1: i32, %arg2: i32, %arg3: i32) -> (i32, i32, i32) {
    %c0_i32 = arith.constant 0 : i32
    return %arg0, %arg1, %arg2 : i32, i32, i32
  }
  func.func @transform_4(%arg0: i32, %arg1: i32, %arg2: i32, %arg3: i32) -> (i32, i32, i32) {
    %c0_i32 = arith.constant 0 : i32
    return %arg0, %arg1, %arg2 : i32, i32, i32
  }
}

module attributes {stable_mosaic.version = 11 : i64} {
  func.func @_mm_fused_kernel(%arg0: i32, %arg1: i32, %arg2: i32, %arg3: i32, %arg4: memref<1x16x1024xbf16, #tpu.memory_space<vmem>>, %arg5: memref<1x1024x128xbf16, #tpu.memory_space<vmem>>, %arg6: memref<1x1x128xf32, #tpu.memory_space<vmem>>, %arg7: memref<1x16x128xbf16, #tpu.memory_space<vmem>>) attributes {dimension_semantics = [#tpu.dimension_semantics<parallel>, #tpu.dimension_semantics<parallel>, #tpu.dimension_semantics<parallel>, #tpu.dimension_semantics<arbitrary>], iteration_bounds = array<i64: 1, 1, 1, 1>, scalar_prefetch = 0 : i64, scratch_operands = 0 : i64, tpu.core_type = #tpu.core_type<tc>, window_params = [{transform_indices = @transform_0, window_bounds = array<i64: 1, 16, 1024>}, {transform_indices = @transform_1, window_bounds = array<i64: 1, 1024, 128>}, {transform_indices = @transform_2, window_bounds = array<i64: 1, 1, 128>}, {transform_indices = @transform_3, window_bounds = array<i64: 1, 16, 128>}]} {
    %c0 = arith.constant 0 : index
    %c0_0 = arith.constant 0 : index
    %c0_1 = arith.constant 0 : index
    %0 = vector.load %arg4[%c0, %c0_0, %c0_1] : memref<1x16x1024xbf16, #tpu.memory_space<vmem>>, vector<1x16x1024xbf16>
    %1 = vector.shape_cast %0 : vector<1x16x1024xbf16> to vector<16x1024xbf16>
    %c0_2 = arith.constant 0 : index
    %c0_3 = arith.constant 0 : index
    %c0_4 = arith.constant 0 : index
    %2 = vector.load %arg5[%c0_2, %c0_3, %c0_4] : memref<1x1024x128xbf16, #tpu.memory_space<vmem>>, vector<1x1024x128xbf16>
    %3 = vector.shape_cast %2 : vector<1x1024x128xbf16> to vector<1024x128xbf16>
    %cst = arith.constant dense<0.000000e+00> : vector<16x128xf32>
    %4 = tpu.matmul %1, %3, %cst {dimension_numbers = #tpu.dot_dimension_numbers<[1], [0], [0], [1], [0, 0, 1, 1], [], []>} : vector<16x1024xbf16>, vector<1024x128xbf16>, vector<16x128xf32> -> vector<16x128xf32>
    %c0_5 = arith.constant 0 : index
    %c0_6 = arith.constant 0 : index
    %c0_7 = arith.constant 0 : index
    %5 = vector.load %arg6[%c0_5, %c0_6, %c0_7] : memref<1x1x128xf32, #tpu.memory_space<vmem>>, vector<1x1x128xf32>
    %6 = vector.shape_cast %5 : vector<1x1x128xf32> to vector<1x128xf32>
    %7 = vector.broadcast %6 : vector<1x128xf32> to vector<16x128xf32>
    %8 = arith.addf %4, %7 : vector<16x128xf32>
    %9 = arith.truncf %8 : vector<16x128xf32> to vector<16x128xbf16>
    %c0_8 = arith.constant 0 : index
    %c0_9 = arith.constant 0 : index
    %c0_10 = arith.constant 0 : index
    %10 = vector.load %arg7[%c0_8, %c0_9, %c0_10] : memref<1x16x128xbf16, #tpu.memory_space<vmem>>, vector<1x16x128xbf16>
    %11 = vector.shape_cast %10 : vector<1x16x128xbf16> to vector<16x128xbf16>
    %12 = vector.shape_cast %9 : vector<16x128xbf16> to vector<1x16x128xbf16>
    tpu.vector_store %arg7[%c0_8, %c0_9, %c0_10], %12 {strides = array<i32>} : memref<1x16x128xbf16, #tpu.memory_space<vmem>>, vector<1x16x128xbf16>,
    return
  }
  func.func @transform_0(%arg0: i32, %arg1: i32, %arg2: i32, %arg3: i32) -> (i32, i32, i32) {
    %c0_i32 = arith.constant 0 : i32
    return %arg0, %arg1, %arg3 : i32, i32, i32
  }
  func.func @transform_1(%arg0: i32, %arg1: i32, %arg2: i32, %arg3: i32) -> (i32, i32, i32) {
    %c0_i32 = arith.constant 0 : i32
    return %arg0, %arg3, %arg2 : i32, i32, i32
  }
  func.func @transform_2(%arg0: i32, %arg1: i32, %arg2: i32, %arg3: i32) -> (i32, i32, i32) {
    %c0_i32 = arith.constant 0 : i32
    %c0_i32_0 = arith.constant 0 : i32
    return %arg0, %c0_i32, %arg2 : i32, i32, i32
  }
  func.func @transform_3(%arg0: i32, %arg1: i32, %arg2: i32, %arg3: i32) -> (i32, i32, i32) {
    %c0_i32 = arith.constant 0 : i32
    return %arg0, %arg1, %arg2 : i32, i32, i32
  }
}

module attributes {stable_mosaic.version = 11 : i64} {
  func.func @_mm_fused_kernel(%arg0: i32, %arg1: i32, %arg2: i32, %arg3: i32, %arg4: memref<1x16x128xbf16, #tpu.memory_space<vmem>>, %arg5: memref<1x128x128xbf16, #tpu.memory_space<vmem>>, %arg6: memref<1x1x128xf32, #tpu.memory_space<vmem>>, %arg7: memref<1x16x128xbf16, #tpu.memory_space<vmem>>) attributes {dimension_semantics = [#tpu.dimension_semantics<parallel>, #tpu.dimension_semantics<parallel>, #tpu.dimension_semantics<parallel>, #tpu.dimension_semantics<arbitrary>], iteration_bounds = array<i64: 1, 1, 1, 1>, scalar_prefetch = 0 : i64, scratch_operands = 0 : i64, tpu.core_type = #tpu.core_type<tc>, window_params = [{transform_indices = @transform_0, window_bounds = array<i64: 1, 16, 128>}, {transform_indices = @transform_1, window_bounds = array<i64: 1, 128, 128>}, {transform_indices = @transform_2, window_bounds = array<i64: 1, 1, 128>}, {transform_indices = @transform_3, window_bounds = array<i64: 1, 16, 128>}]} {
    %c0 = arith.constant 0 : index
    %c0_0 = arith.constant 0 : index
    %c0_1 = arith.constant 0 : index
    %0 = vector.load %arg4[%c0, %c0_0, %c0_1] : memref<1x16x128xbf16, #tpu.memory_space<vmem>>, vector<1x16x128xbf16>
    %1 = vector.shape_cast %0 : vector<1x16x128xbf16> to vector<16x128xbf16>
    %c0_2 = arith.constant 0 : index
    %c0_3 = arith.constant 0 : index
    %c0_4 = arith.constant 0 : index
    %2 = vector.load %arg5[%c0_2, %c0_3, %c0_4] : memref<1x128x128xbf16, #tpu.memory_space<vmem>>, vector<1x128x128xbf16>
    %3 = vector.shape_cast %2 : vector<1x128x128xbf16> to vector<128x128xbf16>
    %cst = arith.constant dense<0.000000e+00> : vector<16x128xf32>
    %4 = tpu.matmul %1, %3, %cst {dimension_numbers = #tpu.dot_dimension_numbers<[1], [0], [0], [1], [0, 0, 1, 1], [], []>} : vector<16x128xbf16>, vector<128x128xbf16>, vector<16x128xf32> -> vector<16x128xf32>
    %c0_5 = arith.constant 0 : index
    %c0_6 = arith.constant 0 : index
    %c0_7 = arith.constant 0 : index
    %5 = vector.load %arg6[%c0_5, %c0_6, %c0_7] : memref<1x1x128xf32, #tpu.memory_space<vmem>>, vector<1x1x128xf32>
    %6 = vector.shape_cast %5 : vector<1x1x128xf32> to vector<1x128xf32>
    %7 = vector.broadcast %6 : vector<1x128xf32> to vector<16x128xf32>
    %8 = arith.addf %4, %7 : vector<16x128xf32>
    %cst_8 = arith.constant 0.000000e+00 : f32
    %9 = vector.broadcast %cst_8 : f32 to vector<16x128xf32>
    %10 = arith.maximumf %8, %9 : vector<16x128xf32>
    %11 = arith.truncf %10 : vector<16x128xf32> to vector<16x128xbf16>
    %c0_9 = arith.constant 0 : index
    %c0_10 = arith.constant 0 : index
    %c0_11 = arith.constant 0 : index
    %12 = vector.load %arg7[%c0_9, %c0_10, %c0_11] : memref<1x16x128xbf16, #tpu.memory_space<vmem>>, vector<1x16x128xbf16>
    %13 = vector.shape_cast %12 : vector<1x16x128xbf16> to vector<16x128xbf16>
    %14 = vector.shape_cast %11 : vector<16x128xbf16> to vector<1x16x128xbf16>
    tpu.vector_store %arg7[%c0_9, %c0_10, %c0_11], %14 {strides = array<i32>} : memref<1x16x128xbf16, #tpu.memory_space<vmem>>, vector<1x16x128xbf16>,
    return
  }
  func.func @transform_0(%arg0: i32, %arg1: i32, %arg2: i32, %arg3: i32) -> (i32, i32, i32) {
    %c0_i32 = arith.constant 0 : i32
    return %arg0, %arg1, %arg3 : i32, i32, i32
  }
  func.func @transform_1(%arg0: i32, %arg1: i32, %arg2: i32, %arg3: i32) -> (i32, i32, i32) {
    %c0_i32 = arith.constant 0 : i32
    return %arg0, %arg3, %arg2 : i32, i32, i32
  }
  func.func @transform_2(%arg0: i32, %arg1: i32, %arg2: i32, %arg3: i32) -> (i32, i32, i32) {
    %c0_i32 = arith.constant 0 : i32
    %c0_i32_0 = arith.constant 0 : i32
    return %arg0, %c0_i32, %arg2 : i32, i32, i32
  }
  func.func @transform_3(%arg0: i32, %arg1: i32, %arg2: i32, %arg3: i32) -> (i32, i32, i32) {
    %c0_i32 = arith.constant 0 : i32
    return %arg0, %arg1, %arg2 : i32, i32, i32
  }
}

module attributes {stable_mosaic.version = 11 : i64} {
  func.func @_mm_fused_kernel(%arg0: i32, %arg1: i32, %arg2: i32, %arg3: i32, %arg4: memref<1x16x384xbf16, #tpu.memory_space<vmem>>, %arg5: memref<1x384x128xbf16, #tpu.memory_space<vmem>>, %arg6: memref<1x1x128xf32, #tpu.memory_space<vmem>>, %arg7: memref<1x16x128xbf16, #tpu.memory_space<vmem>>) attributes {dimension_semantics = [#tpu.dimension_semantics<parallel>, #tpu.dimension_semantics<parallel>, #tpu.dimension_semantics<parallel>, #tpu.dimension_semantics<arbitrary>], iteration_bounds = array<i64: 1, 1, 1, 1>, scalar_prefetch = 0 : i64, scratch_operands = 0 : i64, tpu.core_type = #tpu.core_type<tc>, window_params = [{transform_indices = @transform_0, window_bounds = array<i64: 1, 16, 384>}, {transform_indices = @transform_1, window_bounds = array<i64: 1, 384, 128>}, {transform_indices = @transform_2, window_bounds = array<i64: 1, 1, 128>}, {transform_indices = @transform_3, window_bounds = array<i64: 1, 16, 128>}]} {
    %c0 = arith.constant 0 : index
    %c0_0 = arith.constant 0 : index
    %c0_1 = arith.constant 0 : index
    %0 = vector.load %arg4[%c0, %c0_0, %c0_1] : memref<1x16x384xbf16, #tpu.memory_space<vmem>>, vector<1x16x384xbf16>
    %1 = vector.shape_cast %0 : vector<1x16x384xbf16> to vector<16x384xbf16>
    %c0_2 = arith.constant 0 : index
    %c0_3 = arith.constant 0 : index
    %c0_4 = arith.constant 0 : index
    %2 = vector.load %arg5[%c0_2, %c0_3, %c0_4] : memref<1x384x128xbf16, #tpu.memory_space<vmem>>, vector<1x384x128xbf16>
    %3 = vector.shape_cast %2 : vector<1x384x128xbf16> to vector<384x128xbf16>
    %cst = arith.constant dense<0.000000e+00> : vector<16x128xf32>
    %4 = tpu.matmul %1, %3, %cst {dimension_numbers = #tpu.dot_dimension_numbers<[1], [0], [0], [1], [0, 0, 1, 1], [], []>} : vector<16x384xbf16>, vector<384x128xbf16>, vector<16x128xf32> -> vector<16x128xf32>
    %c0_5 = arith.constant 0 : index
    %c0_6 = arith.constant 0 : index
    %c0_7 = arith.constant 0 : index
    %5 = vector.load %arg6[%c0_5, %c0_6, %c0_7] : memref<1x1x128xf32, #tpu.memory_space<vmem>>, vector<1x1x128xf32>
    %6 = vector.shape_cast %5 : vector<1x1x128xf32> to vector<1x128xf32>
    %7 = vector.broadcast %6 : vector<1x128xf32> to vector<16x128xf32>
    %8 = arith.addf %4, %7 : vector<16x128xf32>
    %9 = arith.truncf %8 : vector<16x128xf32> to vector<16x128xbf16>
    %c0_8 = arith.constant 0 : index
    %c0_9 = arith.constant 0 : index
    %c0_10 = arith.constant 0 : index
    %10 = vector.load %arg7[%c0_8, %c0_9, %c0_10] : memref<1x16x128xbf16, #tpu.memory_space<vmem>>, vector<1x16x128xbf16>
    %11 = vector.shape_cast %10 : vector<1x16x128xbf16> to vector<16x128xbf16>
    %12 = vector.shape_cast %9 : vector<16x128xbf16> to vector<1x16x128xbf16>
    tpu.vector_store %arg7[%c0_8, %c0_9, %c0_10], %12 {strides = array<i32>} : memref<1x16x128xbf16, #tpu.memory_space<vmem>>, vector<1x16x128xbf16>,
    return
  }
  func.func @transform_0(%arg0: i32, %arg1: i32, %arg2: i32, %arg3: i32) -> (i32, i32, i32) {
    %c0_i32 = arith.constant 0 : i32
    return %arg0, %arg1, %arg3 : i32, i32, i32
  }
  func.func @transform_1(%arg0: i32, %arg1: i32, %arg2: i32, %arg3: i32) -> (i32, i32, i32) {
    %c0_i32 = arith.constant 0 : i32
    return %arg0, %arg3, %arg2 : i32, i32, i32
  }
  func.func @transform_2(%arg0: i32, %arg1: i32, %arg2: i32, %arg3: i32) -> (i32, i32, i32) {
    %c0_i32 = arith.constant 0 : i32
    %c0_i32_0 = arith.constant 0 : i32
    return %arg0, %c0_i32, %arg2 : i32, i32, i32
  }
  func.func @transform_3(%arg0: i32, %arg1: i32, %arg2: i32, %arg3: i32) -> (i32, i32, i32) {
    %c0_i32 = arith.constant 0 : i32
    return %arg0, %arg1, %arg2 : i32, i32, i32
  }
}

module attributes {stable_mosaic.version = 11 : i64} {
  func.func @_mm_fused_kernel(%arg0: i32, %arg1: i32, %arg2: i32, %arg3: i32, %arg4: memref<1x16x128xbf16, #tpu.memory_space<vmem>>, %arg5: memref<1x128x128xbf16, #tpu.memory_space<vmem>>, %arg6: memref<1x1x128xf32, #tpu.memory_space<vmem>>, %arg7: memref<1x16x128xbf16, #tpu.memory_space<vmem>>, %arg8: memref<1x16x128xbf16, #tpu.memory_space<vmem>>) attributes {dimension_semantics = [#tpu.dimension_semantics<parallel>, #tpu.dimension_semantics<parallel>, #tpu.dimension_semantics<parallel>, #tpu.dimension_semantics<arbitrary>], iteration_bounds = array<i64: 1, 1, 1, 1>, scalar_prefetch = 0 : i64, scratch_operands = 0 : i64, tpu.core_type = #tpu.core_type<tc>, window_params = [{transform_indices = @transform_0, window_bounds = array<i64: 1, 16, 128>}, {transform_indices = @transform_1, window_bounds = array<i64: 1, 128, 128>}, {transform_indices = @transform_2, window_bounds = array<i64: 1, 1, 128>}, {transform_indices = @transform_3, window_bounds = array<i64: 1, 16, 128>}, {transform_indices = @transform_4, window_bounds = array<i64: 1, 16, 128>}]} {
    %c0 = arith.constant 0 : index
    %c0_0 = arith.constant 0 : index
    %c0_1 = arith.constant 0 : index
    %0 = vector.load %arg4[%c0, %c0_0, %c0_1] : memref<1x16x128xbf16, #tpu.memory_space<vmem>>, vector<1x16x128xbf16>
    %1 = vector.shape_cast %0 : vector<1x16x128xbf16> to vector<16x128xbf16>
    %cst = arith.constant 0.000000e+00 : bf16
    %2 = vector.broadcast %cst : bf16 to vector<16x128xbf16>
    %3 = arith.maximumf %1, %2 : vector<16x128xbf16>
    %c0_2 = arith.constant 0 : index
    %c0_3 = arith.constant 0 : index
    %c0_4 = arith.constant 0 : index
    %4 = vector.load %arg5[%c0_2, %c0_3, %c0_4] : memref<1x128x128xbf16, #tpu.memory_space<vmem>>, vector<1x128x128xbf16>
    %5 = vector.shape_cast %4 : vector<1x128x128xbf16> to vector<128x128xbf16>
    %cst_5 = arith.constant dense<0.000000e+00> : vector<16x128xf32>
    %6 = tpu.matmul %3, %5, %cst_5 {dimension_numbers = #tpu.dot_dimension_numbers<[1], [0], [0], [1], [0, 0, 1, 1], [], []>} : vector<16x128xbf16>, vector<128x128xbf16>, vector<16x128xf32> -> vector<16x128xf32>
    %c0_6 = arith.constant 0 : index
    %c0_7 = arith.constant 0 : index
    %c0_8 = arith.constant 0 : index
    %7 = vector.load %arg6[%c0_6, %c0_7, %c0_8] : memref<1x1x128xf32, #tpu.memory_space<vmem>>, vector<1x1x128xf32>
    %8 = vector.shape_cast %7 : vector<1x1x128xf32> to vector<1x128xf32>
    %9 = vector.broadcast %8 : vector<1x128xf32> to vector<16x128xf32>
    %10 = arith.addf %6, %9 : vector<16x128xf32>
    %c0_9 = arith.constant 0 : index
    %c0_10 = arith.constant 0 : index
    %c0_11 = arith.constant 0 : index
    %11 = vector.load %arg7[%c0_9, %c0_10, %c0_11] : memref<1x16x128xbf16, #tpu.memory_space<vmem>>, vector<1x16x128xbf16>
    %12 = vector.shape_cast %11 : vector<1x16x128xbf16> to vector<16x128xbf16>
    %13 = arith.extf %12 : vector<16x128xbf16> to vector<16x128xf32>
    %14 = arith.addf %10, %13 : vector<16x128xf32>
    %cst_12 = arith.constant 0.000000e+00 : f32
    %15 = vector.broadcast %cst_12 : f32 to vector<16x128xf32>
    %16 = arith.maximumf %14, %15 : vector<16x128xf32>
    %17 = arith.truncf %16 : vector<16x128xf32> to vector<16x128xbf16>
    %c0_13 = arith.constant 0 : index
    %c0_14 = arith.constant 0 : index
    %c0_15 = arith.constant 0 : index
    %18 = vector.load %arg8[%c0_13, %c0_14, %c0_15] : memref<1x16x128xbf16, #tpu.memory_space<vmem>>, vector<1x16x128xbf16>
    %19 = vector.shape_cast %18 : vector<1x16x128xbf16> to vector<16x128xbf16>
    %20 = vector.shape_cast %17 : vector<16x128xbf16> to vector<1x16x128xbf16>
    tpu.vector_store %arg8[%c0_13, %c0_14, %c0_15], %20 {strides = array<i32>} : memref<1x16x128xbf16, #tpu.memory_space<vmem>>, vector<1x16x128xbf16>,
    return
  }
  func.func @transform_0(%arg0: i32, %arg1: i32, %arg2: i32, %arg3: i32) -> (i32, i32, i32) {
    %c0_i32 = arith.constant 0 : i32
    return %arg0, %arg1, %arg3 : i32, i32, i32
  }
  func.func @transform_1(%arg0: i32, %arg1: i32, %arg2: i32, %arg3: i32) -> (i32, i32, i32) {
    %c0_i32 = arith.constant 0 : i32
    return %arg0, %arg3, %arg2 : i32, i32, i32
  }
  func.func @transform_2(%arg0: i32, %arg1: i32, %arg2: i32, %arg3: i32) -> (i32, i32, i32) {
    %c0_i32 = arith.constant 0 : i32
    %c0_i32_0 = arith.constant 0 : i32
    return %arg0, %c0_i32, %arg2 : i32, i32, i32
  }
  func.func @transform_3(%arg0: i32, %arg1: i32, %arg2: i32, %arg3: i32) -> (i32, i32, i32) {
    %c0_i32 = arith.constant 0 : i32
    return %arg0, %arg1, %arg2 : i32, i32, i32
  }
  func.func @transform_4(%arg0: i32, %arg1: i32, %arg2: i32, %arg3: i32) -> (i32, i32, i32) {
    %c0_i32 = arith.constant 0 : i32
    return %arg0, %arg1, %arg2 : i32, i32, i32
  }
}

module attributes {stable_mosaic.version = 11 : i64} {
  func.func @_mm_fused_kernel(%arg0: i32, %arg1: i32, %arg2: i32, %arg3: i32, %arg4: memref<1x16x128xbf16, #tpu.memory_space<vmem>>, %arg5: memref<1x128x128xbf16, #tpu.memory_space<vmem>>, %arg6: memref<1x1x128xf32, #tpu.memory_space<vmem>>, %arg7: memref<1x16x128xbf16, #tpu.memory_space<vmem>>) attributes {dimension_semantics = [#tpu.dimension_semantics<parallel>, #tpu.dimension_semantics<parallel>, #tpu.dimension_semantics<parallel>, #tpu.dimension_semantics<arbitrary>], iteration_bounds = array<i64: 1, 1, 1, 1>, scalar_prefetch = 0 : i64, scratch_operands = 0 : i64, tpu.core_type = #tpu.core_type<tc>, window_params = [{transform_indices = @transform_0, window_bounds = array<i64: 1, 16, 128>}, {transform_indices = @transform_1, window_bounds = array<i64: 1, 128, 128>}, {transform_indices = @transform_2, window_bounds = array<i64: 1, 1, 128>}, {transform_indices = @transform_3, window_bounds = array<i64: 1, 16, 128>}]} {
    %c0 = arith.constant 0 : index
    %c0_0 = arith.constant 0 : index
    %c0_1 = arith.constant 0 : index
    %0 = vector.load %arg4[%c0, %c0_0, %c0_1] : memref<1x16x128xbf16, #tpu.memory_space<vmem>>, vector<1x16x128xbf16>
    %1 = vector.shape_cast %0 : vector<1x16x128xbf16> to vector<16x128xbf16>
    %c0_2 = arith.constant 0 : index
    %c0_3 = arith.constant 0 : index
    %c0_4 = arith.constant 0 : index
    %2 = vector.load %arg5[%c0_2, %c0_3, %c0_4] : memref<1x128x128xbf16, #tpu.memory_space<vmem>>, vector<1x128x128xbf16>
    %3 = vector.shape_cast %2 : vector<1x128x128xbf16> to vector<128x128xbf16>
    %cst = arith.constant dense<0.000000e+00> : vector<16x128xf32>
    %4 = tpu.matmul %1, %3, %cst {dimension_numbers = #tpu.dot_dimension_numbers<[1], [0], [0], [1], [0, 0, 1, 1], [], []>} : vector<16x128xbf16>, vector<128x128xbf16>, vector<16x128xf32> -> vector<16x128xf32>
    %c0_5 = arith.constant 0 : index
    %c0_6 = arith.constant 0 : index
    %c0_7 = arith.constant 0 : index
    %5 = vector.load %arg6[%c0_5, %c0_6, %c0_7] : memref<1x1x128xf32, #tpu.memory_space<vmem>>, vector<1x1x128xf32>
    %6 = vector.shape_cast %5 : vector<1x1x128xf32> to vector<1x128xf32>
    %7 = vector.broadcast %6 : vector<1x128xf32> to vector<16x128xf32>
    %8 = arith.addf %4, %7 : vector<16x128xf32>
    %cst_8 = arith.constant 0.000000e+00 : f32
    %9 = vector.broadcast %cst_8 : f32 to vector<16x128xf32>
    %10 = arith.maximumf %8, %9 : vector<16x128xf32>
    %11 = arith.truncf %10 : vector<16x128xf32> to vector<16x128xbf16>
    %c0_9 = arith.constant 0 : index
    %c0_10 = arith.constant 0 : index
    %c0_11 = arith.constant 0 : index
    %12 = vector.load %arg7[%c0_9, %c0_10, %c0_11] : memref<1x16x128xbf16, #tpu.memory_space<vmem>>, vector<1x16x128xbf16>
    %13 = vector.shape_cast %12 : vector<1x16x128xbf16> to vector<16x128xbf16>
    %14 = vector.shape_cast %11 : vector<16x128xbf16> to vector<1x16x128xbf16>
    tpu.vector_store %arg7[%c0_9, %c0_10, %c0_11], %14 {strides = array<i32>} : memref<1x16x128xbf16, #tpu.memory_space<vmem>>, vector<1x16x128xbf16>,
    return
  }
  func.func @transform_0(%arg0: i32, %arg1: i32, %arg2: i32, %arg3: i32) -> (i32, i32, i32) {
    %c0_i32 = arith.constant 0 : i32
    return %arg0, %arg1, %arg3 : i32, i32, i32
  }
  func.func @transform_1(%arg0: i32, %arg1: i32, %arg2: i32, %arg3: i32) -> (i32, i32, i32) {
    %c0_i32 = arith.constant 0 : i32
    return %arg0, %arg3, %arg2 : i32, i32, i32
  }
  func.func @transform_2(%arg0: i32, %arg1: i32, %arg2: i32, %arg3: i32) -> (i32, i32, i32) {
    %c0_i32 = arith.constant 0 : i32
    %c0_i32_0 = arith.constant 0 : i32
    return %arg0, %c0_i32, %arg2 : i32, i32, i32
  }
  func.func @transform_3(%arg0: i32, %arg1: i32, %arg2: i32, %arg3: i32) -> (i32, i32, i32) {
    %c0_i32 = arith.constant 0 : i32
    return %arg0, %arg1, %arg2 : i32, i32, i32
  }
}

module attributes {stable_mosaic.version = 11 : i64} {
  func.func @_mm_fused_kernel(%arg0: i32, %arg1: i32, %arg2: i32, %arg3: i32, %arg4: memref<1x16x1024xbf16, #tpu.memory_space<vmem>>, %arg5: memref<1x1024x256xbf16, #tpu.memory_space<vmem>>, %arg6: memref<1x1x256xf32, #tpu.memory_space<vmem>>, %arg7: memref<1x16x256xbf16, #tpu.memory_space<vmem>>) attributes {dimension_semantics = [#tpu.dimension_semantics<parallel>, #tpu.dimension_semantics<parallel>, #tpu.dimension_semantics<parallel>, #tpu.dimension_semantics<arbitrary>], iteration_bounds = array<i64: 1, 1, 4, 1>, scalar_prefetch = 0 : i64, scratch_operands = 0 : i64, tpu.core_type = #tpu.core_type<tc>, window_params = [{transform_indices = @transform_0, window_bounds = array<i64: 1, 16, 1024>}, {transform_indices = @transform_1, window_bounds = array<i64: 1, 1024, 256>}, {transform_indices = @transform_2, window_bounds = array<i64: 1, 1, 256>}, {transform_indices = @transform_3, window_bounds = array<i64: 1, 16, 256>}]} {
    %c0 = arith.constant 0 : index
    %c0_0 = arith.constant 0 : index
    %c0_1 = arith.constant 0 : index
    %0 = vector.load %arg4[%c0, %c0_0, %c0_1] : memref<1x16x1024xbf16, #tpu.memory_space<vmem>>, vector<1x16x1024xbf16>
    %1 = vector.shape_cast %0 : vector<1x16x1024xbf16> to vector<16x1024xbf16>
    %c0_2 = arith.constant 0 : index
    %c0_3 = arith.constant 0 : index
    %c0_4 = arith.constant 0 : index
    %2 = vector.load %arg5[%c0_2, %c0_3, %c0_4] : memref<1x1024x256xbf16, #tpu.memory_space<vmem>>, vector<1x1024x256xbf16>
    %3 = vector.shape_cast %2 : vector<1x1024x256xbf16> to vector<1024x256xbf16>
    %cst = arith.constant dense<0.000000e+00> : vector<16x256xf32>
    %4 = tpu.matmul %1, %3, %cst {dimension_numbers = #tpu.dot_dimension_numbers<[1], [0], [0], [1], [0, 0, 1, 1], [], []>} : vector<16x1024xbf16>, vector<1024x256xbf16>, vector<16x256xf32> -> vector<16x256xf32>
    %c0_5 = arith.constant 0 : index
    %c0_6 = arith.constant 0 : index
    %c0_7 = arith.constant 0 : index
    %5 = vector.load %arg6[%c0_5, %c0_6, %c0_7] : memref<1x1x256xf32, #tpu.memory_space<vmem>>, vector<1x1x256xf32>
    %6 = vector.shape_cast %5 : vector<1x1x256xf32> to vector<1x256xf32>
    %7 = vector.broadcast %6 : vector<1x256xf32> to vector<16x256xf32>
    %8 = arith.addf %4, %7 : vector<16x256xf32>
    %cst_8 = arith.constant 0.000000e+00 : f32
    %9 = vector.broadcast %cst_8 : f32 to vector<16x256xf32>
    %10 = arith.maximumf %8, %9 : vector<16x256xf32>
    %11 = arith.truncf %10 : vector<16x256xf32> to vector<16x256xbf16>
    %c0_9 = arith.constant 0 : index
    %c0_10 = arith.constant 0 : index
    %c0_11 = arith.constant 0 : index
    %12 = vector.load %arg7[%c0_9, %c0_10, %c0_11] : memref<1x16x256xbf16, #tpu.memory_space<vmem>>, vector<1x16x256xbf16>
    %13 = vector.shape_cast %12 : vector<1x16x256xbf16> to vector<16x256xbf16>
    %14 = vector.shape_cast %11 : vector<16x256xbf16> to vector<1x16x256xbf16>
    tpu.vector_store %arg7[%c0_9, %c0_10, %c0_11], %14 {strides = array<i32>} : memref<1x16x256xbf16, #tpu.memory_space<vmem>>, vector<1x16x256xbf16>,
    return
  }
  func.func @transform_0(%arg0: i32, %arg1: i32, %arg2: i32, %arg3: i32) -> (i32, i32, i32) {
    %c0_i32 = arith.constant 0 : i32
    return %arg0, %arg1, %arg3 : i32, i32, i32
  }
  func.func @transform_1(%arg0: i32, %arg1: i32, %arg2: i32, %arg3: i32) -> (i32, i32, i32) {
    %c0_i32 = arith.constant 0 : i32
    return %arg0, %arg3, %arg2 : i32, i32, i32
  }
  func.func @transform_2(%arg0: i32, %arg1: i32, %arg2: i32, %arg3: i32) -> (i32, i32, i32) {
    %c0_i32 = arith.constant 0 : i32
    %c0_i32_0 = arith.constant 0 : i32
    return %arg0, %c0_i32, %arg2 : i32, i32, i32
  }
  func.func @transform_3(%arg0: i32, %arg1: i32, %arg2: i32, %arg3: i32) -> (i32, i32, i32) {
    %c0_i32 = arith.constant 0 : i32
    return %arg0, %arg1, %arg2 : i32, i32, i32
  }
}

module attributes {stable_mosaic.version = 11 : i64} {
  func.func @_mm_fused_kernel(%arg0: i32, %arg1: i32, %arg2: i32, %arg3: i32, %arg4: memref<1x64x128xbf16, #tpu.memory_space<vmem>>, %arg5: memref<1x128x128xbf16, #tpu.memory_space<vmem>>, %arg6: memref<1x1x128xf32, #tpu.memory_space<vmem>>, %arg7: memref<1x64x128xbf16, #tpu.memory_space<vmem>>) attributes {dimension_semantics = [#tpu.dimension_semantics<parallel>, #tpu.dimension_semantics<parallel>, #tpu.dimension_semantics<parallel>, #tpu.dimension_semantics<arbitrary>], iteration_bounds = array<i64: 1, 1, 1, 1>, scalar_prefetch = 0 : i64, scratch_operands = 0 : i64, tpu.core_type = #tpu.core_type<tc>, window_params = [{transform_indices = @transform_0, window_bounds = array<i64: 1, 64, 128>}, {transform_indices = @transform_1, window_bounds = array<i64: 1, 128, 128>}, {transform_indices = @transform_2, window_bounds = array<i64: 1, 1, 128>}, {transform_indices = @transform_3, window_bounds = array<i64: 1, 64, 128>}]} {
    %c0 = arith.constant 0 : index
    %c0_0 = arith.constant 0 : index
    %c0_1 = arith.constant 0 : index
    %0 = vector.load %arg4[%c0, %c0_0, %c0_1] : memref<1x64x128xbf16, #tpu.memory_space<vmem>>, vector<1x64x128xbf16>
    %1 = vector.shape_cast %0 : vector<1x64x128xbf16> to vector<64x128xbf16>
    %c0_2 = arith.constant 0 : index
    %c0_3 = arith.constant 0 : index
    %c0_4 = arith.constant 0 : index
    %2 = vector.load %arg5[%c0_2, %c0_3, %c0_4] : memref<1x128x128xbf16, #tpu.memory_space<vmem>>, vector<1x128x128xbf16>
    %3 = vector.shape_cast %2 : vector<1x128x128xbf16> to vector<128x128xbf16>
    %cst = arith.constant dense<0.000000e+00> : vector<64x128xf32>
    %4 = tpu.matmul %1, %3, %cst {dimension_numbers = #tpu.dot_dimension_numbers<[1], [0], [0], [1], [0, 0, 1, 1], [], []>} : vector<64x128xbf16>, vector<128x128xbf16>, vector<64x128xf32> -> vector<64x128xf32>
    %c0_5 = arith.constant 0 : index
    %c0_6 = arith.constant 0 : index
    %c0_7 = arith.constant 0 : index
    %5 = vector.load %arg6[%c0_5, %c0_6, %c0_7] : memref<1x1x128xf32, #tpu.memory_space<vmem>>, vector<1x1x128xf32>
    %6 = vector.shape_cast %5 : vector<1x1x128xf32> to vector<1x128xf32>
    %7 = vector.broadcast %6 : vector<1x128xf32> to vector<64x128xf32>
    %8 = arith.addf %4, %7 : vector<64x128xf32>
    %9 = arith.truncf %8 : vector<64x128xf32> to vector<64x128xbf16>
    %c0_8 = arith.constant 0 : index
    %c0_9 = arith.constant 0 : index
    %c0_10 = arith.constant 0 : index
    %10 = vector.load %arg7[%c0_8, %c0_9, %c0_10] : memref<1x64x128xbf16, #tpu.memory_space<vmem>>, vector<1x64x128xbf16>
    %11 = vector.shape_cast %10 : vector<1x64x128xbf16> to vector<64x128xbf16>
    %12 = vector.shape_cast %9 : vector<64x128xbf16> to vector<1x64x128xbf16>
    tpu.vector_store %arg7[%c0_8, %c0_9, %c0_10], %12 {strides = array<i32>} : memref<1x64x128xbf16, #tpu.memory_space<vmem>>, vector<1x64x128xbf16>,
    return
  }
  func.func @transform_0(%arg0: i32, %arg1: i32, %arg2: i32, %arg3: i32) -> (i32, i32, i32) {
    %c0_i32 = arith.constant 0 : i32
    return %arg0, %arg1, %arg3 : i32, i32, i32
  }
  func.func @transform_1(%arg0: i32, %arg1: i32, %arg2: i32, %arg3: i32) -> (i32, i32, i32) {
    %c0_i32 = arith.constant 0 : i32
    return %arg0, %arg3, %arg2 : i32, i32, i32
  }
  func.func @transform_2(%arg0: i32, %arg1: i32, %arg2: i32, %arg3: i32) -> (i32, i32, i32) {
    %c0_i32 = arith.constant 0 : i32
    %c0_i32_0 = arith.constant 0 : i32
    return %arg0, %c0_i32, %arg2 : i32, i32, i32
  }
  func.func @transform_3(%arg0: i32, %arg1: i32, %arg2: i32, %arg3: i32) -> (i32, i32, i32) {
    %c0_i32 = arith.constant 0 : i32
    return %arg0, %arg1, %arg2 : i32, i32, i32
  }
}

</mosaic_0001>

<bundles_post_ra>
// kernel: _lambda_.56
= control target key start
LH: loop header
LB: loop body
LE: loop exit
PB: predicated region body
PF: predicated region fallthrough
CT: control target
= control target key end

     0   :  { %s799_s12 = smov 0   ;;  %s801_s13 = smov 0   ;;  %s862_s0 = inlined_call_operand.vmem [shape: bf16[2,64,128], index: 0, kind: input, shape index: {}]   ;;  %s863_s1 = inlined_call_operand.vmem [shape: bf16[2,128,128], index: 1, kind: input, shape index: {}]   ;;  %s864_s2 = inlined_call_operand.vmem [shape: f32[2,1,128], index: 2, kind: input, shape index: {}]   ;;  %s865_s3 = inlined_call_operand.vmem [shape: bf16[2,64,128], index: 3, kind: output, shape index: {}]  }
   0x1   :  { %s803_s14 = smov 0  }
   0x2 LB: > { %s39_s15 = sadd.s32 1, %s773_s13  ;;  %p611_p0 = scmp.ge.s32.totalorder %s777_s14, 1  ;;  %s777_s14 = sphi %s803_s14, %s13_s14   ;;  %s773_s13 = sphi %s801_s13, %s867_s13   ;;  %s769_s12 = sphi %s799_s12, %s866_s12  }
   0x3   : > { %p41_p1 = scmp.ge.s32.totalorder %s39_s15, 2  ;;  %p214_p2 = scmp.lt.s32.totalorder %s777_s14, 3 }
   0x5   : > { %s869_s15 = smov (%p41_p1, %s39_s15), 0  ;;  %p215_p3 = pnand %p611_p0, %p214_p2 }
   0x6   : > { %p271_p4 = scmp.lt.s32.totalorder (!%p215_p3), %s769_s12, 1 }
   0x7   : > { %218 = sbr.rel (%p215_p3) target bundleno = 196 (0xc4), region = 32 }
   0xc   : > { %s871_s12 = smov (!%p271_p4, %s769_s12), 1 }
   0xd   : > { %s669_s16 = sshll.u32 %s871_s12, 6  ;;  %s301_s22 = scalar_lea.vmem %s864_s2, %s871_s12 }
   0xe   : > { %s823_s19 = scalar_lea.vmem %s863_s1, %s669_s16  ;;  %s668_s23 = sshll.u32 %s871_s12, 5  ;;  %v754_v14 = vld [vmem:[%s301_s22] ss:$0 sm:$0xff] }
   0xf   : > { %v682_v0 = vld [vmem:[%s823_s19 + $0x38] sm:$0xff]  ;;  %v681_v1 = vld [vmem:[%s823_s19 + $0x30] sm:$0xff]  ;;  %v680_v2 = vld [vmem:[%s823_s19 + $0x28] sm:$0xff]  ;;  %s281_s26 = scalar_lea.vmem %s862_s0, %s668_s23  ;;  %s313_s4 = scalar_lea.vmem %s865_s3, %s668_s23 }
  0x10   : > { %415 = vmatpush.bf16.msra.mxu0 %v682_v0  ;;  %706 = vmatpush.bf16.msra.mxu1 %v682_v0  ;;  %v679_v3 = vld [vmem:[%s823_s19 + $0x20] sm:$0xff]  ;;  %v678_v4 = vld [vmem:[%s823_s19 + $0x18] sm:$0xff]  ;;  %v677_v5 = vld [vmem:[%s823_s19 + $0x10] sm:$0xff] }
  0x11   : > { %707 = vmatpush.bf16.msra.mxu2 %v682_v0  ;;  %708 = vmatpush.bf16.msra.mxu3 %v682_v0  ;;  %v676_v6 = vld [vmem:[%s823_s19 + $0x8] sm:$0xff]  ;;  %v675_v7 = vld [vmem:[%s823_s19] sm:$0xff]  ;;  %v673_v10 = vld [vmem:[%s281_s26 + $0x10] sm:$0xff] }
  0x12   : > { %v671_v8 = vld [vmem:[%s281_s26] sm:$0xff]  ;;  %v672_v9 = vld [vmem:[%s281_s26 + $0x8] sm:$0xff]  ;;  %v674_v11 = vld [vmem:[%s281_s26 + $0x18] sm:$0xff] }
  0x14   : > { %416 = vmatpush.bf16.msra.mxu0 %v681_v1  ;;  %709 = vmatpush.bf16.msra.mxu1 %v681_v1 }
  0x15   : > { %710 = vmatpush.bf16.msra.mxu2 %v681_v1  ;;  %711 = vmatpush.bf16.msra.mxu3 %v681_v1 }
  0x18   : > { %417 = vmatpush.bf16.msra.mxu0 %v680_v2  ;;  %712 = vmatpush.bf16.msra.mxu1 %v680_v2 }
  0x19   : > { %713 = vmatpush.bf16.msra.mxu2 %v680_v2  ;;  %714 = vmatpush.bf16.msra.mxu3 %v680_v2 }
  0x1c   : > { %418 = vmatpush.bf16.msra.mxu0 %v679_v3  ;;  %715 = vmatpush.bf16.msra.mxu1 %v679_v3 }
  0x1d   : > { %716 = vmatpush.bf16.msra.mxu2 %v679_v3  ;;  %717 = vmatpush.bf16.msra.mxu3 %v679_v3 }
  0x20   : > { %419 = vmatpush.bf16.msra.mxu0 %v678_v4  ;;  %718 = vmatpush.bf16.msra.mxu1 %v678_v4 }
  0x21   : > { %719 = vmatpush.bf16.msra.mxu2 %v678_v4  ;;  %720 = vmatpush.bf16.msra.mxu3 %v678_v4 }
  0x24   : > { %420 = vmatpush.bf16.msra.mxu0 %v677_v5  ;;  %721 = vmatpush.bf16.msra.mxu1 %v677_v5 }
  0x25   : > { %722 = vmatpush.bf16.msra.mxu2 %v677_v5  ;;  %723 = vmatpush.bf16.msra.mxu3 %v677_v5 }
  0x28   : > { %421 = vmatpush.bf16.msra.mxu0 %v676_v6  ;;  %724 = vmatpush.bf16.msra.mxu1 %v676_v6 }
  0x29   : > { %725 = vmatpush.bf16.msra.mxu2 %v676_v6  ;;  %726 = vmatpush.bf16.msra.mxu3 %v676_v6 }
  0x2c   : > { %422 = vmatpush.bf16.msra.mxu0 %v675_v7  ;;  %727 = vmatpush.bf16.msra.mxu1 %v675_v7 }
  0x2d   : > { %728 = vmatpush.bf16.msra.mxu2 %v675_v7  ;;  %729 = vmatpush.bf16.msra.mxu3 %v675_v7 }
  0x2f   : > { %423 = vmatmul.bf16.vlgmr.msra.gmra.mxu0 %v671_v8  ;;  %428 = vmatmul.bf16.vlgmr.msra.gmra.mxu1 %v672_v9 }
  0x30   : > { %433 = vmatmul.bf16.vlgmr.msra.gmra.mxu2 %v673_v10  ;;  %438 = vmatmul.bf16.vlgmr.msra.gmra.mxu3 %v674_v11 }
  0xac   : > { %v424_v12 = vpop.f32.mrf.mxu0  ;;  %v429_v13 = vpop.f32.mrf.mxu1 }
  0xad   : > { %v425_v15 = vadd.f32 %v754_v14, %v424_v12  ;;  %v430_v16 = vadd.f32 %v754_v14, %v429_v13 }
  0xaf   : > { %v444_v23 = vmax.f32 %v425_v15, 0.0  ;;  %v446_v24 = vmax.f32 %v430_v16, 0.0 }
  0xb3   : > { %v434_v17 = vpop.f32.mrf.mxu2  ;;  %v439_v18 = vpop.f32.mrf.mxu3 }
  0xb4   : > { %v426_v19 = vpop.f32.mrf.mxu0  ;;  %v431_v20 = vpop.f32.mrf.mxu1  ;;  %v435_v29 = vadd.f32 %v754_v14, %v434_v17  ;;  %v440_v30 = vadd.f32 %v754_v14, %v439_v18 }
  0xb5   : > { %v427_v21 = vadd.f32 %v754_v14, %v426_v19  ;;  %v432_v22 = vadd.f32 %v754_v14, %v431_v20 }
  0xb6   : > { %v448_v35 = vmax.f32 %v435_v29, 0.0  ;;  %v450_v36 = vmax.f32 %v440_v30, 0.0 }
  0xb7   : > { %v445_v25 = vmax.f32 %v427_v21, 0.0  ;;  %v447_v26 = vmax.f32 %v432_v22, 0.0 }
  0xb9   : > { %v686_v27 = vpack.c.bf16 %v445_v25, %v444_v23  ;;  %v691_v28 = vpack.c.bf16 %v447_v26, %v446_v24 }
  0xbb   : > { %687 = vst [vmem:[%s313_s4] sm:$0xff] %v686_v27   ;;  %v436_v31 = vpop.f32.mrf.mxu2  ;;  %v441_v32 = vpop.f32.mrf.mxu3 }
  0xbc   : > { %703 = vst [vmem:[%s313_s4 + $0x8] sm:$0xff] %v691_v28   ;;  %v437_v33 = vadd.f32 %v754_v14, %v436_v31  ;;  %v442_v34 = vadd.f32 %v754_v14, %v441_v32 }
  0xbe   : > { %v449_v37 = vmax.f32 %v437_v33, 0.0  ;;  %v451_v38 = vmax.f32 %v442_v34, 0.0 }
  0xc0   : > { %v696_v39 = vpack.c.bf16 %v449_v37, %v448_v35  ;;  %v701_v40 = vpack.c.bf16 %v451_v38, %v450_v36 }
  0xc2   : > { %704 = vst [vmem:[%s313_s4 + $0x10] sm:$0xff] %v696_v39  }
  0xc3   : > { %705 = vst [vmem:[%s313_s4 + $0x18] sm:$0xff] %v701_v40  }
  0xc4 PF: > { %s13_s14 = sadd.s32 1, %s777_s14   ;;  %s866_s12 = smov %s773_s13 }
  0xc5   : > { %p10_p5 = scmp.ge.s32.totalorder %s13_s14, 4   ;;  %s867_s13 = smov %s869_s15 }
  0xc7   :  { %12 = sbr.rel (!%p10_p5) target bundleno = 2 (0x2), region = 68 }

// kernel: _lambda_.57
= control target key start
LH: loop header
LB: loop body
LE: loop exit
PB: predicated region body
PF: predicated region fallthrough
CT: control target
= control target key end

     0   :  { %s5410_s12 = smov 0   ;;  %s5412_s13 = smov 0   ;;  %s6096_s0 = inlined_call_operand.vmem [shape: bf16[2,64,3456], index: 0, kind: input, shape index: {}]   ;;  %s6097_s1 = inlined_call_operand.vmem [shape: bf16[2,3456,128], index: 1, kind: input, shape index: {}]   ;;  %s6098_s2 = inlined_call_operand.vmem [shape: f32[2,1,128], index: 2, kind: input, shape index: {}]   ;;  %s6099_s3 = inlined_call_operand.vmem [shape: bf16[2,64,128], index: 3, kind: output, shape index: {}]  }
   0x1   :  { %s5414_s14 = smov 0  }
   0x2 LB: > { %s39_s15 = sadd.s32 1, %s5384_s13  ;;  %p3664_p0 = scmp.ge.s32.totalorder %s5388_s14, 1  ;;  %s5388_s14 = sphi %s5414_s14, %s13_s14   ;;  %s5384_s13 = sphi %s5412_s13, %s6101_s13   ;;  %s5380_s12 = sphi %s5410_s12, %s6100_s12  }
   0x3   : > { %p41_p1 = scmp.ge.s32.totalorder %s39_s15, 2  ;;  %p217_p2 = scmp.lt.s32.totalorder %s5388_s14, 3 }
   0x5   : > { %s6103_s15 = smov (%p41_p1, %s39_s15), 0  ;;  %p218_p3 = pnand %p3664_p0, %p217_p2 }
   0x6   : > { %p277_p4 = scmp.lt.s32.totalorder (!%p218_p3), %s5380_s12, 1 }
   0x7   : > { %221 = sbr.rel (%p218_p3) target bundleno = 613 (0x265), region = 32 }
   0xc   : > { %s6105_s12 = smov (!%p277_p4, %s5380_s12), 1 }
   0xd   : > { %s5340_s16 = smul.u32 1728, %s6105_s12  ;;  %s309_s23 = scalar_lea.vmem %s6098_s2, %s6105_s12 }
   0xe   : > { %s5339_s20 = smul.u32 864, %s6105_s12  ;;  %s4967_s29 = sshll.u32 %s6105_s12, 5 }
   0xf   : > { %s5434_s19 = scalar_lea.vmem %s6097_s1, %s5340_s16  ;;  %s6079_s5 = scalar_lea.vmem %s6099_s3, %s4967_s29 }
  0x10   : > { %v5083_v0 = vld [vmem:[%s5434_s19 + $0x38] sm:$0xff]  ;;  %v5082_v3 = vld [vmem:[%s5434_s19 + $0x30] sm:$0xff]  ;;  %v5081_v6 = vld [vmem:[%s5434_s19 + $0x28] sm:$0xff]  ;;  %s5463_s26 = scalar_lea.vmem %s6096_s0, %s5339_s20 }
  0x11   : > { %v5091_v1 = vld [vmem:[%s5434_s19 + $0x78] sm:$0xff]  ;;  %2711 = vmatpush.bf16.msra.mxu0 %v5083_v0  ;;  %5315 = vmatpush.bf16.msra.mxu3 %v5083_v0  ;;  %v5090_v4 = vld [vmem:[%s5434_s19 + $0x70] sm:$0xff]  ;;  %v5089_v7 = vld [vmem:[%s5434_s19 + $0x68] sm:$0xff] }
  0x12   : > { %v5099_v2 = vld [vmem:[%s5434_s19 + $0xb8] sm:$0xff]  ;;  %2740 = vmatpush.bf16.msra.mxu1 %v5091_v1  ;;  %v5098_v5 = vld [vmem:[%s5434_s19 + $0xb0] sm:$0xff]  ;;  %v5097_v8 = vld [vmem:[%s5434_s19 + $0xa8] sm:$0xff] }
  0x13   : > { %2769 = vmatpush.bf16.msra.mxu2 %v5099_v2  ;;  %v5080_v9 = vld [vmem:[%s5434_s19 + $0x20] sm:$0xff]  ;;  %v5079_v12 = vld [vmem:[%s5434_s19 + $0x18] sm:$0xff]  ;;  %v5078_v15 = vld [vmem:[%s5434_s19 + $0x10] sm:$0xff] }
  0x14   : > { %v5088_v10 = vld [vmem:[%s5434_s19 + $0x60] sm:$0xff]  ;;  %v5087_v13 = vld [vmem:[%s5434_s19 + $0x58] sm:$0xff]  ;;  %v5086_v16 = vld [vmem:[%s5434_s19 + $0x50] sm:$0xff] }
  0x15   : > { %2712 = vmatpush.bf16.msra.mxu0 %v5082_v3  ;;  %5316 = vmatpush.bf16.msra.mxu3 %v5082_v3  ;;  %v5096_v11 = vld [vmem:[%s5434_s19 + $0xa0] sm:$0xff]  ;;  %v5095_v14 = vld [vmem:[%s5434_s19 + $0x98] sm:$0xff]  ;;  %v5094_v17 = vld [vmem:[%s5434_s19 + $0x90] sm:$0xff] }
  0x16   : > { %2741 = vmatpush.bf16.msra.mxu1 %v5090_v4  ;;  %v5077_v18 = vld [vmem:[%s5434_s19 + $0x8] sm:$0xff]  ;;  %v5076_v21 = vld [vmem:[%s5434_s19] sm:$0xff]  ;;  %v3887_v26 = vld [vmem:[%s5463_s26 + $0x1b0] sm:$0xf] }
  0x17   : > { %2770 = vmatpush.bf16.msra.mxu2 %v5098_v5  ;;  %v5085_v19 = vld [vmem:[%s5434_s19 + $0x48] sm:$0xff]  ;;  %v5084_v22 = vld [vmem:[%s5434_s19 + $0x40] sm:$0xff]  ;;  %v5035_v27 = vld [vmem:[%s5463_s26 + $0x218] sm:$0xf0] }
  0x18   : > { %v5093_v20 = vld [vmem:[%s5434_s19 + $0x88] sm:$0xff]  ;;  %v5092_v23 = vld [vmem:[%s5434_s19 + $0x80] sm:$0xff]  ;;  %v3673_v29 = vld [vmem:[%s5463_s26 + $0x6c] sm:$0xf0]  ;;  %v3888_v35 = vor.u32 %v5035_v27, %v3887_v26 }
  0x19   : > { %2713 = vmatpush.bf16.msra.mxu0 %v5081_v6  ;;  %5317 = vmatpush.bf16.msra.mxu3 %v5081_v6  ;;  %v3671_v24 = vld [vmem:[%s5463_s26] sm:$0xf]  ;;  %v4981_v25 = vld [vmem:[%s5463_s26 + $0x68] sm:$0xf0]  ;;  %v4968_v28 = vld [vmem:[%s5463_s26 + $0x4] sm:$0xf] }
  0x1a   : > { %2742 = vmatpush.bf16.msra.mxu1 %v5089_v7  ;;  %v3679_v30 = vld [vmem:[%s5463_s26 + $0x8] sm:$0xf]  ;;  %v4982_v31 = vld [vmem:[%s5463_s26 + $0x70] sm:$0xf0]  ;;  %v5107_v32 = vld [vmem:[%s5434_s19 + $0xf8] sm:$0xff]  ;;  %v3672_v34 = vor.u32 %v4981_v25, %v3671_v24  ;;  %v3676_v36 = vor.u32 %v4968_v28, %v3673_v29 }
  0x1b   : > { %2771 = vmatpush.bf16.msra.mxu2 %v5097_v8  ;;  %v5131_v33 = vld [vmem:[%s5434_s19 + $0x1b8] sm:$0xff]  ;;  %v3680_v37 = vor.u32 %v4982_v31, %v3679_v30  ;;  %v5106_v40 = vld [vmem:[%s5434_s19 + $0xf0] sm:$0xff]  ;;  %v5105_v44 = vld [vmem:[%s5434_s19 + $0xe8] sm:$0xff] }
  0x1c   : > { %v5115_v38 = vld [vmem:[%s5434_s19 + $0x138] sm:$0xff]  ;;  %v5130_v41 = vld [vmem:[%s5434_s19 + $0x1b0] sm:$0xff]  ;;  %v5129_v45 = vld [vmem:[%s5434_s19 + $0x1a8] sm:$0xff] }
  0x1d   : > { %2714 = vmatpush.bf16.msra.mxu0 %v5080_v9  ;;  %5318 = vmatpush.bf16.msra.mxu3 %v5080_v9  ;;  %v5123_v39 = vld [vmem:[%s5434_s19 + $0x178] sm:$0xff]  ;;  %v5114_v42 = vld [vmem:[%s5434_s19 + $0x130] sm:$0xff]  ;;  %v5113_v46 = vld [vmem:[%s5434_s19 + $0x128] sm:$0xff] }
  0x1e   : > { %2743 = vmatpush.bf16.msra.mxu1 %v5088_v10  ;;  %v5122_v43 = vld [vmem:[%s5434_s19 + $0x170] sm:$0xff]  ;;  %v5121_v47 = vld [vmem:[%s5434_s19 + $0x168] sm:$0xff]  ;;  %v5104_v48 = vld [vmem:[%s5434_s19 + $0xe0] sm:$0xff] }
  0x1f   : > { %2772 = vmatpush.bf16.msra.mxu2 %v5096_v11  ;;  %v5128_v49 = vld [vmem:[%s5434_s19 + $0x1a0] sm:$0xff]  ;;  %v3779_v51 = vld [vmem:[%s5463_s26 + $0xd8] sm:$0xf]  ;;  %v3995_v53 = vld [vmem:[%s5463_s26 + $0x288] sm:$0xf] }
  0x20   : > { %v5112_v50 = vld [vmem:[%s5434_s19 + $0x120] sm:$0xff]  ;;  %v5062_v54 = vld [vmem:[%s5463_s26 + $0x2f0] sm:$0xf0]  ;;  %v4995_v55 = vld [vmem:[%s5463_s26 + $0xdc] sm:$0xf] }
  0x21   : > { %2715 = vmatpush.bf16.msra.mxu0 %v5079_v12  ;;  %5319 = vmatpush.bf16.msra.mxu3 %v5079_v12  ;;  %v5008_v52 = vld [vmem:[%s5463_s26 + $0x140] sm:$0xf0]  ;;  %v3781_v56 = vld [vmem:[%s5463_s26 + $0x144] sm:$0xf0]  ;;  %v3787_v57 = vld [vmem:[%s5463_s26 + $0xe0] sm:$0xf]  ;;  %v3996_v63 = vor.u32 %v5062_v54, %v3995_v53 }
  0x22   : > { %2744 = vmatpush.bf16.msra.mxu1 %v5087_v13  ;;  %v5009_v58 = vld [vmem:[%s5463_s26 + $0x148] sm:$0xf0]  ;;  %v5120_v59 = vld [vmem:[%s5434_s19 + $0x160] sm:$0xff]  ;;  %v5103_v60 = vld [vmem:[%s5434_s19 + $0xd8] sm:$0xff]  ;;  %v3780_v62 = vor.u32 %v5008_v52, %v3779_v51  ;;  %v3784_v0 = vor.u32 %v4995_v55, %v3781_v56 }
  0x23   : > { %2773 = vmatpush.bf16.msra.mxu2 %v5095_v14  ;;  %v5127_v61 = vld [vmem:[%s5434_s19 + $0x198] sm:$0xff]  ;;  %v3788_v1 = vor.u32 %v5009_v58, %v3787_v57  ;;  %v5102_v4 = vld [vmem:[%s5434_s19 + $0xd0] sm:$0xff]  ;;  %v5101_v8 = vld [vmem:[%s5434_s19 + $0xc8] sm:$0xff] }
  0x24   : > { %v5111_v2 = vld [vmem:[%s5434_s19 + $0x118] sm:$0xff]  ;;  %v5126_v5 = vld [vmem:[%s5434_s19 + $0x190] sm:$0xff]  ;;  %v5125_v9 = vld [vmem:[%s5434_s19 + $0x188] sm:$0xff] }
  0x25   : > { %2716 = vmatpush.bf16.msra.mxu0 %v5078_v15  ;;  %5320 = vmatpush.bf16.msra.mxu3 %v5078_v15  ;;  %v5119_v3 = vld [vmem:[%s5434_s19 + $0x158] sm:$0xff]  ;;  %v5110_v6 = vld [vmem:[%s5434_s19 + $0x110] sm:$0xff]  ;;  %v5109_v10 = vld [vmem:[%s5434_s19 + $0x108] sm:$0xff] }
  0x26   : > { %2745 = vmatpush.bf16.msra.mxu1 %v5086_v16  ;;  %v5118_v7 = vld [vmem:[%s5434_s19 + $0x150] sm:$0xff]  ;;  %v5117_v11 = vld [vmem:[%s5434_s19 + $0x148] sm:$0xff]  ;;  %v5100_v12 = vld [vmem:[%s5434_s19 + $0xc0] sm:$0xff] }
  0x27   : > { %2774 = vmatpush.bf16.msra.mxu2 %v5094_v17  ;;  %v5124_v13 = vld [vmem:[%s5434_s19 + $0x180] sm:$0xff]  ;;  %v5022_v15 = vld [vmem:[%s5463_s26 + $0x1b4] sm:$0xf]  ;;  %v5139_v16 = vld [vmem:[%s5434_s19 + $0x1f8] sm:$0xff] }
  0x28   : > { %v5108_v14 = vld [vmem:[%s5434_s19 + $0x100] sm:$0xff]  ;;  %v4983_v24 = vld [vmem:[%s5463_s26 + $0x78] sm:$0xf0]  ;;  %v5138_v30 = vld [vmem:[%s5434_s19 + $0x1f0] sm:$0xff] }
  0x29   : > { %2717 = vmatpush.bf16.msra.mxu0 %v5077_v18  ;;  %5321 = vmatpush.bf16.msra.mxu3 %v5077_v18  ;;  %v3889_v17 = vld [vmem:[%s5463_s26 + $0x21c] sm:$0xf0]  ;;  %v4969_v18 = vld [vmem:[%s5463_s26 + $0xc] sm:$0xf]  ;;  %v5147_v25 = vld [vmem:[%s5434_s19 + $0x238] sm:$0xff] }
  0x2a   : > { %2746 = vmatpush.bf16.msra.mxu1 %v5085_v19  ;;  %v3681_v19 = vld [vmem:[%s5463_s26 + $0x74] sm:$0xf0]  ;;  %v3892_v27 = vor.u32 %v5022_v15, %v3889_v17  ;;  %v5146_v31 = vld [vmem:[%s5434_s19 + $0x230] sm:$0xff]  ;;  %v5133_v56 = vld [vmem:[%s5434_s19 + $0x1c8] sm:$0xff] }
  0x2b   : > { %2775 = vmatpush.bf16.msra.mxu2 %v5093_v20  ;;  %v3895_v20 = vld [vmem:[%s5463_s26 + $0x1b8] sm:$0xf]  ;;  %v3684_v26 = vor.u32 %v4969_v18, %v3681_v19  ;;  %v5134_v54 = vld [vmem:[%s5434_s19 + $0x1d0] sm:$0xff]  ;;  %v5161_v57 = vld [vmem:[%s5434_s19 + $0x2a8] sm:$0xff] }
  0x2c   : > { %v5142_v55 = vld [vmem:[%s5434_s19 + $0x210] sm:$0xff]  ;;  %v5141_v58 = vld [vmem:[%s5434_s19 + $0x208] sm:$0xff]  ;;  %v5179_v15 = vld [vmem:[%s5434_s19 + $0x338] sm:$0xff] }
  0x2d   : > { %2718 = vmatpush.bf16.msra.mxu0 %v5076_v21  ;;  %5322 = vmatpush.bf16.msra.mxu3 %v5076_v21  ;;  %v5036_v21 = vld [vmem:[%s5463_s26 + $0x220] sm:$0xf0]  ;;  %v5170_v17 = vld [vmem:[%s5434_s19 + $0x2f0] sm:$0xff] }
  0x2e   : > { %2747 = vmatpush.bf16.msra.mxu1 %v5084_v22  ;;  %v5116_v22 = vld [vmem:[%s5434_s19 + $0x140] sm:$0xff]  ;;  %v3896_v28 = vor.u32 %v5036_v21, %v3895_v20  ;;  %v5150_v18 = vld [vmem:[%s5434_s19 + $0x250] sm:$0xff] }
  0x2f   : > { %2776 = vmatpush.bf16.msra.mxu2 %v5092_v23  ;;  %v3687_v23 = vld [vmem:[%s5463_s26 + $0x10] sm:$0xf]  ;;  %v5050_v20 = vld [vmem:[%s5463_s26 + $0x294] sm:$0xf]  ;;  %v4005_v21 = vld [vmem:[%s5463_s26 + $0x2fc] sm:$0xf0] }
  0x30   : > { %2719 = vmatmul.bf16.vlgmr.msra.gmra.mxu0 %v3672_v34  ;;  %2729 = vmatmul.bf16.vlgmr.msra.gmra.mxu3 %v3888_v35  ;;  %v3688_v29 = vor.u32 %v4983_v24, %v3687_v23  ;;  %v5145_v34 = vld [vmem:[%s5434_s19 + $0x228] sm:$0xff]  ;;  %v5155_v35 = vld [vmem:[%s5434_s19 + $0x278] sm:$0xff]  ;;  %v5178_v19 = vld [vmem:[%s5434_s19 + $0x330] sm:$0xff] }
  0x31   : > { %2798 = vmatpush.bf16.msrb.mxu3 %v5107_v32  ;;  %2748 = vmatmul.bf16.vlgmr.msra.gmra.mxu1 %v3676_v36  ;;  %v5137_v32 = vld [vmem:[%s5434_s19 + $0x1e8] sm:$0xff]  ;;  %v5162_v36 = vld [vmem:[%s5434_s19 + $0x2b0] sm:$0xff]  ;;  %v3797_v23 = vld [vmem:[%s5463_s26 + $0x154] sm:$0xf0] }
  0x32   : > { %2777 = vmatmul.bf16.vlgmr.msra.gmra.mxu2 %v3680_v37  ;;  %2827 = vmatpush.bf16.msrb.mxu0 %v5115_v38  ;;  %v5154_v37 = vld [vmem:[%s5434_s19 + $0x270] sm:$0xff]  ;;  %v5136_v38 = vld [vmem:[%s5434_s19 + $0x1e0] sm:$0xff] }
  0x33   : > { %2885 = vmatpush.bf16.msrb.mxu2 %v5131_v33  ;;  %2856 = vmatpush.bf16.msrb.mxu1 %v5123_v39  ;;  %v5163_v33 = vld [vmem:[%s5434_s19 + $0x2b8] sm:$0xff]  ;;  %v5144_v39 = vld [vmem:[%s5434_s19 + $0x220] sm:$0xff]  ;;  %v3803_v24 = vld [vmem:[%s5463_s26 + $0xf0] sm:$0xf] }
  0x35   : > { %2799 = vmatpush.bf16.msrb.mxu3 %v5106_v40  ;;  %v5049_v40 = vld [vmem:[%s5463_s26 + $0x28c] sm:$0xf] }
  0x36   : > { %2828 = vmatpush.bf16.msrb.mxu0 %v5114_v42  ;;  %v4996_v42 = vld [vmem:[%s5463_s26 + $0xe4] sm:$0xf] }
  0x37   : > { %2886 = vmatpush.bf16.msrb.mxu2 %v5130_v41  ;;  %2857 = vmatpush.bf16.msrb.mxu1 %v5122_v43  ;;  %v3997_v41 = vld [vmem:[%s5463_s26 + $0x2f4] sm:$0xf0]  ;;  %v3789_v43 = vld [vmem:[%s5463_s26 + $0x14c] sm:$0xf0] }
  0x38   : > { %v4000_v51 = vor.u32 %v5049_v40, %v3997_v41  ;;  %v5024_v40 = vld [vmem:[%s5463_s26 + $0x1c4] sm:$0xf]  ;;  %v4971_v41 = vld [vmem:[%s5463_s26 + $0x1c] sm:$0xf] }
  0x39   : > { %2800 = vmatpush.bf16.msrb.mxu3 %v5105_v44  ;;  %v4003_v44 = vld [vmem:[%s5463_s26 + $0x290] sm:$0xf] }
  0x3a   : > { %2829 = vmatpush.bf16.msrb.mxu0 %v5113_v46  ;;  %v5135_v46 = vld [vmem:[%s5434_s19 + $0x1d8] sm:$0xff] }
  0x3b   : > { %2887 = vmatpush.bf16.msrb.mxu2 %v5129_v45  ;;  %2858 = vmatpush.bf16.msrb.mxu1 %v5121_v47  ;;  %v5063_v45 = vld [vmem:[%s5463_s26 + $0x2f8] sm:$0xf0]  ;;  %v3795_v47 = vld [vmem:[%s5463_s26 + $0xe8] sm:$0xf] }
  0x3c   : > { %v4004_v52 = vor.u32 %v5063_v45, %v4003_v44  ;;  %v3911_v44 = vld [vmem:[%s5463_s26 + $0x1c8] sm:$0xf]  ;;  %v5038_v45 = vld [vmem:[%s5463_s26 + $0x230] sm:$0xf0] }
  0x3d   : > { %2801 = vmatpush.bf16.msrb.mxu3 %v5104_v48  ;;  %v5010_v48 = vld [vmem:[%s5463_s26 + $0x150] sm:$0xf0] }
  0x3e   : > { %2830 = vmatpush.bf16.msrb.mxu0 %v5112_v50  ;;  %v3792_v50 = vor.u32 %v4996_v42, %v3789_v43  ;;  %v3796_v53 = vor.u32 %v5010_v48, %v3795_v47  ;;  %v3697_v42 = vld [vmem:[%s5463_s26 + $0x84] sm:$0xf0]  ;;  %v3905_v43 = vld [vmem:[%s5463_s26 + $0x22c] sm:$0xf0]  ;;  %v4985_v47 = vld [vmem:[%s5463_s26 + $0x88] sm:$0xf0] }
  0x3f   : > { %2888 = vmatpush.bf16.msrb.mxu2 %v5128_v49  ;;  %2859 = vmatpush.bf16.msrb.mxu1 %v5120_v59  ;;  %v5143_v49 = vld [vmem:[%s5434_s19 + $0x218] sm:$0xff]  ;;  %v5153_v59 = vld [vmem:[%s5434_s19 + $0x268] sm:$0xff]  ;;  %v3700_v48 = vor.u32 %v4971_v41, %v3697_v42 }
  0x40   : > { %2724 = vmatmul.bf16.gmra.mxu0 %v3780_v62  ;;  %2734 = vmatmul.bf16.gmra.mxu3 %v3996_v63  ;;  %v5132_v62 = vld [vmem:[%s5434_s19 + $0x1c0] sm:$0xff] }
  0x41   : > { %2802 = vmatpush.bf16.msrb.mxu3 %v5103_v60  ;;  %2753 = vmatmul.bf16.gmra.mxu1 %v3784_v0  ;;  %v5160_v60 = vld [vmem:[%s5434_s19 + $0x2a0] sm:$0xff]  ;;  %v5023_v0 = vld [vmem:[%s5463_s26 + $0x1bc] sm:$0xf] }
  0x42   : > { %2782 = vmatmul.bf16.gmra.mxu2 %v3788_v1  ;;  %2831 = vmatpush.bf16.msrb.mxu0 %v5111_v2  ;;  %v5140_v63 = vld [vmem:[%s5434_s19 + $0x200] sm:$0xff]  ;;  %v3897_v1 = vld [vmem:[%s5463_s26 + $0x224] sm:$0xf0]  ;;  %v4970_v2 = vld [vmem:[%s5463_s26 + $0x14] sm:$0xf] }
  0x43   : > { %2889 = vmatpush.bf16.msrb.mxu2 %v5127_v61  ;;  %2860 = vmatpush.bf16.msrb.mxu1 %v5119_v3  ;;  %v5152_v61 = vld [vmem:[%s5434_s19 + $0x260] sm:$0xff] }
  0x44   : > { %v3689_v3 = vld [vmem:[%s5463_s26 + $0x7c] sm:$0xf0] }
  0x45   : > { %2803 = vmatpush.bf16.msrb.mxu3 %v5102_v4  ;;  %v3695_v4 = vld [vmem:[%s5463_s26 + $0x18] sm:$0xf] }
  0x46   : > { %2832 = vmatpush.bf16.msrb.mxu0 %v5110_v6  ;;  %v3903_v6 = vld [vmem:[%s5463_s26 + $0x1c0] sm:$0xf] }
  0x47   : > { %2890 = vmatpush.bf16.msrb.mxu2 %v5126_v5  ;;  %2861 = vmatpush.bf16.msrb.mxu1 %v5118_v7  ;;  %v4984_v5 = vld [vmem:[%s5463_s26 + $0x80] sm:$0xf0]  ;;  %v5037_v7 = vld [vmem:[%s5463_s26 + $0x228] sm:$0xf0] }
  0x49   : > { %2804 = vmatpush.bf16.msrb.mxu3 %v5101_v8  ;;  %v3900_v8 = vor.u32 %v5023_v0, %v3897_v1  ;;  %v3811_v0 = vld [vmem:[%s5463_s26 + $0xf8] sm:$0xf]  ;;  %v5012_v1 = vld [vmem:[%s5463_s26 + $0x160] sm:$0xf0] }
  0x4a   : > { %2833 = vmatpush.bf16.msrb.mxu0 %v5109_v10  ;;  %v3696_v10 = vor.u32 %v4984_v5, %v3695_v4  ;;  %v5174_v5 = vld [vmem:[%s5434_s19 + $0x310] sm:$0xff] }
  0x4b   : > { %2891 = vmatpush.bf16.msrb.mxu2 %v5125_v9  ;;  %2862 = vmatpush.bf16.msrb.mxu1 %v5117_v11  ;;  %v3692_v9 = vor.u32 %v4970_v2, %v3689_v3  ;;  %v3904_v11 = vor.u32 %v5037_v7, %v3903_v6  ;;  %v5186_v6 = vld [vmem:[%s5434_s19 + $0x370] sm:$0xff]  ;;  %v3812_v7 = vor.u32 %v5012_v1, %v3811_v0 }
  0x4d   : > { %2805 = vmatpush.bf16.msrb.mxu3 %v5100_v12  ;;  %v5159_v12 = vld [vmem:[%s5434_s19 + $0x298] sm:$0xff] }
  0x4e   : > { %2834 = vmatpush.bf16.msrb.mxu0 %v5108_v14  ;;  %v5151_v14 = vld [vmem:[%s5434_s19 + $0x258] sm:$0xff] }
  0x4f   : > { %2892 = vmatpush.bf16.msrb.mxu2 %v5124_v13  ;;  %2863 = vmatpush.bf16.msrb.mxu1 %v5116_v22  ;;  %v5171_v13 = vld [vmem:[%s5434_s19 + $0x2f8] sm:$0xff]  ;;  %v4997_v22 = vld [vmem:[%s5463_s26 + $0xec] sm:$0xf] }
  0x50   : > { %2806 = vmatmul.bf16.vlgmr.msrb.gmra.mxu3 %v3684_v26  ;;  %v4011_v26 = vld [vmem:[%s5463_s26 + $0x298] sm:$0xf] }
  0x51   : > { %2914 = vmatpush.bf16.msra.mxu3 %v5139_v16  ;;  %2758 = vmatmul.bf16.gmra.mxu1 %v3892_v27  ;;  %v5158_v16 = vld [vmem:[%s5434_s19 + $0x290] sm:$0xff]  ;;  %v5064_v27 = vld [vmem:[%s5463_s26 + $0x300] sm:$0xf0] }
  0x52   : > { %2943 = vmatpush.bf16.msra.mxu0 %v5147_v25  ;;  %2787 = vmatmul.bf16.gmra.mxu2 %v3896_v28  ;;  %v5011_v25 = vld [vmem:[%s5463_s26 + $0x158] sm:$0xf0]  ;;  %v4008_v28 = vor.u32 %v5050_v20, %v4005_v21  ;;  %v4986_v20 = vld [vmem:[%s5463_s26 + $0x90] sm:$0xf0]  ;;  %v3919_v21 = vld [vmem:[%s5463_s26 + $0x1d0] sm:$0xf] }
  0x53   : > { %2835 = vmatmul.bf16.vlgmr.msrb.gmra.mxu0 %v3688_v29  ;;  %3001 = vmatpush.bf16.msra.mxu2 %v5163_v33  ;;  %v3800_v29 = vor.u32 %v4997_v22, %v3797_v23  ;;  %v5169_v33 = vld [vmem:[%s5434_s19 + $0x2e8] sm:$0xff]  ;;  %v5039_v22 = vld [vmem:[%s5463_s26 + $0x238] sm:$0xf0] }
  0x54   : > { %2972 = vmatpush.bf16.msra.mxu1 %v5155_v35  ;;  %v5177_v35 = vld [vmem:[%s5434_s19 + $0x328] sm:$0xff] }
  0x55   : > { %2915 = vmatpush.bf16.msra.mxu3 %v5138_v30  ;;  %v3804_v30 = vor.u32 %v5011_v25, %v3803_v24 }
  0x56   : > { %2944 = vmatpush.bf16.msra.mxu0 %v5146_v31  ;;  %v4012_v31 = vor.u32 %v5064_v27, %v4011_v26  ;;  %v5172_v27 = vld [vmem:[%s5434_s19 + $0x300] sm:$0xff] }
  0x57   : > { %3002 = vmatpush.bf16.msra.mxu2 %v5162_v36  ;;  %v5156_v36 = vld [vmem:[%s5434_s19 + $0x280] sm:$0xff] }
  0x58   : > { %2973 = vmatpush.bf16.msra.mxu1 %v5154_v37  ;;  %v5168_v37 = vld [vmem:[%s5434_s19 + $0x2e0] sm:$0xff] }
  0x59   : > { %2916 = vmatpush.bf16.msra.mxu3 %v5137_v32  ;;  %v5157_v32 = vld [vmem:[%s5434_s19 + $0x288] sm:$0xff] }
  0x5a   : > { %2945 = vmatpush.bf16.msra.mxu0 %v5145_v34  ;;  %v5149_v34 = vld [vmem:[%s5434_s19 + $0x248] sm:$0xff] }
  0x5b   : > { %3003 = vmatpush.bf16.msra.mxu2 %v5161_v57  ;;  %v5194_v57 = vld [vmem:[%s5434_s19 + $0x3b0] sm:$0xff] }
  0x5c   : > { %2974 = vmatpush.bf16.msra.mxu1 %v5153_v59  ;;  %v4998_v59 = vld [vmem:[%s5463_s26 + $0xf4] sm:$0xf] }
  0x5d   : > { %2917 = vmatpush.bf16.msra.mxu3 %v5136_v38  ;;  %v5148_v38 = vld [vmem:[%s5434_s19 + $0x240] sm:$0xff] }
  0x5e   : > { %2946 = vmatpush.bf16.msra.mxu0 %v5144_v39  ;;  %v5176_v39 = vld [vmem:[%s5434_s19 + $0x320] sm:$0xff] }
  0x5f   : > { %3004 = vmatpush.bf16.msra.mxu2 %v5160_v60  ;;  %v3805_v60 = vld [vmem:[%s5463_s26 + $0x15c] sm:$0xf0] }
  0x60   : > { %2811 = vmatmul.bf16.gmra.mxu3 %v3792_v50  ;;  %2975 = vmatpush.bf16.msra.mxu1 %v5152_v61  ;;  %v3912_v50 = vor.u32 %v5038_v45, %v3911_v44  ;;  %v4013_v61 = vld [vmem:[%s5463_s26 + $0x304] sm:$0xf0]  ;;  %v3808_v2 = vor.u32 %v4998_v59, %v3805_v60  ;;  %v5202_v44 = vld [vmem:[%s5434_s19 + $0x3f0] sm:$0xff] }
  0x61   : > { %2918 = vmatpush.bf16.msra.mxu3 %v5135_v46  ;;  %2763 = vmatmul.bf16.gmra.mxu1 %v4000_v51  ;;  %v3703_v46 = vld [vmem:[%s5463_s26 + $0x20] sm:$0xf] }
  0x62   : > { %2947 = vmatpush.bf16.msra.mxu0 %v5143_v49  ;;  %2792 = vmatmul.bf16.gmra.mxu2 %v4004_v52  ;;  %v3908_v49 = vor.u32 %v5024_v40, %v3905_v43  ;;  %v3704_v51 = vor.u32 %v4985_v47, %v3703_v46  ;;  %v5167_v52 = vld [vmem:[%s5434_s19 + $0x2d8] sm:$0xff]  ;;  %v5190_v43 = vld [vmem:[%s5434_s19 + $0x390] sm:$0xff]  ;;  %v5052_v46 = vld [vmem:[%s5463_s26 + $0x2a4] sm:$0xf] }
  0x63   : > { %2840 = vmatmul.bf16.gmra.mxu0 %v3796_v53  ;;  %3005 = vmatpush.bf16.msra.mxu2 %v5159_v12  ;;  %v5195_v53 = vld [vmem:[%s5434_s19 + $0x3b8] sm:$0xff]  ;;  %v5623_v12 = vld [vmem:[%s309_s23] ss:$0 sm:$0xff]  ;;  %v4021_v47 = vld [vmem:[%s5463_s26 + $0x30c] sm:$0xf0] }
  0x64   : > { %2976 = vmatpush.bf16.msra.mxu1 %v5151_v14  ;;  %v5192_v14 = vld [vmem:[%s5434_s19 + $0x3a0] sm:$0xff]  ;;  %v5211_v40 = vld [vmem:[%s5434_s19 + $0x438] sm:$0xff] }
  0x65   : > { %2919 = vmatpush.bf16.msra.mxu3 %v5134_v54  ;;  %v5175_v54 = vld [vmem:[%s5434_s19 + $0x318] sm:$0xff] }
  0x66   : > { %2948 = vmatpush.bf16.msra.mxu0 %v5142_v55  ;;  %v5187_v55 = vld [vmem:[%s5434_s19 + $0x378] sm:$0xff] }
  0x67   : > { %3006 = vmatpush.bf16.msra.mxu2 %v5158_v16  ;;  %v3913_v16 = vld [vmem:[%s5463_s26 + $0x234] sm:$0xf0] }
  0x68   : > { %2977 = vmatpush.bf16.msra.mxu1 %v5150_v18  ;;  %v3705_v18 = vld [vmem:[%s5463_s26 + $0x8c] sm:$0xf0] }
  0x69   : > { %2920 = vmatpush.bf16.msra.mxu3 %v5133_v56  ;;  %v5166_v56 = vld [vmem:[%s5434_s19 + $0x2d0] sm:$0xff] }
  0x6a   : > { %2949 = vmatpush.bf16.msra.mxu0 %v5141_v58  ;;  %v5051_v58 = vld [vmem:[%s5463_s26 + $0x29c] sm:$0xf] }
  0x6b   : > { %3007 = vmatpush.bf16.msra.mxu2 %v5157_v32  ;;  %v4016_v3 = vor.u32 %v5051_v58, %v4013_v61  ;;  %v5182_v61 = vld [vmem:[%s5434_s19 + $0x350] sm:$0xff] }
  0x6c   : > { %2978 = vmatpush.bf16.msra.mxu1 %v5149_v34  ;;  %v5203_v34 = vld [vmem:[%s5434_s19 + $0x3f8] sm:$0xff] }
  0x6d   : > { %2921 = vmatpush.bf16.msra.mxu3 %v5132_v62  ;;  %v4019_v62 = vld [vmem:[%s5463_s26 + $0x2a0] sm:$0xf] }
  0x6e   : > { %2950 = vmatpush.bf16.msra.mxu0 %v5140_v63  ;;  %v5065_v63 = vld [vmem:[%s5463_s26 + $0x308] sm:$0xf0] }
  0x6f   : > { %3008 = vmatpush.bf16.msra.mxu2 %v5156_v36  ;;  %v4020_v4 = vor.u32 %v5065_v63, %v4019_v62  ;;  %v5210_v62 = vld [vmem:[%s5434_s19 + $0x430] sm:$0xff] }
  0x70   : > { %2816 = vmatmul.bf16.gmra.mxu3 %v3900_v8  ;;  %2979 = vmatpush.bf16.msra.mxu1 %v5148_v38  ;;  %v5165_v8 = vld [vmem:[%s5434_s19 + $0x2c8] sm:$0xff] }
  0x71   : > { %2864 = vmatmul.bf16.vlgmr.msrb.gmra.mxu1 %v3692_v9  ;;  %3030 = vmatpush.bf16.msrb.mxu3 %v5171_v13  ;;  %v5193_v9 = vld [vmem:[%s5434_s19 + $0x3a8] sm:$0xff]  ;;  %v5164_v13 = vld [vmem:[%s5434_s19 + $0x2c0] sm:$0xff] }
  0x72   : > { %2893 = vmatmul.bf16.vlgmr.msrb.gmra.mxu2 %v3696_v10  ;;  %3059 = vmatpush.bf16.msrb.mxu0 %v5179_v15  ;;  %v5173_v10 = vld [vmem:[%s5434_s19 + $0x308] sm:$0xff] }
  0x73   : > { %2845 = vmatmul.bf16.gmra.mxu0 %v3904_v11  ;;  %3117 = vmatpush.bf16.msrb.mxu2 %v5195_v53  ;;  %v5185_v11 = vld [vmem:[%s5434_s19 + $0x368] sm:$0xff] }
  0x74   : > { %3088 = vmatpush.bf16.msrb.mxu1 %v5187_v55  ;;  %v5025_v15 = vld [vmem:[%s5463_s26 + $0x1cc] sm:$0xf]  ;;  %v4027_v53 = vld [vmem:[%s5463_s26 + $0x2a8] sm:$0xf] }
  0x75   : > { %3031 = vmatpush.bf16.msrb.mxu3 %v5170_v17  ;;  %v4972_v17 = vld [vmem:[%s5463_s26 + $0x24] sm:$0xf]  ;;  %v3916_v23 = vor.u32 %v5025_v15, %v3913_v16 }
  0x76   : > { %3060 = vmatpush.bf16.msrb.mxu0 %v5178_v19  ;;  %v3711_v19 = vld [vmem:[%s5463_s26 + $0x28] sm:$0xf]  ;;  %v3708_v25 = vor.u32 %v4972_v17, %v3705_v18  ;;  %v5200_v15 = vld [vmem:[%s5434_s19 + $0x3e0] sm:$0xff]  ;;  %v5026_v17 = vld [vmem:[%s5463_s26 + $0x1d4] sm:$0xf] }
  0x77   : > { %3118 = vmatpush.bf16.msrb.mxu2 %v5194_v57  ;;  %v3712_v26 = vor.u32 %v4986_v20, %v3711_v19  ;;  %v4973_v18 = vld [vmem:[%s5463_s26 + $0x2c] sm:$0xf]  ;;  %v3713_v19 = vld [vmem:[%s5463_s26 + $0x94] sm:$0xf0]  ;;  %v3921_v20 = vld [vmem:[%s5463_s26 + $0x23c] sm:$0xf0] }
  0x78   : > { %3089 = vmatpush.bf16.msrb.mxu1 %v5186_v6 }
  0x79   : > { %3032 = vmatpush.bf16.msrb.mxu3 %v5169_v33  ;;  %v5191_v33 = vld [vmem:[%s5434_s19 + $0x398] sm:$0xff] }
  0x7a   : > { %3061 = vmatpush.bf16.msrb.mxu0 %v5177_v35 }
  0x7b   : > { %3119 = vmatpush.bf16.msrb.mxu2 %v5193_v9  ;;  %v5181_v9 = vld [vmem:[%s5434_s19 + $0x348] sm:$0xff] }
  0x7c   : > { %3090 = vmatpush.bf16.msrb.mxu1 %v5185_v11 }
  0x7d   : > { %3033 = vmatpush.bf16.msrb.mxu3 %v5168_v37 }
  0x7e   : > { %3062 = vmatpush.bf16.msrb.mxu0 %v5176_v39  ;;  %v5183_v39 = vld [vmem:[%s5434_s19 + $0x358] sm:$0xff] }
  0x7f   : > { %3120 = vmatpush.bf16.msrb.mxu2 %v5192_v14  ;;  %v5188_v14 = vld [vmem:[%s5434_s19 + $0x380] sm:$0xff] }
  0x80   : > { %2821 = vmatmul.bf16.gmra.mxu3 %v4008_v28  ;;  %v5184_v28 = vld [vmem:[%s5434_s19 + $0x360] sm:$0xff] }
  0x81   : > { %2869 = vmatmul.bf16.gmra.mxu1 %v3800_v29  ;;  %3034 = vmatpush.bf16.msrb.mxu3 %v5167_v52 }
  0x82   : > { %2898 = vmatmul.bf16.gmra.mxu2 %v3804_v30  ;;  %3063 = vmatpush.bf16.msrb.mxu0 %v5175_v54  ;;  %v5066_v54 = vld [vmem:[%s5463_s26 + $0x310] sm:$0xf0] }
  0x83   : > { %2850 = vmatmul.bf16.gmra.mxu0 %v4012_v31  ;;  %v3920_v31 = vor.u32 %v5039_v22, %v3919_v21  ;;  %3091 = vmatpush.bf16.msrb.mxu1 %v5184_v28  ;;  %v4028_v1 = vor.u32 %v5066_v54, %v4027_v53  ;;  %v3927_v21 = vld [vmem:[%s5463_s26 + $0x1d8] sm:$0xf]  ;;  %v5040_v22 = vld [vmem:[%s5463_s26 + $0x240] sm:$0xf0]  ;;  %v5226_v53 = vld [vmem:[%s5434_s19 + $0x4b0] sm:$0xff] }
  0x84   : > { %3121 = vmatpush.bf16.msrb.mxu2 %v5191_v33  ;;  %v5208_v33 = vld [vmem:[%s5434_s19 + $0x420] sm:$0xff]  ;;  %v5053_v54 = vld [vmem:[%s5463_s26 + $0x2ac] sm:$0xf] }
  0x85   : > { %3035 = vmatpush.bf16.msrb.mxu3 %v5166_v56  ;;  %v4024_v56 = vor.u32 %v5052_v46, %v4021_v47  ;;  %v5207_v46 = vld [vmem:[%s5434_s19 + $0x418] sm:$0xff] }
  0x86   : > { %3064 = vmatpush.bf16.msrb.mxu0 %v5174_v5  ;;  %v5219_v47 = vld [vmem:[%s5434_s19 + $0x478] sm:$0xff] }
  0x87   : > { %3092 = vmatpush.bf16.msrb.mxu1 %v5183_v39 }
  0x88   : > { %3122 = vmatpush.bf16.msrb.mxu2 %v5190_v43 }
  0x89   : > { %3036 = vmatpush.bf16.msrb.mxu3 %v5165_v8 }
  0x8a   : > { %3065 = vmatpush.bf16.msrb.mxu0 %v5173_v10  ;;  %v5209_v10 = vld [vmem:[%s5434_s19 + $0x428] sm:$0xff] }
  0x8b   : > { %3093 = vmatpush.bf16.msrb.mxu1 %v5182_v61  ;;  %v3827_v61 = vld [vmem:[%s5463_s26 + $0x108] sm:$0xf] }
  0x8d   : > { %3037 = vmatpush.bf16.msrb.mxu3 %v5164_v13 }
  0x8e   : > { %3066 = vmatpush.bf16.msrb.mxu0 %v5172_v27  ;;  %v3716_v27 = vor.u32 %v4973_v18, %v3713_v19 }
  0x8f   : > { %3094 = vmatpush.bf16.msrb.mxu1 %v5181_v9  ;;  %v5218_v9 = vld [vmem:[%s5434_s19 + $0x470] sm:$0xff] }
  0x90   : > { %2922 = vmatmul.bf16.vlgmr.msra.gmra.mxu3 %v3700_v48  ;;  %v4999_v48 = vld [vmem:[%s5463_s26 + $0xfc] sm:$0xf] }
  0x91   : > { %2874 = vmatmul.bf16.gmra.mxu1 %v3908_v49  ;;  %3146 = vmatpush.bf16.msra.mxu3 %v5203_v34  ;;  %v3813_v49 = vld [vmem:[%s5463_s26 + $0x164] sm:$0xf0] }
  0x92   : > { %2903 = vmatmul.bf16.gmra.mxu2 %v3912_v50  ;;  %v3819_v50 = vld [vmem:[%s5463_s26 + $0x100] sm:$0xf]  ;;  %v3816_v59 = vor.u32 %v4999_v48, %v3813_v49 }
  0x93   : > { %2951 = vmatmul.bf16.vlgmr.msra.gmra.mxu0 %v3704_v51  ;;  %v5013_v51 = vld [vmem:[%s5463_s26 + $0x168] sm:$0xf0] }
  0x94   : > { %3175 = vmatpush.bf16.msra.mxu0 %v5211_v40  ;;  %v3820_v60 = vor.u32 %v5013_v51, %v3819_v50  ;;  %v5227_v40 = vld [vmem:[%s5434_s19 + $0x4b8] sm:$0xff]  ;;  %v5198_v51 = vld [vmem:[%s5434_s19 + $0x3d0] sm:$0xff] }
  0x95   : > { %3147 = vmatpush.bf16.msra.mxu3 %v5202_v44 }
  0x98   : > { %3176 = vmatpush.bf16.msra.mxu0 %v5210_v62  ;;  %v5014_v62 = vld [vmem:[%s5463_s26 + $0x170] sm:$0xf0] }
  0x9c   : > { %3177 = vmatpush.bf16.msra.mxu0 %v5209_v10 }
  0xa0   : > { %2927 = vmatmul.bf16.gmra.mxu3 %v3808_v2  ;;  %3178 = vmatpush.bf16.msra.mxu0 %v5208_v33  ;;  %v4988_v33 = vld [vmem:[%s5463_s26 + $0xa0] sm:$0xf0] }
  0xa1   : > { %2879 = vmatmul.bf16.gmra.mxu1 %v4016_v3  ;;  %v5189_v3 = vld [vmem:[%s5434_s19 + $0x388] sm:$0xff] }
  0xa2   : > { %2908 = vmatmul.bf16.gmra.mxu2 %v4020_v4  ;;  %v5201_v4 = vld [vmem:[%s5434_s19 + $0x3e8] sm:$0xff] }
  0xa3   : > { %2956 = vmatmul.bf16.gmra.mxu0 %v3812_v7  ;;  %3123 = vmatpush.bf16.msrb.mxu2 %v5189_v3 }
  0xa4   : > { %3148 = vmatpush.bf16.msra.mxu3 %v5201_v4  ;;  %3179 = vmatpush.bf16.msra.mxu0 %v5207_v46  ;;  %v5216_v46 = vld [vmem:[%s5434_s19 + $0x460] sm:$0xff] }
  0xa7   : > { %3124 = vmatpush.bf16.msrb.mxu2 %v5188_v14 }
  0xa8   : > { %3149 = vmatpush.bf16.msra.mxu3 %v5200_v15 }
  0xad   : > { %v2720_v24 = vpop.f32.mrf.mxu0 }
  0xae   : > { %v2721_v29 = vadd.f32 %v5623_v12, %v2720_v24  ;;  %v2749_v30 = vpop.f32.mrf.mxu1  ;;  %v3719_v24 = vld [vmem:[%s5463_s26 + $0x30] sm:$0xf] }
  0xb0   : > { %v2750_v32 = vadd.f32 %v2749_v30, %v2721_v29  ;;  %2932 = vmatmul.bf16.gmra.mxu3 %v3916_v23  ;;  %v3924_v30 = vor.u32 %v5026_v17, %v3921_v20 }
  0xb1   : > { %2980 = vmatmul.bf16.vlgmr.msra.gmra.mxu1 %v3708_v25  ;;  %v4987_v25 = vld [vmem:[%s5463_s26 + $0x98] sm:$0xf0] }
  0xb2   : > { %3009 = vmatmul.bf16.vlgmr.msra.gmra.mxu2 %v3712_v26 }
  0xb3   : > { %2961 = vmatmul.bf16.gmra.mxu0 %v3920_v31  ;;  %v5640_v35 = vpop.f32.mrf.mxu3  ;;  %v3928_v31 = vor.u32 %v5040_v22, %v3927_v21  ;;  %3233 = vmatpush.bf16.msra.mxu2 %v5227_v40  ;;  %v5205_v21 = vld [vmem:[%s5434_s19 + $0x408] sm:$0xff] }
  0xb4   : > { %v2731_v28 = vadd.f32 %v5623_v12, %v5640_v35  ;;  %v5199_v35 = vld [vmem:[%s5434_s19 + $0x3d8] sm:$0xff]  ;;  %v5217_v22 = vld [vmem:[%s5434_s19 + $0x468] sm:$0xff] }
  0xb5   : > { %v2778_v36 = vpop.f32.mrf.mxu2  ;;  %v2722_v38 = vpop.f32.mrf.mxu0  ;;  %3150 = vmatpush.bf16.msra.mxu3 %v5199_v35 }
  0xb6   : > { %v5642_v37 = vadd.f32 %v2778_v36, %v2750_v32  ;;  %v2723_v41 = vadd.f32 %v5623_v12, %v2722_v38  ;;  %v2751_v42 = vpop.f32.mrf.mxu1  ;;  %v5180_v32 = vld [vmem:[%s5434_s19 + $0x340] sm:$0xff]  ;;  %v3720_v36 = vor.u32 %v4987_v25, %v3719_v24 }
  0xb7   : > { %3095 = vmatpush.bf16.msrb.mxu1 %v5180_v32  ;;  %3234 = vmatpush.bf16.msra.mxu2 %v5226_v53  ;;  %v3727_v32 = vld [vmem:[%s5463_s26 + $0x38] sm:$0xf] }
  0xb8   : > { %v2752_v45 = vadd.f32 %v2751_v42, %v2723_v41  ;;  %v5235_v53 = vld [vmem:[%s5434_s19 + $0x4f8] sm:$0xff] }
  0xb9   : > { %3151 = vmatpush.bf16.msra.mxu3 %v5198_v51 }
  0xbb   : > { %v5655_v52 = vpop.f32.mrf.mxu3  ;;  %3204 = vmatpush.bf16.msra.mxu1 %v5219_v47 }
  0xbc   : > { %v2733_v44 = vadd.f32 %v5623_v12, %v5655_v52  ;;  %v5000_v52 = vld [vmem:[%s5463_s26 + $0x104] sm:$0xf] }
  0xbd   : > { %v2780_v55 = vpop.f32.mrf.mxu2  ;;  %v2725_v58 = vpop.f32.mrf.mxu0 }
  0xbe   : > { %v5659_v57 = vadd.f32 %v2780_v55, %v2752_v45  ;;  %v2726_v63 = vadd.f32 %v5623_v12, %v2725_v58  ;;  %v2754_v0 = vpop.f32.mrf.mxu1  ;;  %v3821_v55 = vld [vmem:[%s5463_s26 + $0x16c] sm:$0xf0] }
  0xbf   : > { %v4035_v58 = vld [vmem:[%s5463_s26 + $0x2b0] sm:$0xf]  ;;  %3205 = vmatpush.bf16.msra.mxu1 %v5218_v9 }
  0xc0   : > { %v2755_v2 = vadd.f32 %v2754_v0, %v2726_v63  ;;  %2937 = vmatmul.bf16.gmra.mxu3 %v4024_v56  ;;  %v4029_v56 = vld [vmem:[%s5463_s26 + $0x314] sm:$0xf0] }
  0xc1   : > { %2985 = vmatmul.bf16.gmra.mxu1 %v3816_v59  ;;  %v5067_v59 = vld [vmem:[%s5463_s26 + $0x318] sm:$0xf0]  ;;  %v4032_v4 = vor.u32 %v5053_v54, %v4029_v56 }
  0xc2   : > { %3014 = vmatmul.bf16.gmra.mxu2 %v3820_v60  ;;  %v5215_v56 = vld [vmem:[%s5434_s19 + $0x458] sm:$0xff] }
  0xc3   : > { %2966 = vmatmul.bf16.gmra.mxu0 %v4028_v1  ;;  %v5666_v5 = vpop.f32.mrf.mxu3  ;;  %v3824_v1 = vor.u32 %v5000_v52, %v3821_v55  ;;  %3206 = vmatpush.bf16.msra.mxu1 %v5217_v22 }
  0xc5   : > { %v2783_v6 = vpop.f32.mrf.mxu2  ;;  %v2727_v8 = vpop.f32.mrf.mxu0 }
  0xc6   : > { %v5668_v7 = vadd.f32 %v2783_v6, %v2755_v2  ;;  %v2728_v11 = vadd.f32 %v5623_v12, %v2727_v8  ;;  %v2756_v13 = vpop.f32.mrf.mxu1  ;;  %v2736_v2 = vadd.f32 %v5623_v12, %v5666_v5  ;;  %v4036_v6 = vor.u32 %v5067_v59, %v4035_v58  ;;  %v5206_v8 = vld [vmem:[%s5434_s19 + $0x410] sm:$0xff]  ;;  %v5225_v5 = vld [vmem:[%s5434_s19 + $0x4a8] sm:$0xff]  ;;  %v5243_v58 = vld [vmem:[%s5434_s19 + $0x538] sm:$0xff] }
  0xc7   : > { %3180 = vmatpush.bf16.msra.mxu0 %v5206_v8  ;;  %3235 = vmatpush.bf16.msra.mxu2 %v5225_v5  ;;  %v5015_v8 = vld [vmem:[%s5463_s26 + $0x178] sm:$0xf0] }
  0xc8   : > { %v2757_v16 = vadd.f32 %v2756_v13, %v2728_v11  ;;  %v3828_v11 = vor.u32 %v5014_v62, %v3827_v61  ;;  %3207 = vmatpush.bf16.msra.mxu1 %v5216_v46  ;;  %v5222_v62 = vld [vmem:[%s5434_s19 + $0x490] sm:$0xff]  ;;  %v3735_v46 = vld [vmem:[%s5463_s26 + $0x40] sm:$0xf] }
  0xcb   : > { %v5681_v23 = vpop.f32.mrf.mxu3  ;;  %3181 = vmatpush.bf16.msra.mxu0 %v5205_v21 }
  0xcc   : > { %v2738_v19 = vadd.f32 %v5623_v12, %v5681_v23  ;;  %v3929_v12 = vld [vmem:[%s5463_s26 + $0x244] sm:$0xf0]  ;;  %v4974_v23 = vld [vmem:[%s5463_s26 + $0x34] sm:$0xf]  ;;  %3208 = vmatpush.bf16.msra.mxu1 %v5215_v56 }
  0xcd   : > { %v2785_v26 = vpop.f32.mrf.mxu2 }
  0xce   : > { %v5687_v29 = vadd.f32 %v2785_v26, %v2757_v16  ;;  %v2759_v34 = vpop.f32.mrf.mxu1 }
  0xcf   : > { %v2760_v38 = vadd.f32 %v2759_v34, %v2731_v28  ;;  %v5224_v28 = vld [vmem:[%s5434_s19 + $0x4a0] sm:$0xff] }
  0xd0   : > { %v2836_v39 = vpop.f32.mrf.mxu0  ;;  %3038 = vmatmul.bf16.vlgmr.msrb.gmra.mxu3 %v3716_v27  ;;  %v5196_v27 = vld [vmem:[%s5434_s19 + $0x3c0] sm:$0xff]  ;;  %3236 = vmatpush.bf16.msra.mxu2 %v5224_v28 }
  0xd1   : > { %2990 = vmatmul.bf16.gmra.mxu1 %v3924_v30  ;;  %v5027_v30 = vld [vmem:[%s5463_s26 + $0x1dc] sm:$0xf] }
  0xd2   : > { %3019 = vmatmul.bf16.gmra.mxu2 %v3928_v31  ;;  %v3721_v31 = vld [vmem:[%s5463_s26 + $0x9c] sm:$0xf0]  ;;  %v3932_v40 = vor.u32 %v5027_v30, %v3929_v12  ;;  %v5213_v12 = vld [vmem:[%s5434_s19 + $0x448] sm:$0xff] }
  0xd3   : > { %3067 = vmatmul.bf16.vlgmr.msrb.gmra.mxu0 %v3720_v36  ;;  %v2807_v41 = vpop.f32.mrf.mxu3  ;;  %v3935_v36 = vld [vmem:[%s5463_s26 + $0x1e0] sm:$0xf] }
  0xd4   : > { %v2808_v43 = vadd.f32 %v2807_v41, %v5642_v37 }
  0xd5   : > { %v2788_v42 = vpop.f32.mrf.mxu2 }
  0xd6   : > { %v5696_v45 = vadd.f32 %v2788_v42, %v2760_v38  ;;  %v2761_v48 = vpop.f32.mrf.mxu1  ;;  %v5700_v49 = vadd.f32 %v2836_v39, %v2808_v43  ;;  %v5041_v38 = vld [vmem:[%s5463_s26 + $0x248] sm:$0xf0]  ;;  %v3724_v42 = vor.u32 %v4974_v23, %v3721_v31  ;;  %v3728_v43 = vor.u32 %v4988_v33, %v3727_v32 }
  0xd7   : > { %v2762_v50 = vadd.f32 %v2761_v48, %v2733_v44  ;;  %v5204_v44 = vld [vmem:[%s5434_s19 + $0x400] sm:$0xff]  ;;  %v3936_v48 = vor.u32 %v5041_v38, %v3935_v36  ;;  %v5241_v23 = vld [vmem:[%s5434_s19 + $0x528] sm:$0xff] }
  0xd8   : > { %v2838_v37 = vpop.f32.mrf.mxu0  ;;  %3182 = vmatpush.bf16.msra.mxu0 %v5204_v44  ;;  %v5232_v36 = vld [vmem:[%s5434_s19 + $0x4e0] sm:$0xff] }
  0xd9   : > { %v5028_v38 = vld [vmem:[%s5463_s26 + $0x1e4] sm:$0xf] }
  0xdb   : > { %v2809_v60 = vpop.f32.mrf.mxu3 }
  0xdc   : > { %v2810_v0 = vadd.f32 %v2809_v60, %v5659_v57  ;;  %v5197_v57 = vld [vmem:[%s5434_s19 + $0x3c8] sm:$0xff]  ;;  %3291 = vmatpush.bf16.msrb.mxu0 %v5243_v58 }
  0xdd   : > { %v2790_v63 = vpop.f32.mrf.mxu2  ;;  %3152 = vmatpush.bf16.msra.mxu3 %v5197_v57 }
  0xde   : > { %v5715_v3 = vadd.f32 %v2790_v63, %v2762_v50  ;;  %v2764_v10 = vpop.f32.mrf.mxu1  ;;  %v5719_v13 = vadd.f32 %v2838_v37, %v2810_v0  ;;  %v5234_v63 = vld [vmem:[%s5434_s19 + $0x4f0] sm:$0xff] }
  0xdf   : > { %v2765_v14 = vadd.f32 %v2764_v10, %v2736_v2  ;;  %v5054_v0 = vld [vmem:[%s5463_s26 + $0x2b4] sm:$0xf]  ;;  %v5001_v2 = vld [vmem:[%s5463_s26 + $0x10c] sm:$0xf]  ;;  %v4043_v10 = vld [vmem:[%s5463_s26 + $0x2b8] sm:$0xf] }
  0xe0   : > { %v2841_v15 = vpop.f32.mrf.mxu0  ;;  %3043 = vmatmul.bf16.gmra.mxu3 %v3824_v1  ;;  %v4037_v1 = vld [vmem:[%s5463_s26 + $0x31c] sm:$0xf0] }
  0xe1   : > { %2995 = vmatmul.bf16.gmra.mxu1 %v4032_v4  ;;  %3153 = vmatpush.bf16.msra.mxu3 %v5196_v27  ;;  %v3829_v4 = vld [vmem:[%s5463_s26 + $0x174] sm:$0xf0] }
  0xe2   : > { %3024 = vmatmul.bf16.gmra.mxu2 %v4036_v6  ;;  %v3835_v6 = vld [vmem:[%s5463_s26 + $0x110] sm:$0xf]  ;;  %v3832_v5 = vor.u32 %v5001_v2, %v3829_v4  ;;  %v5251_v2 = vld [vmem:[%s5434_s19 + $0x578] sm:$0xff] }
  0xe3   : > { %3072 = vmatmul.bf16.gmra.mxu0 %v3828_v11  ;;  %v2812_v16 = vpop.f32.mrf.mxu3  ;;  %v5068_v11 = vld [vmem:[%s5463_s26 + $0x320] sm:$0xf0] }
  0xe4   : > { %v2813_v18 = vadd.f32 %v2812_v16, %v5668_v7  ;;  %v3836_v16 = vor.u32 %v5015_v8, %v3835_v6  ;;  %v4044_v21 = vor.u32 %v5068_v11, %v4043_v10  ;;  %v5258_v10 = vld [vmem:[%s5434_s19 + $0x5b0] sm:$0xff]  ;;  %v5055_v11 = vld [vmem:[%s5463_s26 + $0x2bc] sm:$0xf] }
  0xe5   : > { %v2793_v17 = vpop.f32.mrf.mxu2  ;;  %3262 = vmatpush.bf16.msrb.mxu3 %v5235_v53 }
  0xe6   : > { %v5726_v20 = vadd.f32 %v2793_v17, %v2765_v14  ;;  %v2766_v24 = vpop.f32.mrf.mxu1  ;;  %v5730_v25 = vadd.f32 %v2841_v15, %v2813_v18  ;;  %v4040_v15 = vor.u32 %v5054_v0, %v4037_v1  ;;  %v5214_v17 = vld [vmem:[%s5434_s19 + $0x450] sm:$0xff]  ;;  %v5239_v1 = vld [vmem:[%s5434_s19 + $0x518] sm:$0xff] }
  0xe7   : > { %v2767_v26 = vadd.f32 %v2766_v24, %v2738_v19  ;;  %v5242_v18 = vld [vmem:[%s5434_s19 + $0x530] sm:$0xff]  ;;  %3209 = vmatpush.bf16.msra.mxu1 %v5214_v17 }
  0xe8   : > { %v2843_v7 = vpop.f32.mrf.mxu0  ;;  %3292 = vmatpush.bf16.msrb.mxu0 %v5242_v18  ;;  %v3843_v18 = vld [vmem:[%s5463_s26 + $0x118] sm:$0xf] }
  0xe9   : > { %3263 = vmatpush.bf16.msrb.mxu3 %v5234_v63 }
  0xeb   : > { %v2814_v34 = vpop.f32.mrf.mxu3  ;;  %3210 = vmatpush.bf16.msra.mxu1 %v5213_v12 }
  0xec   : > { %v2815_v35 = vadd.f32 %v2814_v34, %v5687_v29  ;;  %v5223_v29 = vld [vmem:[%s5434_s19 + $0x498] sm:$0xff]  ;;  %3293 = vmatpush.bf16.msrb.mxu0 %v5241_v23  ;;  %v5220_v34 = vld [vmem:[%s5434_s19 + $0x480] sm:$0xff] }
  0xed   : > { %v2795_v39 = vpop.f32.mrf.mxu2  ;;  %3237 = vmatpush.bf16.msra.mxu2 %v5223_v29 }
  0xee   : > { %v5743_v41 = vadd.f32 %v2795_v39, %v2767_v26  ;;  %v2865_v47 = vpop.f32.mrf.mxu1  ;;  %v5747_v50 = vadd.f32 %v2843_v7, %v2815_v35  ;;  %v5233_v7 = vld [vmem:[%s5434_s19 + $0x4e8] sm:$0xff]  ;;  %v4975_v39 = vld [vmem:[%s5463_s26 + $0x3c] sm:$0xf] }
  0xef   : > { %v2866_v51 = vadd.f32 %v2865_v47, %v5700_v49  ;;  %3264 = vmatpush.bf16.msrb.mxu3 %v5233_v7  ;;  %v3729_v35 = vld [vmem:[%s5463_s26 + $0xa4] sm:$0xf0]  ;;  %v4989_v47 = vld [vmem:[%s5463_s26 + $0xa8] sm:$0xf0] }
  0xf0   : > { %v2846_v37 = vpop.f32.mrf.mxu0  ;;  %3048 = vmatmul.bf16.gmra.mxu3 %v3932_v40  ;;  %v3937_v40 = vld [vmem:[%s5463_s26 + $0x24c] sm:$0xf0]  ;;  %v3736_v56 = vor.u32 %v4989_v47, %v3735_v46  ;;  %v5256_v46 = vld [vmem:[%s5434_s19 + $0x5a0] sm:$0xff]  ;;  %v5029_v47 = vld [vmem:[%s5463_s26 + $0x1ec] sm:$0xf] }
  0xf1   : > { %3096 = vmatmul.bf16.vlgmr.msrb.gmra.mxu1 %v3724_v42  ;;  %3238 = vmatpush.bf16.msra.mxu2 %v5222_v62  ;;  %v3943_v42 = vld [vmem:[%s5463_s26 + $0x1e8] sm:$0xf]  ;;  %v3940_v29 = vor.u32 %v5028_v38, %v3937_v40 }
  0xf2   : > { %3125 = vmatmul.bf16.vlgmr.msrb.gmra.mxu2 %v3728_v43  ;;  %v5042_v43 = vld [vmem:[%s5463_s26 + $0x250] sm:$0xf0] }
  0xf3   : > { %3077 = vmatmul.bf16.gmra.mxu0 %v3936_v48  ;;  %v2817_v54 = vpop.f32.mrf.mxu3  ;;  %3265 = vmatpush.bf16.msrb.mxu3 %v5232_v36  ;;  %v3944_v53 = vor.u32 %v5042_v43, %v3943_v42 }
  0xf4   : > { %v2818_v52 = vadd.f32 %v2817_v54, %v5696_v45  ;;  %v5212_v54 = vld [vmem:[%s5434_s19 + $0x440] sm:$0xff] }
  0xf5   : > { %v2894_v55 = vpop.f32.mrf.mxu2  ;;  %3211 = vmatpush.bf16.msra.mxu1 %v5212_v54 }
  0xf6   : > { %v5753_v49 = vadd.f32 %v2894_v55, %v2866_v51  ;;  %v2867_v59 = vpop.f32.mrf.mxu1  ;;  %v5757_v60 = vadd.f32 %v2846_v37, %v2818_v52  ;;  %v3732_v37 = vor.u32 %v4975_v39, %v3729_v35  ;;  %v5240_v52 = vld [vmem:[%s5434_s19 + $0x520] sm:$0xff]  ;;  %v5237_v39 = vld [vmem:[%s5434_s19 + $0x508] sm:$0xff] }
  0xf7   : > { %v2868_v45 = vadd.f32 %v2867_v59, %v5719_v13  ;;  %3294 = vmatpush.bf16.msrb.mxu0 %v5240_v52  ;;  %v5249_v35 = vld [vmem:[%s5434_s19 + $0x568] sm:$0xff]  ;;  %v3951_v52 = vld [vmem:[%s5463_s26 + $0x1f0] sm:$0xf] }
  0xf8   : > { %v2848_v61 = vpop.f32.mrf.mxu0 }
  0xf9   : > { %3320 = vmatpush.bf16.msrb.mxu1 %v5251_v2 }
  0xfb   : > { %v2819_v9 = vpop.f32.mrf.mxu3  ;;  %3295 = vmatpush.bf16.msrb.mxu0 %v5239_v1 }
  0xfc   : > { %v2820_v14 = vadd.f32 %v2819_v9, %v5715_v3  ;;  %v5221_v3 = vld [vmem:[%s5434_s19 + $0x488] sm:$0xff] }
  0xfd   : > { %v2896_v13 = vpop.f32.mrf.mxu2  ;;  %3239 = vmatpush.bf16.msra.mxu2 %v5221_v3 }
  0xfe   : > { %v5771_v57 = vadd.f32 %v2896_v13, %v2868_v45  ;;  %v2870_v19 = vpop.f32.mrf.mxu1  ;;  %v5775_v22 = vadd.f32 %v2848_v61, %v2820_v14  ;;  %v5259_v45 = vld [vmem:[%s5434_s19 + $0x5b8] sm:$0xff]  ;;  %v5002_v14 = vld [vmem:[%s5463_s26 + $0x114] sm:$0xf]  ;;  %v3837_v13 = vld [vmem:[%s5463_s26 + $0x17c] sm:$0xf0] }
  0xff   : > { %v2871_v26 = vadd.f32 %v2870_v19, %v5730_v25  ;;  %v5016_v19 = vld [vmem:[%s5463_s26 + $0x180] sm:$0xf0] }
 0x100   : > { %v2851_v24 = vpop.f32.mrf.mxu0  ;;  %3053 = vmatmul.bf16.gmra.mxu3 %v4040_v15  ;;  %v4045_v15 = vld [vmem:[%s5463_s26 + $0x324] sm:$0xf0]  ;;  %v3844_v12 = vor.u32 %v5016_v19, %v3843_v18  ;;  %v5266_v18 = vld [vmem:[%s5434_s19 + $0x5f0] sm:$0xff]  ;;  %v5056_v19 = vld [vmem:[%s5463_s26 + $0x2c4] sm:$0xf] }
 0x101   : > { %3101 = vmatmul.bf16.gmra.mxu1 %v3832_v5  ;;  %3240 = vmatpush.bf16.msra.mxu2 %v5220_v34  ;;  %v4051_v5 = vld [vmem:[%s5463_s26 + $0x2c0] sm:$0xf]  ;;  %v4048_v3 = vor.u32 %v5055_v11, %v4045_v15 }
 0x102   : > { %3130 = vmatmul.bf16.gmra.mxu2 %v3836_v16  ;;  %v5069_v16 = vld [vmem:[%s5463_s26 + $0x328] sm:$0xf0] }
 0x103   : > { %3082 = vmatmul.bf16.gmra.mxu0 %v4044_v21  ;;  %v2822_v27 = vpop.f32.mrf.mxu3  ;;  %v4052_v7 = vor.u32 %v5069_v16, %v4051_v5 }
 0x104   : > { %v2823_v28 = vadd.f32 %v2822_v27, %v5726_v20  ;;  %v5238_v27 = vld [vmem:[%s5434_s19 + $0x510] sm:$0xff] }
 0x105   : > { %v2899_v30 = vpop.f32.mrf.mxu2  ;;  %3349 = vmatpush.bf16.msrb.mxu2 %v5259_v45  ;;  %3296 = vmatpush.bf16.msrb.mxu0 %v5238_v27 }
 0x106   : > { %v5781_v25 = vadd.f32 %v2899_v30, %v2871_v26  ;;  %v2872_v31 = vpop.f32.mrf.mxu1  ;;  %v5785_v32 = vadd.f32 %v2851_v24, %v2823_v28  ;;  %v3840_v24 = vor.u32 %v5002_v14, %v3837_v13  ;;  %v5250_v28 = vld [vmem:[%s5434_s19 + $0x570] sm:$0xff]  ;;  %v5247_v14 = vld [vmem:[%s5434_s19 + $0x558] sm:$0xff] }
 0x107   : > { %v2873_v20 = vadd.f32 %v2872_v31, %v5747_v50  ;;  %3321 = vmatpush.bf16.msrb.mxu1 %v5250_v28  ;;  %v5275_v13 = vld [vmem:[%s5434_s19 + $0x638] sm:$0xff]  ;;  %v4059_v28 = vld [vmem:[%s5463_s26 + $0x2c8] sm:$0xf] }
 0x108   : > { %v2853_v33 = vpop.f32.mrf.mxu0 }
 0x109   : > { %3350 = vmatpush.bf16.msrb.mxu2 %v5258_v10  ;;  %3297 = vmatpush.bf16.msrb.mxu0 %v5237_v39 }
 0x10b   : > { %v2824_v44 = vpop.f32.mrf.mxu3  ;;  %3322 = vmatpush.bf16.msrb.mxu1 %v5249_v35 }
 0x10c   : > { %v2825_v48 = vadd.f32 %v2824_v44, %v5743_v41  ;;  %v5231_v41 = vld [vmem:[%s5434_s19 + $0x4d8] sm:$0xff] }
 0x10d   : > { %v2901_v50 = vpop.f32.mrf.mxu2  ;;  %3266 = vmatpush.bf16.msrb.mxu3 %v5231_v41 }
 0x10e   : > { %v5799_v51 = vadd.f32 %v2901_v50, %v2873_v20  ;;  %v2875_v55 = vpop.f32.mrf.mxu1  ;;  %v5803_v58 = vadd.f32 %v2853_v33, %v2825_v48  ;;  %v5257_v20 = vld [vmem:[%s5434_s19 + $0x5a8] sm:$0xff]  ;;  %v3945_v48 = vld [vmem:[%s5463_s26 + $0x254] sm:$0xf0]  ;;  %v4976_v50 = vld [vmem:[%s5463_s26 + $0x44] sm:$0xf] }
 0x10f   : > { %v2876_v59 = vadd.f32 %v2875_v55, %v5757_v60  ;;  %3351 = vmatpush.bf16.msrb.mxu2 %v5257_v20  ;;  %v5043_v55 = vld [vmem:[%s5463_s26 + $0x258] sm:$0xf0] }
 0x110   : > { %v2952_v61 = vpop.f32.mrf.mxu0  ;;  %3154 = vmatmul.bf16.vlgmr.msra.gmra.mxu3 %v3732_v37  ;;  %v3737_v37 = vld [vmem:[%s5463_s26 + $0xac] sm:$0xf0]  ;;  %v3952_v1 = vor.u32 %v5043_v55, %v3951_v52  ;;  %v5264_v52 = vld [vmem:[%s5434_s19 + $0x5e0] sm:$0xff]  ;;  %v5030_v55 = vld [vmem:[%s5463_s26 + $0x1f4] sm:$0xf] }
 0x111   : > { %3106 = vmatmul.bf16.gmra.mxu1 %v3940_v29  ;;  %v3743_v29 = vld [vmem:[%s5463_s26 + $0x48] sm:$0xf]  ;;  %v3740_v41 = vor.u32 %v4976_v50, %v3737_v37 }
 0x112   : > { %3135 = vmatmul.bf16.gmra.mxu2 %v3944_v53  ;;  %v4990_v53 = vld [vmem:[%s5463_s26 + $0xb0] sm:$0xf0]  ;;  %v5273_v50 = vld [vmem:[%s5434_s19 + $0x628] sm:$0xff] }
 0x113   : > { %3183 = vmatmul.bf16.vlgmr.msra.gmra.mxu0 %v3736_v56  ;;  %v2923_v62 = vpop.f32.mrf.mxu3  ;;  %3352 = vmatpush.bf16.msrb.mxu2 %v5256_v46  ;;  %v3744_v45 = vor.u32 %v4990_v53, %v3743_v29 }
 0x114   : > { %v2924_v0 = vadd.f32 %v2923_v62, %v5753_v49  ;;  %v5230_v49 = vld [vmem:[%s5434_s19 + $0x4d0] sm:$0xff]  ;;  %v5236_v62 = vld [vmem:[%s5434_s19 + $0x500] sm:$0xff] }
 0x115   : > { %v2904_v63 = vpop.f32.mrf.mxu2  ;;  %3267 = vmatpush.bf16.msrb.mxu3 %v5230_v49  ;;  %3298 = vmatpush.bf16.msrb.mxu0 %v5236_v62 }
 0x116   : > { %v5809_v60 = vadd.f32 %v2904_v63, %v2876_v59  ;;  %v2877_v4 = vpop.f32.mrf.mxu1  ;;  %v5813_v6 = vadd.f32 %v2952_v61, %v2924_v0  ;;  %v3948_v59 = vor.u32 %v5029_v47, %v3945_v48  ;;  %v5248_v63 = vld [vmem:[%s5434_s19 + $0x560] sm:$0xff]  ;;  %v5245_v48 = vld [vmem:[%s5434_s19 + $0x548] sm:$0xff] }
 0x117   : > { %v2878_v8 = vadd.f32 %v2877_v4, %v5775_v22  ;;  %3323 = vmatpush.bf16.msrb.mxu1 %v5248_v63  ;;  %v3751_v63 = vld [vmem:[%s5463_s26 + $0x50] sm:$0xf] }
 0x118   : > { %v2954_v9 = vpop.f32.mrf.mxu0 }
 0x119   : > { %3407 = vmatpush.bf16.msra.mxu0 %v5275_v13 }
 0x11b   : > { %v2925_v17 = vpop.f32.mrf.mxu3  ;;  %3324 = vmatpush.bf16.msrb.mxu1 %v5247_v14 }
 0x11c   : > { %v2926_v22 = vadd.f32 %v2925_v17, %v5771_v57  ;;  %v5229_v57 = vld [vmem:[%s5434_s19 + $0x4c8] sm:$0xff]  ;;  %v5254_v17 = vld [vmem:[%s5434_s19 + $0x590] sm:$0xff] }
 0x11d   : > { %v2906_v21 = vpop.f32.mrf.mxu2  ;;  %3268 = vmatpush.bf16.msrb.mxu3 %v5229_v57 }
 0x11e   : > { %v5827_v26 = vadd.f32 %v2906_v21, %v2878_v8  ;;  %v2880_v30 = vpop.f32.mrf.mxu1  ;;  %v5831_v23 = vadd.f32 %v2954_v9, %v2926_v22  ;;  %v5267_v9 = vld [vmem:[%s5434_s19 + $0x5f8] sm:$0xff]  ;;  %v4053_v21 = vld [vmem:[%s5463_s26 + $0x32c] sm:$0xf0] }
 0x11f   : > { %v2881_v31 = vadd.f32 %v2880_v30, %v5785_v32  ;;  %v5003_v22 = vld [vmem:[%s5463_s26 + $0x11c] sm:$0xf]  ;;  %v5070_v30 = vld [vmem:[%s5463_s26 + $0x330] sm:$0xf0] }
 0x120   : > { %v2957_v33 = vpop.f32.mrf.mxu0  ;;  %3159 = vmatmul.bf16.gmra.mxu3 %v3840_v24  ;;  %v3845_v24 = vld [vmem:[%s5463_s26 + $0x184] sm:$0xf0]  ;;  %v4060_v39 = vor.u32 %v5070_v30, %v4059_v28  ;;  %v5936_v28 = vld [vmem:[%s5434_s19 + $0x6b0] sm:$0xff]  ;;  %v5057_v30 = vld [vmem:[%s5463_s26 + $0x2cc] sm:$0xf] }
 0x121   : > { %3111 = vmatmul.bf16.gmra.mxu1 %v4048_v3  ;;  %v3851_v3 = vld [vmem:[%s5463_s26 + $0x120] sm:$0xf]  ;;  %v3848_v57 = vor.u32 %v5003_v22, %v3845_v24  ;;  %v5928_v22 = vld [vmem:[%s5434_s19 + $0x678] sm:$0xff] }
 0x122   : > { %3140 = vmatmul.bf16.gmra.mxu2 %v4052_v7  ;;  %v5017_v7 = vld [vmem:[%s5463_s26 + $0x188] sm:$0xf0] }
 0x123   : > { %3188 = vmatmul.bf16.gmra.mxu0 %v3844_v12  ;;  %v2928_v34 = vpop.f32.mrf.mxu3  ;;  %v3852_v20 = vor.u32 %v5017_v7, %v3851_v3 }
 0x124   : > { %v2929_v38 = vadd.f32 %v2928_v34, %v5781_v25  ;;  %v5228_v25 = vld [vmem:[%s5434_s19 + $0x4c0] sm:$0xff]  ;;  %v5246_v34 = vld [vmem:[%s5434_s19 + $0x550] sm:$0xff] }
 0x125   : > { %v2909_v36 = vpop.f32.mrf.mxu2  ;;  %3269 = vmatpush.bf16.msrb.mxu3 %v5228_v25  ;;  %3325 = vmatpush.bf16.msrb.mxu1 %v5246_v34 }
 0x126   : > { %v5837_v32 = vadd.f32 %v2909_v36, %v2881_v31  ;;  %v2882_v40 = vpop.f32.mrf.mxu1  ;;  %v5841_v42 = vadd.f32 %v2957_v33, %v2929_v38  ;;  %v4056_v31 = vor.u32 %v5056_v19, %v4053_v21  ;;  %v5274_v36 = vld [vmem:[%s5434_s19 + $0x630] sm:$0xff]  ;;  %v5271_v21 = vld [vmem:[%s5434_s19 + $0x618] sm:$0xff] }
 0x127   : > { %v2883_v43 = vadd.f32 %v2882_v40, %v5803_v58  ;;  %3408 = vmatpush.bf16.msra.mxu0 %v5274_v36  ;;  %v3859_v36 = vld [vmem:[%s5463_s26 + $0x128] sm:$0xf] }
 0x128   : > { %v2959_v44 = vpop.f32.mrf.mxu0 }
 0x129   : > { %3378 = vmatpush.bf16.msra.mxu3 %v5267_v9  ;;  %3326 = vmatpush.bf16.msrb.mxu1 %v5245_v48 }
 0x12b   : > { %v2930_v54 = vpop.f32.mrf.mxu3  ;;  %3409 = vmatpush.bf16.msra.mxu0 %v5273_v50 }
 0x12c   : > { %v2931_v58 = vadd.f32 %v2930_v54, %v5799_v51  ;;  %v5255_v51 = vld [vmem:[%s5434_s19 + $0x598] sm:$0xff]  ;;  %v5252_v54 = vld [vmem:[%s5434_s19 + $0x580] sm:$0xff] }
 0x12d   : > { %v2911_v56 = vpop.f32.mrf.mxu2  ;;  %3353 = vmatpush.bf16.msrb.mxu2 %v5255_v51  ;;  %3379 = vmatpush.bf16.msra.mxu3 %v5266_v18 }
 0x12e   : > { %v5855_v61 = vadd.f32 %v2911_v56, %v2883_v43  ;;  %v2981_v0 = vpop.f32.mrf.mxu1  ;;  %v5859_v2 = vadd.f32 %v2959_v44, %v2931_v58  ;;  %v5265_v44 = vld [vmem:[%s5434_s19 + $0x5e8] sm:$0xff]  ;;  %v3745_v58 = vld [vmem:[%s5463_s26 + $0xb4] sm:$0xf0] }
 0x12f   : > { %v2982_v8 = vadd.f32 %v2981_v0, %v5813_v6  ;;  %v4977_v56 = vld [vmem:[%s5463_s26 + $0x4c] sm:$0xf]  ;;  %v4991_v0 = vld [vmem:[%s5463_s26 + $0xb8] sm:$0xf0] }
 0x130   : > { %v2962_v4 = vpop.f32.mrf.mxu0  ;;  %3164 = vmatmul.bf16.gmra.mxu3 %v3948_v59  ;;  %v3953_v59 = vld [vmem:[%s5463_s26 + $0x25c] sm:$0xf0]  ;;  %v3752_v14 = vor.u32 %v4991_v0, %v3751_v63  ;;  %v5031_v0 = vld [vmem:[%s5463_s26 + $0x1fc] sm:$0xf] }
 0x131   : > { %3212 = vmatmul.bf16.vlgmr.msra.gmra.mxu1 %v3740_v41  ;;  %3354 = vmatpush.bf16.msrb.mxu2 %v5254_v17  ;;  %v3959_v41 = vld [vmem:[%s5463_s26 + $0x1f8] sm:$0xf]  ;;  %v3956_v51 = vor.u32 %v5030_v55, %v3953_v59  ;;  %v5288_v63 = vld [vmem:[%s5434_s19 + $0x6a0] sm:$0xff] }
 0x132   : > { %3241 = vmatmul.bf16.vlgmr.msra.gmra.mxu2 %v3744_v45  ;;  %3380 = vmatpush.bf16.msra.mxu3 %v5265_v44  ;;  %v5044_v45 = vld [vmem:[%s5463_s26 + $0x260] sm:$0xf0] }
 0x133   : > { %3193 = vmatmul.bf16.gmra.mxu0 %v3952_v1  ;;  %v2933_v49 = vpop.f32.mrf.mxu3  ;;  %v3960_v9 = vor.u32 %v5044_v45, %v3959_v41 }
 0x134   : > { %v2934_v10 = vadd.f32 %v2933_v49, %v5809_v60  ;;  %v5244_v49 = vld [vmem:[%s5434_s19 + $0x540] sm:$0xff] }
 0x135   : > { %v3010_v11 = vpop.f32.mrf.mxu2  ;;  %3327 = vmatpush.bf16.msrb.mxu1 %v5244_v49 }
 0x136   : > { %v5865_v6 = vadd.f32 %v3010_v11, %v2982_v8  ;;  %v2983_v15 = vpop.f32.mrf.mxu1  ;;  %v5869_v5 = vadd.f32 %v2962_v4, %v2934_v10  ;;  %3381 = vmatpush.bf16.msra.mxu3 %v5264_v52  ;;  %v3748_v4 = vor.u32 %v4977_v56, %v3745_v58  ;;  %v5272_v10 = vld [vmem:[%s5434_s19 + $0x620] sm:$0xff]  ;;  %v5269_v56 = vld [vmem:[%s5434_s19 + $0x608] sm:$0xff] }
 0x137   : > { %v2984_v60 = vadd.f32 %v2983_v15, %v5831_v23  ;;  %3410 = vmatpush.bf16.msra.mxu0 %v5272_v10  ;;  %v5281_v58 = vld [vmem:[%s5434_s19 + $0x668] sm:$0xff]  ;;  %v3967_v10 = vld [vmem:[%s5463_s26 + $0x200] sm:$0xf] }
 0x138   : > { %v2964_v16 = vpop.f32.mrf.mxu0 }
 0x139   : > { %5323 = vmatpush.bf16.msra.mxu1 %v5928_v22 }
 0x13b   : > { %v2935_v27 = vpop.f32.mrf.mxu3  ;;  %3411 = vmatpush.bf16.msra.mxu0 %v5271_v21 }
 0x13c   : > { %v2936_v12 = vadd.f32 %v2935_v27, %v5827_v26  ;;  %v5253_v26 = vld [vmem:[%s5434_s19 + $0x588] sm:$0xff]  ;;  %v5262_v27 = vld [vmem:[%s5434_s19 + $0x5d0] sm:$0xff] }
 0x13d   : > { %v3012_v23 = vpop.f32.mrf.mxu2  ;;  %3355 = vmatpush.bf16.msrb.mxu2 %v5253_v26 }
 0x13e   : > { %v5883_v33 = vadd.f32 %v3012_v23, %v2984_v60  ;;  %v2986_v38 = vpop.f32.mrf.mxu1  ;;  %v5887_v35 = vadd.f32 %v2964_v16, %v2936_v12  ;;  %v5920_v60 = vld [vmem:[%s5434_s19 + $0x6b8] sm:$0xff]  ;;  %v5004_v12 = vld [vmem:[%s5463_s26 + $0x124] sm:$0xf]  ;;  %v3853_v23 = vld [vmem:[%s5463_s26 + $0x18c] sm:$0xf0] }
 0x13f   : > { %v2987_v43 = vadd.f32 %v2986_v38, %v5841_v42  ;;  %v5018_v38 = vld [vmem:[%s5463_s26 + $0x190] sm:$0xf0] }
 0x140   : > { %v2967_v40 = vpop.f32.mrf.mxu0  ;;  %3169 = vmatmul.bf16.gmra.mxu3 %v4056_v31  ;;  %v4061_v31 = vld [vmem:[%s5463_s26 + $0x334] sm:$0xf0]  ;;  %v3860_v48 = vor.u32 %v5018_v38, %v3859_v36  ;;  %v5005_v36 = vld [vmem:[%s5463_s26 + $0x12c] sm:$0xf] }
 0x141   : > { %3217 = vmatmul.bf16.gmra.mxu1 %v3848_v57  ;;  %3356 = vmatpush.bf16.msrb.mxu2 %v5252_v54  ;;  %v4067_v57 = vld [vmem:[%s5463_s26 + $0x2d0] sm:$0xf]  ;;  %v4064_v26 = vor.u32 %v5057_v30, %v4061_v31  ;;  %v3861_v38 = vld [vmem:[%s5463_s26 + $0x194] sm:$0xf0] }
 0x142   : > { %3246 = vmatmul.bf16.gmra.mxu2 %v3852_v20  ;;  %v5071_v20 = vld [vmem:[%s5463_s26 + $0x338] sm:$0xf0] }
 0x143   : > { %3198 = vmatmul.bf16.gmra.mxu0 %v4060_v39  ;;  %v2938_v25 = vpop.f32.mrf.mxu3  ;;  %v4068_v44 = vor.u32 %v5071_v20, %v4067_v57  ;;  %v5286_v57 = vld [vmem:[%s5434_s19 + $0x690] sm:$0xff] }
 0x144   : > { %v2939_v46 = vadd.f32 %v2938_v25, %v5837_v32  ;;  %v5270_v25 = vld [vmem:[%s5434_s19 + $0x610] sm:$0xff] }
 0x145   : > { %v3015_v47 = vpop.f32.mrf.mxu2  ;;  %3465 = vmatpush.bf16.msra.mxu2 %v5920_v60  ;;  %3412 = vmatpush.bf16.msra.mxu0 %v5270_v25  ;;  %v5058_v20 = vld [vmem:[%s5463_s26 + $0x2d4] sm:$0xf] }
 0x146   : > { %v5893_v42 = vadd.f32 %v3015_v47, %v2987_v43  ;;  %v2988_v37 = vpop.f32.mrf.mxu1  ;;  %v5897_v29 = vadd.f32 %v2967_v40, %v2939_v46  ;;  %v3856_v40 = vor.u32 %v5004_v12, %v3853_v23  ;;  %v5952_v46 = vld [vmem:[%s5434_s19 + $0x670] sm:$0xff] }
 0x147   : > { %v2989_v32 = vadd.f32 %v2988_v37, %v5859_v2  ;;  %5324 = vmatpush.bf16.msra.mxu1 %v5952_v46 }
 0x148   : > { %v2969_v53 = vpop.f32.mrf.mxu0 }
 0x149   : > { %3466 = vmatpush.bf16.msra.mxu2 %v5936_v28  ;;  %3413 = vmatpush.bf16.msra.mxu0 %v5269_v56 }
 0x14b   : > { %v2940_v62 = vpop.f32.mrf.mxu3  ;;  %5325 = vmatpush.bf16.msra.mxu1 %v5281_v58 }
 0x14c   : > { %v2941_v1 = vadd.f32 %v2940_v62, %v5855_v61  ;;  %v5263_v61 = vld [vmem:[%s5434_s19 + $0x5d8] sm:$0xff] }
 0x14d   : > { %v3017_v2 = vpop.f32.mrf.mxu2  ;;  %3382 = vmatpush.bf16.msra.mxu3 %v5263_v61 }
 0x14e   : > { %v5911_v8 = vadd.f32 %v3017_v2, %v2989_v32  ;;  %v2991_v11 = vpop.f32.mrf.mxu1  ;;  %v5915_v13 = vadd.f32 %v2969_v53, %v2941_v1  ;;  %v5289_v32 = vld [vmem:[%s5434_s19 + $0x6a8] sm:$0xff]  ;;  %v4978_v2 = vld [vmem:[%s5463_s26 + $0x54] sm:$0xf] }
 0x14f   : > { %v2992_v15 = vadd.f32 %v2991_v11, %v5869_v5  ;;  %3467 = vmatpush.bf16.msra.mxu2 %v5289_v32  ;;  %v3961_v1 = vld [vmem:[%s5463_s26 + $0x264] sm:$0xf0]  ;;  %v5045_v11 = vld [vmem:[%s5463_s26 + $0x268] sm:$0xf0] }
 0x150   : > { %v3068_v16 = vpop.f32.mrf.mxu0  ;;  %3270 = vmatmul.bf16.vlgmr.msrb.gmra.mxu3 %v3748_v4  ;;  %v3753_v4 = vld [vmem:[%s5463_s26 + $0xbc] sm:$0xf0] }
 0x151   : > { %3222 = vmatmul.bf16.gmra.mxu1 %v3956_v51  ;;  %3383 = vmatpush.bf16.msra.mxu3 %v5262_v27  ;;  %v3759_v51 = vld [vmem:[%s5463_s26 + $0x58] sm:$0xf]  ;;  %v3756_v61 = vor.u32 %v4978_v2, %v3753_v4  ;;  %v4979_v2 = vld [vmem:[%s5463_s26 + $0x5c] sm:$0xf]  ;;  %v3761_v4 = vld [vmem:[%s5463_s26 + $0xc4] sm:$0xf0] }
 0x152   : > { %3251 = vmatmul.bf16.gmra.mxu2 %v3960_v9  ;;  %v4992_v9 = vld [vmem:[%s5463_s26 + $0xc0] sm:$0xf0] }
 0x153   : > { %3299 = vmatmul.bf16.vlgmr.msrb.gmra.mxu0 %v3752_v14  ;;  %v3039_v17 = vpop.f32.mrf.mxu3  ;;  %3468 = vmatpush.bf16.msra.mxu2 %v5288_v63 }
 0x154   : > { %v3040_v5 = vadd.f32 %v3039_v17, %v5865_v6  ;;  %v3760_v17 = vor.u32 %v4992_v9, %v3759_v51  ;;  %v3969_v51 = vld [vmem:[%s5463_s26 + $0x26c] sm:$0xf0]  ;;  %v3975_v9 = vld [vmem:[%s5463_s26 + $0x208] sm:$0xf] }
 0x155   : > { %v3020_v18 = vpop.f32.mrf.mxu2 }
 0x156   : > { %v5924_v19 = vadd.f32 %v3020_v18, %v2992_v15  ;;  %v2993_v24 = vpop.f32.mrf.mxu1  ;;  %v5930_v3 = vadd.f32 %v3068_v16, %v3040_v5  ;;  %v3964_v15 = vor.u32 %v5031_v0, %v3961_v1  ;;  %v5268_v18 = vld [vmem:[%s5434_s19 + $0x600] sm:$0xff] }
 0x157   : > { %v2994_v7 = vadd.f32 %v2993_v24, %v5887_v35  ;;  %v5280_v5 = vld [vmem:[%s5434_s19 + $0x660] sm:$0xff]  ;;  %v3968_v24 = vor.u32 %v5045_v11, %v3967_v10  ;;  %3414 = vmatpush.bf16.msra.mxu0 %v5268_v18 }
 0x158   : > { %v3070_v6 = vpop.f32.mrf.mxu0  ;;  %5326 = vmatpush.bf16.msra.mxu1 %v5280_v5  ;;  %v5032_v1 = vld [vmem:[%s5463_s26 + $0x204] sm:$0xf]  ;;  %v3767_v11 = vld [vmem:[%s5463_s26 + $0x60] sm:$0xf] }
 0x159   : > { %v3972_v18 = vor.u32 %v5032_v1, %v3969_v51 }
 0x15b   : > { %v3041_v34 = vpop.f32.mrf.mxu3  ;;  %3436 = vmatpush.bf16.msrb.mxu0 %v5928_v22  ;;  %v5279_v22 = vld [vmem:[%s5434_s19 + $0x658] sm:$0xff] }
 0x15c   : > { %v3042_v35 = vadd.f32 %v3041_v34, %v5883_v33  ;;  %v5261_v33 = vld [vmem:[%s5434_s19 + $0x5c8] sm:$0xff]  ;;  %5327 = vmatpush.bf16.msra.mxu1 %v5279_v22  ;;  %v4069_v34 = vld [vmem:[%s5463_s26 + $0x33c] sm:$0xf0] }
 0x15d   : > { %v3022_v39 = vpop.f32.mrf.mxu2  ;;  %3384 = vmatpush.bf16.msra.mxu3 %v5261_v33 }
 0x15e   : > { %v5948_v43 = vadd.f32 %v3022_v39, %v2994_v7  ;;  %v2996_v47 = vpop.f32.mrf.mxu1  ;;  %v5954_v50 = vadd.f32 %v3070_v6, %v3042_v35  ;;  %v3867_v39 = vld [vmem:[%s5463_s26 + $0x130] sm:$0xf]  ;;  %v5019_v35 = vld [vmem:[%s5463_s26 + $0x198] sm:$0xf0] }
 0x15f   : > { %v2997_v37 = vadd.f32 %v2996_v47, %v5897_v29  ;;  %3437 = vmatpush.bf16.msrb.mxu0 %v5952_v46  ;;  %v4072_v47 = vor.u32 %v5058_v20, %v4069_v34  ;;  %v3869_v20 = vld [vmem:[%s5463_s26 + $0x19c] sm:$0xf0]  ;;  %v4077_v34 = vld [vmem:[%s5463_s26 + $0x344] sm:$0xf0] }
 0x160   : > { %v3073_v53 = vpop.f32.mrf.mxu0  ;;  %3275 = vmatmul.bf16.gmra.mxu3 %v3856_v40 }
 0x161   : > { %3227 = vmatmul.bf16.gmra.mxu1 %v4064_v26  ;;  %v4075_v26 = vld [vmem:[%s5463_s26 + $0x2d8] sm:$0xf] }
 0x162   : > { %3256 = vmatmul.bf16.gmra.mxu2 %v4068_v44  ;;  %v5072_v44 = vld [vmem:[%s5463_s26 + $0x340] sm:$0xf0] }
 0x163   : > { %3304 = vmatmul.bf16.gmra.mxu0 %v3860_v48  ;;  %v3044_v54 = vpop.f32.mrf.mxu3 }
 0x164   : > { %v3045_v29 = vadd.f32 %v3044_v54, %v5893_v42  ;;  %v5260_v42 = vld [vmem:[%s5434_s19 + $0x5c0] sm:$0xff]  ;;  %3438 = vmatpush.bf16.msrb.mxu0 %v5281_v58 }
 0x165   : > { %v3025_v52 = vpop.f32.mrf.mxu2  ;;  %3385 = vmatpush.bf16.msra.mxu3 %v5260_v42 }
 0x166   : > { %v5961_v55 = vadd.f32 %v3025_v52, %v2997_v37  ;;  %v2998_v59 = vpop.f32.mrf.mxu1  ;;  %v5965_v41 = vadd.f32 %v3073_v53, %v3045_v29  ;;  %v3868_v37 = vor.u32 %v5019_v35, %v3867_v39  ;;  %v5278_v53 = vld [vmem:[%s5434_s19 + $0x650] sm:$0xff]  ;;  %v3875_v35 = vld [vmem:[%s5463_s26 + $0x138] sm:$0xf] }
 0x167   : > { %v2999_v45 = vadd.f32 %v2998_v59, %v5915_v13  ;;  %5328 = vmatpush.bf16.msra.mxu1 %v5278_v53 }
 0x168   : > { %v3075_v62 = vpop.f32.mrf.mxu0  ;;  %3439 = vmatpush.bf16.msrb.mxu0 %v5280_v5 }
 0x169   : > { %5331 = vmatpush.bf16.msrb.mxu3 %v5920_v60 }
 0x16b   : > { %v3046_v49 = vpop.f32.mrf.mxu3 }
 0x16c   : > { %v3047_v13 = vadd.f32 %v3046_v49, %v5911_v8  ;;  %v5287_v8 = vld [vmem:[%s5434_s19 + $0x698] sm:$0xff]  ;;  %3440 = vmatpush.bf16.msrb.mxu0 %v5279_v22  ;;  %v5046_v49 = vld [vmem:[%s5463_s26 + $0x270] sm:$0xf0] }
 0x16d   : > { %v3027_v14 = vpop.f32.mrf.mxu2  ;;  %5332 = vmatpush.bf16.msrb.mxu3 %v5936_v28  ;;  %3469 = vmatpush.bf16.msra.mxu2 %v5287_v8  ;;  %v3976_v5 = vor.u32 %v5046_v49, %v3975_v9 }
 0x16e   : > { %v5980_v16 = vadd.f32 %v3027_v14, %v2999_v45  ;;  %v3097_v21 = vpop.f32.mrf.mxu1  ;;  %v5984_v7 = vadd.f32 %v3075_v62, %v3047_v13  ;;  %v4993_v14 = vld [vmem:[%s5463_s26 + $0xc8] sm:$0xf0] }
 0x16f   : > { %v3098_v6 = vadd.f32 %v3097_v21, %v5930_v3  ;;  %v5276_v21 = vld [vmem:[%s5434_s19 + $0x640] sm:$0xff] }
 0x170   : > { %v3078_v60 = vpop.f32.mrf.mxu0  ;;  %3280 = vmatmul.bf16.gmra.mxu3 %v3964_v15  ;;  %3441 = vmatpush.bf16.msrb.mxu0 %v5278_v53 }
 0x171   : > { %3328 = vmatmul.bf16.vlgmr.msrb.gmra.mxu1 %v3756_v61  ;;  %5333 = vmatpush.bf16.msrb.mxu3 %v5289_v32  ;;  %v4076_v32 = vor.u32 %v5072_v44, %v4075_v26  ;;  %v3764_v61 = vor.u32 %v4979_v2, %v3761_v4  ;;  %v3983_v2 = vld [vmem:[%s5463_s26 + $0x210] sm:$0xf]  ;;  %v5047_v4 = vld [vmem:[%s5463_s26 + $0x278] sm:$0xf0] }
 0x172   : > { %3357 = vmatmul.bf16.vlgmr.msrb.gmra.mxu2 %v3760_v17 }
 0x173   : > { %3309 = vmatmul.bf16.gmra.mxu0 %v3968_v24  ;;  %v3049_v27 = vpop.f32.mrf.mxu3  ;;  %3470 = vmatpush.bf16.msra.mxu2 %v5286_v57 }
 0x174   : > { %v3050_v28 = vadd.f32 %v3049_v27, %v5924_v19 }
 0x175   : > { %v3126_v30 = vpop.f32.mrf.mxu2  ;;  %5334 = vmatpush.bf16.msrb.mxu3 %v5288_v63 }
 0x176   : > { %v5992_v3 = vadd.f32 %v3126_v30, %v3098_v6  ;;  %v3099_v12 = vpop.f32.mrf.mxu1  ;;  %v5995_v23 = vadd.f32 %v3078_v60, %v3050_v28 }
 0x177   : > { %v3100_v19 = vadd.f32 %v3099_v12, %v5954_v50  ;;  %v3864_v50 = vor.u32 %v5005_v36, %v3861_v38  ;;  %v4083_v36 = vld [vmem:[%s5463_s26 + $0x2e0] sm:$0xf]  ;;  %v5073_v38 = vld [vmem:[%s5463_s26 + $0x348] sm:$0xf0] }
 0x178   : > { %v3080_v31 = vpop.f32.mrf.mxu0 }
 0x179   : > { %5335 = vmatpush.bf16.msrb.mxu3 %v5287_v8 }
 0x17b   : > { %v3051_v40 = vpop.f32.mrf.mxu3 }
 0x17c   : > { %v3052_v25 = vadd.f32 %v3051_v40, %v5948_v43  ;;  %v5285_v43 = vld [vmem:[%s5434_s19 + $0x688] sm:$0xff]  ;;  %v5020_v40 = vld [vmem:[%s5463_s26 + $0x1a0] sm:$0xf0] }
 0x17d   : > { %v3128_v46 = vpop.f32.mrf.mxu2  ;;  %5336 = vmatpush.bf16.msrb.mxu3 %v5286_v57  ;;  %3471 = vmatpush.bf16.msra.mxu2 %v5285_v43  ;;  %v5006_v57 = vld [vmem:[%s5463_s26 + $0x134] sm:$0xf] }
 0x17e   : > { %v6008_v48 = vadd.f32 %v3128_v46, %v3100_v19  ;;  %v3102_v33 = vpop.f32.mrf.mxu1  ;;  %v3081_v54 = vadd.f32 %v3080_v31, %v3052_v25  ;;  %v5059_v19 = vld [vmem:[%s5463_s26 + $0x2dc] sm:$0xf]  ;;  %v3872_v25 = vor.u32 %v5006_v57, %v3869_v20  ;;  %v5074_v57 = vld [vmem:[%s5463_s26 + $0x350] sm:$0xf0] }
 0x17f   : > { %v3103_v29 = vadd.f32 %v3102_v33, %v5965_v41  ;;  %v5277_v41 = vld [vmem:[%s5434_s19 + $0x648] sm:$0xff] }
 0x180   : > { %v3083_v52 = vpop.f32.mrf.mxu0  ;;  %3285 = vmatmul.bf16.gmra.mxu3 %v4072_v47  ;;  %5329 = vmatpush.bf16.msra.mxu1 %v5277_v41  ;;  %v4084_v47 = vor.u32 %v5073_v38, %v4083_v36 }
 0x181   : > { %3333 = vmatmul.bf16.gmra.mxu1 %v3864_v50  ;;  %5337 = vmatpush.bf16.msrb.mxu3 %v5285_v43 }
 0x182   : > { %3362 = vmatmul.bf16.gmra.mxu2 %v3868_v37  ;;  %3442 = vmatpush.bf16.msrb.mxu0 %v5277_v41  ;;  %v3876_v37 = vor.u32 %v5020_v40, %v3875_v35  ;;  %v5033_v41 = vld [vmem:[%s5463_s26 + $0x20c] sm:$0xf] }
 0x183   : > { %3314 = vmatmul.bf16.gmra.mxu0 %v4076_v32  ;;  %v3054_v56 = vpop.f32.mrf.mxu3 }
 0x184   : > { %v3055_v58 = vadd.f32 %v3054_v56, %v5961_v55  ;;  %v5284_v55 = vld [vmem:[%s5434_s19 + $0x680] sm:$0xff]  ;;  %5330 = vmatpush.bf16.msra.mxu1 %v5276_v21 }
 0x185   : > { %v3131_v59 = vpop.f32.mrf.mxu2  ;;  %3472 = vmatpush.bf16.msra.mxu2 %v5284_v55  ;;  %5338 = vmatpush.bf16.msrb.mxu3 %v5284_v55  ;;  %v4994_v55 = vld [vmem:[%s5463_s26 + $0xd0] sm:$0xf0] }
 0x186   : > { %v6014_v45 = vadd.f32 %v3131_v59, %v3103_v29  ;;  %v3104_v62 = vpop.f32.mrf.mxu1  ;;  %v3084_v42 = vadd.f32 %v3083_v52, %v3055_v58  ;;  %3443 = vmatpush.bf16.msrb.mxu0 %v5276_v21 }
 0x187   : > { %v3105_v0 = vadd.f32 %v3104_v62, %v5984_v7  ;;  %v3768_v7 = vor.u32 %v4993_v14, %v3767_v11  ;;  %v3977_v62 = vld [vmem:[%s5463_s26 + $0x274] sm:$0xf0] }
 0x188   : > { %v3085_v63 = vpop.f32.mrf.mxu0  ;;  %v3980_v49 = vor.u32 %v5033_v41, %v3977_v62  ;;  %v4980_v41 = vld [vmem:[%s5463_s26 + $0x64] sm:$0xf]  ;;  %v3769_v62 = vld [vmem:[%s5463_s26 + $0xcc] sm:$0xf0] }
 0x18b   : > { %v3056_v10 = vpop.f32.mrf.mxu3 }
 0x18c   : > { %v3057_v13 = vadd.f32 %v3056_v10, %v5980_v16 }
 0x18d   : > { %v3133_v15 = vpop.f32.mrf.mxu2 }
 0x18e   : > { %v6028_v17 = vadd.f32 %v3133_v15, %v3105_v0  ;;  %v3107_v24 = vpop.f32.mrf.mxu1  ;;  %v3086_v60 = vadd.f32 %v3085_v63, %v3057_v13  ;;  %v3877_v63 = vld [vmem:[%s5463_s26 + $0x1a4] sm:$0xf0]  ;;  %v3984_v13 = vor.u32 %v5047_v4, %v3983_v2  ;;  %v3772_v4 = vor.u32 %v4980_v41, %v3769_v62 }
 0x18f   : > { %v3108_v6 = vadd.f32 %v3107_v24, %v5995_v23  ;;  %v3775_v0 = vld [vmem:[%s5463_s26 + $0x68] sm:$0xf] }
 0x190   : > { %v3184_v8 = vpop.f32.mrf.mxu0  ;;  %3386 = vmatmul.bf16.vlgmr.msra.gmra.mxu3 %v3764_v61  ;;  %v3776_v11 = vor.u32 %v4994_v55, %v3775_v0 }
 0x191   : > { %3338 = vmatmul.bf16.gmra.mxu1 %v3972_v18 }
 0x192   : > { %3367 = vmatmul.bf16.gmra.mxu2 %v3976_v5 }
 0x193   : > { %3415 = vmatmul.bf16.vlgmr.msra.gmra.mxu0 %v3768_v7  ;;  %v3155_v16 = vpop.f32.mrf.mxu3 }
 0x194   : > { %v3156_v28 = vadd.f32 %v3155_v16, %v5992_v3  ;;  %v4080_v3 = vor.u32 %v5059_v19, %v4077_v34  ;;  %v5060_v16 = vld [vmem:[%s5463_s26 + $0x2e4] sm:$0xf]  ;;  %v4091_v19 = vld [vmem:[%s5463_s26 + $0x2e8] sm:$0xf] }
 0x195   : > { %v3136_v27 = vpop.f32.mrf.mxu2  ;;  %v4092_v40 = vor.u32 %v5074_v57, %v4091_v19 }
 0x196   : > { %v3137_v30 = vadd.f32 %v3136_v27, %v3108_v6  ;;  %v3109_v22 = vpop.f32.mrf.mxu1  ;;  %v3185_v12 = vadd.f32 %v3184_v8, %v3156_v28  ;;  %v4085_v27 = vld [vmem:[%s5463_s26 + $0x34c] sm:$0xf0]  ;;  %v5034_v28 = vld [vmem:[%s5463_s26 + $0x214] sm:$0xf] }
 0x197   : > { %v3110_v23 = vadd.f32 %v3109_v22, %v3081_v54  ;;  %v3985_v22 = vld [vmem:[%s5463_s26 + $0x27c] sm:$0xf0]  ;;  %v4088_v36 = vor.u32 %v5060_v16, %v4085_v27 }
 0x198   : > { %v3186_v31 = vpop.f32.mrf.mxu0  ;;  %v3988_v38 = vor.u32 %v5034_v28, %v3985_v22 }
 0x19b   : > { %v3157_v39 = vpop.f32.mrf.mxu3 }
 0x19c   : > { %v3158_v44 = vadd.f32 %v3157_v39, %v6008_v48 }
 0x19d   : > { %v3138_v26 = vpop.f32.mrf.mxu2 }
 0x19e   : > { %v3139_v46 = vadd.f32 %v3138_v26, %v3110_v23  ;;  %v3112_v50 = vpop.f32.mrf.mxu1  ;;  %v3187_v53 = vadd.f32 %v3186_v31, %v3158_v44  ;;  %v5021_v23 = vld [vmem:[%s5463_s26 + $0x1a8] sm:$0xf0] }
 0x19f   : > { %v3113_v33 = vadd.f32 %v3112_v50, %v3084_v42  ;;  %v5007_v42 = vld [vmem:[%s5463_s26 + $0x13c] sm:$0xf] }
 0x1a0   : > { %v3189_v32 = vpop.f32.mrf.mxu0  ;;  %3391 = vmatmul.bf16.gmra.mxu3 %v3872_v25 }
 0x1a1   : > { %3343 = vmatmul.bf16.gmra.mxu1 %v4080_v3 }
 0x1a2   : > { %3372 = vmatmul.bf16.gmra.mxu2 %v4084_v47 }
 0x1a3   : > { %3420 = vmatmul.bf16.gmra.mxu0 %v3876_v37  ;;  %v3160_v48 = vpop.f32.mrf.mxu3 }
 0x1a4   : > { %v3161_v52 = vadd.f32 %v3160_v48, %v6014_v45  ;;  %v3880_v45 = vor.u32 %v5007_v42, %v3877_v63  ;;  %v5061_v48 = vld [vmem:[%s5463_s26 + $0x2ec] sm:$0xf] }
 0x1a5   : > { %v3141_v54 = vpop.f32.mrf.mxu2 }
 0x1a6   : > { %v3142_v29 = vadd.f32 %v3141_v54, %v3113_v33  ;;  %v3114_v43 = vpop.f32.mrf.mxu1  ;;  %v3190_v56 = vadd.f32 %v3189_v32, %v3161_v52  ;;  %v4099_v54 = vld [vmem:[%s5463_s26 + $0x2f0] sm:$0xf]  ;;  %v5075_v52 = vld [vmem:[%s5463_s26 + $0x358] sm:$0xf0] }
 0x1a7   : > { %v3115_v58 = vadd.f32 %v3114_v43, %v3086_v60  ;;  %v4093_v43 = vld [vmem:[%s5463_s26 + $0x354] sm:$0xf0]  ;;  %v4100_v0 = vor.u32 %v5075_v52, %v4099_v54 }
 0x1a8   : > { %v3191_v59 = vpop.f32.mrf.mxu0 }
 0x1ab   : > { %v3162_v1 = vpop.f32.mrf.mxu3 }
 0x1ac   : > { %v3163_v9 = vadd.f32 %v3162_v1, %v6028_v17 }
 0x1ad   : > { %v3143_v51 = vpop.f32.mrf.mxu2 }
 0x1ae   : > { %v3144_v10 = vadd.f32 %v3143_v51, %v3115_v58  ;;  %v3213_v14 = vpop.f32.mrf.mxu1  ;;  %v3192_v15 = vadd.f32 %v3191_v59, %v3163_v9  ;;  %v5048_v58 = vld [vmem:[%s5463_s26 + $0x280] sm:$0xf0] }
 0x1af   : > { %v3214_v18 = vadd.f32 %v3213_v14, %v3185_v12  ;;  %v3883_v12 = vld [vmem:[%s5463_s26 + $0x140] sm:$0xf] }
 0x1b0   : > { %v3194_v61 = vpop.f32.mrf.mxu0  ;;  %3396 = vmatmul.bf16.gmra.mxu3 %v3980_v49  ;;  %v3884_v39 = vor.u32 %v5021_v23, %v3883_v12 }
 0x1b1   : > { %3449 = vmatmul.bf16.vlgmr.msra.gmra.mxu1 %v3880_v45 }
 0x1b2   : > { %3473 = vmatmul.bf16.vlgmr.msra.gmra.mxu2 %v3776_v11 }
 0x1b3   : > { %3425 = vmatmul.bf16.gmra.mxu0 %v3984_v13  ;;  %v3165_v17 = vpop.f32.mrf.mxu3 }
 0x1b4   : > { %v3166_v5 = vadd.f32 %v3165_v17, %v3137_v30 }
 0x1b5   : > { %v3242_v21 = vpop.f32.mrf.mxu2 }
 0x1b6   : > { %v6052_v24 = vadd.f32 %v3242_v21, %v3214_v18  ;;  %v3215_v7 = vpop.f32.mrf.mxu1  ;;  %v3195_v60 = vadd.f32 %v3194_v61, %v3166_v5 }
 0x1b7   : > { %v3216_v8 = vadd.f32 %v3215_v7, %v3187_v53 }
 0x1b8   : > { %v3196_v6 = vpop.f32.mrf.mxu0 }
 0x1bb   : > { %v3167_v31 = vpop.f32.mrf.mxu3 }
 0x1bc   : > { %v3168_v20 = vadd.f32 %v3167_v31, %v3139_v46 }
 0x1bd   : > { %v3244_v34 = vpop.f32.mrf.mxu2 }
 0x1be   : > { %v3245_v30 = vadd.f32 %v3244_v34, %v3216_v8  ;;  %v3218_v35 = vpop.f32.mrf.mxu1  ;;  %v3197_v26 = vadd.f32 %v3196_v6, %v3168_v20 }
 0x1bf   : > { %v3219_v25 = vadd.f32 %v3218_v35, %v3190_v56  ;;  %v3991_v56 = vld [vmem:[%s5463_s26 + $0x218] sm:$0xf] }
 0x1c0   : > { %v3199_v44 = vpop.f32.mrf.mxu0  ;;  %3401 = vmatmul.bf16.gmra.mxu3 %v4088_v36  ;;  %v3992_v1 = vor.u32 %v5048_v58, %v3991_v56 }
 0x1c1   : > { %3454 = vmatmul.bf16.gmra.mxu1 %v3988_v38 }
 0x1c2   : > { %3478 = vmatmul.bf16.gmra.mxu2 %v3884_v39 }
 0x1c3   : > { %3430 = vmatmul.bf16.gmra.mxu0 %v4092_v40  ;;  %v3170_v46 = vpop.f32.mrf.mxu3 }
 0x1c4   : > { %v3171_v3 = vadd.f32 %v3170_v46, %v3142_v29  ;;  %v4096_v29 = vor.u32 %v5061_v48, %v4093_v43 }
 0x1c5   : > { %v3247_v47 = vpop.f32.mrf.mxu2 }
 0x1c6   : > { %v3248_v50 = vadd.f32 %v3247_v47, %v3219_v25  ;;  %v3220_v37 = vpop.f32.mrf.mxu1  ;;  %v3200_v53 = vadd.f32 %v3199_v44, %v3171_v3 }
 0x1c7   : > { %v3221_v32 = vadd.f32 %v3220_v37, %v3192_v15 }
 0x1c8   : > { %v3201_v33 = vpop.f32.mrf.mxu0 }
 0x1cb   : > { %v3172_v59 = vpop.f32.mrf.mxu3 }
 0x1cc   : > { %v3173_v42 = vadd.f32 %v3172_v59, %v3144_v10 }
 0x1cd   : > { %v3249_v63 = vpop.f32.mrf.mxu2 }
 0x1ce   : > { %v3250_v55 = vadd.f32 %v3249_v63, %v3221_v32  ;;  %v3223_v2 = vpop.f32.mrf.mxu1  ;;  %v3202_v51 = vadd.f32 %v3201_v33, %v3173_v42 }
 0x1cf   : > { %v3224_v9 = vadd.f32 %v3223_v2, %v3195_v60 }
 0x1d0   : > { %v3300_v49 = vpop.f32.mrf.mxu0  ;;  %3488 = vmatmul.bf16.vlgmr.msrb.gmra.mxu3 %v4100_v0 }
 0x1d1   : > { %3459 = vmatmul.bf16.gmra.mxu1 %v4096_v29 }
 0x1d2   : > { %3483 = vmatmul.bf16.gmra.mxu2 %v3992_v1 }
 0x1d3   : > { %3444 = vmatmul.bf16.vlgmr.msrb.gmra.mxu0 %v3772_v4  ;;  %v3271_v45 = vpop.f32.mrf.mxu3 }
 0x1d4   : > { %v3272_v14 = vadd.f32 %v3271_v45, %v6052_v24 }
 0x1d5   : > { %v3252_v11 = vpop.f32.mrf.mxu2 }
 0x1d6   : > { %v3253_v13 = vadd.f32 %v3252_v11, %v3224_v9  ;;  %v3225_v10 = vpop.f32.mrf.mxu1  ;;  %v3301_v15 = vadd.f32 %v3300_v49, %v3272_v14 }
 0x1d7   : > { %v3226_v61 = vadd.f32 %v3225_v10, %v3197_v26 }
 0x1d8   : > { %v3302_v18 = vpop.f32.mrf.mxu0 }
 0x1db   : > { %v3273_v17 = vpop.f32.mrf.mxu3 }
 0x1dc   : > { %v3274_v21 = vadd.f32 %v3273_v17, %v3245_v30 }
 0x1dd   : > { %v3254_v5 = vpop.f32.mrf.mxu2 }
 0x1de   : > { %v3255_v7 = vadd.f32 %v3254_v5, %v3226_v61  ;;  %v3228_v6 = vpop.f32.mrf.mxu1  ;;  %v3303_v60 = vadd.f32 %v3302_v18, %v3274_v21 }
 0x1df   : > { %v3229_v8 = vadd.f32 %v3228_v6, %v3200_v53 }
 0x1e0   : > { %v3305_v16 = vpop.f32.mrf.mxu0 }
 0x1e3   : > { %v3276_v27 = vpop.f32.mrf.mxu3 }
 0x1e4   : > { %v3277_v22 = vadd.f32 %v3276_v27, %v3248_v50 }
 0x1e5   : > { %v3257_v28 = vpop.f32.mrf.mxu2 }
 0x1e6   : > { %v3258_v12 = vadd.f32 %v3257_v28, %v3229_v8  ;;  %v3230_v23 = vpop.f32.mrf.mxu1  ;;  %v3306_v31 = vadd.f32 %v3305_v16, %v3277_v22 }
 0x1e7   : > { %v3231_v24 = vadd.f32 %v3230_v23, %v3202_v51 }
 0x1e8   : > { %v3307_v19 = vpop.f32.mrf.mxu0 }
 0x1eb   : > { %v3278_v57 = vpop.f32.mrf.mxu3 }
 0x1ec   : > { %v3279_v34 = vadd.f32 %v3278_v57, %v3250_v55 }
 0x1ed   : > { %v3259_v20 = vpop.f32.mrf.mxu2 }
 0x1ee   : > { %v3260_v36 = vadd.f32 %v3259_v20, %v3231_v24  ;;  %v3329_v38 = vpop.f32.mrf.mxu1  ;;  %v3308_v39 = vadd.f32 %v3307_v19, %v3279_v34 }
 0x1ef   : > { %v3330_v35 = vadd.f32 %v3329_v38, %v3301_v15 }
 0x1f0   : > { %v3310_v30 = vpop.f32.mrf.mxu0 }
 0x1f3   : > { %v3281_v40 = vpop.f32.mrf.mxu3 }
 0x1f4   : > { %v3282_v26 = vadd.f32 %v3281_v40, %v3253_v13 }
 0x1f5   : > { %v3358_v44 = vpop.f32.mrf.mxu2 }
 0x1f6   : > { %v3359_v25 = vadd.f32 %v3358_v44, %v3330_v35  ;;  %v3331_v46 = vpop.f32.mrf.mxu1  ;;  %v3311_v3 = vadd.f32 %v3310_v30, %v3282_v26 }
 0x1f7   : > { %v3332_v50 = vadd.f32 %v3331_v46, %v3303_v60 }
 0x1f8   : > { %v3312_v47 = vpop.f32.mrf.mxu0 }
 0x1fb   : > { %v3283_v37 = vpop.f32.mrf.mxu3 }
 0x1fc   : > { %v3284_v53 = vadd.f32 %v3283_v37, %v3255_v7 }
 0x1fd   : > { %v3360_v33 = vpop.f32.mrf.mxu2 }
 0x1fe   : > { %v6071_v32 = vadd.f32 %v3360_v33, %v3332_v50  ;;  %v3334_v48 = vpop.f32.mrf.mxu1  ;;  %v6073_v54 = vadd.f32 %v3312_v47, %v3284_v53 }
 0x1ff   : > { %v3335_v43 = vadd.f32 %v3334_v48, %v3306_v31 }
 0x200   : > { %v3315_v52 = vpop.f32.mrf.mxu0 }
 0x203   : > { %v3286_v56 = vpop.f32.mrf.mxu3 }
 0x204   : > { %v3287_v58 = vadd.f32 %v3286_v56, %v3258_v12 }
 0x205   : > { %v3363_v59 = vpop.f32.mrf.mxu2 }
 0x206   : > { %v3364_v41 = vadd.f32 %v3363_v59, %v3335_v43  ;;  %v3336_v62 = vpop.f32.mrf.mxu1  ;;  %v3316_v42 = vadd.f32 %v3315_v52, %v3287_v58 }
 0x207   : > { %v3337_v20 = vadd.f32 %v3336_v62, %v3308_v39 }
 0x208   : > { %v3317_v63 = vpop.f32.mrf.mxu0 }
 0x20b   : > { %v3288_v0 = vpop.f32.mrf.mxu3 }
 0x20c   : > { %v3289_v55 = vadd.f32 %v3288_v0, %v3260_v36 }
 0x20d   : > { %v3365_v29 = vpop.f32.mrf.mxu2 }
 0x20e   : > { %v3339_v1 = vpop.f32.mrf.mxu1  ;;  %v3318_v2 = vadd.f32 %v3317_v63, %v3289_v55  ;;  %v3366_v34 = vadd.f32 %v3365_v29, %v3337_v20 }
 0x20f   : > { %v3340_v4 = vadd.f32 %v3339_v1, %v3311_v3 }
 0x210   : > { %v3416_v51 = vpop.f32.mrf.mxu0 }
 0x213   : > { %v3387_v9 = vpop.f32.mrf.mxu3 }
 0x214   : > { %v3388_v45 = vadd.f32 %v3387_v9, %v3359_v25 }
 0x215   : > { %v3368_v49 = vpop.f32.mrf.mxu2 }
 0x216   : > { %v3369_v11 = vadd.f32 %v3368_v49, %v3340_v4  ;;  %v3341_v14 = vpop.f32.mrf.mxu1  ;;  %v3417_v13 = vadd.f32 %v3416_v51, %v3388_v45 }
 0x217   : > { %v3342_v59 = vadd.f32 %v3341_v14, %v6073_v54 }
 0x218   : > { %v3418_v10 = vpop.f32.mrf.mxu0 }
 0x21b   : > { %v3389_v15 = vpop.f32.mrf.mxu3 }
 0x21c   : > { %v3390_v62 = vadd.f32 %v3389_v15, %v6071_v32 }
 0x21d   : > { %v3370_v61 = vpop.f32.mrf.mxu2 }
 0x21e   : > { %v3344_v18 = vpop.f32.mrf.mxu1  ;;  %v3419_v49 = vadd.f32 %v3418_v10, %v3390_v62 }
 0x21f   : > { %v3345_v33 = vadd.f32 %v3344_v18, %v3316_v42  ;;  %v3371_v42 = vadd.f32 %v3370_v61, %v3342_v59 }
 0x220   : > { %v3421_v17 = vpop.f32.mrf.mxu0 }
 0x223   : > { %v3392_v5 = vpop.f32.mrf.mxu3 }
 0x224   : > { %v3393_v36 = vadd.f32 %v3392_v5, %v3364_v41 }
 0x225   : > { %v3373_v21 = vpop.f32.mrf.mxu2 }
 0x226   : > { %v3346_v7 = vpop.f32.mrf.mxu1  ;;  %v3422_v26 = vadd.f32 %v3421_v17, %v3393_v36  ;;  %v3374_v56 = vadd.f32 %v3373_v21, %v3345_v33 }
 0x227   : > { %v3347_v58 = vadd.f32 %v3346_v7, %v3318_v2 }
 0x228   : > { %v3423_v6 = vpop.f32.mrf.mxu0 }
 0x22b   : > { %v3394_v60 = vpop.f32.mrf.mxu3 }
 0x22c   : > { %v3395_v35 = vadd.f32 %v3394_v60, %v3366_v34 }
 0x22d   : > { %v3375_v8 = vpop.f32.mrf.mxu2 }
 0x22e   : > { %v3450_v16 = vpop.f32.mrf.mxu1  ;;  %v3424_v46 = vadd.f32 %v3423_v6, %v3395_v35  ;;  %v3376_v63 = vadd.f32 %v3375_v8, %v3347_v58 }
 0x22f   : > { %v3451_v25 = vadd.f32 %v3450_v16, %v3422_v26 }
 0x230   : > { %v3426_v27 = vpop.f32.mrf.mxu0 }
 0x233   : > { %v3397_v28 = vpop.f32.mrf.mxu3 }
 0x234   : > { %v3398_v55 = vadd.f32 %v3397_v28, %v3369_v11 }
 0x235   : > { %v3474_v22 = vpop.f32.mrf.mxu2 }
 0x236   : > { %v3452_v12 = vpop.f32.mrf.mxu1  ;;  %v3427_v45 = vadd.f32 %v3426_v27, %v3398_v55 }
 0x237   : > { %v3453_v3 = vadd.f32 %v3452_v12, %v3424_v46 }
 0x238   : > { %v3428_v23 = vpop.f32.mrf.mxu0 }
 0x23b   : > { %v3399_v31 = vpop.f32.mrf.mxu3 }
 0x23c   : > { %v3400_v51 = vadd.f32 %v3399_v31, %v3371_v42 }
 0x23d   : > { %v3476_v24 = vpop.f32.mrf.mxu2 }
 0x23e   : > { %v3455_v19 = vpop.f32.mrf.mxu1  ;;  %v3429_v15 = vadd.f32 %v3428_v23, %v3400_v51 }
 0x23f   : > { %v3456_v32 = vadd.f32 %v3455_v19, %v3427_v45 }
 0x240   : > { %v3431_v57 = vpop.f32.mrf.mxu0 }
 0x243   : > { %v3402_v38 = vpop.f32.mrf.mxu3 }
 0x244   : > { %v3403_v0 = vadd.f32 %v3402_v38, %v3374_v56 }
 0x245   : > { %v3479_v30 = vpop.f32.mrf.mxu2 }
 0x246   : > { %v3457_v40 = vpop.f32.mrf.mxu1  ;;  %v3480_v47 = vadd.f32 %v3479_v30, %v3451_v25  ;;  %v3432_v9 = vadd.f32 %v3431_v57, %v3403_v0 }
 0x247   : > { %v3458_v6 = vadd.f32 %v3457_v40, %v3429_v15 }
 0x248   : > { %v3433_v44 = vpop.f32.mrf.mxu0  ;;  %v3496_v52 = vmax.f32 %v3480_v47, 0.0 }
 0x24b   : > { %v3404_v50 = vpop.f32.mrf.mxu3 }
 0x24c   : > { %v3405_v1 = vadd.f32 %v3404_v50, %v3376_v63 }
 0x24d   : > { %v3481_v37 = vpop.f32.mrf.mxu2 }
 0x24e   : > { %v3482_v53 = vadd.f32 %v3481_v37, %v3453_v3  ;;  %v3460_v48 = vpop.f32.mrf.mxu1  ;;  %v3434_v21 = vadd.f32 %v3433_v44, %v3405_v1 }
 0x24f   : > { %v3461_v54 = vadd.f32 %v3460_v48, %v3432_v9 }
 0x250   : > { %v3497_v39 = vmax.f32 %v3482_v53, 0.0  ;;  %v3445_v43 = vpop.f32.mrf.mxu0 }
 0x251   : > { %v3446_v4 = vadd.f32 %v3445_v43, %v3417_v13 }
 0x252   : > { %v5300_v41 = vpack.c.bf16 %v3497_v39, %v3496_v52 }
 0x253   : > { %v3489_v29 = vpop.f32.mrf.mxu3  ;;  %v3475_v5 = vadd.f32 %v3474_v22, %v3446_v4 }
 0x254   : > { %5312 = vst [vmem:[%s6079_s5 + $0x8] sm:$0xff] %v5300_v41   ;;  %v3490_v7 = vadd.f32 %v3489_v29, %v3461_v54 }
 0x255   : > { %v3484_v2 = vpop.f32.mrf.mxu2  ;;  %v3494_v8 = vmax.f32 %v3475_v5, 0.0 }
 0x256   : > { %v3462_v17 = vpop.f32.mrf.mxu1  ;;  %v3485_v13 = vadd.f32 %v3484_v2, %v3456_v32  ;;  %v3500_v22 = vmax.f32 %v3490_v7, 0.0 }
 0x257   : > { %v3463_v61 = vadd.f32 %v3462_v17, %v3434_v21 }
 0x258   : > { %v3447_v18 = vpop.f32.mrf.mxu0  ;;  %v3498_v57 = vmax.f32 %v3485_v13, 0.0 }
 0x259   : > { %v3448_v14 = vadd.f32 %v3447_v18, %v3419_v49 }
 0x25b   : > { %v3477_v11 = vadd.f32 %v3476_v24, %v3448_v14  ;;  %v3491_v60 = vpop.f32.mrf.mxu3 }
 0x25c   : > { %v3492_v27 = vadd.f32 %v3491_v60, %v3463_v61 }
 0x25d   : > { %v3495_v10 = vmax.f32 %v3477_v11, 0.0  ;;  %v3486_v16 = vpop.f32.mrf.mxu2 }
 0x25e   : > { %v3487_v28 = vadd.f32 %v3486_v16, %v3458_v6  ;;  %v3501_v31 = vmax.f32 %v3492_v27, 0.0 }
 0x25f   : > { %v5295_v12 = vpack.c.bf16 %v3495_v10, %v3494_v8 }
 0x260   : > { %v3499_v19 = vmax.f32 %v3487_v28, 0.0  ;;  %v5310_v23 = vpack.c.bf16 %v3501_v31, %v3500_v22 }
 0x261   : > { %5296 = vst [vmem:[%s6079_s5] sm:$0xff] %v5295_v12  }
 0x262   : > { %v5305_v20 = vpack.c.bf16 %v3499_v19, %v3498_v57  ;;  %5314 = vst [vmem:[%s6079_s5 + $0x18] sm:$0xff] %v5310_v23  }
 0x264   : > { %5313 = vst [vmem:[%s6079_s5 + $0x10] sm:$0xff] %v5305_v20  }
 0x265 PF: > { %s13_s14 = sadd.s32 1, %s5388_s14   ;;  %s6100_s12 = smov %s5384_s13 }
 0x266   : > { %p10_p5 = scmp.ge.s32.totalorder %s13_s14, 4   ;;  %s6101_s13 = smov %s6103_s15 }
 0x268   :  { %12 = sbr.rel (!%p10_p5) target bundleno = 2 (0x2), region = 68 }

// kernel: _lambda_.55
= control target key start
LH: loop header
LB: loop body
LE: loop exit
PB: predicated region body
PF: predicated region fallthrough
CT: control target
= control target key end

     0   :  { %s218_s1 = inlined_call_operand.vmem [shape: bf16[1,128,128], index: 1, kind: input, shape index: {}]   ;;  %s219_s2 = inlined_call_operand.vmem [shape: f32[1,1,128], index: 2, kind: input, shape index: {}]   ;;  %s220_s0 = inlined_call_operand.vmem [shape: bf16[1,16,128], index: 0, kind: input, shape index: {}]   ;;  %s221_s3 = inlined_call_operand.vmem [shape: bf16[1,16,128], index: 3, kind: output, shape index: {}]  }
   0x1   :  { %v158_v0 = vld [vmem:[%s218_s1 + $0x38] sm:$0xff]  ;;  %v157_v1 = vld [vmem:[%s218_s1 + $0x30] sm:$0xff]  ;;  %v156_v2 = vld [vmem:[%s218_s1 + $0x28] sm:$0xff] }
   0x2   :  { %90 = vmatpush.bf16.msra.mxu0 %v158_v0  ;;  %v155_v3 = vld [vmem:[%s218_s1 + $0x20] sm:$0xff]  ;;  %v154_v4 = vld [vmem:[%s218_s1 + $0x18] sm:$0xff]  ;;  %v153_v5 = vld [vmem:[%s218_s1 + $0x10] sm:$0xff] }
   0x3   :  { %v152_v6 = vld [vmem:[%s218_s1 + $0x8] sm:$0xff]  ;;  %v151_v7 = vld [vmem:[%s218_s1] sm:$0xff] }
   0x4   :  { %v150_v8 = vld [vmem:[%s220_s0] sm:$0xff] }
   0x5   :  { %v164_v10 = vld [vmem:[%s219_s2] ss:$0 sm:$0xff] }
   0x6   :  { %91 = vmatpush.bf16.msra.mxu0 %v157_v1 }
   0xa   :  { %92 = vmatpush.bf16.msra.mxu0 %v156_v2 }
   0xe   :  { %93 = vmatpush.bf16.msra.mxu0 %v155_v3 }
  0x12   :  { %94 = vmatpush.bf16.msra.mxu0 %v154_v4 }
  0x16   :  { %95 = vmatpush.bf16.msra.mxu0 %v153_v5 }
  0x1a   :  { %96 = vmatpush.bf16.msra.mxu0 %v152_v6 }
  0x1e   :  { %97 = vmatpush.bf16.msra.mxu0 %v151_v7 }
  0x21   :  { %98 = vmatmul.bf16.vlgmr.msra.gmra.mxu0 %v150_v8 }
  0x9e   :  { %v99_v9 = vpop.f32.mrf.mxu0 }
  0x9f   :  { %v100_v11 = vadd.f32 %v164_v10, %v99_v9 }
  0xa1   :  { %v104_v14 = vmax.f32 %v100_v11, 0.0 }
  0xa6   :  { %v101_v12 = vpop.f32.mrf.mxu0 }
  0xa7   :  { %v102_v13 = vadd.f32 %v164_v10, %v101_v12 }
  0xa9   :  { %v105_v15 = vmax.f32 %v102_v13, 0.0 }
  0xab   :  { %v162_v16 = vpack.c.bf16 %v105_v15, %v104_v14 }
  0xad   :  { %163 = vst [vmem:[%s221_s3] sm:$0xff] %v162_v16  }

// kernel: _lambda_.59
= control target key start
LH: loop header
LB: loop body
LE: loop exit
PB: predicated region body
PF: predicated region fallthrough
CT: control target
= control target key end

     0   :  { %8 = vsyncpa [#allocation3], 0  ;;  %s421_s0 = inlined_call_operand.vmem [shape: bf16[1,64,128], index: 0, kind: input, shape index: {}]   ;;  %s422_s1 = inlined_call_operand.hbm [shape: bf16[1,128,128], index: 1, kind: input, shape index: {}]   ;;  %s423_s2 = inlined_call_operand.hbm [shape: f32[1,1,128], index: 2, kind: input, shape index: {}]   ;;  %s424_s3 = inlined_call_operand.vmem [shape: bf16[1,64,128], index: 3, kind: output, shape index: {}]  }
   0x1   :  { %s16_s14 = sshll.u32 %s422_s1, 4  ;;  %s17_s14 = int_to_ptr.hbm [resolvable:$true] %s16_s14 }
   0x2   :  { %9 = vsyncpa [#allocation5], 0  ;;  %s367_s15 = smov [#allocation2]   ;;  %s30_s19 = sshll.u32 %s423_s2, 4  ;;  %s31_s19 = int_to_ptr.hbm [resolvable:$true] %s30_s19 }
   0x3   :  { %s18_s16 = sshll.u32 %s367_s15, 4  ;;  %s368_s20 = smov 64   ;;  %s19_s16 = int_to_ptr.vmem [resolvable:$true] %s18_s16 }
   0x4   :  { %s369_s21 = smov 4   ;;  %s370_s22 = smov [#allocation4]  }
   0x5   :  { %24 = dma.hbm_to_vmem [thread:$0]  %s17_s14, 1024, %s19_s16, [#allocation3], %s368_s20, %s368_s20, %s369_s21  }
   0x6   :  { %s32_s23 = sshll.u32 %s370_s22, 4  ;;  %s33_s23 = int_to_ptr.vmem [resolvable:$true] %s32_s23 }
   0x7   :  { %35 = dma.hbm_to_vmem [thread:$0]  %s31_s19, 16, %s33_s23, [#allocation5]  }
   0x8   :  { %363 = dma.done.wait [#allocation3], 1024  }
   0x9   :  { %364 = vsyncadd [#allocation3], 4294966272 }
   0xa   :  { %365 = dma.done.wait [#allocation5], 16  }
   0xb   :  { %366 = vsyncadd [#allocation5], 4294967280  ;;  %v262_v0 = vld [vmem:[#allocation2 + $0x38] sm:$0xff]  ;;  %v261_v1 = vld [vmem:[#allocation2 + $0x30] sm:$0xff] }
   0xc   :  { %144 = vmatpush.bf16.msra.mxu0 %v262_v0  ;;  %286 = vmatpush.bf16.msra.mxu1 %v262_v0  ;;  %v260_v2 = vld [vmem:[#allocation2 + $0x28] sm:$0xff]  ;;  %v259_v3 = vld [vmem:[#allocation2 + $0x20] sm:$0xff]  ;;  %v258_v4 = vld [vmem:[#allocation2 + $0x18] sm:$0xff] }
   0xd   :  { %287 = vmatpush.bf16.msra.mxu2 %v262_v0  ;;  %288 = vmatpush.bf16.msra.mxu3 %v262_v0  ;;  %v257_v5 = vld [vmem:[#allocation2 + $0x10] sm:$0xff]  ;;  %v256_v6 = vld [vmem:[#allocation2 + $0x8] sm:$0xff]  ;;  %v255_v7 = vld [vmem:[#allocation2] sm:$0xff] }
   0xe   :  { %v251_v8 = vld [vmem:[%s421_s0] sm:$0xff]  ;;  %v252_v9 = vld [vmem:[%s421_s0 + $0x8] sm:$0xff]  ;;  %v253_v10 = vld [vmem:[%s421_s0 + $0x10] sm:$0xff] }
   0xf   :  { %v254_v11 = vld [vmem:[%s421_s0 + $0x18] sm:$0xff]  ;;  %v314_v14 = vld [vmem:[#allocation4] ss:$0 sm:$0xff] }
  0x10   :  { %145 = vmatpush.bf16.msra.mxu0 %v261_v1  ;;  %289 = vmatpush.bf16.msra.mxu1 %v261_v1 }
  0x11   :  { %290 = vmatpush.bf16.msra.mxu2 %v261_v1  ;;  %291 = vmatpush.bf16.msra.mxu3 %v261_v1 }
  0x14   :  { %146 = vmatpush.bf16.msra.mxu0 %v260_v2  ;;  %292 = vmatpush.bf16.msra.mxu1 %v260_v2 }
  0x15   :  { %293 = vmatpush.bf16.msra.mxu2 %v260_v2  ;;  %294 = vmatpush.bf16.msra.mxu3 %v260_v2 }
  0x18   :  { %147 = vmatpush.bf16.msra.mxu0 %v259_v3  ;;  %295 = vmatpush.bf16.msra.mxu1 %v259_v3 }
  0x19   :  { %296 = vmatpush.bf16.msra.mxu2 %v259_v3  ;;  %297 = vmatpush.bf16.msra.mxu3 %v259_v3 }
  0x1c   :  { %148 = vmatpush.bf16.msra.mxu0 %v258_v4  ;;  %298 = vmatpush.bf16.msra.mxu1 %v258_v4 }
  0x1d   :  { %299 = vmatpush.bf16.msra.mxu2 %v258_v4  ;;  %300 = vmatpush.bf16.msra.mxu3 %v258_v4 }
  0x20   :  { %149 = vmatpush.bf16.msra.mxu0 %v257_v5  ;;  %301 = vmatpush.bf16.msra.mxu1 %v257_v5 }
  0x21   :  { %302 = vmatpush.bf16.msra.mxu2 %v257_v5  ;;  %303 = vmatpush.bf16.msra.mxu3 %v257_v5 }
  0x24   :  { %150 = vmatpush.bf16.msra.mxu0 %v256_v6  ;;  %304 = vmatpush.bf16.msra.mxu1 %v256_v6 }
  0x25   :  { %305 = vmatpush.bf16.msra.mxu2 %v256_v6  ;;  %306 = vmatpush.bf16.msra.mxu3 %v256_v6 }
  0x28   :  { %151 = vmatpush.bf16.msra.mxu0 %v255_v7  ;;  %307 = vmatpush.bf16.msra.mxu1 %v255_v7 }
  0x29   :  { %308 = vmatpush.bf16.msra.mxu2 %v255_v7  ;;  %309 = vmatpush.bf16.msra.mxu3 %v255_v7 }
  0x2b   :  { %152 = vmatmul.bf16.vlgmr.msra.gmra.mxu0 %v251_v8  ;;  %157 = vmatmul.bf16.vlgmr.msra.gmra.mxu1 %v252_v9 }
  0x2c   :  { %162 = vmatmul.bf16.vlgmr.msra.gmra.mxu2 %v253_v10  ;;  %167 = vmatmul.bf16.vlgmr.msra.gmra.mxu3 %v254_v11 }
  0xa8   :  { %v153_v12 = vpop.f32.mrf.mxu0  ;;  %v158_v13 = vpop.f32.mrf.mxu1 }
  0xa9   :  { %v154_v15 = vadd.f32 %v314_v14, %v153_v12  ;;  %v159_v16 = vadd.f32 %v314_v14, %v158_v13 }
  0xab   :  { %v173_v23 = vmax.f32 %v154_v15, 0.0  ;;  %v175_v24 = vmax.f32 %v159_v16, 0.0 }
  0xaf   :  { %v163_v17 = vpop.f32.mrf.mxu2  ;;  %v168_v18 = vpop.f32.mrf.mxu3 }
  0xb0   :  { %v155_v19 = vpop.f32.mrf.mxu0  ;;  %v160_v20 = vpop.f32.mrf.mxu1  ;;  %v164_v29 = vadd.f32 %v314_v14, %v163_v17  ;;  %v169_v30 = vadd.f32 %v314_v14, %v168_v18 }
  0xb1   :  { %v156_v21 = vadd.f32 %v314_v14, %v155_v19  ;;  %v161_v22 = vadd.f32 %v314_v14, %v160_v20 }
  0xb2   :  { %v177_v35 = vmax.f32 %v164_v29, 0.0  ;;  %v179_v36 = vmax.f32 %v169_v30, 0.0 }
  0xb3   :  { %v174_v25 = vmax.f32 %v156_v21, 0.0  ;;  %v176_v26 = vmax.f32 %v161_v22, 0.0 }
  0xb5   :  { %v266_v27 = vpack.c.bf16 %v174_v25, %v173_v23  ;;  %v271_v28 = vpack.c.bf16 %v176_v26, %v175_v24 }
  0xb7   :  { %267 = vst [vmem:[%s424_s3] sm:$0xff] %v266_v27   ;;  %v165_v31 = vpop.f32.mrf.mxu2  ;;  %v170_v32 = vpop.f32.mrf.mxu3 }
  0xb8   :  { %283 = vst [vmem:[%s424_s3 + $0x8] sm:$0xff] %v271_v28   ;;  %v166_v33 = vadd.f32 %v314_v14, %v165_v31  ;;  %v171_v34 = vadd.f32 %v314_v14, %v170_v32 }
  0xba   :  { %v178_v37 = vmax.f32 %v166_v33, 0.0  ;;  %v180_v38 = vmax.f32 %v171_v34, 0.0 }
  0xbc   :  { %v276_v39 = vpack.c.bf16 %v178_v37, %v177_v35  ;;  %v281_v40 = vpack.c.bf16 %v180_v38, %v179_v36 }
  0xbe   :  { %284 = vst [vmem:[%s424_s3 + $0x10] sm:$0xff] %v276_v39  }
  0xbf   :  { %285 = vst [vmem:[%s424_s3 + $0x18] sm:$0xff] %v281_v40  }
  0xc0   :  { %201 = vsyncpa [#allocation3], 1 }
  0xc1   :  { %202 = vsyncpa [#allocation5], 1 }

// kernel: _lambda_.60
= control target key start
LH: loop header
LB: loop body
LE: loop exit
PB: predicated region body
PF: predicated region fallthrough
CT: control target
= control target key end

     0   :  { %8 = vsyncpa [#allocation3], 0  ;;  %s531_s15 = smov [#allocation2]   ;;  %s669_s0 = inlined_call_operand.vmem [shape: bf16[1,32,384], index: 0, kind: input, shape index: {}]   ;;  %s670_s1 = inlined_call_operand.vmem [shape: bf16[1,384,128], index: 1, kind: input, shape index: {}]   ;;  %s671_s2 = inlined_call_operand.hbm [shape: f32[1,1,128], index: 2, kind: input, shape index: {}]   ;;  %s672_s3 = inlined_call_operand.vmem [shape: bf16[1,32,128], index: 3, kind: output, shape index: {}]  }
   0x1   :  { %s18_s14 = sshll.u32 %s671_s2, 4  ;;  %s20_s16 = sshll.u32 %s531_s15, 4  ;;  %s19_s14 = int_to_ptr.hbm [resolvable:$true] %s18_s14  ;;  %s21_s16 = int_to_ptr.vmem [resolvable:$true] %s20_s16 }
   0x2   :  { %23 = dma.hbm_to_vmem [thread:$0]  %s19_s14, 16, %s21_s16, [#allocation3]  }
   0x3   :  { %529 = dma.done.wait [#allocation3], 16  }
   0x4   :  { %530 = vsyncadd [#allocation3], 4294967280  ;;  %v467_v0 = vld [vmem:[%s670_s1 + $0x38] sm:$0xff]  ;;  %v466_v3 = vld [vmem:[%s670_s1 + $0x30] sm:$0xff] }
   0x5   :  { %v475_v1 = vld [vmem:[%s670_s1 + $0x78] sm:$0xff]  ;;  %264 = vmatpush.bf16.msra.mxu0 %v467_v0  ;;  %v474_v4 = vld [vmem:[%s670_s1 + $0x70] sm:$0xff]  ;;  %495 = vmatpush.bf16.msra.mxu3 %v467_v0  ;;  %v465_v6 = vld [vmem:[%s670_s1 + $0x28] sm:$0xff] }
   0x6   :  { %v483_v2 = vld [vmem:[%s670_s1 + $0xb8] sm:$0xff]  ;;  %283 = vmatpush.bf16.msra.mxu1 %v475_v1  ;;  %v482_v5 = vld [vmem:[%s670_s1 + $0xb0] sm:$0xff]  ;;  %v473_v7 = vld [vmem:[%s670_s1 + $0x68] sm:$0xff] }
   0x7   :  { %302 = vmatpush.bf16.msra.mxu2 %v483_v2  ;;  %v481_v8 = vld [vmem:[%s670_s1 + $0xa8] sm:$0xff]  ;;  %v464_v9 = vld [vmem:[%s670_s1 + $0x20] sm:$0xff]  ;;  %v463_v12 = vld [vmem:[%s670_s1 + $0x18] sm:$0xff] }
   0x8   :  { %v472_v10 = vld [vmem:[%s670_s1 + $0x60] sm:$0xff]  ;;  %v471_v13 = vld [vmem:[%s670_s1 + $0x58] sm:$0xff]  ;;  %v462_v15 = vld [vmem:[%s670_s1 + $0x10] sm:$0xff] }
   0x9   :  { %265 = vmatpush.bf16.msra.mxu0 %v466_v3  ;;  %496 = vmatpush.bf16.msra.mxu3 %v466_v3  ;;  %v480_v11 = vld [vmem:[%s670_s1 + $0xa0] sm:$0xff]  ;;  %v479_v14 = vld [vmem:[%s670_s1 + $0x98] sm:$0xff]  ;;  %v470_v16 = vld [vmem:[%s670_s1 + $0x50] sm:$0xff] }
   0xa   :  { %284 = vmatpush.bf16.msra.mxu1 %v474_v4  ;;  %v478_v17 = vld [vmem:[%s670_s1 + $0x90] sm:$0xff]  ;;  %v461_v18 = vld [vmem:[%s670_s1 + $0x8] sm:$0xff]  ;;  %v460_v21 = vld [vmem:[%s670_s1] sm:$0xff] }
   0xb   :  { %303 = vmatpush.bf16.msra.mxu2 %v482_v5  ;;  %v469_v19 = vld [vmem:[%s670_s1 + $0x48] sm:$0xff]  ;;  %v468_v22 = vld [vmem:[%s670_s1 + $0x40] sm:$0xff]  ;;  %v338_v27 = vld [vmem:[%s669_s0 + $0xc] sm:$0xf0] }
   0xc   :  { %v477_v20 = vld [vmem:[%s670_s1 + $0x88] sm:$0xff]  ;;  %v476_v23 = vld [vmem:[%s670_s1 + $0x80] sm:$0xff]  ;;  %v456_v29 = vld [vmem:[%s669_s0 + $0x10] sm:$0xf0] }
   0xd   :  { %266 = vmatpush.bf16.msra.mxu0 %v465_v6  ;;  %497 = vmatpush.bf16.msra.mxu3 %v465_v6  ;;  %v336_v24 = vld [vmem:[%s669_s0] sm:$0xf]  ;;  %v455_v25 = vld [vmem:[%s669_s0 + $0x8] sm:$0xf0]  ;;  %v454_v26 = vld [vmem:[%s669_s0 + $0x4] sm:$0xf] }
   0xe   :  { %285 = vmatpush.bf16.msra.mxu1 %v473_v7  ;;  %v344_v28 = vld [vmem:[%s669_s0 + $0x8] sm:$0xf]  ;;  %v348_v30 = vld [vmem:[%s669_s0 + $0x18] sm:$0xf]  ;;  %v458_v31 = vld [vmem:[%s669_s0 + $0x20] sm:$0xf0]  ;;  %v337_v32 = vor.u32 %v455_v25, %v336_v24  ;;  %v341_v33 = vor.u32 %v454_v26, %v338_v27 }
   0xf   :  { %304 = vmatpush.bf16.msra.mxu2 %v481_v8  ;;  %v345_v34 = vor.u32 %v456_v29, %v344_v28  ;;  %v349_v35 = vor.u32 %v458_v31, %v348_v30  ;;  %v457_v36 = vld [vmem:[%s669_s0 + $0x1c] sm:$0xf]  ;;  %v350_v37 = vld [vmem:[%s669_s0 + $0x24] sm:$0xf0]  ;;  %v356_v38 = vld [vmem:[%s669_s0 + $0x20] sm:$0xf] }
  0x10   :  { %v459_v39 = vld [vmem:[%s669_s0 + $0x28] sm:$0xf0]  ;;  %v353_v40 = vor.u32 %v457_v36, %v350_v37  ;;  %v504_v44 = vld [vmem:[#allocation2] ss:$0 sm:$0xff] }
  0x11   :  { %267 = vmatpush.bf16.msra.mxu0 %v464_v9  ;;  %498 = vmatpush.bf16.msra.mxu3 %v464_v9  ;;  %v357_v41 = vor.u32 %v459_v39, %v356_v38 }
  0x12   :  { %286 = vmatpush.bf16.msra.mxu1 %v472_v10 }
  0x13   :  { %305 = vmatpush.bf16.msra.mxu2 %v480_v11 }
  0x15   :  { %268 = vmatpush.bf16.msra.mxu0 %v463_v12  ;;  %499 = vmatpush.bf16.msra.mxu3 %v463_v12 }
  0x16   :  { %287 = vmatpush.bf16.msra.mxu1 %v471_v13 }
  0x17   :  { %306 = vmatpush.bf16.msra.mxu2 %v479_v14 }
  0x19   :  { %269 = vmatpush.bf16.msra.mxu0 %v462_v15  ;;  %500 = vmatpush.bf16.msra.mxu3 %v462_v15 }
  0x1a   :  { %288 = vmatpush.bf16.msra.mxu1 %v470_v16 }
  0x1b   :  { %307 = vmatpush.bf16.msra.mxu2 %v478_v17 }
  0x1d   :  { %270 = vmatpush.bf16.msra.mxu0 %v461_v18  ;;  %501 = vmatpush.bf16.msra.mxu3 %v461_v18 }
  0x1e   :  { %289 = vmatpush.bf16.msra.mxu1 %v469_v19 }
  0x1f   :  { %308 = vmatpush.bf16.msra.mxu2 %v477_v20 }
  0x21   :  { %271 = vmatpush.bf16.msra.mxu0 %v460_v21  ;;  %502 = vmatpush.bf16.msra.mxu3 %v460_v21 }
  0x22   :  { %290 = vmatpush.bf16.msra.mxu1 %v468_v22 }
  0x23   :  { %309 = vmatpush.bf16.msra.mxu2 %v476_v23 }
  0x24   :  { %272 = vmatmul.bf16.vlgmr.msra.gmra.mxu0 %v337_v32  ;;  %277 = vmatmul.bf16.vlgmr.msra.gmra.mxu3 %v349_v35 }
  0x25   :  { %291 = vmatmul.bf16.vlgmr.msra.gmra.mxu1 %v341_v33 }
  0x26   :  { %310 = vmatmul.bf16.vlgmr.msra.gmra.mxu2 %v345_v34 }
  0x35   :  { %296 = vmatmul.bf16.gmra.mxu1 %v353_v40 }
  0x36   :  { %315 = vmatmul.bf16.gmra.mxu2 %v357_v41 }
  0xa1   :  { %v273_v42 = vpop.f32.mrf.mxu0 }
  0xa2   :  { %v292_v43 = vpop.f32.mrf.mxu1  ;;  %v274_v46 = vadd.f32 %v504_v44, %v273_v42 }
  0xa4   :  { %v293_v50 = vadd.f32 %v292_v43, %v274_v46 }
  0xa7   :  { %v278_v52 = vpop.f32.mrf.mxu3 }
  0xa8   :  { %v279_v59 = vadd.f32 %v504_v44, %v278_v52 }
  0xa9   :  { %v311_v45 = vpop.f32.mrf.mxu2  ;;  %v275_v47 = vpop.f32.mrf.mxu0 }
  0xaa   :  { %v294_v48 = vpop.f32.mrf.mxu1  ;;  %v276_v49 = vadd.f32 %v504_v44, %v275_v47  ;;  %v312_v54 = vadd.f32 %v311_v45, %v293_v50 }
  0xac   :  { %v295_v51 = vadd.f32 %v294_v48, %v276_v49 }
  0xaf   :  { %v280_v60 = vpop.f32.mrf.mxu3 }
  0xb0   :  { %v281_v63 = vadd.f32 %v504_v44, %v280_v60 }
  0xb1   :  { %v313_v53 = vpop.f32.mrf.mxu2 }
  0xb2   :  { %v314_v55 = vadd.f32 %v313_v53, %v295_v51  ;;  %v297_v56 = vpop.f32.mrf.mxu1 }
  0xb3   :  { %v298_v62 = vadd.f32 %v297_v56, %v279_v59 }
  0xb4   :  { %v487_v57 = vpack.c.bf16 %v314_v55, %v312_v54 }
  0xb6   :  { %488 = vst [vmem:[%s672_s3] sm:$0xff] %v487_v57  }
  0xb9   :  { %v316_v58 = vpop.f32.mrf.mxu2 }
  0xba   :  { %v299_v61 = vpop.f32.mrf.mxu1  ;;  %v317_v2 = vadd.f32 %v316_v58, %v298_v62 }
  0xbb   :  { %v300_v0 = vadd.f32 %v299_v61, %v281_v63 }
  0xc1   :  { %v318_v1 = vpop.f32.mrf.mxu2 }
  0xc2   :  { %v319_v3 = vadd.f32 %v318_v1, %v300_v0 }
  0xc4   :  { %v492_v4 = vpack.c.bf16 %v319_v3, %v317_v2 }
  0xc6   :  { %494 = vst [vmem:[%s672_s3 + $0x8] sm:$0xff] %v492_v4  }
  0xc7   :  { %333 = vsyncpa [#allocation3], 1 }

// kernel: _lambda_.61
= control target key start
LH: loop header
LB: loop body
LE: loop exit
PB: predicated region body
PF: predicated region fallthrough
CT: control target
= control target key end

     0   :  { %8 = vsyncpa [#allocation3], 0  ;;  %s332_s15 = smov [#allocation2]   ;;  %s419_s0 = inlined_call_operand.vmem [shape: bf16[1,16,256], index: 0, kind: input, shape index: {}]   ;;  %s420_s1 = inlined_call_operand.vmem [shape: bf16[1,256,128], index: 1, kind: input, shape index: {}]   ;;  %s421_s2 = inlined_call_operand.hbm [shape: f32[1,1,128], index: 2, kind: input, shape index: {}]   ;;  %s422_s3 = inlined_call_operand.vmem [shape: bf16[1,16,128], index: 3, kind: output, shape index: {}]  }
   0x1   :  { %s18_s14 = sshll.u32 %s421_s2, 4  ;;  %s20_s16 = sshll.u32 %s332_s15, 4  ;;  %s19_s14 = int_to_ptr.hbm [resolvable:$true] %s18_s14  ;;  %s21_s16 = int_to_ptr.vmem [resolvable:$true] %s20_s16 }
   0x2   :  { %23 = dma.hbm_to_vmem [thread:$0]  %s19_s14, 16, %s21_s16, [#allocation3]  }
   0x3   :  { %330 = dma.done.wait [#allocation3], 16  }
   0x4   :  { %331 = vsyncadd [#allocation3], 4294967280  ;;  %v290_v0 = vld [vmem:[%s420_s1 + $0x38] sm:$0xff]  ;;  %v289_v2 = vld [vmem:[%s420_s1 + $0x30] sm:$0xff] }
   0x5   :  { %v298_v1 = vld [vmem:[%s420_s1 + $0x78] sm:$0xff]  ;;  %172 = vmatpush.bf16.msra.mxu0 %v290_v0  ;;  %v297_v3 = vld [vmem:[%s420_s1 + $0x70] sm:$0xff]  ;;  %v288_v4 = vld [vmem:[%s420_s1 + $0x28] sm:$0xff] }
   0x6   :  { %186 = vmatpush.bf16.msra.mxu1 %v298_v1  ;;  %v296_v5 = vld [vmem:[%s420_s1 + $0x68] sm:$0xff]  ;;  %v287_v6 = vld [vmem:[%s420_s1 + $0x20] sm:$0xff]  ;;  %v286_v8 = vld [vmem:[%s420_s1 + $0x18] sm:$0xff] }
   0x7   :  { %v295_v7 = vld [vmem:[%s420_s1 + $0x60] sm:$0xff]  ;;  %v294_v9 = vld [vmem:[%s420_s1 + $0x58] sm:$0xff]  ;;  %v285_v10 = vld [vmem:[%s420_s1 + $0x10] sm:$0xff] }
   0x8   :  { %v293_v11 = vld [vmem:[%s420_s1 + $0x50] sm:$0xff]  ;;  %v284_v12 = vld [vmem:[%s420_s1 + $0x8] sm:$0xff]  ;;  %v283_v14 = vld [vmem:[%s420_s1] sm:$0xff] }
   0x9   :  { %173 = vmatpush.bf16.msra.mxu0 %v289_v2  ;;  %v292_v13 = vld [vmem:[%s420_s1 + $0x48] sm:$0xff]  ;;  %v291_v15 = vld [vmem:[%s420_s1 + $0x40] sm:$0xff] }
   0xa   :  { %187 = vmatpush.bf16.msra.mxu1 %v297_v3  ;;  %v211_v16 = vld [vmem:[%s419_s0] sm:$0xf]  ;;  %v282_v17 = vld [vmem:[%s419_s0 + $0x4] sm:$0xf0]  ;;  %v281_v18 = vld [vmem:[%s419_s0 + $0x4] sm:$0xf] }
   0xb   :  { %v213_v19 = vld [vmem:[%s419_s0 + $0x8] sm:$0xf0]  ;;  %v212_v20 = vor.u32 %v282_v17, %v211_v16  ;;  %v305_v24 = vld [vmem:[#allocation2] ss:$0 sm:$0xff] }
   0xc   :  { %v216_v21 = vor.u32 %v281_v18, %v213_v19 }
   0xd   :  { %174 = vmatpush.bf16.msra.mxu0 %v288_v4 }
   0xe   :  { %188 = vmatpush.bf16.msra.mxu1 %v296_v5 }
  0x11   :  { %175 = vmatpush.bf16.msra.mxu0 %v287_v6 }
  0x12   :  { %189 = vmatpush.bf16.msra.mxu1 %v295_v7 }
  0x15   :  { %176 = vmatpush.bf16.msra.mxu0 %v286_v8 }
  0x16   :  { %190 = vmatpush.bf16.msra.mxu1 %v294_v9 }
  0x19   :  { %177 = vmatpush.bf16.msra.mxu0 %v285_v10 }
  0x1a   :  { %191 = vmatpush.bf16.msra.mxu1 %v293_v11 }
  0x1d   :  { %178 = vmatpush.bf16.msra.mxu0 %v284_v12 }
  0x1e   :  { %192 = vmatpush.bf16.msra.mxu1 %v292_v13 }
  0x21   :  { %179 = vmatpush.bf16.msra.mxu0 %v283_v14 }
  0x22   :  { %193 = vmatpush.bf16.msra.mxu1 %v291_v15 }
  0x24   :  { %180 = vmatmul.bf16.vlgmr.msra.gmra.mxu0 %v212_v20 }
  0x25   :  { %194 = vmatmul.bf16.vlgmr.msra.gmra.mxu1 %v216_v21 }
  0xa1   :  { %v181_v22 = vpop.f32.mrf.mxu0 }
  0xa2   :  { %v195_v23 = vpop.f32.mrf.mxu1  ;;  %v182_v25 = vadd.f32 %v305_v24, %v181_v22 }
  0xa4   :  { %v196_v29 = vadd.f32 %v195_v23, %v182_v25 }
  0xa9   :  { %v183_v26 = vpop.f32.mrf.mxu0 }
  0xaa   :  { %v184_v27 = vadd.f32 %v305_v24, %v183_v26  ;;  %v197_v28 = vpop.f32.mrf.mxu1 }
  0xac   :  { %v198_v30 = vadd.f32 %v197_v28, %v184_v27 }
  0xae   :  { %v302_v31 = vpack.c.bf16 %v198_v30, %v196_v29 }
  0xb0   :  { %303 = vst [vmem:[%s422_s3] sm:$0xff] %v302_v31  }
  0xb1   :  { %208 = vsyncpa [#allocation3], 1 }

// kernel: _lambda_.62
= control target key start
LH: loop header
LB: loop body
LE: loop exit
PB: predicated region body
PF: predicated region fallthrough
CT: control target
= control target key end

     0   :  { %9 = vsyncpa [#allocation3], 0  ;;  %s460_s18 = smov [#allocation2]   ;;  %s579_s0 = inlined_call_operand.vmem [shape: bf16[1,16,384], index: 0, kind: input, shape index: {}]   ;;  %s580_s1 = inlined_call_operand.vmem [shape: bf16[1,384,128], index: 1, kind: input, shape index: {}]   ;;  %s581_s2 = inlined_call_operand.hbm [shape: f32[1,1,128], index: 2, kind: input, shape index: {}]   ;;  %s582_s3 = inlined_call_operand.vmem [shape: bf16[1,16,128], index: 3, kind: input, shape index: {}]   ;;  %s583_s4 = inlined_call_operand.vmem [shape: bf16[1,16,128], index: 4, kind: output, shape index: {}]  }
   0x1   :  { %s19_s17 = sshll.u32 %s581_s2, 4  ;;  %s21_s19 = sshll.u32 %s460_s18, 4  ;;  %s20_s17 = int_to_ptr.hbm [resolvable:$true] %s19_s17  ;;  %s22_s19 = int_to_ptr.vmem [resolvable:$true] %s21_s19 }
   0x2   :  { %24 = dma.hbm_to_vmem [thread:$0]  %s20_s17, 16, %s22_s19, [#allocation3]  }
   0x3   :  { %458 = dma.done.wait [#allocation3], 16  }
   0x4   :  { %459 = vsyncadd [#allocation3], 4294967280  ;;  %v406_v0 = vld [vmem:[%s580_s1 + $0x38] sm:$0xff]  ;;  %v405_v3 = vld [vmem:[%s580_s1 + $0x30] sm:$0xff] }
   0x5   :  { %v414_v1 = vld [vmem:[%s580_s1 + $0x78] sm:$0xff]  ;;  %246 = vmatpush.bf16.msra.mxu0 %v406_v0  ;;  %v413_v4 = vld [vmem:[%s580_s1 + $0x70] sm:$0xff]  ;;  %v404_v6 = vld [vmem:[%s580_s1 + $0x28] sm:$0xff] }
   0x6   :  { %v422_v2 = vld [vmem:[%s580_s1 + $0xb8] sm:$0xff]  ;;  %260 = vmatpush.bf16.msra.mxu1 %v414_v1  ;;  %v421_v5 = vld [vmem:[%s580_s1 + $0xb0] sm:$0xff]  ;;  %v412_v7 = vld [vmem:[%s580_s1 + $0x68] sm:$0xff] }
   0x7   :  { %274 = vmatpush.bf16.msra.mxu2 %v422_v2  ;;  %v420_v8 = vld [vmem:[%s580_s1 + $0xa8] sm:$0xff]  ;;  %v403_v9 = vld [vmem:[%s580_s1 + $0x20] sm:$0xff]  ;;  %v402_v12 = vld [vmem:[%s580_s1 + $0x18] sm:$0xff] }
   0x8   :  { %v411_v10 = vld [vmem:[%s580_s1 + $0x60] sm:$0xff]  ;;  %v410_v13 = vld [vmem:[%s580_s1 + $0x58] sm:$0xff]  ;;  %v401_v15 = vld [vmem:[%s580_s1 + $0x10] sm:$0xff] }
   0x9   :  { %247 = vmatpush.bf16.msra.mxu0 %v405_v3  ;;  %v419_v11 = vld [vmem:[%s580_s1 + $0xa0] sm:$0xff]  ;;  %v418_v14 = vld [vmem:[%s580_s1 + $0x98] sm:$0xff]  ;;  %v409_v16 = vld [vmem:[%s580_s1 + $0x50] sm:$0xff] }
   0xa   :  { %261 = vmatpush.bf16.msra.mxu1 %v413_v4  ;;  %v31_v17 = vld [vmem:[%s579_s0] sm:$0xff]  ;;  %v33_v18 = vld [vmem:[%s579_s0 + $0xc] sm:$0xff]  ;;  %v32_v20 = vld [vmem:[%s579_s0 + $0x8] sm:$0xf] }
   0xb   :  { %275 = vmatpush.bf16.msra.mxu2 %v421_v5  ;;  %v417_v19 = vld [vmem:[%s580_s1 + $0x90] sm:$0xff]  ;;  %v35_v22 = vunpack.c.l.bf16 %v31_v17  ;;  %v38_v23 = vunpack.c.l.bf16 %v33_v18  ;;  %v36_v24 = vunpack.c.h.bf16 %v31_v17  ;;  %v39_v25 = vunpack.c.h.bf16 %v33_v18  ;;  %v400_v26 = vld [vmem:[%s580_s1 + $0x8] sm:$0xff]  ;;  %v399_v35 = vld [vmem:[%s580_s1] sm:$0xff] }
   0xc   :  { %v34_v21 = vld [vmem:[%s579_s0 + $0x14] sm:$0xf]  ;;  %v408_v27 = vld [vmem:[%s580_s1 + $0x48] sm:$0xff]  ;;  %v37_v28 = vunpack.c.l.bf16 %v32_v20  ;;  %v407_v36 = vld [vmem:[%s580_s1 + $0x40] sm:$0xff] }
   0xd   :  { %248 = vmatpush.bf16.msra.mxu0 %v404_v6  ;;  %v40_v29 = vunpack.c.l.bf16 %v34_v21  ;;  %v416_v30 = vld [vmem:[%s580_s1 + $0x88] sm:$0xff]  ;;  %v41_v31 = vmax.f32 %v35_v22, 0.0  ;;  %v44_v32 = vmax.f32 %v38_v23, 0.0  ;;  %v42_v33 = vmax.f32 %v36_v24, 0.0  ;;  %v415_v39 = vld [vmem:[%s580_s1 + $0x80] sm:$0xff] }
   0xe   :  { %262 = vmatpush.bf16.msra.mxu1 %v412_v7  ;;  %v45_v34 = vmax.f32 %v39_v25, 0.0  ;;  %v43_v37 = vmax.f32 %v37_v28, 0.0  ;;  %v433_v44 = vld [vmem:[#allocation2] ss:$0 sm:$0xff] }
   0xf   :  { %276 = vmatpush.bf16.msra.mxu2 %v420_v8  ;;  %v46_v38 = vmax.f32 %v40_v29, 0.0  ;;  %v47_v40 = vpack.c.bf16 %v44_v32, %v41_v31  ;;  %v424_v51 = vld [vmem:[%s582_s3] sm:$0xff]  }
  0x10   :  { %v48_v41 = vpack.c.bf16 %v45_v34, %v42_v33  ;;  %v425_v54 = vunpack.c.l.bf16 %v424_v51  ;;  %v426_v56 = vunpack.c.h.bf16 %v424_v51 }
  0x11   :  { %249 = vmatpush.bf16.msra.mxu0 %v403_v9  ;;  %v49_v42 = vpack.c.bf16 %v46_v38, %v43_v37 }
  0x12   :  { %263 = vmatpush.bf16.msra.mxu1 %v411_v10 }
  0x13   :  { %277 = vmatpush.bf16.msra.mxu2 %v419_v11 }
  0x15   :  { %250 = vmatpush.bf16.msra.mxu0 %v402_v12 }
  0x16   :  { %264 = vmatpush.bf16.msra.mxu1 %v410_v13 }
  0x17   :  { %278 = vmatpush.bf16.msra.mxu2 %v418_v14 }
  0x19   :  { %251 = vmatpush.bf16.msra.mxu0 %v401_v15 }
  0x1a   :  { %265 = vmatpush.bf16.msra.mxu1 %v409_v16 }
  0x1b   :  { %279 = vmatpush.bf16.msra.mxu2 %v417_v19 }
  0x1d   :  { %252 = vmatpush.bf16.msra.mxu0 %v400_v26 }
  0x1e   :  { %266 = vmatpush.bf16.msra.mxu1 %v408_v27 }
  0x1f   :  { %280 = vmatpush.bf16.msra.mxu2 %v416_v30 }
  0x21   :  { %253 = vmatpush.bf16.msra.mxu0 %v399_v35 }
  0x22   :  { %267 = vmatpush.bf16.msra.mxu1 %v407_v36 }
  0x23   :  { %281 = vmatpush.bf16.msra.mxu2 %v415_v39 }
  0x24   :  { %254 = vmatmul.bf16.vlgmr.msra.gmra.mxu0 %v47_v40 }
  0x25   :  { %268 = vmatmul.bf16.vlgmr.msra.gmra.mxu1 %v48_v41 }
  0x26   :  { %282 = vmatmul.bf16.vlgmr.msra.gmra.mxu2 %v49_v42 }
  0xa1   :  { %v255_v43 = vpop.f32.mrf.mxu0 }
  0xa2   :  { %v269_v45 = vpop.f32.mrf.mxu1  ;;  %v256_v46 = vadd.f32 %v433_v44, %v255_v43 }
  0xa4   :  { %v270_v49 = vadd.f32 %v269_v45, %v256_v46 }
  0xa9   :  { %v283_v47 = vpop.f32.mrf.mxu2  ;;  %v257_v48 = vpop.f32.mrf.mxu0 }
  0xaa   :  { %v258_v50 = vadd.f32 %v433_v44, %v257_v48  ;;  %v271_v52 = vpop.f32.mrf.mxu1  ;;  %v284_v53 = vadd.f32 %v283_v47, %v270_v49 }
  0xac   :  { %v272_v55 = vadd.f32 %v271_v52, %v258_v50  ;;  %v292_v59 = vadd.f32 %v425_v54, %v284_v53 }
  0xb1   :  { %v285_v57 = vpop.f32.mrf.mxu2 }
  0xb2   :  { %v286_v58 = vadd.f32 %v285_v57, %v272_v55 }
  0xb4   :  { %v293_v60 = vadd.f32 %v426_v56, %v286_v58 }
  0xb6   :  { %v430_v61 = vpack.c.bf16 %v293_v60, %v292_v59 }
  0xb8   :  { %431 = vst [vmem:[%s583_s4] sm:$0xff] %v430_v61  }
  0xb9   :  { %302 = vsyncpa [#allocation3], 1 }

// kernel: _lambda_.65
= control target key start
LH: loop header
LB: loop body
LE: loop exit
PB: predicated region body
PF: predicated region fallthrough
CT: control target
= control target key end

     0   :  { %10 = vsyncpa [#allocation3], 0  ;;  %s473_s21 = smov [#allocation2]   ;;  %s600_s0 = inlined_call_operand.vmem [shape: bf16[1,16,384], index: 0, kind: input, shape index: {}]   ;;  %s601_s1 = inlined_call_operand.vmem [shape: bf16[1,384,128], index: 1, kind: input, shape index: {}]   ;;  %s602_s2 = inlined_call_operand.hbm [shape: f32[1,1,128], index: 2, kind: input, shape index: {}]   ;;  %s603_s3 = inlined_call_operand.vmem [shape: bf16[1,16,128], index: 3, kind: input, shape index: {}]   ;;  %s604_s4 = inlined_call_operand.vmem [shape: bf16[1,16,128], index: 4, kind: input, shape index: {}]   ;;  %s605_s5 = inlined_call_operand.vmem [shape: bf16[1,16,128], index: 5, kind: output, shape index: {}]  }
   0x1   :  { %s20_s20 = sshll.u32 %s602_s2, 4  ;;  %s22_s22 = sshll.u32 %s473_s21, 4  ;;  %s21_s20 = int_to_ptr.hbm [resolvable:$true] %s20_s20  ;;  %s23_s22 = int_to_ptr.vmem [resolvable:$true] %s22_s22 }
   0x2   :  { %25 = dma.hbm_to_vmem [thread:$0]  %s21_s20, 16, %s23_s22, [#allocation3]  }
   0x3   :  { %471 = dma.done.wait [#allocation3], 16  }
   0x4   :  { %472 = vsyncadd [#allocation3], 4294967280  ;;  %v415_v0 = vld [vmem:[%s601_s1 + $0x38] sm:$0xff]  ;;  %v414_v3 = vld [vmem:[%s601_s1 + $0x30] sm:$0xff] }
   0x5   :  { %v423_v1 = vld [vmem:[%s601_s1 + $0x78] sm:$0xff]  ;;  %249 = vmatpush.bf16.msra.mxu0 %v415_v0  ;;  %v422_v4 = vld [vmem:[%s601_s1 + $0x70] sm:$0xff]  ;;  %v413_v6 = vld [vmem:[%s601_s1 + $0x28] sm:$0xff] }
   0x6   :  { %v431_v2 = vld [vmem:[%s601_s1 + $0xb8] sm:$0xff]  ;;  %263 = vmatpush.bf16.msra.mxu1 %v423_v1  ;;  %v430_v5 = vld [vmem:[%s601_s1 + $0xb0] sm:$0xff]  ;;  %v421_v7 = vld [vmem:[%s601_s1 + $0x68] sm:$0xff] }
   0x7   :  { %277 = vmatpush.bf16.msra.mxu2 %v431_v2  ;;  %v429_v8 = vld [vmem:[%s601_s1 + $0xa8] sm:$0xff]  ;;  %v412_v9 = vld [vmem:[%s601_s1 + $0x20] sm:$0xff]  ;;  %v411_v12 = vld [vmem:[%s601_s1 + $0x18] sm:$0xff] }
   0x8   :  { %v420_v10 = vld [vmem:[%s601_s1 + $0x60] sm:$0xff]  ;;  %v419_v13 = vld [vmem:[%s601_s1 + $0x58] sm:$0xff]  ;;  %v410_v15 = vld [vmem:[%s601_s1 + $0x10] sm:$0xff] }
   0x9   :  { %250 = vmatpush.bf16.msra.mxu0 %v414_v3  ;;  %v428_v11 = vld [vmem:[%s601_s1 + $0xa0] sm:$0xff]  ;;  %v427_v14 = vld [vmem:[%s601_s1 + $0x98] sm:$0xff]  ;;  %v418_v16 = vld [vmem:[%s601_s1 + $0x50] sm:$0xff] }
   0xa   :  { %264 = vmatpush.bf16.msra.mxu1 %v422_v4  ;;  %v34_v17 = vld [vmem:[%s600_s0] sm:$0xff]  ;;  %v36_v18 = vld [vmem:[%s600_s0 + $0xc] sm:$0xff]  ;;  %v35_v20 = vld [vmem:[%s600_s0 + $0x8] sm:$0xf] }
   0xb   :  { %278 = vmatpush.bf16.msra.mxu2 %v430_v5  ;;  %v426_v19 = vld [vmem:[%s601_s1 + $0x90] sm:$0xff]  ;;  %v38_v22 = vunpack.c.l.bf16 %v34_v17  ;;  %v41_v23 = vunpack.c.l.bf16 %v36_v18  ;;  %v39_v24 = vunpack.c.h.bf16 %v34_v17  ;;  %v42_v25 = vunpack.c.h.bf16 %v36_v18  ;;  %v409_v26 = vld [vmem:[%s601_s1 + $0x8] sm:$0xff]  ;;  %v408_v35 = vld [vmem:[%s601_s1] sm:$0xff] }
   0xc   :  { %v37_v21 = vld [vmem:[%s600_s0 + $0x14] sm:$0xf]  ;;  %v417_v27 = vld [vmem:[%s601_s1 + $0x48] sm:$0xff]  ;;  %v40_v28 = vunpack.c.l.bf16 %v35_v20  ;;  %v416_v36 = vld [vmem:[%s601_s1 + $0x40] sm:$0xff] }
   0xd   :  { %251 = vmatpush.bf16.msra.mxu0 %v413_v6  ;;  %v43_v29 = vunpack.c.l.bf16 %v37_v21  ;;  %v425_v30 = vld [vmem:[%s601_s1 + $0x88] sm:$0xff]  ;;  %v44_v31 = vmax.f32 %v38_v22, 0.0  ;;  %v47_v32 = vmax.f32 %v41_v23, 0.0  ;;  %v45_v33 = vmax.f32 %v39_v24, 0.0  ;;  %v424_v39 = vld [vmem:[%s601_s1 + $0x80] sm:$0xff] }
   0xe   :  { %265 = vmatpush.bf16.msra.mxu1 %v421_v7  ;;  %v48_v34 = vmax.f32 %v42_v25, 0.0  ;;  %v46_v37 = vmax.f32 %v40_v28, 0.0  ;;  %v446_v43 = vld [vmem:[#allocation2] ss:$0 sm:$0xff] }
   0xf   :  { %279 = vmatpush.bf16.msra.mxu2 %v429_v8  ;;  %v49_v38 = vmax.f32 %v43_v29, 0.0  ;;  %v50_v40 = vpack.c.bf16 %v47_v32, %v44_v31  ;;  %v433_v50 = vld [vmem:[%s603_s3] sm:$0xff]  }
  0x10   :  { %v51_v41 = vpack.c.bf16 %v48_v34, %v45_v33  ;;  %v434_v53 = vunpack.c.l.bf16 %v433_v50  ;;  %v437_v54 = vld [vmem:[%s604_s4] sm:$0xff]   ;;  %v435_v57 = vunpack.c.h.bf16 %v433_v50 }
  0x11   :  { %252 = vmatpush.bf16.msra.mxu0 %v412_v9  ;;  %v52_v42 = vpack.c.bf16 %v49_v38, %v46_v37  ;;  %v438_v60 = vunpack.c.l.bf16 %v437_v54  ;;  %v439_v62 = vunpack.c.h.bf16 %v437_v54 }
  0x12   :  { %266 = vmatpush.bf16.msra.mxu1 %v420_v10 }
  0x13   :  { %280 = vmatpush.bf16.msra.mxu2 %v428_v11 }
  0x15   :  { %253 = vmatpush.bf16.msra.mxu0 %v411_v12 }
  0x16   :  { %267 = vmatpush.bf16.msra.mxu1 %v419_v13 }
  0x17   :  { %281 = vmatpush.bf16.msra.mxu2 %v427_v14 }
  0x19   :  { %254 = vmatpush.bf16.msra.mxu0 %v410_v15 }
  0x1a   :  { %268 = vmatpush.bf16.msra.mxu1 %v418_v16 }
  0x1b   :  { %282 = vmatpush.bf16.msra.mxu2 %v426_v19 }
  0x1d   :  { %255 = vmatpush.bf16.msra.mxu0 %v409_v26 }
  0x1e   :  { %269 = vmatpush.bf16.msra.mxu1 %v417_v27 }
  0x1f   :  { %283 = vmatpush.bf16.msra.mxu2 %v425_v30 }
  0x21   :  { %256 = vmatpush.bf16.msra.mxu0 %v408_v35 }
  0x22   :  { %270 = vmatpush.bf16.msra.mxu1 %v416_v36 }
  0x23   :  { %284 = vmatpush.bf16.msra.mxu2 %v424_v39 }
  0x24   :  { %257 = vmatmul.bf16.vlgmr.msra.gmra.mxu0 %v50_v40 }
  0x25   :  { %271 = vmatmul.bf16.vlgmr.msra.gmra.mxu1 %v51_v41 }
  0x26   :  { %285 = vmatmul.bf16.vlgmr.msra.gmra.mxu2 %v52_v42 }
  0xa1   :  { %v258_v44 = vpop.f32.mrf.mxu0 }
  0xa2   :  { %v272_v45 = vpop.f32.mrf.mxu1  ;;  %v259_v46 = vadd.f32 %v446_v43, %v258_v44 }
  0xa4   :  { %v273_v48 = vadd.f32 %v272_v45, %v259_v46 }
  0xa9   :  { %v286_v47 = vpop.f32.mrf.mxu2  ;;  %v260_v49 = vpop.f32.mrf.mxu0 }
  0xaa   :  { %v261_v51 = vadd.f32 %v446_v43, %v260_v49  ;;  %v287_v52 = vadd.f32 %v286_v47, %v273_v48  ;;  %v274_v55 = vpop.f32.mrf.mxu1 }
  0xac   :  { %v275_v56 = vadd.f32 %v274_v55, %v261_v51  ;;  %v295_v59 = vadd.f32 %v434_v53, %v287_v52 }
  0xae   :  { %v301_v0 = vadd.f32 %v438_v60, %v295_v59 }
  0xb1   :  { %v288_v58 = vpop.f32.mrf.mxu2 }
  0xb2   :  { %v289_v61 = vadd.f32 %v288_v58, %v275_v56 }
  0xb4   :  { %v296_v63 = vadd.f32 %v435_v57, %v289_v61 }
  0xb6   :  { %v302_v1 = vadd.f32 %v439_v62, %v296_v63 }
  0xb8   :  { %v443_v2 = vpack.c.bf16 %v302_v1, %v301_v0 }
  0xba   :  { %444 = vst [vmem:[%s605_s5] sm:$0xff] %v443_v2  }
  0xbb   :  { %311 = vsyncpa [#allocation3], 1 }

// kernel: _lambda_.67
= control target key start
LH: loop header
LB: loop body
LE: loop exit
PB: predicated region body
PF: predicated region fallthrough
CT: control target
= control target key end

     0   :  { %9 = vsyncpa [#allocation3], 0  ;;  %s308_s0 = inlined_call_operand.vmem [shape: bf16[1,16,128], index: 0, kind: input, shape index: {}]   ;;  %s309_s1 = inlined_call_operand.hbm [shape: bf16[1,128,128], index: 1, kind: input, shape index: {}]   ;;  %s310_s2 = inlined_call_operand.hbm [shape: f32[1,1,128], index: 2, kind: input, shape index: {}]   ;;  %s311_s3 = inlined_call_operand.vmem [shape: bf16[1,16,128], index: 3, kind: input, shape index: {}]   ;;  %s312_s4 = inlined_call_operand.vmem [shape: bf16[1,16,128], index: 4, kind: output, shape index: {}]  }
   0x1   :  { %s17_s17 = sshll.u32 %s309_s1, 4  ;;  %s18_s17 = int_to_ptr.hbm [resolvable:$true] %s17_s17 }
   0x2   :  { %10 = vsyncpa [#allocation5], 0  ;;  %s264_s18 = smov [#allocation2]   ;;  %s31_s22 = sshll.u32 %s310_s2, 4  ;;  %s32_s22 = int_to_ptr.hbm [resolvable:$true] %s31_s22 }
   0x3   :  { %s19_s19 = sshll.u32 %s264_s18, 4  ;;  %s265_s23 = smov 64   ;;  %s20_s19 = int_to_ptr.vmem [resolvable:$true] %s19_s19 }
   0x4   :  { %s266_s24 = smov 4   ;;  %s267_s25 = smov [#allocation4]  }
   0x5   :  { %25 = dma.hbm_to_vmem [thread:$0]  %s18_s17, 1024, %s20_s19, [#allocation3], %s265_s23, %s265_s23, %s266_s24  }
   0x6   :  { %s33_s26 = sshll.u32 %s267_s25, 4  ;;  %s34_s26 = int_to_ptr.vmem [resolvable:$true] %s33_s26 }
   0x7   :  { %36 = dma.hbm_to_vmem [thread:$0]  %s32_s22, 16, %s34_s26, [#allocation5]  }
   0x8   :  { %260 = dma.done.wait [#allocation3], 1024  }
   0x9   :  { %261 = vsyncadd [#allocation3], 4294966272 }
   0xa   :  { %262 = dma.done.wait [#allocation5], 16  }
   0xb   :  { %263 = vsyncadd [#allocation5], 4294967280  ;;  %v193_v0 = vld [vmem:[#allocation2 + $0x38] sm:$0xff]  ;;  %v192_v1 = vld [vmem:[#allocation2 + $0x30] sm:$0xff] }
   0xc   :  { %122 = vmatpush.bf16.msra.mxu0 %v193_v0  ;;  %v191_v2 = vld [vmem:[#allocation2 + $0x28] sm:$0xff]  ;;  %v190_v3 = vld [vmem:[#allocation2 + $0x20] sm:$0xff]  ;;  %v189_v4 = vld [vmem:[#allocation2 + $0x18] sm:$0xff] }
   0xd   :  { %v188_v5 = vld [vmem:[#allocation2 + $0x10] sm:$0xff]  ;;  %v195_v6 = vld [vmem:[%s308_s0] sm:$0xff]   ;;  %v187_v9 = vld [vmem:[#allocation2 + $0x8] sm:$0xff] }
   0xe   :  { %v196_v7 = vunpack.c.l.bf16 %v195_v6  ;;  %v197_v8 = vunpack.c.h.bf16 %v195_v6  ;;  %v186_v12 = vld [vmem:[#allocation2] sm:$0xff] }
   0xf   :  { %v211_v15 = vld [vmem:[#allocation4] ss:$0 sm:$0xff] }
  0x10   :  { %123 = vmatpush.bf16.msra.mxu0 %v192_v1  ;;  %v51_v10 = vmax.f32 %v196_v7, 0.0  ;;  %v52_v11 = vmax.f32 %v197_v8, 0.0  ;;  %v199_v16 = vld [vmem:[%s311_s3] sm:$0xff]  }
  0x11   :  { %v200_v18 = vunpack.c.l.bf16 %v199_v16  ;;  %v201_v19 = vunpack.c.h.bf16 %v199_v16 }
  0x12   :  { %v53_v13 = vpack.c.bf16 %v52_v11, %v51_v10 }
  0x14   :  { %124 = vmatpush.bf16.msra.mxu0 %v191_v2 }
  0x18   :  { %125 = vmatpush.bf16.msra.mxu0 %v190_v3 }
  0x1c   :  { %126 = vmatpush.bf16.msra.mxu0 %v189_v4 }
  0x20   :  { %127 = vmatpush.bf16.msra.mxu0 %v188_v5 }
  0x24   :  { %128 = vmatpush.bf16.msra.mxu0 %v187_v9 }
  0x28   :  { %129 = vmatpush.bf16.msra.mxu0 %v186_v12 }
  0x2b   :  { %130 = vmatmul.bf16.vlgmr.msra.gmra.mxu0 %v53_v13 }
  0xa8   :  { %v131_v14 = vpop.f32.mrf.mxu0 }
  0xa9   :  { %v132_v17 = vadd.f32 %v211_v15, %v131_v14 }
  0xab   :  { %v140_v21 = vadd.f32 %v200_v18, %v132_v17 }
  0xad   :  { %v142_v24 = vmax.f32 %v140_v21, 0.0 }
  0xb0   :  { %v133_v20 = vpop.f32.mrf.mxu0 }
  0xb1   :  { %v134_v22 = vadd.f32 %v211_v15, %v133_v20 }
  0xb3   :  { %v141_v23 = vadd.f32 %v201_v19, %v134_v22 }
  0xb5   :  { %v143_v25 = vmax.f32 %v141_v23, 0.0 }
  0xb7   :  { %v205_v26 = vpack.c.bf16 %v143_v25, %v142_v24 }
  0xb9   :  { %206 = vst [vmem:[%s312_s4] sm:$0xff] %v205_v26  }
  0xba   :  { %152 = vsyncpa [#allocation3], 1 }
  0xbb   :  { %153 = vsyncpa [#allocation5], 1 }

// kernel: _lambda_.68
= control target key start
LH: loop header
LB: loop body
LE: loop exit
PB: predicated region body
PF: predicated region fallthrough
CT: control target
= control target key end

     0   :  { %8 = vsyncpa [#allocation3], 0  ;;  %s289_s0 = inlined_call_operand.vmem [shape: bf16[1,16,128], index: 0, kind: input, shape index: {}]   ;;  %s290_s1 = inlined_call_operand.hbm [shape: bf16[1,128,128], index: 1, kind: input, shape index: {}]   ;;  %s291_s2 = inlined_call_operand.hbm [shape: f32[1,1,128], index: 2, kind: input, shape index: {}]   ;;  %s292_s3 = inlined_call_operand.vmem [shape: bf16[1,16,128], index: 3, kind: output, shape index: {}]  }
   0x1   :  { %s16_s14 = sshll.u32 %s290_s1, 4  ;;  %s17_s14 = int_to_ptr.hbm [resolvable:$true] %s16_s14 }
   0x2   :  { %9 = vsyncpa [#allocation5], 0  ;;  %s253_s15 = smov [#allocation2]   ;;  %s30_s19 = sshll.u32 %s291_s2, 4  ;;  %s31_s19 = int_to_ptr.hbm [resolvable:$true] %s30_s19 }
   0x3   :  { %s18_s16 = sshll.u32 %s253_s15, 4  ;;  %s254_s20 = smov 64   ;;  %s19_s16 = int_to_ptr.vmem [resolvable:$true] %s18_s16 }
   0x4   :  { %s255_s21 = smov 4   ;;  %s256_s22 = smov [#allocation4]  }
   0x5   :  { %24 = dma.hbm_to_vmem [thread:$0]  %s17_s14, 1024, %s19_s16, [#allocation3], %s254_s20, %s254_s20, %s255_s21  }
   0x6   :  { %s32_s23 = sshll.u32 %s256_s22, 4  ;;  %s33_s23 = int_to_ptr.vmem [resolvable:$true] %s32_s23 }
   0x7   :  { %35 = dma.hbm_to_vmem [thread:$0]  %s31_s19, 16, %s33_s23, [#allocation5]  }
   0x8   :  { %249 = dma.done.wait [#allocation3], 1024  }
   0x9   :  { %250 = vsyncadd [#allocation3], 4294966272 }
   0xa   :  { %251 = dma.done.wait [#allocation5], 16  }
   0xb   :  { %252 = vsyncadd [#allocation5], 4294967280  ;;  %v190_v0 = vld [vmem:[#allocation2 + $0x38] sm:$0xff]  ;;  %v189_v1 = vld [vmem:[#allocation2 + $0x30] sm:$0xff] }
   0xc   :  { %120 = vmatpush.bf16.msra.mxu0 %v190_v0  ;;  %v188_v2 = vld [vmem:[#allocation2 + $0x28] sm:$0xff]  ;;  %v187_v3 = vld [vmem:[#allocation2 + $0x20] sm:$0xff]  ;;  %v186_v4 = vld [vmem:[#allocation2 + $0x18] sm:$0xff] }
   0xd   :  { %v185_v5 = vld [vmem:[#allocation2 + $0x10] sm:$0xff]  ;;  %v184_v6 = vld [vmem:[#allocation2 + $0x8] sm:$0xff]  ;;  %v183_v7 = vld [vmem:[#allocation2] sm:$0xff] }
   0xe   :  { %v182_v8 = vld [vmem:[%s289_s0] sm:$0xff] }
   0xf   :  { %v200_v10 = vld [vmem:[#allocation4] ss:$0 sm:$0xff] }
  0x10   :  { %121 = vmatpush.bf16.msra.mxu0 %v189_v1 }
  0x14   :  { %122 = vmatpush.bf16.msra.mxu0 %v188_v2 }
  0x18   :  { %123 = vmatpush.bf16.msra.mxu0 %v187_v3 }
  0x1c   :  { %124 = vmatpush.bf16.msra.mxu0 %v186_v4 }
  0x20   :  { %125 = vmatpush.bf16.msra.mxu0 %v185_v5 }
  0x24   :  { %126 = vmatpush.bf16.msra.mxu0 %v184_v6 }
  0x28   :  { %127 = vmatpush.bf16.msra.mxu0 %v183_v7 }
  0x2b   :  { %128 = vmatmul.bf16.vlgmr.msra.gmra.mxu0 %v182_v8 }
  0xa8   :  { %v129_v9 = vpop.f32.mrf.mxu0 }
  0xa9   :  { %v130_v11 = vadd.f32 %v200_v10, %v129_v9 }
  0xab   :  { %v134_v14 = vmax.f32 %v130_v11, 0.0 }
  0xb0   :  { %v131_v12 = vpop.f32.mrf.mxu0 }
  0xb1   :  { %v132_v13 = vadd.f32 %v200_v10, %v131_v12 }
  0xb3   :  { %v135_v15 = vmax.f32 %v132_v13, 0.0 }
  0xb5   :  { %v194_v16 = vpack.c.bf16 %v135_v15, %v134_v14 }
  0xb7   :  { %195 = vst [vmem:[%s292_s3] sm:$0xff] %v194_v16  }
  0xb8   :  { %144 = vsyncpa [#allocation3], 1 }
  0xb9   :  { %145 = vsyncpa [#allocation5], 1 }

// kernel: _lambda_.66
= control target key start
LH: loop header
LB: loop body
LE: loop exit
PB: predicated region body
PF: predicated region fallthrough
CT: control target
= control target key end

     0   :  { %8 = vsyncpa [#allocation3], 0  ;;  %s1106_s15 = smov [#allocation2]   ;;  %s1373_s0 = inlined_call_operand.vmem [shape: bf16[1,16,1024], index: 0, kind: input, shape index: {}]   ;;  %s1374_s1 = inlined_call_operand.vmem [shape: bf16[1,1024,128], index: 1, kind: input, shape index: {}]   ;;  %s1375_s2 = inlined_call_operand.hbm [shape: f32[1,1,128], index: 2, kind: input, shape index: {}]   ;;  %s1376_s3 = inlined_call_operand.vmem [shape: bf16[1,16,128], index: 3, kind: output, shape index: {}]  }
   0x1   :  { %s18_s14 = sshll.u32 %s1375_s2, 4  ;;  %s20_s16 = sshll.u32 %s1106_s15, 4  ;;  %s19_s14 = int_to_ptr.hbm [resolvable:$true] %s18_s14  ;;  %s21_s16 = int_to_ptr.vmem [resolvable:$true] %s20_s16 }
   0x2   :  { %23 = dma.hbm_to_vmem [thread:$0]  %s19_s14, 16, %s21_s16, [#allocation3]  }
   0x3   :  { %1104 = dma.done.wait [#allocation3], 16  }
   0x4   :  { %1105 = vsyncadd [#allocation3], 4294967280  ;;  %v1016_v0 = vld [vmem:[%s1374_s1 + $0x38] sm:$0xff]  ;;  %v1015_v4 = vld [vmem:[%s1374_s1 + $0x30] sm:$0xff] }
   0x5   :  { %v1024_v1 = vld [vmem:[%s1374_s1 + $0x78] sm:$0xff]  ;;  %592 = vmatpush.bf16.msra.mxu0 %v1016_v0  ;;  %v1023_v5 = vld [vmem:[%s1374_s1 + $0x70] sm:$0xff]  ;;  %v1014_v8 = vld [vmem:[%s1374_s1 + $0x28] sm:$0xff] }
   0x6   :  { %v1032_v2 = vld [vmem:[%s1374_s1 + $0xb8] sm:$0xff]  ;;  %606 = vmatpush.bf16.msra.mxu1 %v1024_v1  ;;  %v1031_v6 = vld [vmem:[%s1374_s1 + $0xb0] sm:$0xff]  ;;  %v1022_v9 = vld [vmem:[%s1374_s1 + $0x68] sm:$0xff] }
   0x7   :  { %v1040_v3 = vld [vmem:[%s1374_s1 + $0xf8] sm:$0xff]  ;;  %620 = vmatpush.bf16.msra.mxu2 %v1032_v2  ;;  %v1039_v7 = vld [vmem:[%s1374_s1 + $0xf0] sm:$0xff]  ;;  %v1030_v10 = vld [vmem:[%s1374_s1 + $0xa8] sm:$0xff] }
   0x8   :  { %634 = vmatpush.bf16.msra.mxu3 %v1040_v3  ;;  %v1038_v11 = vld [vmem:[%s1374_s1 + $0xe8] sm:$0xff]  ;;  %v1013_v12 = vld [vmem:[%s1374_s1 + $0x20] sm:$0xff]  ;;  %v1012_v16 = vld [vmem:[%s1374_s1 + $0x18] sm:$0xff] }
   0x9   :  { %593 = vmatpush.bf16.msra.mxu0 %v1015_v4  ;;  %v1021_v13 = vld [vmem:[%s1374_s1 + $0x60] sm:$0xff]  ;;  %v1020_v17 = vld [vmem:[%s1374_s1 + $0x58] sm:$0xff]  ;;  %v1011_v20 = vld [vmem:[%s1374_s1 + $0x10] sm:$0xff] }
   0xa   :  { %607 = vmatpush.bf16.msra.mxu1 %v1023_v5  ;;  %v1029_v14 = vld [vmem:[%s1374_s1 + $0xa0] sm:$0xff]  ;;  %v1028_v18 = vld [vmem:[%s1374_s1 + $0x98] sm:$0xff]  ;;  %v1019_v21 = vld [vmem:[%s1374_s1 + $0x50] sm:$0xff] }
   0xb   :  { %621 = vmatpush.bf16.msra.mxu2 %v1031_v6  ;;  %v1037_v15 = vld [vmem:[%s1374_s1 + $0xe0] sm:$0xff]  ;;  %v1036_v19 = vld [vmem:[%s1374_s1 + $0xd8] sm:$0xff]  ;;  %v1027_v22 = vld [vmem:[%s1374_s1 + $0x90] sm:$0xff] }
   0xc   :  { %635 = vmatpush.bf16.msra.mxu3 %v1039_v7  ;;  %v1035_v23 = vld [vmem:[%s1374_s1 + $0xd0] sm:$0xff]  ;;  %v1010_v24 = vld [vmem:[%s1374_s1 + $0x8] sm:$0xff]  ;;  %v1009_v28 = vld [vmem:[%s1374_s1] sm:$0xff] }
   0xd   :  { %594 = vmatpush.bf16.msra.mxu0 %v1014_v8  ;;  %v1018_v25 = vld [vmem:[%s1374_s1 + $0x48] sm:$0xff]  ;;  %v1017_v29 = vld [vmem:[%s1374_s1 + $0x40] sm:$0xff]  ;;  %v1048_v32 = vld [vmem:[%s1374_s1 + $0x138] sm:$0xff] }
   0xe   :  { %608 = vmatpush.bf16.msra.mxu1 %v1022_v9  ;;  %v1026_v26 = vld [vmem:[%s1374_s1 + $0x88] sm:$0xff]  ;;  %v1025_v30 = vld [vmem:[%s1374_s1 + $0x80] sm:$0xff]  ;;  %v1056_v33 = vld [vmem:[%s1374_s1 + $0x178] sm:$0xff] }
   0xf   :  { %622 = vmatpush.bf16.msra.mxu2 %v1030_v10  ;;  %v1034_v27 = vld [vmem:[%s1374_s1 + $0xc8] sm:$0xff]  ;;  %v1033_v31 = vld [vmem:[%s1374_s1 + $0xc0] sm:$0xff]  ;;  %v1064_v42 = vld [vmem:[%s1374_s1 + $0x1b8] sm:$0xff] }
  0x10   :  { %636 = vmatpush.bf16.msra.mxu3 %v1038_v11  ;;  %v723_v34 = vld [vmem:[%s1373_s0 + $0x8] sm:$0xf]  ;;  %v715_v36 = vld [vmem:[%s1373_s0] sm:$0xf]  ;;  %v1002_v38 = vld [vmem:[%s1373_s0 + $0xc] sm:$0xf] }
  0x11   :  { %595 = vmatpush.bf16.msra.mxu0 %v1013_v12  ;;  %v1006_v35 = vld [vmem:[%s1373_s0 + $0x24] sm:$0xf0]  ;;  %v1005_v37 = vld [vmem:[%s1373_s0 + $0x1c] sm:$0xf0]  ;;  %v725_v39 = vld [vmem:[%s1373_s0 + $0x28] sm:$0xf0] }
  0x12   :  { %609 = vmatpush.bf16.msra.mxu1 %v1021_v13  ;;  %v1001_v40 = vld [vmem:[%s1373_s0 + $0x4] sm:$0xf]  ;;  %v1072_v43 = vld [vmem:[%s1374_s1 + $0x1f8] sm:$0xff]  ;;  %v724_v44 = vor.u32 %v1006_v35, %v723_v34  ;;  %v716_v45 = vor.u32 %v1005_v37, %v715_v36  ;;  %v728_v46 = vor.u32 %v1002_v38, %v725_v39  ;;  %v1047_v48 = vld [vmem:[%s1374_s1 + $0x130] sm:$0xff] }
  0x13   :  { %623 = vmatpush.bf16.msra.mxu2 %v1029_v14  ;;  %v717_v41 = vld [vmem:[%s1373_s0 + $0x20] sm:$0xf0]  ;;  %v1055_v49 = vld [vmem:[%s1374_s1 + $0x170] sm:$0xff]  ;;  %v1046_v52 = vld [vmem:[%s1374_s1 + $0x128] sm:$0xff] }
  0x14   :  { %637 = vmatpush.bf16.msra.mxu3 %v1037_v15  ;;  %v720_v47 = vor.u32 %v1001_v40, %v717_v41  ;;  %v1063_v50 = vld [vmem:[%s1374_s1 + $0x1b0] sm:$0xff]  ;;  %v1054_v53 = vld [vmem:[%s1374_s1 + $0x168] sm:$0xff]  ;;  %v1045_v56 = vld [vmem:[%s1374_s1 + $0x120] sm:$0xff] }
  0x15   :  { %596 = vmatpush.bf16.msra.mxu0 %v1012_v16  ;;  %v1071_v51 = vld [vmem:[%s1374_s1 + $0x1f0] sm:$0xff]  ;;  %v1062_v54 = vld [vmem:[%s1374_s1 + $0x1a8] sm:$0xff]  ;;  %v1053_v57 = vld [vmem:[%s1374_s1 + $0x160] sm:$0xff] }
  0x16   :  { %610 = vmatpush.bf16.msra.mxu1 %v1020_v17  ;;  %v1070_v55 = vld [vmem:[%s1374_s1 + $0x1e8] sm:$0xff]  ;;  %v1061_v58 = vld [vmem:[%s1374_s1 + $0x1a0] sm:$0xff]  ;;  %v1044_v60 = vld [vmem:[%s1374_s1 + $0x118] sm:$0xff] }
  0x17   :  { %624 = vmatpush.bf16.msra.mxu2 %v1028_v18  ;;  %v1069_v59 = vld [vmem:[%s1374_s1 + $0x1e0] sm:$0xff]  ;;  %v1052_v61 = vld [vmem:[%s1374_s1 + $0x158] sm:$0xff]  ;;  %v1043_v0 = vld [vmem:[%s1374_s1 + $0x110] sm:$0xff] }
  0x18   :  { %638 = vmatpush.bf16.msra.mxu3 %v1036_v19  ;;  %v1060_v62 = vld [vmem:[%s1374_s1 + $0x198] sm:$0xff]  ;;  %v1051_v1 = vld [vmem:[%s1374_s1 + $0x150] sm:$0xff]  ;;  %v1042_v4 = vld [vmem:[%s1374_s1 + $0x108] sm:$0xff] }
  0x19   :  { %597 = vmatpush.bf16.msra.mxu0 %v1011_v20  ;;  %v1068_v63 = vld [vmem:[%s1374_s1 + $0x1d8] sm:$0xff]  ;;  %v1059_v2 = vld [vmem:[%s1374_s1 + $0x190] sm:$0xff]  ;;  %v1050_v5 = vld [vmem:[%s1374_s1 + $0x148] sm:$0xff] }
  0x1a   :  { %611 = vmatpush.bf16.msra.mxu1 %v1019_v21  ;;  %v1067_v3 = vld [vmem:[%s1374_s1 + $0x1d0] sm:$0xff]  ;;  %v1058_v6 = vld [vmem:[%s1374_s1 + $0x188] sm:$0xff]  ;;  %v1041_v8 = vld [vmem:[%s1374_s1 + $0x100] sm:$0xff] }
  0x1b   :  { %625 = vmatpush.bf16.msra.mxu2 %v1027_v22  ;;  %v1066_v7 = vld [vmem:[%s1374_s1 + $0x1c8] sm:$0xff]  ;;  %v1049_v9 = vld [vmem:[%s1374_s1 + $0x140] sm:$0xff]  ;;  %v731_v12 = vld [vmem:[%s1373_s0 + $0x10] sm:$0xf] }
  0x1c   :  { %639 = vmatpush.bf16.msra.mxu3 %v1035_v23  ;;  %v1057_v10 = vld [vmem:[%s1374_s1 + $0x180] sm:$0xff]  ;;  %v1007_v13 = vld [vmem:[%s1373_s0 + $0x2c] sm:$0xf0]  ;;  %v1003_v14 = vld [vmem:[%s1373_s0 + $0x14] sm:$0xf] }
  0x1d   :  { %598 = vmatpush.bf16.msra.mxu0 %v1010_v24  ;;  %v1065_v11 = vld [vmem:[%s1374_s1 + $0x1c0] sm:$0xff]  ;;  %v733_v15 = vld [vmem:[%s1373_s0 + $0x30] sm:$0xf0]  ;;  %v739_v16 = vld [vmem:[%s1373_s0 + $0x18] sm:$0xf]  ;;  %v732_v20 = vor.u32 %v1007_v13, %v731_v12 }
  0x1e   :  { %612 = vmatpush.bf16.msra.mxu1 %v1018_v25  ;;  %v1008_v17 = vld [vmem:[%s1373_s0 + $0x34] sm:$0xf0]  ;;  %v1004_v18 = vld [vmem:[%s1373_s0 + $0x1c] sm:$0xf]  ;;  %v736_v21 = vor.u32 %v1003_v14, %v733_v15 }
  0x1f   :  { %626 = vmatpush.bf16.msra.mxu2 %v1026_v26  ;;  %v741_v19 = vld [vmem:[%s1373_s0 + $0x38] sm:$0xf0]  ;;  %v740_v22 = vor.u32 %v1008_v17, %v739_v16 }
  0x20   :  { %640 = vmatpush.bf16.msra.mxu3 %v1034_v27  ;;  %v744_v23 = vor.u32 %v1004_v18, %v741_v19 }
  0x21   :  { %599 = vmatpush.bf16.msra.mxu0 %v1009_v28  ;;  %v1079_v28 = vld [vmem:[#allocation2] ss:$0 sm:$0xff] }
  0x22   :  { %613 = vmatpush.bf16.msra.mxu1 %v1017_v29 }
  0x23   :  { %627 = vmatpush.bf16.msra.mxu2 %v1025_v30 }
  0x24   :  { %641 = vmatpush.bf16.msra.mxu3 %v1033_v31  ;;  %600 = vmatmul.bf16.vlgmr.msra.gmra.mxu0 %v716_v45 }
  0x25   :  { %648 = vmatpush.bf16.msrb.mxu0 %v1048_v32  ;;  %614 = vmatmul.bf16.vlgmr.msra.gmra.mxu1 %v720_v47 }
  0x26   :  { %662 = vmatpush.bf16.msrb.mxu1 %v1056_v33  ;;  %628 = vmatmul.bf16.vlgmr.msra.gmra.mxu2 %v724_v44 }
  0x27   :  { %676 = vmatpush.bf16.msrb.mxu2 %v1064_v42  ;;  %642 = vmatmul.bf16.vlgmr.msra.gmra.mxu3 %v728_v46 }
  0x28   :  { %690 = vmatpush.bf16.msrb.mxu3 %v1072_v43 }
  0x29   :  { %649 = vmatpush.bf16.msrb.mxu0 %v1047_v48 }
  0x2a   :  { %663 = vmatpush.bf16.msrb.mxu1 %v1055_v49 }
  0x2b   :  { %677 = vmatpush.bf16.msrb.mxu2 %v1063_v50 }
  0x2c   :  { %691 = vmatpush.bf16.msrb.mxu3 %v1071_v51 }
  0x2d   :  { %650 = vmatpush.bf16.msrb.mxu0 %v1046_v52 }
  0x2e   :  { %664 = vmatpush.bf16.msrb.mxu1 %v1054_v53 }
  0x2f   :  { %678 = vmatpush.bf16.msrb.mxu2 %v1062_v54 }
  0x30   :  { %692 = vmatpush.bf16.msrb.mxu3 %v1070_v55 }
  0x31   :  { %651 = vmatpush.bf16.msrb.mxu0 %v1045_v56 }
  0x32   :  { %665 = vmatpush.bf16.msrb.mxu1 %v1053_v57 }
  0x33   :  { %679 = vmatpush.bf16.msrb.mxu2 %v1061_v58 }
  0x34   :  { %693 = vmatpush.bf16.msrb.mxu3 %v1069_v59 }
  0x35   :  { %652 = vmatpush.bf16.msrb.mxu0 %v1044_v60 }
  0x36   :  { %666 = vmatpush.bf16.msrb.mxu1 %v1052_v61 }
  0x37   :  { %680 = vmatpush.bf16.msrb.mxu2 %v1060_v62 }
  0x38   :  { %694 = vmatpush.bf16.msrb.mxu3 %v1068_v63 }
  0x39   :  { %653 = vmatpush.bf16.msrb.mxu0 %v1043_v0 }
  0x3a   :  { %667 = vmatpush.bf16.msrb.mxu1 %v1051_v1 }
  0x3b   :  { %681 = vmatpush.bf16.msrb.mxu2 %v1059_v2 }
  0x3c   :  { %695 = vmatpush.bf16.msrb.mxu3 %v1067_v3 }
  0x3d   :  { %654 = vmatpush.bf16.msrb.mxu0 %v1042_v4 }
  0x3e   :  { %668 = vmatpush.bf16.msrb.mxu1 %v1050_v5 }
  0x3f   :  { %682 = vmatpush.bf16.msrb.mxu2 %v1058_v6 }
  0x40   :  { %696 = vmatpush.bf16.msrb.mxu3 %v1066_v7 }
  0x41   :  { %655 = vmatpush.bf16.msrb.mxu0 %v1041_v8 }
  0x42   :  { %669 = vmatpush.bf16.msrb.mxu1 %v1049_v9 }
  0x43   :  { %683 = vmatpush.bf16.msrb.mxu2 %v1057_v10 }
  0x44   :  { %697 = vmatpush.bf16.msrb.mxu3 %v1065_v11  ;;  %656 = vmatmul.bf16.vlgmr.msrb.gmra.mxu0 %v732_v20 }
  0x45   :  { %670 = vmatmul.bf16.vlgmr.msrb.gmra.mxu1 %v736_v21 }
  0x46   :  { %684 = vmatmul.bf16.vlgmr.msrb.gmra.mxu2 %v740_v22 }
  0x47   :  { %698 = vmatmul.bf16.vlgmr.msrb.gmra.mxu3 %v744_v23 }
  0xa1   :  { %v601_v24 = vpop.f32.mrf.mxu0 }
  0xa2   :  { %v615_v25 = vpop.f32.mrf.mxu1  ;;  %v602_v30 = vadd.f32 %v1079_v28, %v601_v24 }
  0xa4   :  { %v616_v33 = vadd.f32 %v615_v25, %v602_v30 }
  0xa9   :  { %v629_v26 = vpop.f32.mrf.mxu2  ;;  %v603_v29 = vpop.f32.mrf.mxu0 }
  0xaa   :  { %v643_v27 = vpop.f32.mrf.mxu3  ;;  %v617_v31 = vpop.f32.mrf.mxu1  ;;  %v604_v32 = vadd.f32 %v1079_v28, %v603_v29  ;;  %v630_v38 = vadd.f32 %v629_v26, %v616_v33 }
  0xac   :  { %v618_v36 = vadd.f32 %v617_v31, %v604_v32  ;;  %v644_v41 = vadd.f32 %v643_v27, %v630_v38 }
  0xb1   :  { %v631_v34 = vpop.f32.mrf.mxu2 }
  0xb2   :  { %v645_v35 = vpop.f32.mrf.mxu3  ;;  %v632_v40 = vadd.f32 %v631_v34, %v618_v36 }
  0xb4   :  { %v646_v44 = vadd.f32 %v645_v35, %v632_v40 }
  0xc1   :  { %v657_v37 = vpop.f32.mrf.mxu0 }
  0xc2   :  { %v671_v39 = vpop.f32.mrf.mxu1  ;;  %v658_v45 = vadd.f32 %v657_v37, %v644_v41 }
  0xc4   :  { %v672_v48 = vadd.f32 %v671_v39, %v658_v45 }
  0xc9   :  { %v685_v42 = vpop.f32.mrf.mxu2  ;;  %v659_v46 = vpop.f32.mrf.mxu0 }
  0xca   :  { %v699_v43 = vpop.f32.mrf.mxu3  ;;  %v660_v47 = vadd.f32 %v659_v46, %v646_v44  ;;  %v673_v49 = vpop.f32.mrf.mxu1  ;;  %v686_v50 = vadd.f32 %v685_v42, %v672_v48 }
  0xcc   :  { %v674_v51 = vadd.f32 %v673_v49, %v660_v47  ;;  %v700_v55 = vadd.f32 %v699_v43, %v686_v50 }
  0xd1   :  { %v687_v52 = vpop.f32.mrf.mxu2 }
  0xd2   :  { %v688_v53 = vadd.f32 %v687_v52, %v674_v51  ;;  %v701_v54 = vpop.f32.mrf.mxu3 }
  0xd4   :  { %v702_v56 = vadd.f32 %v701_v54, %v688_v53 }
  0xd6   :  { %v1076_v57 = vpack.c.bf16 %v702_v56, %v700_v55 }
  0xd8   :  { %1077 = vst [vmem:[%s1376_s3] sm:$0xff] %v1076_v57  }
  0xd9   :  { %712 = vsyncpa [#allocation3], 1 }

// kernel: _lambda_.69
= control target key start
LH: loop header
LB: loop body
LE: loop exit
PB: predicated region body
PF: predicated region fallthrough
CT: control target
= control target key end

     0   :  { %8 = vsyncpa [#allocation3], 0  ;;  %s463_s15 = smov [#allocation2]   ;;  %s580_s0 = inlined_call_operand.vmem [shape: bf16[1,16,384], index: 0, kind: input, shape index: {}]   ;;  %s581_s1 = inlined_call_operand.vmem [shape: bf16[1,384,128], index: 1, kind: input, shape index: {}]   ;;  %s582_s2 = inlined_call_operand.hbm [shape: f32[1,1,128], index: 2, kind: input, shape index: {}]   ;;  %s583_s3 = inlined_call_operand.vmem [shape: bf16[1,16,128], index: 3, kind: output, shape index: {}]  }
   0x1   :  { %s18_s14 = sshll.u32 %s582_s2, 4  ;;  %s20_s16 = sshll.u32 %s463_s15, 4  ;;  %s19_s14 = int_to_ptr.hbm [resolvable:$true] %s18_s14  ;;  %s21_s16 = int_to_ptr.vmem [resolvable:$true] %s20_s16 }
   0x2   :  { %23 = dma.hbm_to_vmem [thread:$0]  %s19_s14, 16, %s21_s16, [#allocation3]  }
   0x3   :  { %461 = dma.done.wait [#allocation3], 16  }
   0x4   :  { %462 = vsyncadd [#allocation3], 4294967280  ;;  %v413_v0 = vld [vmem:[%s581_s1 + $0x38] sm:$0xff]  ;;  %v412_v3 = vld [vmem:[%s581_s1 + $0x30] sm:$0xff] }
   0x5   :  { %v421_v1 = vld [vmem:[%s581_s1 + $0x78] sm:$0xff]  ;;  %244 = vmatpush.bf16.msra.mxu0 %v413_v0  ;;  %v420_v4 = vld [vmem:[%s581_s1 + $0x70] sm:$0xff]  ;;  %v411_v6 = vld [vmem:[%s581_s1 + $0x28] sm:$0xff] }
   0x6   :  { %v429_v2 = vld [vmem:[%s581_s1 + $0xb8] sm:$0xff]  ;;  %258 = vmatpush.bf16.msra.mxu1 %v421_v1  ;;  %v428_v5 = vld [vmem:[%s581_s1 + $0xb0] sm:$0xff]  ;;  %v419_v7 = vld [vmem:[%s581_s1 + $0x68] sm:$0xff] }
   0x7   :  { %272 = vmatpush.bf16.msra.mxu2 %v429_v2  ;;  %v427_v8 = vld [vmem:[%s581_s1 + $0xa8] sm:$0xff]  ;;  %v410_v9 = vld [vmem:[%s581_s1 + $0x20] sm:$0xff]  ;;  %v409_v12 = vld [vmem:[%s581_s1 + $0x18] sm:$0xff] }
   0x8   :  { %v418_v10 = vld [vmem:[%s581_s1 + $0x60] sm:$0xff]  ;;  %v417_v13 = vld [vmem:[%s581_s1 + $0x58] sm:$0xff]  ;;  %v408_v15 = vld [vmem:[%s581_s1 + $0x10] sm:$0xff] }
   0x9   :  { %245 = vmatpush.bf16.msra.mxu0 %v412_v3  ;;  %v426_v11 = vld [vmem:[%s581_s1 + $0xa0] sm:$0xff]  ;;  %v425_v14 = vld [vmem:[%s581_s1 + $0x98] sm:$0xff]  ;;  %v416_v16 = vld [vmem:[%s581_s1 + $0x50] sm:$0xff] }
   0xa   :  { %259 = vmatpush.bf16.msra.mxu1 %v420_v4  ;;  %v424_v17 = vld [vmem:[%s581_s1 + $0x90] sm:$0xff]  ;;  %v407_v18 = vld [vmem:[%s581_s1 + $0x8] sm:$0xff]  ;;  %v406_v21 = vld [vmem:[%s581_s1] sm:$0xff] }
   0xb   :  { %273 = vmatpush.bf16.msra.mxu2 %v428_v5  ;;  %v415_v19 = vld [vmem:[%s581_s1 + $0x48] sm:$0xff]  ;;  %v414_v22 = vld [vmem:[%s581_s1 + $0x40] sm:$0xff]  ;;  %v299_v26 = vld [vmem:[%s580_s0 + $0xc] sm:$0xf0] }
   0xc   :  { %v423_v20 = vld [vmem:[%s581_s1 + $0x88] sm:$0xff]  ;;  %v297_v23 = vld [vmem:[%s580_s0] sm:$0xf]  ;;  %v403_v25 = vld [vmem:[%s580_s0 + $0x4] sm:$0xf] }
   0xd   :  { %246 = vmatpush.bf16.msra.mxu0 %v411_v6  ;;  %v404_v24 = vld [vmem:[%s580_s0 + $0x8] sm:$0xf0]  ;;  %v422_v27 = vld [vmem:[%s581_s1 + $0x80] sm:$0xff]  ;;  %v305_v28 = vld [vmem:[%s580_s0 + $0x8] sm:$0xf]  ;;  %v302_v31 = vor.u32 %v403_v25, %v299_v26 }
   0xe   :  { %260 = vmatpush.bf16.msra.mxu1 %v419_v7  ;;  %v405_v29 = vld [vmem:[%s580_s0 + $0x10] sm:$0xf0]  ;;  %v298_v30 = vor.u32 %v404_v24, %v297_v23  ;;  %v436_v35 = vld [vmem:[#allocation2] ss:$0 sm:$0xff] }
   0xf   :  { %274 = vmatpush.bf16.msra.mxu2 %v427_v8  ;;  %v306_v32 = vor.u32 %v405_v29, %v305_v28 }
  0x11   :  { %247 = vmatpush.bf16.msra.mxu0 %v410_v9 }
  0x12   :  { %261 = vmatpush.bf16.msra.mxu1 %v418_v10 }
  0x13   :  { %275 = vmatpush.bf16.msra.mxu2 %v426_v11 }
  0x15   :  { %248 = vmatpush.bf16.msra.mxu0 %v409_v12 }
  0x16   :  { %262 = vmatpush.bf16.msra.mxu1 %v417_v13 }
  0x17   :  { %276 = vmatpush.bf16.msra.mxu2 %v425_v14 }
  0x19   :  { %249 = vmatpush.bf16.msra.mxu0 %v408_v15 }
  0x1a   :  { %263 = vmatpush.bf16.msra.mxu1 %v416_v16 }
  0x1b   :  { %277 = vmatpush.bf16.msra.mxu2 %v424_v17 }
  0x1d   :  { %250 = vmatpush.bf16.msra.mxu0 %v407_v18 }
  0x1e   :  { %264 = vmatpush.bf16.msra.mxu1 %v415_v19 }
  0x1f   :  { %278 = vmatpush.bf16.msra.mxu2 %v423_v20 }
  0x21   :  { %251 = vmatpush.bf16.msra.mxu0 %v406_v21 }
  0x22   :  { %265 = vmatpush.bf16.msra.mxu1 %v414_v22 }
  0x23   :  { %279 = vmatpush.bf16.msra.mxu2 %v422_v27 }
  0x24   :  { %252 = vmatmul.bf16.vlgmr.msra.gmra.mxu0 %v298_v30 }
  0x25   :  { %266 = vmatmul.bf16.vlgmr.msra.gmra.mxu1 %v302_v31 }
  0x26   :  { %280 = vmatmul.bf16.vlgmr.msra.gmra.mxu2 %v306_v32 }
  0xa1   :  { %v253_v33 = vpop.f32.mrf.mxu0 }
  0xa2   :  { %v267_v34 = vpop.f32.mrf.mxu1  ;;  %v254_v37 = vadd.f32 %v436_v35, %v253_v33 }
  0xa4   :  { %v268_v40 = vadd.f32 %v267_v34, %v254_v37 }
  0xa9   :  { %v281_v36 = vpop.f32.mrf.mxu2  ;;  %v255_v38 = vpop.f32.mrf.mxu0 }
  0xaa   :  { %v256_v39 = vadd.f32 %v436_v35, %v255_v38  ;;  %v269_v41 = vpop.f32.mrf.mxu1  ;;  %v282_v44 = vadd.f32 %v281_v36, %v268_v40 }
  0xac   :  { %v270_v42 = vadd.f32 %v269_v41, %v256_v39 }
  0xb1   :  { %v283_v43 = vpop.f32.mrf.mxu2 }
  0xb2   :  { %v284_v45 = vadd.f32 %v283_v43, %v270_v42 }
  0xb4   :  { %v433_v46 = vpack.c.bf16 %v284_v45, %v282_v44 }
  0xb6   :  { %434 = vst [vmem:[%s583_s3] sm:$0xff] %v433_v46  }
  0xb7   :  { %294 = vsyncpa [#allocation3], 1 }

// kernel: _lambda_.106
= control target key start
LH: loop header
LB: loop body
LE: loop exit
PB: predicated region body
PF: predicated region fallthrough
CT: control target
= control target key end

     0   :  { %9 = vsyncpa [#allocation3], 0  ;;  %s218_s18 = smov [#allocation2]   ;;  %s280_s0 = inlined_call_operand.vmem [shape: bf16[1,16,128], index: 0, kind: input, shape index: {}]   ;;  %s281_s1 = inlined_call_operand.vmem [shape: bf16[1,128,128], index: 1, kind: input, shape index: {}]   ;;  %s282_s2 = inlined_call_operand.hbm [shape: f32[1,1,128], index: 2, kind: input, shape index: {}]   ;;  %s283_s3 = inlined_call_operand.vmem [shape: bf16[1,16,128], index: 3, kind: input, shape index: {}]   ;;  %s284_s4 = inlined_call_operand.vmem [shape: bf16[1,16,128], index: 4, kind: output, shape index: {}]  }
   0x1   :  { %s19_s17 = sshll.u32 %s282_s2, 4  ;;  %s21_s19 = sshll.u32 %s218_s18, 4  ;;  %s20_s17 = int_to_ptr.hbm [resolvable:$true] %s19_s17  ;;  %s22_s19 = int_to_ptr.vmem [resolvable:$true] %s21_s19 }
   0x2   :  { %24 = dma.hbm_to_vmem [thread:$0]  %s20_s17, 16, %s22_s19, [#allocation3]  }
   0x3   :  { %216 = dma.done.wait [#allocation3], 16  }
   0x4   :  { %217 = vsyncadd [#allocation3], 4294967280  ;;  %v176_v0 = vld [vmem:[%s281_s1 + $0x38] sm:$0xff]  ;;  %v175_v1 = vld [vmem:[%s281_s1 + $0x30] sm:$0xff] }
   0x5   :  { %106 = vmatpush.bf16.msra.mxu0 %v176_v0  ;;  %v174_v2 = vld [vmem:[%s281_s1 + $0x28] sm:$0xff]  ;;  %v173_v3 = vld [vmem:[%s281_s1 + $0x20] sm:$0xff]  ;;  %v172_v4 = vld [vmem:[%s281_s1 + $0x18] sm:$0xff] }
   0x6   :  { %v171_v5 = vld [vmem:[%s281_s1 + $0x10] sm:$0xff]  ;;  %v178_v6 = vld [vmem:[%s280_s0] sm:$0xff]   ;;  %v170_v9 = vld [vmem:[%s281_s1 + $0x8] sm:$0xff] }
   0x7   :  { %v179_v7 = vunpack.c.l.bf16 %v178_v6  ;;  %v180_v8 = vunpack.c.h.bf16 %v178_v6  ;;  %v169_v12 = vld [vmem:[%s281_s1] sm:$0xff] }
   0x8   :  { %v191_v15 = vld [vmem:[#allocation2] ss:$0 sm:$0xff] }
   0x9   :  { %107 = vmatpush.bf16.msra.mxu0 %v175_v1  ;;  %v35_v10 = vmax.f32 %v179_v7, 0.0  ;;  %v36_v11 = vmax.f32 %v180_v8, 0.0  ;;  %v182_v16 = vld [vmem:[%s283_s3] sm:$0xff]  }
   0xa   :  { %v183_v18 = vunpack.c.l.bf16 %v182_v16  ;;  %v184_v19 = vunpack.c.h.bf16 %v182_v16 }
   0xb   :  { %v37_v13 = vpack.c.bf16 %v36_v11, %v35_v10 }
   0xd   :  { %108 = vmatpush.bf16.msra.mxu0 %v174_v2 }
  0x11   :  { %109 = vmatpush.bf16.msra.mxu0 %v173_v3 }
  0x15   :  { %110 = vmatpush.bf16.msra.mxu0 %v172_v4 }
  0x19   :  { %111 = vmatpush.bf16.msra.mxu0 %v171_v5 }
  0x1d   :  { %112 = vmatpush.bf16.msra.mxu0 %v170_v9 }
  0x21   :  { %113 = vmatpush.bf16.msra.mxu0 %v169_v12 }
  0x24   :  { %114 = vmatmul.bf16.vlgmr.msra.gmra.mxu0 %v37_v13 }
  0xa1   :  { %v115_v14 = vpop.f32.mrf.mxu0 }
  0xa2   :  { %v116_v17 = vadd.f32 %v191_v15, %v115_v14 }
  0xa4   :  { %v124_v21 = vadd.f32 %v183_v18, %v116_v17 }
  0xa6   :  { %v126_v24 = vmax.f32 %v124_v21, 0.0 }
  0xa9   :  { %v117_v20 = vpop.f32.mrf.mxu0 }
  0xaa   :  { %v118_v22 = vadd.f32 %v191_v15, %v117_v20 }
  0xac   :  { %v125_v23 = vadd.f32 %v184_v19, %v118_v22 }
  0xae   :  { %v127_v25 = vmax.f32 %v125_v23, 0.0 }
  0xb0   :  { %v188_v26 = vpack.c.bf16 %v127_v25, %v126_v24 }
  0xb2   :  { %189 = vst [vmem:[%s284_s4] sm:$0xff] %v188_v26  }
  0xb3   :  { %136 = vsyncpa [#allocation3], 1 }

// kernel: _lambda_.102
= control target key start
LH: loop header
LB: loop body
LE: loop exit
PB: predicated region body
PF: predicated region fallthrough
CT: control target
= control target key end

     0   :  { %8 = vsyncpa [#allocation3], 0  ;;  %s207_s15 = smov [#allocation2]   ;;  %s261_s0 = inlined_call_operand.vmem [shape: bf16[1,16,128], index: 0, kind: input, shape index: {}]   ;;  %s262_s1 = inlined_call_operand.vmem [shape: bf16[1,128,128], index: 1, kind: input, shape index: {}]   ;;  %s263_s2 = inlined_call_operand.hbm [shape: f32[1,1,128], index: 2, kind: input, shape index: {}]   ;;  %s264_s3 = inlined_call_operand.vmem [shape: bf16[1,16,128], index: 3, kind: output, shape index: {}]  }
   0x1   :  { %s18_s14 = sshll.u32 %s263_s2, 4  ;;  %s20_s16 = sshll.u32 %s207_s15, 4  ;;  %s19_s14 = int_to_ptr.hbm [resolvable:$true] %s18_s14  ;;  %s21_s16 = int_to_ptr.vmem [resolvable:$true] %s20_s16 }
   0x2   :  { %23 = dma.hbm_to_vmem [thread:$0]  %s19_s14, 16, %s21_s16, [#allocation3]  }
   0x3   :  { %205 = dma.done.wait [#allocation3], 16  }
   0x4   :  { %206 = vsyncadd [#allocation3], 4294967280  ;;  %v173_v0 = vld [vmem:[%s262_s1 + $0x38] sm:$0xff]  ;;  %v172_v1 = vld [vmem:[%s262_s1 + $0x30] sm:$0xff] }
   0x5   :  { %104 = vmatpush.bf16.msra.mxu0 %v173_v0  ;;  %v171_v2 = vld [vmem:[%s262_s1 + $0x28] sm:$0xff]  ;;  %v170_v3 = vld [vmem:[%s262_s1 + $0x20] sm:$0xff]  ;;  %v169_v4 = vld [vmem:[%s262_s1 + $0x18] sm:$0xff] }
   0x6   :  { %v168_v5 = vld [vmem:[%s262_s1 + $0x10] sm:$0xff]  ;;  %v167_v6 = vld [vmem:[%s262_s1 + $0x8] sm:$0xff]  ;;  %v166_v7 = vld [vmem:[%s262_s1] sm:$0xff] }
   0x7   :  { %v165_v8 = vld [vmem:[%s261_s0] sm:$0xff] }
   0x8   :  { %v180_v10 = vld [vmem:[#allocation2] ss:$0 sm:$0xff] }
   0x9   :  { %105 = vmatpush.bf16.msra.mxu0 %v172_v1 }
   0xd   :  { %106 = vmatpush.bf16.msra.mxu0 %v171_v2 }
  0x11   :  { %107 = vmatpush.bf16.msra.mxu0 %v170_v3 }
  0x15   :  { %108 = vmatpush.bf16.msra.mxu0 %v169_v4 }
  0x19   :  { %109 = vmatpush.bf16.msra.mxu0 %v168_v5 }
  0x1d   :  { %110 = vmatpush.bf16.msra.mxu0 %v167_v6 }
  0x21   :  { %111 = vmatpush.bf16.msra.mxu0 %v166_v7 }
  0x24   :  { %112 = vmatmul.bf16.vlgmr.msra.gmra.mxu0 %v165_v8 }
  0xa1   :  { %v113_v9 = vpop.f32.mrf.mxu0 }
  0xa2   :  { %v114_v11 = vadd.f32 %v180_v10, %v113_v9 }
  0xa4   :  { %v118_v14 = vmax.f32 %v114_v11, 0.0 }
  0xa9   :  { %v115_v12 = vpop.f32.mrf.mxu0 }
  0xaa   :  { %v116_v13 = vadd.f32 %v180_v10, %v115_v12 }
  0xac   :  { %v119_v15 = vmax.f32 %v116_v13, 0.0 }
  0xae   :  { %v177_v16 = vpack.c.bf16 %v119_v15, %v118_v14 }
  0xb0   :  { %178 = vst [vmem:[%s264_s3] sm:$0xff] %v177_v16  }
  0xb1   :  { %128 = vsyncpa [#allocation3], 1 }

// kernel: squeeze.94
= control target key start
LH: loop header
LB: loop body
LE: loop exit
PB: predicated region body
PF: predicated region fallthrough
CT: control target
= control target key end

     0   :  { %s663_s0 = inlined_call_operand.vmem [shape: bf16[1,8,1024], index: 0, kind: input, shape index: {}]   ;;  %s664_s1 = inlined_call_operand.vmem [shape: bf16[1,2,2,2,2,2,2,128], index: 1, kind: output, shape index: {}]  }
   0x1   :  { %v543_v0 = vld [vmem:[%s663_s0 + $0x10] sm:$0xff]   ;;  %v539_v2 = vld [vmem:[%s663_s0] sm:$0xff]   ;;  %v544_v5 = vld [vmem:[%s663_s0 + $0x8] sm:$0xff]  }
   0x2   :  { %v532_v1 = vunpack.c.l.bf16 %v543_v0  ;;  %v540_v3 = vunpack.c.l.bf16 %v539_v2  ;;  %v541_v4 = vunpack.c.h.bf16 %v539_v2  ;;  %v536_v6 = vunpack.c.l.bf16 %v544_v5  ;;  %v542_v9 = vld [vmem:[%s663_s0 + $0x18] sm:$0xff]  }
   0x3   :  { %v537_v7 = vunpack.c.h.bf16 %v544_v5  ;;  %v533_v8 = vunpack.c.h.bf16 %v543_v0  ;;  %v528_v10 = vunpack.c.l.bf16 %v542_v9  ;;  %v529_v11 = vunpack.c.h.bf16 %v542_v9 }
   0x4   :  { %195 = vst [vmem:[#allocation0 + $0x10] sm:$0x1] %v532_v1  }
   0x5   :  { %123 = vst [vmem:[#allocation0] sm:$0x1] %v540_v3  }
   0x6   :  { %125 = vst [vmem:[#allocation0 + $0x1f] sm:$0x2] %v540_v3  }
   0x7   :  { %127 = vst [vmem:[#allocation0 + $0x3e] sm:$0x4] %v540_v3  }
   0x8   :  { %129 = vst [vmem:[#allocation0 + $0x5d] sm:$0x8] %v540_v3  }
   0x9   :  { %131 = vst [vmem:[#allocation0 + $0x7c] sm:$0x10] %v540_v3  }
   0xa   :  { %133 = vst [vmem:[#allocation0 + $0x9b] sm:$0x20] %v540_v3  }
   0xb   :  { %135 = vst [vmem:[#allocation0 + $0xba] sm:$0x40] %v540_v3  }
   0xc   :  { %137 = vst [vmem:[#allocation0 + $0xd9] sm:$0x80] %v540_v3  }
   0xd   :  { %141 = vst [vmem:[#allocation0 + $0x1] sm:$0x1] %v541_v4  }
   0xe   :  { %143 = vst [vmem:[#allocation0 + $0x20] sm:$0x2] %v541_v4  }
   0xf   :  { %145 = vst [vmem:[#allocation0 + $0x3f] sm:$0x4] %v541_v4  }
  0x10   :  { %147 = vst [vmem:[#allocation0 + $0x5e] sm:$0x8] %v541_v4  }
  0x11   :  { %149 = vst [vmem:[#allocation0 + $0x7d] sm:$0x10] %v541_v4  }
  0x12   :  { %151 = vst [vmem:[#allocation0 + $0x9c] sm:$0x20] %v541_v4  }
  0x13   :  { %153 = vst [vmem:[#allocation0 + $0xbb] sm:$0x40] %v541_v4  }
  0x14   :  { %155 = vst [vmem:[#allocation0 + $0xda] sm:$0x80] %v541_v4   ;;  %v266_v12 = vld [vmem:[#allocation0] sm:$0x3] }
  0x15   :  { %159 = vst [vmem:[#allocation0 + $0x8] sm:$0x1] %v536_v6   ;;  %v267_v15 = vpack.c.bf16 0.0, %v266_v12  ;;  %v293_v17 = vld [vmem:[#allocation0 + $0x20] sm:$0x3] }
  0x16   :  { %161 = vst [vmem:[#allocation0 + $0x27] sm:$0x2] %v536_v6   ;;  %v294_v23 = vpack.c.bf16 0.0, %v293_v17  ;;  %v321_v26 = vld [vmem:[#allocation0 + $0x40] sm:$0x3] }
  0x17   :  { %163 = vst [vmem:[#allocation0 + $0x46] sm:$0x4] %v536_v6   ;;  %v322_v31 = vpack.c.bf16 0.0, %v321_v26  ;;  %v349_v34 = vld [vmem:[#allocation0 + $0x60] sm:$0x3] }
  0x18   :  { %165 = vst [vmem:[#allocation0 + $0x65] sm:$0x8] %v536_v6   ;;  %v350_v39 = vpack.c.bf16 0.0, %v349_v34  ;;  %v377_v42 = vld [vmem:[#allocation0 + $0x80] sm:$0x3] }
  0x19   :  { %167 = vst [vmem:[#allocation0 + $0x84] sm:$0x10] %v536_v6   ;;  %v378_v47 = vpack.c.bf16 0.0, %v377_v42  ;;  %v405_v50 = vld [vmem:[#allocation0 + $0xa0] sm:$0x3] }
  0x1a   :  { %169 = vst [vmem:[#allocation0 + $0xa3] sm:$0x20] %v536_v6   ;;  %v406_v55 = vpack.c.bf16 0.0, %v405_v50  ;;  %v433_v58 = vld [vmem:[#allocation0 + $0xc0] sm:$0x3] }
  0x1b   :  { %171 = vst [vmem:[#allocation0 + $0xc2] sm:$0x40] %v536_v6   ;;  %v434_v63 = vpack.c.bf16 0.0, %v433_v58  ;;  %v461_v2 = vld [vmem:[#allocation0 + $0xe0] sm:$0x3] }
  0x1c   :  { %173 = vst [vmem:[#allocation0 + $0xe1] sm:$0x80] %v536_v6  }
  0x1d   :  { %177 = vst [vmem:[#allocation0 + $0x9] sm:$0x1] %v537_v7  }
  0x1e   :  { %179 = vst [vmem:[#allocation0 + $0x28] sm:$0x2] %v537_v7  }
  0x1f   :  { %181 = vst [vmem:[#allocation0 + $0x47] sm:$0x4] %v537_v7  }
  0x20   :  { %183 = vst [vmem:[#allocation0 + $0x66] sm:$0x8] %v537_v7  }
  0x21   :  { %185 = vst [vmem:[#allocation0 + $0x85] sm:$0x10] %v537_v7  }
  0x22   :  { %187 = vst [vmem:[#allocation0 + $0xa4] sm:$0x20] %v537_v7  }
  0x23   :  { %189 = vst [vmem:[#allocation0 + $0xc3] sm:$0x40] %v537_v7  }
  0x24   :  { %191 = vst [vmem:[#allocation0 + $0xe2] sm:$0x80] %v537_v7   ;;  %v272_v13 = vld [vmem:[#allocation0 + $0x8] sm:$0x3]  ;;  %v462_v7 = vpack.c.bf16 0.0, %v461_v2 }
  0x25   :  { %197 = vst [vmem:[#allocation0 + $0x2f] sm:$0x2] %v532_v1   ;;  %v273_v16 = vpack.c.bf16 0.0, %v272_v13  ;;  %v300_v19 = vld [vmem:[#allocation0 + $0x28] sm:$0x3] }
  0x26   :  { %199 = vst [vmem:[#allocation0 + $0x4e] sm:$0x4] %v532_v1   ;;  %v301_v25 = vpack.c.bf16 0.0, %v300_v19  ;;  %v328_v28 = vld [vmem:[#allocation0 + $0x48] sm:$0x3] }
  0x27   :  { %201 = vst [vmem:[#allocation0 + $0x6d] sm:$0x8] %v532_v1   ;;  %v329_v33 = vpack.c.bf16 0.0, %v328_v28  ;;  %v356_v36 = vld [vmem:[#allocation0 + $0x68] sm:$0x3] }
  0x28   :  { %203 = vst [vmem:[#allocation0 + $0x8c] sm:$0x10] %v532_v1   ;;  %v357_v41 = vpack.c.bf16 0.0, %v356_v36  ;;  %v384_v44 = vld [vmem:[#allocation0 + $0x88] sm:$0x3] }
  0x29   :  { %205 = vst [vmem:[#allocation0 + $0xab] sm:$0x20] %v532_v1   ;;  %v385_v49 = vpack.c.bf16 0.0, %v384_v44  ;;  %v412_v52 = vld [vmem:[#allocation0 + $0xa8] sm:$0x3] }
  0x2a   :  { %207 = vst [vmem:[#allocation0 + $0xca] sm:$0x40] %v532_v1   ;;  %v413_v57 = vpack.c.bf16 0.0, %v412_v52  ;;  %v440_v60 = vld [vmem:[#allocation0 + $0xc8] sm:$0x3] }
  0x2b   :  { %209 = vst [vmem:[#allocation0 + $0xe9] sm:$0x80] %v532_v1   ;;  %v441_v1 = vpack.c.bf16 0.0, %v440_v60  ;;  %v468_v4 = vld [vmem:[#allocation0 + $0xe8] sm:$0x3] }
  0x2c   :  { %213 = vst [vmem:[#allocation0 + $0x11] sm:$0x1] %v533_v8   ;;  %v469_v9 = vpack.c.bf16 0.0, %v468_v4 }
  0x2d   :  { %215 = vst [vmem:[#allocation0 + $0x30] sm:$0x2] %v533_v8  }
  0x2e   :  { %217 = vst [vmem:[#allocation0 + $0x4f] sm:$0x4] %v533_v8  }
  0x2f   :  { %219 = vst [vmem:[#allocation0 + $0x6e] sm:$0x8] %v533_v8  }
  0x30   :  { %221 = vst [vmem:[#allocation0 + $0x8d] sm:$0x10] %v533_v8  }
  0x31   :  { %223 = vst [vmem:[#allocation0 + $0xac] sm:$0x20] %v533_v8  }
  0x32   :  { %225 = vst [vmem:[#allocation0 + $0xcb] sm:$0x40] %v533_v8  }
  0x33   :  { %227 = vst [vmem:[#allocation0 + $0xea] sm:$0x80] %v533_v8   ;;  %v279_v14 = vld [vmem:[#allocation0 + $0x10] sm:$0x3] }
  0x34   :  { %231 = vst [vmem:[#allocation0 + $0x18] sm:$0x1] %v528_v10   ;;  %v280_v18 = vpack.c.bf16 0.0, %v279_v14  ;;  %v307_v21 = vld [vmem:[#allocation0 + $0x30] sm:$0x3] }
  0x35   :  { %233 = vst [vmem:[#allocation0 + $0x37] sm:$0x2] %v528_v10   ;;  %v308_v27 = vpack.c.bf16 0.0, %v307_v21  ;;  %v335_v30 = vld [vmem:[#allocation0 + $0x50] sm:$0x3] }
  0x36   :  { %235 = vst [vmem:[#allocation0 + $0x56] sm:$0x4] %v528_v10   ;;  %v336_v35 = vpack.c.bf16 0.0, %v335_v30  ;;  %v363_v38 = vld [vmem:[#allocation0 + $0x70] sm:$0x3] }
  0x37   :  { %237 = vst [vmem:[#allocation0 + $0x75] sm:$0x8] %v528_v10   ;;  %v364_v43 = vpack.c.bf16 0.0, %v363_v38  ;;  %v391_v46 = vld [vmem:[#allocation0 + $0x90] sm:$0x3] }
  0x38   :  { %239 = vst [vmem:[#allocation0 + $0x94] sm:$0x10] %v528_v10   ;;  %v392_v51 = vpack.c.bf16 0.0, %v391_v46  ;;  %v419_v54 = vld [vmem:[#allocation0 + $0xb0] sm:$0x3] }
  0x39   :  { %241 = vst [vmem:[#allocation0 + $0xb3] sm:$0x20] %v528_v10   ;;  %v420_v59 = vpack.c.bf16 0.0, %v419_v54  ;;  %v447_v62 = vld [vmem:[#allocation0 + $0xd0] sm:$0x3] }
  0x3a   :  { %243 = vst [vmem:[#allocation0 + $0xd2] sm:$0x40] %v528_v10   ;;  %v448_v3 = vpack.c.bf16 0.0, %v447_v62  ;;  %v475_v6 = vld [vmem:[#allocation0 + $0xf0] sm:$0x3] }
  0x3b   :  { %245 = vst [vmem:[#allocation0 + $0xf1] sm:$0x80] %v528_v10   ;;  %v476_v10 = vpack.c.bf16 0.0, %v475_v6 }
  0x3c   :  { %249 = vst [vmem:[#allocation0 + $0x19] sm:$0x1] %v529_v11  }
  0x3d   :  { %251 = vst [vmem:[#allocation0 + $0x38] sm:$0x2] %v529_v11  }
  0x3e   :  { %253 = vst [vmem:[#allocation0 + $0x57] sm:$0x4] %v529_v11  }
  0x3f   :  { %255 = vst [vmem:[#allocation0 + $0x76] sm:$0x8] %v529_v11  }
  0x40   :  { %257 = vst [vmem:[#allocation0 + $0x95] sm:$0x10] %v529_v11  }
  0x41   :  { %259 = vst [vmem:[#allocation0 + $0xb4] sm:$0x20] %v529_v11  }
  0x42   :  { %261 = vst [vmem:[#allocation0 + $0xd3] sm:$0x40] %v529_v11  }
  0x43   :  { %263 = vst [vmem:[#allocation0 + $0xf2] sm:$0x80] %v529_v11   ;;  %v286_v20 = vld [vmem:[#allocation0 + $0x18] sm:$0x3] }
  0x44   :  { %270 = vst [vmem:[%s664_s1] sm:$0x1] %v267_v15  ;;  %v287_v22 = vpack.c.bf16 0.0, %v286_v20  ;;  %v314_v24 = vld [vmem:[#allocation0 + $0x38] sm:$0x3] }
  0x45   :  { %495 = vst [vmem:[%s664_s1 + $0x1] sm:$0x1] %v273_v16  ;;  %v315_v29 = vpack.c.bf16 0.0, %v314_v24  ;;  %v342_v32 = vld [vmem:[#allocation0 + $0x58] sm:$0x3] }
  0x46   :  { %496 = vst [vmem:[%s664_s1 + $0x2] sm:$0x1] %v280_v18  ;;  %v343_v37 = vpack.c.bf16 0.0, %v342_v32  ;;  %v370_v40 = vld [vmem:[#allocation0 + $0x78] sm:$0x3] }
  0x47   :  { %497 = vst [vmem:[%s664_s1 + $0x3] sm:$0x1] %v287_v22  ;;  %v371_v45 = vpack.c.bf16 0.0, %v370_v40  ;;  %v398_v48 = vld [vmem:[#allocation0 + $0x98] sm:$0x3] }
  0x48   :  { %498 = vst [vmem:[%s664_s1 + $0x4] sm:$0x1] %v294_v23  ;;  %v399_v53 = vpack.c.bf16 0.0, %v398_v48  ;;  %v426_v56 = vld [vmem:[#allocation0 + $0xb8] sm:$0x3] }
  0x49   :  { %499 = vst [vmem:[%s664_s1 + $0x5] sm:$0x1] %v301_v25  ;;  %v427_v61 = vpack.c.bf16 0.0, %v426_v56  ;;  %v454_v0 = vld [vmem:[#allocation0 + $0xd8] sm:$0x3] }
  0x4a   :  { %500 = vst [vmem:[%s664_s1 + $0x6] sm:$0x1] %v308_v27  ;;  %v455_v5 = vpack.c.bf16 0.0, %v454_v0  ;;  %v482_v8 = vld [vmem:[#allocation0 + $0xf8] sm:$0x3] }
  0x4b   :  { %501 = vst [vmem:[%s664_s1 + $0x7] sm:$0x1] %v315_v29  ;;  %v483_v11 = vpack.c.bf16 0.0, %v482_v8 }
  0x4c   :  { %502 = vst [vmem:[%s664_s1 + $0x8] sm:$0x1] %v322_v31 }
  0x4d   :  { %503 = vst [vmem:[%s664_s1 + $0x9] sm:$0x1] %v329_v33 }
  0x4e   :  { %504 = vst [vmem:[%s664_s1 + $0xa] sm:$0x1] %v336_v35 }
  0x4f   :  { %505 = vst [vmem:[%s664_s1 + $0xb] sm:$0x1] %v343_v37 }
  0x50   :  { %506 = vst [vmem:[%s664_s1 + $0xc] sm:$0x1] %v350_v39 }
  0x51   :  { %507 = vst [vmem:[%s664_s1 + $0xd] sm:$0x1] %v357_v41 }
  0x52   :  { %508 = vst [vmem:[%s664_s1 + $0xe] sm:$0x1] %v364_v43 }
  0x53   :  { %509 = vst [vmem:[%s664_s1 + $0xf] sm:$0x1] %v371_v45 }
  0x54   :  { %510 = vst [vmem:[%s664_s1 + $0x10] sm:$0x1] %v378_v47 }
  0x55   :  { %511 = vst [vmem:[%s664_s1 + $0x11] sm:$0x1] %v385_v49 }
  0x56   :  { %512 = vst [vmem:[%s664_s1 + $0x12] sm:$0x1] %v392_v51 }
  0x57   :  { %513 = vst [vmem:[%s664_s1 + $0x13] sm:$0x1] %v399_v53 }
  0x58   :  { %514 = vst [vmem:[%s664_s1 + $0x14] sm:$0x1] %v406_v55 }
  0x59   :  { %515 = vst [vmem:[%s664_s1 + $0x15] sm:$0x1] %v413_v57 }
  0x5a   :  { %516 = vst [vmem:[%s664_s1 + $0x16] sm:$0x1] %v420_v59 }
  0x5b   :  { %517 = vst [vmem:[%s664_s1 + $0x17] sm:$0x1] %v427_v61 }
  0x5c   :  { %518 = vst [vmem:[%s664_s1 + $0x18] sm:$0x1] %v434_v63 }
  0x5d   :  { %519 = vst [vmem:[%s664_s1 + $0x19] sm:$0x1] %v441_v1 }
  0x5e   :  { %520 = vst [vmem:[%s664_s1 + $0x1a] sm:$0x1] %v448_v3 }
  0x5f   :  { %521 = vst [vmem:[%s664_s1 + $0x1b] sm:$0x1] %v455_v5 }
  0x60   :  { %522 = vst [vmem:[%s664_s1 + $0x1c] sm:$0x1] %v462_v7 }
  0x61   :  { %523 = vst [vmem:[%s664_s1 + $0x1d] sm:$0x1] %v469_v9 }
  0x62   :  { %524 = vst [vmem:[%s664_s1 + $0x1e] sm:$0x1] %v476_v10 }
  0x63   :  { %525 = vst [vmem:[%s664_s1 + $0x1f] sm:$0x1] %v483_v11 }

// kernel: _lambda_.107
= control target key start
LH: loop header
LB: loop body
LE: loop exit
PB: predicated region body
PF: predicated region fallthrough
CT: control target
= control target key end

     0   :  { %8 = vsyncpa [#allocation4], 0  ;;  %s3648_s0 = inlined_call_operand.vmem [shape: bf16[1,16,1024], index: 0, kind: input, shape index: {}]   ;;  %s3649_s1 = inlined_call_operand.vmem [shape: bf16[1,1024,1024], index: 1, kind: input, shape index: {}]   ;;  %s3650_s2 = inlined_call_operand.hbm [shape: f32[1,1,1024], index: 2, kind: input, shape index: {}]   ;;  %s3651_s3 = inlined_call_operand.vmem [shape: bf16[1,16,1024], index: 3, kind: output, shape index: {}]  }
   0x1   :  { %10 = vsyncpa [#allocation4 + $0x1], 0  ;;  %s2941_s12 = smov 0   ;;  %s2943_s13 = smov 0  }
   0x2   :  { %s2945_s14 = smov 0   ;;  %s2947_s15 = smov 0  }
   0x3   :  { %s2949_s16 = smov 0   ;;  %s2951_s17 = smov 0  }
   0x4 LB: > { %s2090_s18 = sadd.s32 4294967295, %s2919_s17   ;;  %s34_s19 = sadd.s32 1, %s2915_s16  ;;  %s2919_s17 = sphi %s2951_s17, %s16_s17   ;;  %s2915_s16 = sphi %s2949_s16, %s3659_s16   ;;  %s2911_s15 = sphi %s2947_s15, %s3658_s15   ;;  %s2907_s14 = sphi %s2945_s14, %s3657_s14   ;;  %s2903_s13 = sphi %s2943_s13, %s3656_s13   ;;  %s2899_s12 = sphi %s2941_s12, %s3655_s12  }
   0x5   : > { %p36_p0 = scmp.ge.s32.totalorder %s34_s19, 4  ;;  %s83_s20 = sadd.s32 1, %s2907_s14 }
   0x6   : > { %p90_p1 = scmp.ne.s32.totalorder %s2907_s14, %s2903_s13  ;;  %p91_p2 = scmp.eq.s32.totalorder %s2919_s17, 0 }
   0x7   : > { %s3661_s19 = smov (%p36_p0, %s34_s19), 0  ;;  %p124_p4 = scmp.ne.s32.totalorder %s2903_s13, %s2899_s12 }
   0x8   : > { %p2977_p3 = por %p91_p2, %p90_p1  ;;  %s79_s22 = ssub.s32 %s2915_s16, %s3661_s19 }
   0x9   : > { %p125_p5 = scmp.eq.s32.totalorder %s2090_s18, 0  ;;  %p81_p6 = scmp.eq.s32.totalorder %s79_s22, 0 }
   0xa   : > { %p152_p7 = scmp.eq.s32.totalorder %s2090_s18, 3  ;;  %p2094_p10 = scmp.ge.s32.totalorder %s2919_s17, 4 }
   0xb   : > { %p2984_p8 = por %p125_p5, %p124_p4 }
   0xc   : > { %s2989_s24 = scalar_select %p81_p6, %s2907_s14, %s83_s20  }
   0xd   : > { %p2991_p9 = por %p152_p7, %p90_p1  ;;  %193 = sbr.rel (%p2094_p10) target bundleno = 155 (0x9b), region = 20 }
  0x12   : > { %196 = sbr.rel (!%p2977_p3) target bundleno = 150 (0x96), region = 24  ;;  %s198_s26 = sand.u32 (%p2977_p3), 1, %s2907_s14  }
  0x13   : > { %s2653_s27 = sshll.u32 (%p2977_p3), %s2915_s16, 3  ;;  %s2095_s28 = sshll.u32 (%p2977_p3), %s198_s26, 10 }
  0x14   : > { %s3003_s4 = scalar_lea.vmem (%p2977_p3), %s3649_s1, %s2653_s27  ;;  %s3008_s5 = scalar_lea.vmem (%p2977_p3), [#allocation2], %s2095_s28 }
  0x15   : > { %v491_v0 = vld [vmem:[%s3003_s4] sm:$0xff] (%p2977_p3) }
  0x16   : > { %v493_v1 = vld [vmem:[%s3003_s4 + $0x20] sm:$0xff] (%p2977_p3)  ;;  %492 = vst [vmem:[%s3008_s5] sm:$0xff] (%p2977_p3), %v491_v0 }
  0x17   : > { %v495_v2 = vld [vmem:[%s3003_s4 + $0x40] sm:$0xff]  ;;  %494 = vst [vmem:[%s3008_s5 + $0x8] sm:$0xff] %v493_v1 }
  0x18   : > { %v497_v3 = vld [vmem:[%s3003_s4 + $0x60] sm:$0xff]  ;;  %496 = vst [vmem:[%s3008_s5 + $0x10] sm:$0xff] %v495_v2 }
  0x19   : > { %v499_v4 = vld [vmem:[%s3003_s4 + $0x80] sm:$0xff]  ;;  %498 = vst [vmem:[%s3008_s5 + $0x18] sm:$0xff] %v497_v3 }
  0x1a   : > { %v501_v5 = vld [vmem:[%s3003_s4 + $0xa0] sm:$0xff]  ;;  %500 = vst [vmem:[%s3008_s5 + $0x20] sm:$0xff] %v499_v4 }
  0x1b   : > { %v503_v6 = vld [vmem:[%s3003_s4 + $0xc0] sm:$0xff]  ;;  %502 = vst [vmem:[%s3008_s5 + $0x28] sm:$0xff] %v501_v5 }
  0x1c   : > { %v505_v7 = vld [vmem:[%s3003_s4 + $0xe0] sm:$0xff]  ;;  %504 = vst [vmem:[%s3008_s5 + $0x30] sm:$0xff] %v503_v6 }
  0x1d   : > { %v507_v8 = vld [vmem:[%s3003_s4 + $0x100] sm:$0xff]  ;;  %506 = vst [vmem:[%s3008_s5 + $0x38] sm:$0xff] %v505_v7 }
  0x1e   : > { %v509_v9 = vld [vmem:[%s3003_s4 + $0x120] sm:$0xff]  ;;  %508 = vst [vmem:[%s3008_s5 + $0x40] sm:$0xff] %v507_v8 }
  0x1f   : > { %v511_v10 = vld [vmem:[%s3003_s4 + $0x140] sm:$0xff]  ;;  %510 = vst [vmem:[%s3008_s5 + $0x48] sm:$0xff] %v509_v9 }
  0x20   : > { %v513_v11 = vld [vmem:[%s3003_s4 + $0x160] sm:$0xff]  ;;  %512 = vst [vmem:[%s3008_s5 + $0x50] sm:$0xff] %v511_v10 }
  0x21   : > { %v515_v12 = vld [vmem:[%s3003_s4 + $0x180] sm:$0xff]  ;;  %514 = vst [vmem:[%s3008_s5 + $0x58] sm:$0xff] %v513_v11 }
  0x22   : > { %v517_v13 = vld [vmem:[%s3003_s4 + $0x1a0] sm:$0xff]  ;;  %516 = vst [vmem:[%s3008_s5 + $0x60] sm:$0xff] %v515_v12 }
  0x23   : > { %v519_v14 = vld [vmem:[%s3003_s4 + $0x1c0] sm:$0xff]  ;;  %518 = vst [vmem:[%s3008_s5 + $0x68] sm:$0xff] %v517_v13 }
  0x24   : > { %v521_v15 = vld [vmem:[%s3003_s4 + $0x1e0] sm:$0xff]  ;;  %520 = vst [vmem:[%s3008_s5 + $0x70] sm:$0xff] %v519_v14 }
  0x25   : > { %v523_v16 = vld [vmem:[%s3003_s4 + $0x200] sm:$0xff]  ;;  %522 = vst [vmem:[%s3008_s5 + $0x78] sm:$0xff] %v521_v15 }
  0x26   : > { %v525_v17 = vld [vmem:[%s3003_s4 + $0x220] sm:$0xff]  ;;  %524 = vst [vmem:[%s3008_s5 + $0x80] sm:$0xff] %v523_v16 }
  0x27   : > { %v527_v18 = vld [vmem:[%s3003_s4 + $0x240] sm:$0xff]  ;;  %526 = vst [vmem:[%s3008_s5 + $0x88] sm:$0xff] %v525_v17 }
  0x28   : > { %v529_v19 = vld [vmem:[%s3003_s4 + $0x260] sm:$0xff]  ;;  %528 = vst [vmem:[%s3008_s5 + $0x90] sm:$0xff] %v527_v18 }
  0x29   : > { %v531_v20 = vld [vmem:[%s3003_s4 + $0x280] sm:$0xff]  ;;  %530 = vst [vmem:[%s3008_s5 + $0x98] sm:$0xff] %v529_v19 }
  0x2a   : > { %v533_v21 = vld [vmem:[%s3003_s4 + $0x2a0] sm:$0xff]  ;;  %532 = vst [vmem:[%s3008_s5 + $0xa0] sm:$0xff] %v531_v20 }
  0x2b   : > { %v535_v22 = vld [vmem:[%s3003_s4 + $0x2c0] sm:$0xff]  ;;  %534 = vst [vmem:[%s3008_s5 + $0xa8] sm:$0xff] %v533_v21 }
  0x2c   : > { %v537_v23 = vld [vmem:[%s3003_s4 + $0x2e0] sm:$0xff]  ;;  %536 = vst [vmem:[%s3008_s5 + $0xb0] sm:$0xff] %v535_v22 }
  0x2d   : > { %v539_v24 = vld [vmem:[%s3003_s4 + $0x300] sm:$0xff]  ;;  %538 = vst [vmem:[%s3008_s5 + $0xb8] sm:$0xff] %v537_v23 }
  0x2e   : > { %v541_v25 = vld [vmem:[%s3003_s4 + $0x320] sm:$0xff]  ;;  %540 = vst [vmem:[%s3008_s5 + $0xc0] sm:$0xff] %v539_v24 }
  0x2f   : > { %v543_v26 = vld [vmem:[%s3003_s4 + $0x340] sm:$0xff]  ;;  %542 = vst [vmem:[%s3008_s5 + $0xc8] sm:$0xff] %v541_v25 }
  0x30   : > { %v545_v27 = vld [vmem:[%s3003_s4 + $0x360] sm:$0xff]  ;;  %544 = vst [vmem:[%s3008_s5 + $0xd0] sm:$0xff] %v543_v26 }
  0x31   : > { %v547_v28 = vld [vmem:[%s3003_s4 + $0x380] sm:$0xff]  ;;  %546 = vst [vmem:[%s3008_s5 + $0xd8] sm:$0xff] %v545_v27 }
  0x32   : > { %v549_v29 = vld [vmem:[%s3003_s4 + $0x3a0] sm:$0xff]  ;;  %548 = vst [vmem:[%s3008_s5 + $0xe0] sm:$0xff] %v547_v28 }
  0x33   : > { %v551_v30 = vld [vmem:[%s3003_s4 + $0x3c0] sm:$0xff]  ;;  %550 = vst [vmem:[%s3008_s5 + $0xe8] sm:$0xff] %v549_v29 }
  0x34   : > { %v553_v31 = vld [vmem:[%s3003_s4 + $0x3e0] sm:$0xff]  ;;  %552 = vst [vmem:[%s3008_s5 + $0xf0] sm:$0xff] %v551_v30 }
  0x35   : > { %v555_v32 = vld [vmem:[%s3003_s4 + $0x400] sm:$0xff]  ;;  %554 = vst [vmem:[%s3008_s5 + $0xf8] sm:$0xff] %v553_v31 }
  0x36   : > { %v557_v33 = vld [vmem:[%s3003_s4 + $0x420] sm:$0xff]  ;;  %556 = vst [vmem:[%s3008_s5 + $0x100] sm:$0xff] %v555_v32 }
  0x37   : > { %v559_v34 = vld [vmem:[%s3003_s4 + $0x440] sm:$0xff]  ;;  %558 = vst [vmem:[%s3008_s5 + $0x108] sm:$0xff] %v557_v33 }
  0x38   : > { %v561_v35 = vld [vmem:[%s3003_s4 + $0x460] sm:$0xff]  ;;  %560 = vst [vmem:[%s3008_s5 + $0x110] sm:$0xff] %v559_v34 }
  0x39   : > { %v563_v36 = vld [vmem:[%s3003_s4 + $0x480] sm:$0xff]  ;;  %562 = vst [vmem:[%s3008_s5 + $0x118] sm:$0xff] %v561_v35 }
  0x3a   : > { %v565_v37 = vld [vmem:[%s3003_s4 + $0x4a0] sm:$0xff]  ;;  %564 = vst [vmem:[%s3008_s5 + $0x120] sm:$0xff] %v563_v36 }
  0x3b   : > { %v567_v38 = vld [vmem:[%s3003_s4 + $0x4c0] sm:$0xff]  ;;  %566 = vst [vmem:[%s3008_s5 + $0x128] sm:$0xff] %v565_v37 }
  0x3c   : > { %v569_v39 = vld [vmem:[%s3003_s4 + $0x4e0] sm:$0xff]  ;;  %568 = vst [vmem:[%s3008_s5 + $0x130] sm:$0xff] %v567_v38 }
  0x3d   : > { %v571_v40 = vld [vmem:[%s3003_s4 + $0x500] sm:$0xff]  ;;  %570 = vst [vmem:[%s3008_s5 + $0x138] sm:$0xff] %v569_v39 }
  0x3e   : > { %v573_v41 = vld [vmem:[%s3003_s4 + $0x520] sm:$0xff]  ;;  %572 = vst [vmem:[%s3008_s5 + $0x140] sm:$0xff] %v571_v40 }
  0x3f   : > { %v575_v42 = vld [vmem:[%s3003_s4 + $0x540] sm:$0xff]  ;;  %574 = vst [vmem:[%s3008_s5 + $0x148] sm:$0xff] %v573_v41 }
  0x40   : > { %v577_v43 = vld [vmem:[%s3003_s4 + $0x560] sm:$0xff]  ;;  %576 = vst [vmem:[%s3008_s5 + $0x150] sm:$0xff] %v575_v42 }
  0x41   : > { %v579_v44 = vld [vmem:[%s3003_s4 + $0x580] sm:$0xff]  ;;  %578 = vst [vmem:[%s3008_s5 + $0x158] sm:$0xff] %v577_v43 }
  0x42   : > { %v581_v45 = vld [vmem:[%s3003_s4 + $0x5a0] sm:$0xff]  ;;  %580 = vst [vmem:[%s3008_s5 + $0x160] sm:$0xff] %v579_v44 }
  0x43   : > { %v583_v46 = vld [vmem:[%s3003_s4 + $0x5c0] sm:$0xff]  ;;  %582 = vst [vmem:[%s3008_s5 + $0x168] sm:$0xff] %v581_v45 }
  0x44   : > { %v585_v47 = vld [vmem:[%s3003_s4 + $0x5e0] sm:$0xff]  ;;  %584 = vst [vmem:[%s3008_s5 + $0x170] sm:$0xff] %v583_v46 }
  0x45   : > { %v587_v48 = vld [vmem:[%s3003_s4 + $0x600] sm:$0xff]  ;;  %586 = vst [vmem:[%s3008_s5 + $0x178] sm:$0xff] %v585_v47 }
  0x46   : > { %v589_v49 = vld [vmem:[%s3003_s4 + $0x620] sm:$0xff]  ;;  %588 = vst [vmem:[%s3008_s5 + $0x180] sm:$0xff] %v587_v48 }
  0x47   : > { %v591_v50 = vld [vmem:[%s3003_s4 + $0x640] sm:$0xff]  ;;  %590 = vst [vmem:[%s3008_s5 + $0x188] sm:$0xff] %v589_v49 }
  0x48   : > { %v593_v51 = vld [vmem:[%s3003_s4 + $0x660] sm:$0xff]  ;;  %592 = vst [vmem:[%s3008_s5 + $0x190] sm:$0xff] %v591_v50 }
  0x49   : > { %v595_v52 = vld [vmem:[%s3003_s4 + $0x680] sm:$0xff]  ;;  %594 = vst [vmem:[%s3008_s5 + $0x198] sm:$0xff] %v593_v51 }
  0x4a   : > { %v597_v53 = vld [vmem:[%s3003_s4 + $0x6a0] sm:$0xff]  ;;  %596 = vst [vmem:[%s3008_s5 + $0x1a0] sm:$0xff] %v595_v52 }
  0x4b   : > { %v599_v54 = vld [vmem:[%s3003_s4 + $0x6c0] sm:$0xff]  ;;  %598 = vst [vmem:[%s3008_s5 + $0x1a8] sm:$0xff] %v597_v53 }
  0x4c   : > { %v601_v55 = vld [vmem:[%s3003_s4 + $0x6e0] sm:$0xff]  ;;  %600 = vst [vmem:[%s3008_s5 + $0x1b0] sm:$0xff] %v599_v54 }
  0x4d   : > { %v603_v56 = vld [vmem:[%s3003_s4 + $0x700] sm:$0xff]  ;;  %602 = vst [vmem:[%s3008_s5 + $0x1b8] sm:$0xff] %v601_v55 }
  0x4e   : > { %v605_v57 = vld [vmem:[%s3003_s4 + $0x720] sm:$0xff]  ;;  %604 = vst [vmem:[%s3008_s5 + $0x1c0] sm:$0xff] %v603_v56 }
  0x4f   : > { %v607_v58 = vld [vmem:[%s3003_s4 + $0x740] sm:$0xff]  ;;  %606 = vst [vmem:[%s3008_s5 + $0x1c8] sm:$0xff] %v605_v57 }
  0x50   : > { %v609_v59 = vld [vmem:[%s3003_s4 + $0x760] sm:$0xff]  ;;  %608 = vst [vmem:[%s3008_s5 + $0x1d0] sm:$0xff] %v607_v58 }
  0x51   : > { %v611_v60 = vld [vmem:[%s3003_s4 + $0x780] sm:$0xff]  ;;  %610 = vst [vmem:[%s3008_s5 + $0x1d8] sm:$0xff] %v609_v59 }
  0x52   : > { %v613_v61 = vld [vmem:[%s3003_s4 + $0x7a0] sm:$0xff]  ;;  %612 = vst [vmem:[%s3008_s5 + $0x1e0] sm:$0xff] %v611_v60 }
  0x53   : > { %v615_v62 = vld [vmem:[%s3003_s4 + $0x7c0] sm:$0xff]  ;;  %614 = vst [vmem:[%s3008_s5 + $0x1e8] sm:$0xff] %v613_v61 }
  0x54   : > { %v617_v63 = vld [vmem:[%s3003_s4 + $0x7e0] sm:$0xff]  ;;  %616 = vst [vmem:[%s3008_s5 + $0x1f0] sm:$0xff] %v615_v62 }
  0x55   : > { %v619_v0 = vld [vmem:[%s3003_s4 + $0x800] sm:$0xff]  ;;  %618 = vst [vmem:[%s3008_s5 + $0x1f8] sm:$0xff] %v617_v63 }
  0x56   : > { %v621_v1 = vld [vmem:[%s3003_s4 + $0x820] sm:$0xff]  ;;  %620 = vst [vmem:[%s3008_s5 + $0x200] sm:$0xff] %v619_v0 }
  0x57   : > { %v623_v2 = vld [vmem:[%s3003_s4 + $0x840] sm:$0xff]  ;;  %622 = vst [vmem:[%s3008_s5 + $0x208] sm:$0xff] %v621_v1 }
  0x58   : > { %v625_v3 = vld [vmem:[%s3003_s4 + $0x860] sm:$0xff]  ;;  %624 = vst [vmem:[%s3008_s5 + $0x210] sm:$0xff] %v623_v2 }
  0x59   : > { %v627_v4 = vld [vmem:[%s3003_s4 + $0x880] sm:$0xff]  ;;  %626 = vst [vmem:[%s3008_s5 + $0x218] sm:$0xff] %v625_v3 }
  0x5a   : > { %v629_v5 = vld [vmem:[%s3003_s4 + $0x8a0] sm:$0xff]  ;;  %628 = vst [vmem:[%s3008_s5 + $0x220] sm:$0xff] %v627_v4 }
  0x5b   : > { %v631_v6 = vld [vmem:[%s3003_s4 + $0x8c0] sm:$0xff]  ;;  %630 = vst [vmem:[%s3008_s5 + $0x228] sm:$0xff] %v629_v5 }
  0x5c   : > { %v633_v7 = vld [vmem:[%s3003_s4 + $0x8e0] sm:$0xff]  ;;  %632 = vst [vmem:[%s3008_s5 + $0x230] sm:$0xff] %v631_v6 }
  0x5d   : > { %v635_v8 = vld [vmem:[%s3003_s4 + $0x900] sm:$0xff]  ;;  %634 = vst [vmem:[%s3008_s5 + $0x238] sm:$0xff] %v633_v7 }
  0x5e   : > { %v637_v9 = vld [vmem:[%s3003_s4 + $0x920] sm:$0xff]  ;;  %636 = vst [vmem:[%s3008_s5 + $0x240] sm:$0xff] %v635_v8 }
  0x5f   : > { %v639_v10 = vld [vmem:[%s3003_s4 + $0x940] sm:$0xff]  ;;  %638 = vst [vmem:[%s3008_s5 + $0x248] sm:$0xff] %v637_v9 }
  0x60   : > { %v641_v11 = vld [vmem:[%s3003_s4 + $0x960] sm:$0xff]  ;;  %640 = vst [vmem:[%s3008_s5 + $0x250] sm:$0xff] %v639_v10 }
  0x61   : > { %v643_v12 = vld [vmem:[%s3003_s4 + $0x980] sm:$0xff]  ;;  %642 = vst [vmem:[%s3008_s5 + $0x258] sm:$0xff] %v641_v11 }
  0x62   : > { %v645_v13 = vld [vmem:[%s3003_s4 + $0x9a0] sm:$0xff]  ;;  %644 = vst [vmem:[%s3008_s5 + $0x260] sm:$0xff] %v643_v12 }
  0x63   : > { %v647_v14 = vld [vmem:[%s3003_s4 + $0x9c0] sm:$0xff]  ;;  %646 = vst [vmem:[%s3008_s5 + $0x268] sm:$0xff] %v645_v13 }
  0x64   : > { %v649_v15 = vld [vmem:[%s3003_s4 + $0x9e0] sm:$0xff]  ;;  %648 = vst [vmem:[%s3008_s5 + $0x270] sm:$0xff] %v647_v14 }
  0x65   : > { %v651_v16 = vld [vmem:[%s3003_s4 + $0xa00] sm:$0xff]  ;;  %650 = vst [vmem:[%s3008_s5 + $0x278] sm:$0xff] %v649_v15 }
  0x66   : > { %v653_v17 = vld [vmem:[%s3003_s4 + $0xa20] sm:$0xff]  ;;  %652 = vst [vmem:[%s3008_s5 + $0x280] sm:$0xff] %v651_v16 }
  0x67   : > { %v655_v18 = vld [vmem:[%s3003_s4 + $0xa40] sm:$0xff]  ;;  %654 = vst [vmem:[%s3008_s5 + $0x288] sm:$0xff] %v653_v17 }
  0x68   : > { %v657_v19 = vld [vmem:[%s3003_s4 + $0xa60] sm:$0xff]  ;;  %656 = vst [vmem:[%s3008_s5 + $0x290] sm:$0xff] %v655_v18 }
  0x69   : > { %v659_v20 = vld [vmem:[%s3003_s4 + $0xa80] sm:$0xff]  ;;  %658 = vst [vmem:[%s3008_s5 + $0x298] sm:$0xff] %v657_v19 }
  0x6a   : > { %v661_v21 = vld [vmem:[%s3003_s4 + $0xaa0] sm:$0xff]  ;;  %660 = vst [vmem:[%s3008_s5 + $0x2a0] sm:$0xff] %v659_v20 }
  0x6b   : > { %v663_v22 = vld [vmem:[%s3003_s4 + $0xac0] sm:$0xff]  ;;  %662 = vst [vmem:[%s3008_s5 + $0x2a8] sm:$0xff] %v661_v21 }
  0x6c   : > { %v665_v23 = vld [vmem:[%s3003_s4 + $0xae0] sm:$0xff]  ;;  %664 = vst [vmem:[%s3008_s5 + $0x2b0] sm:$0xff] %v663_v22 }
  0x6d   : > { %v667_v24 = vld [vmem:[%s3003_s4 + $0xb00] sm:$0xff]  ;;  %666 = vst [vmem:[%s3008_s5 + $0x2b8] sm:$0xff] %v665_v23 }
  0x6e   : > { %v669_v25 = vld [vmem:[%s3003_s4 + $0xb20] sm:$0xff]  ;;  %668 = vst [vmem:[%s3008_s5 + $0x2c0] sm:$0xff] %v667_v24 }
  0x6f   : > { %v671_v26 = vld [vmem:[%s3003_s4 + $0xb40] sm:$0xff]  ;;  %670 = vst [vmem:[%s3008_s5 + $0x2c8] sm:$0xff] %v669_v25 }
  0x70   : > { %v673_v27 = vld [vmem:[%s3003_s4 + $0xb60] sm:$0xff]  ;;  %672 = vst [vmem:[%s3008_s5 + $0x2d0] sm:$0xff] %v671_v26 }
  0x71   : > { %v675_v28 = vld [vmem:[%s3003_s4 + $0xb80] sm:$0xff]  ;;  %674 = vst [vmem:[%s3008_s5 + $0x2d8] sm:$0xff] %v673_v27 }
  0x72   : > { %v677_v29 = vld [vmem:[%s3003_s4 + $0xba0] sm:$0xff]  ;;  %676 = vst [vmem:[%s3008_s5 + $0x2e0] sm:$0xff] %v675_v28 }
  0x73   : > { %v679_v30 = vld [vmem:[%s3003_s4 + $0xbc0] sm:$0xff]  ;;  %678 = vst [vmem:[%s3008_s5 + $0x2e8] sm:$0xff] %v677_v29 }
  0x74   : > { %v681_v31 = vld [vmem:[%s3003_s4 + $0xbe0] sm:$0xff]  ;;  %680 = vst [vmem:[%s3008_s5 + $0x2f0] sm:$0xff] %v679_v30 }
  0x75   : > { %v683_v32 = vld [vmem:[%s3003_s4 + $0xc00] sm:$0xff]  ;;  %682 = vst [vmem:[%s3008_s5 + $0x2f8] sm:$0xff] %v681_v31 }
  0x76   : > { %v685_v33 = vld [vmem:[%s3003_s4 + $0xc20] sm:$0xff]  ;;  %684 = vst [vmem:[%s3008_s5 + $0x300] sm:$0xff] %v683_v32 }
  0x77   : > { %v687_v34 = vld [vmem:[%s3003_s4 + $0xc40] sm:$0xff]  ;;  %686 = vst [vmem:[%s3008_s5 + $0x308] sm:$0xff] %v685_v33 }
  0x78   : > { %v689_v35 = vld [vmem:[%s3003_s4 + $0xc60] sm:$0xff]  ;;  %688 = vst [vmem:[%s3008_s5 + $0x310] sm:$0xff] %v687_v34 }
  0x79   : > { %v691_v36 = vld [vmem:[%s3003_s4 + $0xc80] sm:$0xff]  ;;  %690 = vst [vmem:[%s3008_s5 + $0x318] sm:$0xff] %v689_v35 }
  0x7a   : > { %v693_v37 = vld [vmem:[%s3003_s4 + $0xca0] sm:$0xff]  ;;  %692 = vst [vmem:[%s3008_s5 + $0x320] sm:$0xff] %v691_v36 }
  0x7b   : > { %v695_v38 = vld [vmem:[%s3003_s4 + $0xcc0] sm:$0xff]  ;;  %694 = vst [vmem:[%s3008_s5 + $0x328] sm:$0xff] %v693_v37 }
  0x7c   : > { %v697_v39 = vld [vmem:[%s3003_s4 + $0xce0] sm:$0xff]  ;;  %696 = vst [vmem:[%s3008_s5 + $0x330] sm:$0xff] %v695_v38 }
  0x7d   : > { %v699_v40 = vld [vmem:[%s3003_s4 + $0xd00] sm:$0xff]  ;;  %698 = vst [vmem:[%s3008_s5 + $0x338] sm:$0xff] %v697_v39 }
  0x7e   : > { %v701_v41 = vld [vmem:[%s3003_s4 + $0xd20] sm:$0xff]  ;;  %700 = vst [vmem:[%s3008_s5 + $0x340] sm:$0xff] %v699_v40 }
  0x7f   : > { %v703_v42 = vld [vmem:[%s3003_s4 + $0xd40] sm:$0xff]  ;;  %702 = vst [vmem:[%s3008_s5 + $0x348] sm:$0xff] %v701_v41 }
  0x80   : > { %v705_v43 = vld [vmem:[%s3003_s4 + $0xd60] sm:$0xff]  ;;  %704 = vst [vmem:[%s3008_s5 + $0x350] sm:$0xff] %v703_v42 }
  0x81   : > { %v707_v44 = vld [vmem:[%s3003_s4 + $0xd80] sm:$0xff]  ;;  %706 = vst [vmem:[%s3008_s5 + $0x358] sm:$0xff] %v705_v43 }
  0x82   : > { %v709_v45 = vld [vmem:[%s3003_s4 + $0xda0] sm:$0xff]  ;;  %708 = vst [vmem:[%s3008_s5 + $0x360] sm:$0xff] %v707_v44 }
  0x83   : > { %v711_v46 = vld [vmem:[%s3003_s4 + $0xdc0] sm:$0xff]  ;;  %710 = vst [vmem:[%s3008_s5 + $0x368] sm:$0xff] %v709_v45 }
  0x84   : > { %v713_v47 = vld [vmem:[%s3003_s4 + $0xde0] sm:$0xff]  ;;  %712 = vst [vmem:[%s3008_s5 + $0x370] sm:$0xff] %v711_v46 }
  0x85   : > { %v715_v48 = vld [vmem:[%s3003_s4 + $0xe00] sm:$0xff]  ;;  %714 = vst [vmem:[%s3008_s5 + $0x378] sm:$0xff] %v713_v47 }
  0x86   : > { %v717_v49 = vld [vmem:[%s3003_s4 + $0xe20] sm:$0xff]  ;;  %716 = vst [vmem:[%s3008_s5 + $0x380] sm:$0xff] %v715_v48 }
  0x87   : > { %v719_v50 = vld [vmem:[%s3003_s4 + $0xe40] sm:$0xff]  ;;  %718 = vst [vmem:[%s3008_s5 + $0x388] sm:$0xff] %v717_v49 }
  0x88   : > { %v721_v51 = vld [vmem:[%s3003_s4 + $0xe60] sm:$0xff]  ;;  %720 = vst [vmem:[%s3008_s5 + $0x390] sm:$0xff] %v719_v50 }
  0x89   : > { %v723_v52 = vld [vmem:[%s3003_s4 + $0xe80] sm:$0xff]  ;;  %722 = vst [vmem:[%s3008_s5 + $0x398] sm:$0xff] %v721_v51 }
  0x8a   : > { %v725_v53 = vld [vmem:[%s3003_s4 + $0xea0] sm:$0xff]  ;;  %724 = vst [vmem:[%s3008_s5 + $0x3a0] sm:$0xff] %v723_v52 }
  0x8b   : > { %v727_v54 = vld [vmem:[%s3003_s4 + $0xec0] sm:$0xff]  ;;  %726 = vst [vmem:[%s3008_s5 + $0x3a8] sm:$0xff] %v725_v53 }
  0x8c   : > { %v729_v55 = vld [vmem:[%s3003_s4 + $0xee0] sm:$0xff]  ;;  %728 = vst [vmem:[%s3008_s5 + $0x3b0] sm:$0xff] %v727_v54 }
  0x8d   : > { %v731_v56 = vld [vmem:[%s3003_s4 + $0xf00] sm:$0xff]  ;;  %730 = vst [vmem:[%s3008_s5 + $0x3b8] sm:$0xff] %v729_v55 }
  0x8e   : > { %v733_v57 = vld [vmem:[%s3003_s4 + $0xf20] sm:$0xff]  ;;  %732 = vst [vmem:[%s3008_s5 + $0x3c0] sm:$0xff] %v731_v56 }
  0x8f   : > { %v735_v58 = vld [vmem:[%s3003_s4 + $0xf40] sm:$0xff]  ;;  %734 = vst [vmem:[%s3008_s5 + $0x3c8] sm:$0xff] %v733_v57 }
  0x90   : > { %v737_v59 = vld [vmem:[%s3003_s4 + $0xf60] sm:$0xff]  ;;  %736 = vst [vmem:[%s3008_s5 + $0x3d0] sm:$0xff] %v735_v58 }
  0x91   : > { %v739_v60 = vld [vmem:[%s3003_s4 + $0xf80] sm:$0xff]  ;;  %738 = vst [vmem:[%s3008_s5 + $0x3d8] sm:$0xff] %v737_v59 }
  0x92   : > { %v741_v61 = vld [vmem:[%s3003_s4 + $0xfa0] sm:$0xff]  ;;  %740 = vst [vmem:[%s3008_s5 + $0x3e0] sm:$0xff] %v739_v60 }
  0x93   : > { %v743_v62 = vld [vmem:[%s3003_s4 + $0xfc0] sm:$0xff]  ;;  %742 = vst [vmem:[%s3008_s5 + $0x3e8] sm:$0xff] %v741_v61 }
  0x94   : > { %v745_v63 = vld [vmem:[%s3003_s4 + $0xfe0] sm:$0xff]  ;;  %744 = vst [vmem:[%s3008_s5 + $0x3f0] sm:$0xff] %v743_v62 }
  0x95   : > { %746 = vst [vmem:[%s3008_s5 + $0x3f8] sm:$0xff] %v745_v63 }
  0x96 PF: > { %s753_s6 = sand.u32 1, %s2907_s14   ;;  %s2099_s7 = sshll.u32 %s2915_s16, 1 }
  0x97   : > { %s2098_s8 = sshll.u32 %s753_s6, 1  ;;  %s763_s11 = scalar_lea.hbm %s3650_s2, %s2099_s7 }
  0x98   : > { %s765_s12 = sshll.u32 %s763_s11, 4  ;;  %s757_s18 = scalar_lea.vmem [#allocation3], %s2098_s8  ;;  %s766_s12 = int_to_ptr.hbm [resolvable:$true] %s765_s12 }
  0x99   : > { %s767_s20 = sshll.u32 %s757_s18, 4  ;;  %s754_s22 = scalar_lea.sflag [#allocation4], %s753_s6  ;;  %s768_s20 = int_to_ptr.vmem [resolvable:$true] %s767_s20 }
  0x9a   : > { %2791 = dma.hbm_to_vmem [thread:$0]  (%p2977_p3), %s766_s12, 32, %s768_s20, %s754_s22  }
  0x9b PF: > { %p2100_p11 = scmp.ge.s32.totalorder %s2919_s17, 1  ;;  %p772_p12 = scmp.lt.s32.totalorder %s2919_s17, 5 }
  0x9d   : > { %p773_p13 = pnand %p2100_p11, %p772_p12 }
  0x9e   : > { %s3273_s26 = sand.u32 (!%p773_p13), 1, %s2903_s13  }
  0x9f   : > { %776 = sbr.rel (%p773_p13) target bundleno = 454 (0x1c6), region = 66  ;;  %s2101_s27 = sshll.u32 (!%p773_p13), %s3273_s26, 10 }
  0xa0   : > { %s2102_s28 = sshll.u32 (!%p773_p13), %s3273_s26, 1  ;;  %s3277_s29 = scalar_lea.vmem (!%p773_p13), [#allocation2], %s2101_s27 }
  0xa1   : > { %s786_s21 = scalar_lea.sflag (!%p773_p13), [#allocation4], %s3273_s26  ;;  %s3280_s30 = scalar_lea.vmem (!%p773_p13), [#allocation3], %s2102_s28 }
  0xa4   : > { %2894 = dma.done.wait (%p2984_p8), %s786_s21, 32  }
  0xa5   : > { %2896 = vsyncadd (%p2984_p8), %s786_s21, 4294967264  ;;  %v2194_v0 = vld [vmem:[%s3277_s29 + $0x70] sm:$0xf]  ;;  %v2677_v1 = vld [vmem:[%s3277_s29 + $0x74] sm:$0xf0] }
  0xa6   : > { %v2258_v2 = vld [vmem:[%s3277_s29 + $0xf0] sm:$0xf]  ;;  %v2195_v3 = vor.u32 %v2677_v1, %v2194_v0  ;;  %v2693_v4 = vld [vmem:[%s3277_s29 + $0xf4] sm:$0xf0]  ;;  %v2186_v11 = vld [vmem:[%s3277_s29 + $0x60] sm:$0xf] }
  0xa7   : > { %v2322_v5 = vld [vmem:[%s3277_s29 + $0x170] sm:$0xf]  ;;  %v2709_v6 = vld [vmem:[%s3277_s29 + $0x174] sm:$0xf0]  ;;  %v2259_v7 = vor.u32 %v2693_v4, %v2258_v2  ;;  %v2675_v13 = vld [vmem:[%s3277_s29 + $0x64] sm:$0xf0] }
  0xa8   : > { %v2323_v8 = vor.u32 %v2709_v6, %v2322_v5  ;;  %v2386_v9 = vld [vmem:[%s3277_s29 + $0x1f0] sm:$0xf]  ;;  %v2725_v10 = vld [vmem:[%s3277_s29 + $0x1f4] sm:$0xf0]  ;;  %1673 = vmatpush.bf16.msra.mxu0 %v2195_v3  ;;  %v2250_v14 = vld [vmem:[%s3277_s29 + $0xe0] sm:$0xf]  ;;  %v2187_v16 = vor.u32 %v2675_v13, %v2186_v11 }
  0xa9   : > { %v2387_v12 = vor.u32 %v2725_v10, %v2386_v9  ;;  %v2691_v15 = vld [vmem:[%s3277_s29 + $0xe4] sm:$0xf0]  ;;  %1687 = vmatpush.bf16.msra.mxu1 %v2259_v7  ;;  %v2314_v18 = vld [vmem:[%s3277_s29 + $0x160] sm:$0xf]  ;;  %v2178_v23 = vld [vmem:[%s3277_s29 + $0x50] sm:$0xf] }
  0xaa   : > { %1701 = vmatpush.bf16.msra.mxu2 %v2323_v8  ;;  %v2251_v17 = vor.u32 %v2691_v15, %v2250_v14  ;;  %v2707_v19 = vld [vmem:[%s3277_s29 + $0x164] sm:$0xf0]  ;;  %v2378_v20 = vld [vmem:[%s3277_s29 + $0x1e0] sm:$0xf]  ;;  %v2673_v24 = vld [vmem:[%s3277_s29 + $0x54] sm:$0xf0] }
  0xab   : > { %1715 = vmatpush.bf16.msra.mxu3 %v2387_v12  ;;  %v2315_v21 = vor.u32 %v2707_v19, %v2314_v18  ;;  %v2723_v22 = vld [vmem:[%s3277_s29 + $0x1e4] sm:$0xf0]  ;;  %v2242_v26 = vld [vmem:[%s3277_s29 + $0xd0] sm:$0xf]  ;;  %v2689_v27 = vld [vmem:[%s3277_s29 + $0xd4] sm:$0xf0]  ;;  %v2179_v29 = vor.u32 %v2673_v24, %v2178_v23 }
  0xac   : > { %v2379_v25 = vor.u32 %v2723_v22, %v2378_v20  ;;  %v2306_v28 = vld [vmem:[%s3277_s29 + $0x150] sm:$0xf]  ;;  %1674 = vmatpush.bf16.msra.mxu0 %v2187_v16  ;;  %v2705_v30 = vld [vmem:[%s3277_s29 + $0x154] sm:$0xf0]  ;;  %v2243_v33 = vor.u32 %v2689_v27, %v2242_v26  ;;  %v2170_v35 = vld [vmem:[%s3277_s29 + $0x40] sm:$0xf] }
  0xad   : > { %v2370_v31 = vld [vmem:[%s3277_s29 + $0x1d0] sm:$0xf]  ;;  %v2721_v32 = vld [vmem:[%s3277_s29 + $0x1d4] sm:$0xf0]  ;;  %1688 = vmatpush.bf16.msra.mxu1 %v2251_v17  ;;  %v2307_v34 = vor.u32 %v2705_v30, %v2306_v28  ;;  %v2671_v36 = vld [vmem:[%s3277_s29 + $0x44] sm:$0xf0] }
  0xae   : > { %1702 = vmatpush.bf16.msra.mxu2 %v2315_v21  ;;  %v2234_v37 = vld [vmem:[%s3277_s29 + $0xc0] sm:$0xf]  ;;  %v2371_v38 = vor.u32 %v2721_v32, %v2370_v31  ;;  %v2687_v39 = vld [vmem:[%s3277_s29 + $0xc4] sm:$0xf0]  ;;  %v2171_v44 = vor.u32 %v2671_v36, %v2170_v35  ;;  %v2162_v47 = vld [vmem:[%s3277_s29 + $0x30] sm:$0xf] }
  0xaf   : > { %1716 = vmatpush.bf16.msra.mxu3 %v2379_v25  ;;  %v2298_v40 = vld [vmem:[%s3277_s29 + $0x140] sm:$0xf]  ;;  %v2703_v41 = vld [vmem:[%s3277_s29 + $0x144] sm:$0xf0]  ;;  %v2235_v45 = vor.u32 %v2687_v39, %v2234_v37  ;;  %v2669_v48 = vld [vmem:[%s3277_s29 + $0x34] sm:$0xf0] }
  0xb0   : > { %v2362_v42 = vld [vmem:[%s3277_s29 + $0x1c0] sm:$0xf]  ;;  %v2719_v43 = vld [vmem:[%s3277_s29 + $0x1c4] sm:$0xf0]  ;;  %1675 = vmatpush.bf16.msra.mxu0 %v2179_v29  ;;  %v2299_v46 = vor.u32 %v2703_v41, %v2298_v40  ;;  %v2226_v49 = vld [vmem:[%s3277_s29 + $0xb0] sm:$0xf]  ;;  %v2163_v56 = vor.u32 %v2669_v48, %v2162_v47 }
  0xb1   : > { %1689 = vmatpush.bf16.msra.mxu1 %v2243_v33  ;;  %v2363_v50 = vor.u32 %v2719_v43, %v2362_v42  ;;  %v2685_v51 = vld [vmem:[%s3277_s29 + $0xb4] sm:$0xf0]  ;;  %v2290_v52 = vld [vmem:[%s3277_s29 + $0x130] sm:$0xf]  ;;  %v2154_v59 = vld [vmem:[%s3277_s29 + $0x20] sm:$0xf] }
  0xb2   : > { %1703 = vmatpush.bf16.msra.mxu2 %v2307_v34  ;;  %v2701_v53 = vld [vmem:[%s3277_s29 + $0x134] sm:$0xf0]  ;;  %v2354_v54 = vld [vmem:[%s3277_s29 + $0x1b0] sm:$0xf]  ;;  %v2227_v57 = vor.u32 %v2685_v51, %v2226_v49  ;;  %v2667_v60 = vld [vmem:[%s3277_s29 + $0x24] sm:$0xf0] }
  0xb3   : > { %1717 = vmatpush.bf16.msra.mxu3 %v2371_v38  ;;  %v2717_v55 = vld [vmem:[%s3277_s29 + $0x1b4] sm:$0xf0]  ;;  %v2291_v58 = vor.u32 %v2701_v53, %v2290_v52  ;;  %v2218_v61 = vld [vmem:[%s3277_s29 + $0xa0] sm:$0xf]  ;;  %v2683_v63 = vld [vmem:[%s3277_s29 + $0xa4] sm:$0xf0]  ;;  %v2155_v4 = vor.u32 %v2667_v60, %v2154_v59 }
  0xb4   : > { %1676 = vmatpush.bf16.msra.mxu0 %v2171_v44  ;;  %v2355_v62 = vor.u32 %v2717_v55, %v2354_v54  ;;  %v2282_v0 = vld [vmem:[%s3277_s29 + $0x120] sm:$0xf]  ;;  %v2699_v1 = vld [vmem:[%s3277_s29 + $0x124] sm:$0xf0]  ;;  %v2219_v5 = vor.u32 %v2683_v63, %v2218_v61  ;;  %v2146_v7 = vld [vmem:[%s3277_s29 + $0x10] sm:$0xf] }
  0xb5   : > { %1690 = vmatpush.bf16.msra.mxu1 %v2235_v45  ;;  %v2346_v2 = vld [vmem:[%s3277_s29 + $0x1a0] sm:$0xf]  ;;  %v2715_v3 = vld [vmem:[%s3277_s29 + $0x1a4] sm:$0xf0]  ;;  %v2283_v6 = vor.u32 %v2699_v1, %v2282_v0  ;;  %v2665_v8 = vld [vmem:[%s3277_s29 + $0x14] sm:$0xf0] }
  0xb6   : > { %1704 = vmatpush.bf16.msra.mxu2 %v2299_v46  ;;  %v2210_v9 = vld [vmem:[%s3277_s29 + $0x90] sm:$0xf]  ;;  %v2347_v10 = vor.u32 %v2715_v3, %v2346_v2  ;;  %v2681_v11 = vld [vmem:[%s3277_s29 + $0x94] sm:$0xf0]  ;;  %v2147_v16 = vor.u32 %v2665_v8, %v2146_v7  ;;  %v2138_v17 = vld [vmem:[%s3277_s29] sm:$0xf] }
  0xb7   : > { %1718 = vmatpush.bf16.msra.mxu3 %v2363_v50  ;;  %v2274_v12 = vld [vmem:[%s3277_s29 + $0x110] sm:$0xf]  ;;  %v2697_v13 = vld [vmem:[%s3277_s29 + $0x114] sm:$0xf0]  ;;  %v2663_v18 = vld [vmem:[%s3277_s29 + $0x4] sm:$0xf0]  ;;  %v2211_v19 = vor.u32 %v2681_v11, %v2210_v9 }
  0xb8   : > { %1677 = vmatpush.bf16.msra.mxu0 %v2163_v56  ;;  %v2338_v14 = vld [vmem:[%s3277_s29 + $0x190] sm:$0xf]  ;;  %v2713_v15 = vld [vmem:[%s3277_s29 + $0x194] sm:$0xf0]  ;;  %v2275_v20 = vor.u32 %v2697_v13, %v2274_v12  ;;  %v2202_v21 = vld [vmem:[%s3277_s29 + $0x80] sm:$0xf]  ;;  %v2139_v31 = vor.u32 %v2663_v18, %v2138_v17 }
  0xb9   : > { %1691 = vmatpush.bf16.msra.mxu1 %v2227_v57  ;;  %v2679_v22 = vld [vmem:[%s3277_s29 + $0x84] sm:$0xf0]  ;;  %v2266_v23 = vld [vmem:[%s3277_s29 + $0x100] sm:$0xf]  ;;  %v2339_v24 = vor.u32 %v2713_v15, %v2338_v14  ;;  %v2450_v28 = vld [vmem:[%s3277_s29 + $0x270] sm:$0xf] }
  0xba   : > { %1705 = vmatpush.bf16.msra.mxu2 %v2291_v58  ;;  %v2695_v25 = vld [vmem:[%s3277_s29 + $0x104] sm:$0xf0]  ;;  %v2330_v26 = vld [vmem:[%s3277_s29 + $0x180] sm:$0xf]  ;;  %v2741_v29 = vld [vmem:[%s3277_s29 + $0x274] sm:$0xf0]  ;;  %v2203_v35 = vor.u32 %v2679_v22, %v2202_v21 }
  0xbb   : > { %1719 = vmatpush.bf16.msra.mxu3 %v2355_v62  ;;  %v2711_v27 = vld [vmem:[%s3277_s29 + $0x184] sm:$0xf0]  ;;  %v2514_v30 = vld [vmem:[%s3277_s29 + $0x2f0] sm:$0xf]  ;;  %v2757_v32 = vld [vmem:[%s3277_s29 + $0x2f4] sm:$0xf0]  ;;  %v2267_v36 = vor.u32 %v2695_v25, %v2266_v23  ;;  %v2451_v40 = vor.u32 %v2741_v29, %v2450_v28 }
  0xbc   : > { %1678 = vmatpush.bf16.msra.mxu0 %v2155_v4  ;;  %v2578_v33 = vld [vmem:[%s3277_s29 + $0x370] sm:$0xf]  ;;  %v2773_v34 = vld [vmem:[%s3277_s29 + $0x374] sm:$0xf0]  ;;  %v2331_v39 = vor.u32 %v2711_v27, %v2330_v26  ;;  %v2442_v41 = vld [vmem:[%s3277_s29 + $0x260] sm:$0xf]  ;;  %v2515_v43 = vor.u32 %v2757_v32, %v2514_v30 }
  0xbd   : > { %1692 = vmatpush.bf16.msra.mxu1 %v2219_v5  ;;  %v2642_v37 = vld [vmem:[%s3277_s29 + $0x3f0] sm:$0xf]  ;;  %v2789_v38 = vld [vmem:[%s3277_s29 + $0x3f4] sm:$0xf0]  ;;  %v2739_v42 = vld [vmem:[%s3277_s29 + $0x264] sm:$0xf0]  ;;  %v2579_v44 = vor.u32 %v2773_v34, %v2578_v33 }
  0xbe   : > { %1706 = vmatpush.bf16.msra.mxu2 %v2283_v6  ;;  %v2506_v45 = vld [vmem:[%s3277_s29 + $0x2e0] sm:$0xf]  ;;  %v2755_v46 = vld [vmem:[%s3277_s29 + $0x2e4] sm:$0xf0]  ;;  %v2643_v48 = vor.u32 %v2789_v38, %v2642_v37  ;;  %v2443_v55 = vor.u32 %v2739_v42, %v2442_v41  ;;  %v2434_v56 = vld [vmem:[%s3277_s29 + $0x250] sm:$0xf] }
  0xbf   : > { %1720 = vmatpush.bf16.msra.mxu3 %v2347_v10  ;;  %v2570_v47 = vld [vmem:[%s3277_s29 + $0x360] sm:$0xf]  ;;  %v2771_v49 = vld [vmem:[%s3277_s29 + $0x364] sm:$0xf0]  ;;  %v2737_v57 = vld [vmem:[%s3277_s29 + $0x254] sm:$0xf0]  ;;  %v2507_v60 = vor.u32 %v2755_v46, %v2506_v45 }
  0xc0   : > { %1679 = vmatpush.bf16.msra.mxu0 %v2147_v16  ;;  %v2634_v50 = vld [vmem:[%s3277_s29 + $0x3e0] sm:$0xf]  ;;  %v2787_v51 = vld [vmem:[%s3277_s29 + $0x3e4] sm:$0xf0]  ;;  %v2571_v61 = vor.u32 %v2771_v49, %v2570_v47  ;;  %v2498_v62 = vld [vmem:[%s3277_s29 + $0x2d0] sm:$0xf]  ;;  %v2435_v9 = vor.u32 %v2737_v57, %v2434_v56 }
  0xc1   : > { %1693 = vmatpush.bf16.msra.mxu1 %v2211_v19  ;;  %v2106_v52 = vld [vmem:[%s3648_s0] sm:$0xf]  ;;  %v2114_v54 = vld [vmem:[%s3648_s0 + $0x8] sm:$0xf]  ;;  %v2753_v63 = vld [vmem:[%s3277_s29 + $0x2d4] sm:$0xf0]  ;;  %v2635_v2 = vor.u32 %v2787_v51, %v2634_v50 }
  0xc2   : > { %1707 = vmatpush.bf16.msra.mxu2 %v2275_v20  ;;  %v2658_v53 = vld [vmem:[%s3648_s0 + $0x1c] sm:$0xf0]  ;;  %v2659_v59 = vld [vmem:[%s3648_s0 + $0x24] sm:$0xf0]  ;;  %v2562_v0 = vld [vmem:[%s3277_s29 + $0x350] sm:$0xf]  ;;  %v2499_v12 = vor.u32 %v2753_v63, %v2498_v62 }
  0xc3   : > { %1721 = vmatpush.bf16.msra.mxu3 %v2339_v24  ;;  %v3377_v58 = vor.u32 %v2658_v53, %v2106_v52  ;;  %v3385_v1 = vor.u32 %v2659_v59, %v2114_v54  ;;  %v2769_v3 = vld [vmem:[%s3277_s29 + $0x354] sm:$0xf0]  ;;  %v2626_v4 = vld [vmem:[%s3277_s29 + $0x3d0] sm:$0xf]  ;;  %v2654_v6 = vld [vmem:[%s3648_s0 + $0x4] sm:$0xf] }
  0xc4   : > { %1680 = vmatpush.bf16.msra.mxu0 %v2139_v31  ;;  %v2785_v5 = vld [vmem:[%s3277_s29 + $0x3d4] sm:$0xf0]  ;;  %v2108_v7 = vld [vmem:[%s3648_s0 + $0x20] sm:$0xf0]  ;;  %v2655_v8 = vld [vmem:[%s3648_s0 + $0xc] sm:$0xf]  ;;  %v2563_v13 = vor.u32 %v2769_v3, %v2562_v0 }
  0xc5   : > { %1694 = vmatpush.bf16.msra.mxu1 %v2203_v35  ;;  %v3401_v10 = vor.u32 %v2654_v6, %v2108_v7  ;;  %v2116_v11 = vld [vmem:[%s3648_s0 + $0x28] sm:$0xf0]  ;;  %v2426_v14 = vld [vmem:[%s3277_s29 + $0x240] sm:$0xf]  ;;  %v2735_v15 = vld [vmem:[%s3277_s29 + $0x244] sm:$0xf0]  ;;  %v2627_v18 = vor.u32 %v2785_v5, %v2626_v4 }
  0xc6   : > { %1708 = vmatpush.bf16.msra.mxu2 %v2267_v36  ;;  %v2490_v16 = vld [vmem:[%s3277_s29 + $0x2c0] sm:$0xf]  ;;  %v3409_v17 = vor.u32 %v2655_v8, %v2116_v11  ;;  %v2751_v19 = vld [vmem:[%s3277_s29 + $0x2c4] sm:$0xf0]  ;;  %v2427_v24 = vor.u32 %v2735_v15, %v2426_v14  ;;  %v2418_v27 = vld [vmem:[%s3277_s29 + $0x230] sm:$0xf] }
  0xc7   : > { %1722 = vmatpush.bf16.msra.mxu3 %v2331_v39  ;;  %1681 = vmatmul.bf16.vlgmr.msra.gmra.mxu0 %v3377_v58  ;;  %v2554_v20 = vld [vmem:[%s3277_s29 + $0x340] sm:$0xf]  ;;  %v2767_v21 = vld [vmem:[%s3277_s29 + $0x344] sm:$0xf0]  ;;  %v2491_v25 = vor.u32 %v2751_v19, %v2490_v16  ;;  %v2733_v28 = vld [vmem:[%s3277_s29 + $0x234] sm:$0xf0] }
  0xc8   : > { %1729 = vmatpush.bf16.msrb.mxu0 %v2451_v40  ;;  %1695 = vmatmul.bf16.vlgmr.msra.gmra.mxu1 %v3401_v10  ;;  %v2618_v22 = vld [vmem:[%s3277_s29 + $0x3c0] sm:$0xf]  ;;  %v2783_v23 = vld [vmem:[%s3277_s29 + $0x3c4] sm:$0xf0]  ;;  %v2555_v26 = vor.u32 %v2767_v21, %v2554_v20  ;;  %v2482_v29 = vld [vmem:[%s3277_s29 + $0x2b0] sm:$0xf]  ;;  %v2419_v36 = vor.u32 %v2733_v28, %v2418_v27 }
  0xc9   : > { %1743 = vmatpush.bf16.msrb.mxu1 %v2515_v43  ;;  %1709 = vmatmul.bf16.vlgmr.msra.gmra.mxu2 %v3385_v1  ;;  %v2619_v30 = vor.u32 %v2783_v23, %v2618_v22  ;;  %v2749_v31 = vld [vmem:[%s3277_s29 + $0x2b4] sm:$0xf0]  ;;  %v2546_v32 = vld [vmem:[%s3277_s29 + $0x330] sm:$0xf]  ;;  %v2410_v39 = vld [vmem:[%s3277_s29 + $0x220] sm:$0xf] }
  0xca   : > { %1757 = vmatpush.bf16.msrb.mxu2 %v2579_v44  ;;  %1723 = vmatmul.bf16.vlgmr.msra.gmra.mxu3 %v3409_v17  ;;  %v2765_v33 = vld [vmem:[%s3277_s29 + $0x334] sm:$0xf0]  ;;  %v2610_v34 = vld [vmem:[%s3277_s29 + $0x3b0] sm:$0xf]  ;;  %v2483_v37 = vor.u32 %v2749_v31, %v2482_v29  ;;  %v2731_v40 = vld [vmem:[%s3277_s29 + $0x224] sm:$0xf0] }
  0xcb   : > { %1771 = vmatpush.bf16.msrb.mxu3 %v2643_v48  ;;  %v2781_v35 = vld [vmem:[%s3277_s29 + $0x3b4] sm:$0xf0]  ;;  %v2547_v38 = vor.u32 %v2765_v33, %v2546_v32  ;;  %v2474_v41 = vld [vmem:[%s3277_s29 + $0x2a0] sm:$0xf]  ;;  %v2747_v43 = vld [vmem:[%s3277_s29 + $0x2a4] sm:$0xf0]  ;;  %v2411_v48 = vor.u32 %v2731_v40, %v2410_v39 }
  0xcc   : > { %1730 = vmatpush.bf16.msrb.mxu0 %v2443_v55  ;;  %v2611_v42 = vor.u32 %v2781_v35, %v2610_v34  ;;  %v2538_v44 = vld [vmem:[%s3277_s29 + $0x320] sm:$0xf]  ;;  %v2763_v45 = vld [vmem:[%s3277_s29 + $0x324] sm:$0xf0]  ;;  %v2402_v49 = vld [vmem:[%s3277_s29 + $0x210] sm:$0xf]  ;;  %v2475_v50 = vor.u32 %v2747_v43, %v2474_v41 }
  0xcd   : > { %1744 = vmatpush.bf16.msrb.mxu1 %v2507_v60  ;;  %v2602_v46 = vld [vmem:[%s3277_s29 + $0x3a0] sm:$0xf]  ;;  %v2779_v47 = vld [vmem:[%s3277_s29 + $0x3a4] sm:$0xf0]  ;;  %v2539_v51 = vor.u32 %v2763_v45, %v2538_v44  ;;  %v2729_v52 = vld [vmem:[%s3277_s29 + $0x214] sm:$0xf0] }
  0xce   : > { %1758 = vmatpush.bf16.msrb.mxu2 %v2571_v61  ;;  %v2466_v53 = vld [vmem:[%s3277_s29 + $0x290] sm:$0xf]  ;;  %v2745_v54 = vld [vmem:[%s3277_s29 + $0x294] sm:$0xf0]  ;;  %v2603_v55 = vor.u32 %v2779_v47, %v2602_v46  ;;  %v2394_v61 = vld [vmem:[%s3277_s29 + $0x200] sm:$0xf]  ;;  %v2403_v63 = vor.u32 %v2729_v52, %v2402_v49 }
  0xcf   : > { %1772 = vmatpush.bf16.msrb.mxu3 %v2635_v2  ;;  %v2530_v56 = vld [vmem:[%s3277_s29 + $0x310] sm:$0xf]  ;;  %v2761_v57 = vld [vmem:[%s3277_s29 + $0x314] sm:$0xf0]  ;;  %v2727_v62 = vld [vmem:[%s3277_s29 + $0x204] sm:$0xf0]  ;;  %v2467_v5 = vor.u32 %v2745_v54, %v2466_v53 }
  0xd0   : > { %1731 = vmatpush.bf16.msrb.mxu0 %v2435_v9  ;;  %v2594_v59 = vld [vmem:[%s3277_s29 + $0x390] sm:$0xf]  ;;  %v2777_v60 = vld [vmem:[%s3277_s29 + $0x394] sm:$0xf0]  ;;  %v2458_v0 = vld [vmem:[%s3277_s29 + $0x280] sm:$0xf]  ;;  %v2531_v6 = vor.u32 %v2761_v57, %v2530_v56  ;;  %v2395_v19 = vor.u32 %v2727_v62, %v2394_v61 }
  0xd1   : > { %1745 = vmatpush.bf16.msrb.mxu1 %v2499_v12  ;;  %v2743_v2 = vld [vmem:[%s3277_s29 + $0x284] sm:$0xf0]  ;;  %v2522_v3 = vld [vmem:[%s3277_s29 + $0x300] sm:$0xf]  ;;  %v2676_v9 = vld [vmem:[%s3277_s29 + $0x74] sm:$0xf]  ;;  %v2595_v11 = vor.u32 %v2777_v60, %v2594_v59 }
  0xd2   : > { %1759 = vmatpush.bf16.msrb.mxu2 %v2563_v13  ;;  %v2759_v4 = vld [vmem:[%s3277_s29 + $0x304] sm:$0xf0]  ;;  %v2586_v7 = vld [vmem:[%s3277_s29 + $0x380] sm:$0xf]  ;;  %v2196_v12 = vld [vmem:[%s3277_s29 + $0x78] sm:$0xf0]  ;;  %v2459_v23 = vor.u32 %v2743_v2, %v2458_v0 }
  0xd3   : > { %1773 = vmatpush.bf16.msrb.mxu3 %v2627_v18  ;;  %v2775_v8 = vld [vmem:[%s3277_s29 + $0x384] sm:$0xf0]  ;;  %v2692_v13 = vld [vmem:[%s3277_s29 + $0xf4] sm:$0xf]  ;;  %v2260_v14 = vld [vmem:[%s3277_s29 + $0xf8] sm:$0xf0]  ;;  %v2199_v29 = vor.u32 %v2676_v9, %v2196_v12 }
  0xd4   : > { %1732 = vmatpush.bf16.msrb.mxu0 %v2427_v24  ;;  %v2708_v15 = vld [vmem:[%s3277_s29 + $0x174] sm:$0xf]  ;;  %v2324_v16 = vld [vmem:[%s3277_s29 + $0x178] sm:$0xf0]  ;;  %v2122_v21 = vld [vmem:[%s3648_s0 + $0x10] sm:$0xf]  ;;  %v2523_v24 = vor.u32 %v2759_v4, %v2522_v3  ;;  %v2587_v28 = vor.u32 %v2775_v8, %v2586_v7  ;;  %v2263_v33 = vor.u32 %v2692_v13, %v2260_v14 }
  0xd5   : > { %1746 = vmatpush.bf16.msrb.mxu1 %v2491_v25  ;;  %v2724_v18 = vld [vmem:[%s3277_s29 + $0x1f4] sm:$0xf]  ;;  %v2388_v20 = vld [vmem:[%s3277_s29 + $0x1f8] sm:$0xf0]  ;;  %v2660_v22 = vld [vmem:[%s3648_s0 + $0x2c] sm:$0xf0]  ;;  %v2327_v34 = vor.u32 %v2708_v15, %v2324_v16 }
  0xd6   : > { %1760 = vmatpush.bf16.msrb.mxu2 %v2555_v26  ;;  %v2130_v25 = vld [vmem:[%s3648_s0 + $0x18] sm:$0xf]  ;;  %v2656_v27 = vld [vmem:[%s3648_s0 + $0x14] sm:$0xf]  ;;  %v2657_v31 = vld [vmem:[%s3648_s0 + $0x1c] sm:$0xf]  ;;  %v3485_v39 = vor.u32 %v2660_v22, %v2122_v21 }
  0xd7   : > { %1774 = vmatpush.bf16.msrb.mxu3 %v2619_v30  ;;  %v2661_v26 = vld [vmem:[%s3648_s0 + $0x34] sm:$0xf0]  ;;  %v2124_v30 = vld [vmem:[%s3648_s0 + $0x30] sm:$0xf0]  ;;  %v2132_v32 = vld [vmem:[%s3648_s0 + $0x38] sm:$0xf0] }
  0xd8   : > { %1733 = vmatpush.bf16.msrb.mxu0 %v2419_v36  ;;  %v2674_v35 = vld [vmem:[%s3277_s29 + $0x64] sm:$0xf]  ;;  %v2188_v36 = vld [vmem:[%s3277_s29 + $0x68] sm:$0xf0]  ;;  %v3490_v43 = vor.u32 %v2661_v26, %v2130_v25  ;;  %v3492_v44 = vor.u32 %v2656_v27, %v2124_v30  ;;  %v3496_v47 = vor.u32 %v2657_v31, %v2132_v32  ;;  %v2180_v52 = vld [vmem:[%s3277_s29 + $0x58] sm:$0xf0] }
  0xd9   : > { %1747 = vmatpush.bf16.msrb.mxu1 %v2483_v37  ;;  %v2690_v37 = vld [vmem:[%s3277_s29 + $0xe4] sm:$0xf]  ;;  %v2252_v40 = vld [vmem:[%s3277_s29 + $0xe8] sm:$0xf0]  ;;  %v2688_v53 = vld [vmem:[%s3277_s29 + $0xd4] sm:$0xf] }
  0xda   : > { %1761 = vmatpush.bf16.msrb.mxu2 %v2547_v38  ;;  %v2391_v38 = vor.u32 %v2724_v18, %v2388_v20  ;;  %v2706_v41 = vld [vmem:[%s3277_s29 + $0x164] sm:$0xf]  ;;  %v2380_v46 = vld [vmem:[%s3277_s29 + $0x1e8] sm:$0xf0]  ;;  %v2255_v49 = vor.u32 %v2690_v37, %v2252_v40  ;;  %v2704_v56 = vld [vmem:[%s3277_s29 + $0x154] sm:$0xf] }
  0xdb   : > { %1775 = vmatpush.bf16.msrb.mxu3 %v2611_v42  ;;  %v2316_v42 = vld [vmem:[%s3277_s29 + $0x168] sm:$0xf0]  ;;  %v2722_v45 = vld [vmem:[%s3277_s29 + $0x1e4] sm:$0xf]  ;;  %v2308_v57 = vld [vmem:[%s3277_s29 + $0x158] sm:$0xf0] }
  0xdc   : > { %1734 = vmatpush.bf16.msrb.mxu0 %v2411_v48  ;;  %v2191_v48 = vor.u32 %v2674_v35, %v2188_v36  ;;  %v2383_v54 = vor.u32 %v2722_v45, %v2380_v46  ;;  %v2720_v59 = vld [vmem:[%s3277_s29 + $0x1d4] sm:$0xf]  ;;  %v2372_v60 = vld [vmem:[%s3277_s29 + $0x1d8] sm:$0xf0]  ;;  %v2670_v0 = vld [vmem:[%s3277_s29 + $0x44] sm:$0xf] }
  0xdd   : > { %1748 = vmatpush.bf16.msrb.mxu1 %v2475_v50  ;;  %v2319_v50 = vor.u32 %v2706_v41, %v2316_v42  ;;  %v2172_v2 = vld [vmem:[%s3277_s29 + $0x48] sm:$0xf0]  ;;  %v2686_v3 = vld [vmem:[%s3277_s29 + $0xc4] sm:$0xf]  ;;  %v2375_v4 = vor.u32 %v2720_v59, %v2372_v60  ;;  %v2668_v14 = vld [vmem:[%s3277_s29 + $0x34] sm:$0xf] }
  0xde   : > { %1762 = vmatpush.bf16.msrb.mxu2 %v2539_v51  ;;  %v2672_v51 = vld [vmem:[%s3277_s29 + $0x54] sm:$0xf]  ;;  %v2300_v7 = vld [vmem:[%s3277_s29 + $0x148] sm:$0xf0]  ;;  %v2718_v8 = vld [vmem:[%s3277_s29 + $0x1c4] sm:$0xf] }
  0xdf   : > { %1776 = vmatpush.bf16.msrb.mxu3 %v2603_v55  ;;  %v2244_v55 = vld [vmem:[%s3277_s29 + $0xd8] sm:$0xf0]  ;;  %v2183_v61 = vor.u32 %v2672_v51, %v2180_v52  ;;  %v2364_v9 = vld [vmem:[%s3277_s29 + $0x1c8] sm:$0xf0]  ;;  %v2684_v16 = vld [vmem:[%s3277_s29 + $0xb4] sm:$0xf] }
  0xe0   : > { %1735 = vmatpush.bf16.msrb.mxu0 %v2403_v63  ;;  %v2247_v62 = vor.u32 %v2688_v53, %v2244_v55  ;;  %v2311_v63 = vor.u32 %v2704_v56, %v2308_v57  ;;  %v2164_v15 = vld [vmem:[%s3277_s29 + $0x38] sm:$0xf0]  ;;  %v2367_v18 = vor.u32 %v2718_v8, %v2364_v9  ;;  %v2700_v20 = vld [vmem:[%s3277_s29 + $0x134] sm:$0xf]  ;;  %v2666_v27 = vld [vmem:[%s3277_s29 + $0x24] sm:$0xf] }
  0xe1   : > { %1749 = vmatpush.bf16.msrb.mxu1 %v2467_v5  ;;  %v2236_v5 = vld [vmem:[%s3277_s29 + $0xc8] sm:$0xf0]  ;;  %v2292_v21 = vld [vmem:[%s3277_s29 + $0x138] sm:$0xf0]  ;;  %v2716_v22 = vld [vmem:[%s3277_s29 + $0x1b4] sm:$0xf] }
  0xe2   : > { %1763 = vmatpush.bf16.msrb.mxu2 %v2531_v6  ;;  %v2702_v6 = vld [vmem:[%s3277_s29 + $0x144] sm:$0xf]  ;;  %v2239_v12 = vor.u32 %v2686_v3, %v2236_v5  ;;  %v2295_v26 = vor.u32 %v2700_v20, %v2292_v21  ;;  %v2220_v31 = vld [vmem:[%s3277_s29 + $0xa8] sm:$0xf0]  ;;  %v2664_v40 = vld [vmem:[%s3277_s29 + $0x14] sm:$0xf] }
  0xe3   : > { %1777 = vmatpush.bf16.msrb.mxu3 %v2595_v11  ;;  %v2175_v11 = vor.u32 %v2670_v0, %v2172_v2  ;;  %v2303_v13 = vor.u32 %v2702_v6, %v2300_v7  ;;  %v2698_v32 = vld [vmem:[%s3277_s29 + $0x124] sm:$0xf]  ;;  %v2348_v35 = vld [vmem:[%s3277_s29 + $0x1a8] sm:$0xf0]  ;;  %v2148_v41 = vld [vmem:[%s3277_s29 + $0x18] sm:$0xf0] }
  0xe4   : > { %1736 = vmatpush.bf16.msrb.mxu0 %v2395_v19  ;;  %v2228_v19 = vld [vmem:[%s3277_s29 + $0xb8] sm:$0xf0]  ;;  %v2680_v42 = vld [vmem:[%s3277_s29 + $0x94] sm:$0xf]  ;;  %v2151_v52 = vor.u32 %v2664_v40, %v2148_v41  ;;  %v2662_v53 = vld [vmem:[%s3277_s29 + $0x4] sm:$0xf] }
  0xe5   : > { %1750 = vmatpush.bf16.msrb.mxu1 %v2459_v23  ;;  %v2356_v23 = vld [vmem:[%s3277_s29 + $0x1b8] sm:$0xf0]  ;;  %v2231_v25 = vor.u32 %v2684_v16, %v2228_v19  ;;  %v2678_v57 = vld [vmem:[%s3277_s29 + $0x84] sm:$0xf]  ;;  %v2204_v59 = vld [vmem:[%s3277_s29 + $0x88] sm:$0xf0] }
  0xe6   : > { %1764 = vmatpush.bf16.msrb.mxu2 %v2523_v24  ;;  %v2167_v24 = vor.u32 %v2668_v14, %v2164_v15  ;;  %v2359_v30 = vor.u32 %v2716_v22, %v2356_v23  ;;  %v2212_v46 = vld [vmem:[%s3277_s29 + $0x98] sm:$0xf0]  ;;  %v2694_v60 = vld [vmem:[%s3277_s29 + $0x104] sm:$0xf]  ;;  %v2332_v0 = vld [vmem:[%s3277_s29 + $0x188] sm:$0xf0]  ;;  %v2207_v9 = vor.u32 %v2678_v57, %v2204_v59 }
  0xe7   : > { %1778 = vmatpush.bf16.msrb.mxu3 %v2587_v28  ;;  %1737 = vmatmul.bf16.vlgmr.msrb.gmra.mxu0 %v3485_v39  ;;  %v2156_v28 = vld [vmem:[%s3277_s29 + $0x28] sm:$0xf0]  ;;  %v2340_v51 = vld [vmem:[%s3277_s29 + $0x198] sm:$0xf0]  ;;  %v2215_v55 = vor.u32 %v2680_v42, %v2212_v46  ;;  %v2740_v2 = vld [vmem:[%s3277_s29 + $0x274] sm:$0xf] }
  0xe8   : > { %1785 = vmatpush.bf16.msra.mxu0 %v2199_v29  ;;  %1751 = vmatmul.bf16.vlgmr.msrb.gmra.mxu1 %v3492_v44  ;;  %v2682_v29 = vld [vmem:[%s3277_s29 + $0xa4] sm:$0xf]  ;;  %v2159_v36 = vor.u32 %v2666_v27, %v2156_v28  ;;  %v2452_v3 = vld [vmem:[%s3277_s29 + $0x278] sm:$0xf0]  ;;  %v2772_v7 = vld [vmem:[%s3277_s29 + $0x374] sm:$0xf] }
  0xe9   : > { %1799 = vmatpush.bf16.msra.mxu1 %v2263_v33  ;;  %1765 = vmatmul.bf16.vlgmr.msrb.gmra.mxu2 %v3490_v43  ;;  %v2284_v33 = vld [vmem:[%s3277_s29 + $0x128] sm:$0xf0]  ;;  %v2223_v37 = vor.u32 %v2682_v29, %v2220_v31  ;;  %v2516_v6 = vld [vmem:[%s3277_s29 + $0x2f8] sm:$0xf0]  ;;  %v2455_v15 = vor.u32 %v2740_v2, %v2452_v3  ;;  %v2738_v19 = vld [vmem:[%s3277_s29 + $0x264] sm:$0xf] }
  0xea   : > { %1813 = vmatpush.bf16.msra.mxu2 %v2327_v34  ;;  %1779 = vmatmul.bf16.vlgmr.msrb.gmra.mxu3 %v3496_v47  ;;  %v2714_v34 = vld [vmem:[%s3277_s29 + $0x1a4] sm:$0xf]  ;;  %v2580_v8 = vld [vmem:[%s3277_s29 + $0x378] sm:$0xf0]  ;;  %v2444_v20 = vld [vmem:[%s3277_s29 + $0x268] sm:$0xf0] }
  0xeb   : > { %1827 = vmatpush.bf16.msra.mxu3 %v2391_v38  ;;  %v2287_v38 = vor.u32 %v2698_v32, %v2284_v33  ;;  %v2351_v45 = vor.u32 %v2714_v34, %v2348_v35  ;;  %v2754_v21 = vld [vmem:[%s3277_s29 + $0x2e4] sm:$0xf]  ;;  %v2508_v23 = vld [vmem:[%s3277_s29 + $0x2e8] sm:$0xf0]  ;;  %v2447_v28 = vor.u32 %v2738_v19, %v2444_v20  ;;  %v2736_v31 = vld [vmem:[%s3277_s29 + $0x254] sm:$0xf] }
  0xec   : > { %1786 = vmatpush.bf16.msra.mxu0 %v2191_v48  ;;  %v2696_v48 = vld [vmem:[%s3277_s29 + $0x114] sm:$0xf]  ;;  %v2636_v27 = vld [vmem:[%s3277_s29 + $0x3e8] sm:$0xf0]  ;;  %v2511_v29 = vor.u32 %v2754_v21, %v2508_v23  ;;  %v2436_v32 = vld [vmem:[%s3277_s29 + $0x258] sm:$0xf0] }
  0xed   : > { %1800 = vmatpush.bf16.msra.mxu1 %v2255_v49  ;;  %v2276_v49 = vld [vmem:[%s3277_s29 + $0x118] sm:$0xf0]  ;;  %v2752_v33 = vld [vmem:[%s3277_s29 + $0x2d4] sm:$0xf]  ;;  %v2439_v41 = vor.u32 %v2736_v31, %v2436_v32  ;;  %v2428_v46 = vld [vmem:[%s3277_s29 + $0x248] sm:$0xf0] }
  0xee   : > { %1814 = vmatpush.bf16.msra.mxu2 %v2319_v50  ;;  %v2712_v50 = vld [vmem:[%s3277_s29 + $0x194] sm:$0xf]  ;;  %v2279_v56 = vor.u32 %v2696_v48, %v2276_v49  ;;  %v2500_v35 = vld [vmem:[%s3277_s29 + $0x2d8] sm:$0xf0]  ;;  %v2750_v48 = vld [vmem:[%s3277_s29 + $0x2c4] sm:$0xf] }
  0xef   : > { %1828 = vmatpush.bf16.msra.mxu3 %v2383_v54  ;;  %v2140_v54 = vld [vmem:[%s3277_s29 + $0x8] sm:$0xf0]  ;;  %v2628_v40 = vld [vmem:[%s3277_s29 + $0x3d8] sm:$0xf0]  ;;  %v2748_v57 = vld [vmem:[%s3277_s29 + $0x2b4] sm:$0xf] }
  0xf0   : > { %1787 = vmatpush.bf16.msra.mxu0 %v2183_v61  ;;  %v2343_v61 = vor.u32 %v2712_v50, %v2340_v51  ;;  %v2143_v5 = vor.u32 %v2662_v53, %v2140_v54  ;;  %v2492_v49 = vld [vmem:[%s3277_s29 + $0x2c8] sm:$0xf0]  ;;  %v2782_v51 = vld [vmem:[%s3277_s29 + $0x3c4] sm:$0xf]  ;;  %v2728_v19 = vld [vmem:[%s3277_s29 + $0x214] sm:$0xf] }
  0xf1   : > { %1801 = vmatpush.bf16.msra.mxu1 %v2247_v62  ;;  %v2268_v62 = vld [vmem:[%s3277_s29 + $0x108] sm:$0xf0]  ;;  %v2495_v53 = vor.u32 %v2750_v48, %v2492_v49  ;;  %v2404_v20 = vld [vmem:[%s3277_s29 + $0x218] sm:$0xf0]  ;;  %v2744_v21 = vld [vmem:[%s3277_s29 + $0x294] sm:$0xf] }
  0xf2   : > { %1815 = vmatpush.bf16.msra.mxu2 %v2311_v63  ;;  %v2710_v63 = vld [vmem:[%s3277_s29 + $0x184] sm:$0xf]  ;;  %v2556_v50 = vld [vmem:[%s3277_s29 + $0x348] sm:$0xf0]  ;;  %v2468_v23 = vld [vmem:[%s3277_s29 + $0x298] sm:$0xf0] }
  0xf3   : > { %1829 = vmatpush.bf16.msra.mxu3 %v2375_v4  ;;  %v2756_v4 = vld [vmem:[%s3277_s29 + $0x2f4] sm:$0xf]  ;;  %v2335_v14 = vor.u32 %v2710_v63, %v2332_v0  ;;  %v2612_v0 = vld [vmem:[%s3277_s29 + $0x3b8] sm:$0xf0]  ;;  %v2726_v31 = vld [vmem:[%s3277_s29 + $0x204] sm:$0xf] }
  0xf4   : > { %1788 = vmatpush.bf16.msra.mxu0 %v2175_v11  ;;  %v2271_v11 = vor.u32 %v2694_v60, %v2268_v62  ;;  %v2519_v16 = vor.u32 %v2756_v4, %v2516_v6  ;;  %v2484_v60 = vld [vmem:[%s3277_s29 + $0x2b8] sm:$0xf0]  ;;  %v2780_v63 = vld [vmem:[%s3277_s29 + $0x3b4] sm:$0xf]  ;;  %v2412_v6 = vld [vmem:[%s3277_s29 + $0x228] sm:$0xf0] }
  0xf5   : > { %1802 = vmatpush.bf16.msra.mxu1 %v2239_v12  ;;  %v2788_v12 = vld [vmem:[%s3277_s29 + $0x3f4] sm:$0xf]  ;;  %v2548_v62 = vld [vmem:[%s3277_s29 + $0x338] sm:$0xf0]  ;;  %v2487_v3 = vor.u32 %v2748_v57, %v2484_v60  ;;  %v2396_v32 = vld [vmem:[%s3277_s29 + $0x208] sm:$0xf0] }
  0xf6   : > { %1816 = vmatpush.bf16.msra.mxu2 %v2303_v13  ;;  %v2644_v13 = vld [vmem:[%s3277_s29 + $0x3f8] sm:$0xf0] }
  0xf7   : > { %1830 = vmatpush.bf16.msra.mxu3 %v2367_v18  ;;  %v2583_v18 = vor.u32 %v2772_v7, %v2580_v8  ;;  %v2647_v22 = vor.u32 %v2788_v12, %v2644_v13  ;;  %v2746_v7 = vld [vmem:[%s3277_s29 + $0x2a4] sm:$0xf]  ;;  %v2615_v8 = vor.u32 %v2780_v63, %v2612_v0  ;;  %v2540_v12 = vld [vmem:[%s3277_s29 + $0x328] sm:$0xf0] }
  0xf8   : > { %1789 = vmatpush.bf16.msra.mxu0 %v2167_v24  ;;  %v2770_v24 = vld [vmem:[%s3277_s29 + $0x364] sm:$0xf] }
  0xf9   : > { %1803 = vmatpush.bf16.msra.mxu1 %v2231_v25  ;;  %v2572_v25 = vld [vmem:[%s3277_s29 + $0x368] sm:$0xf0]  ;;  %v2778_v13 = vld [vmem:[%s3277_s29 + $0x3a4] sm:$0xf] }
  0xfa   : > { %1817 = vmatpush.bf16.msra.mxu2 %v2295_v26  ;;  %v2786_v26 = vld [vmem:[%s3277_s29 + $0x3e4] sm:$0xf] }
  0xfb   : > { %1831 = vmatpush.bf16.msra.mxu3 %v2359_v30  ;;  %v2575_v30 = vor.u32 %v2770_v24, %v2572_v25  ;;  %v2639_v34 = vor.u32 %v2786_v26, %v2636_v27  ;;  %v2760_v24 = vld [vmem:[%s3277_s29 + $0x314] sm:$0xf]  ;;  %v2532_v25 = vld [vmem:[%s3277_s29 + $0x318] sm:$0xf0] }
  0xfc   : > { %1790 = vmatpush.bf16.msra.mxu0 %v2159_v36  ;;  %v2768_v36 = vld [vmem:[%s3277_s29 + $0x354] sm:$0xf]  ;;  %v2596_v27 = vld [vmem:[%s3277_s29 + $0x398] sm:$0xf0] }
  0xfd   : > { %1804 = vmatpush.bf16.msra.mxu1 %v2223_v37  ;;  %v2564_v37 = vld [vmem:[%s3277_s29 + $0x358] sm:$0xf0]  ;;  %v2776_v26 = vld [vmem:[%s3277_s29 + $0x394] sm:$0xf] }
  0xfe   : > { %1818 = vmatpush.bf16.msra.mxu2 %v2287_v38  ;;  %v2784_v38 = vld [vmem:[%s3277_s29 + $0x3d4] sm:$0xf]  ;;  %v2567_v42 = vor.u32 %v2768_v36, %v2564_v37  ;;  %v2758_v36 = vld [vmem:[%s3277_s29 + $0x304] sm:$0xf]  ;;  %v2524_v37 = vld [vmem:[%s3277_s29 + $0x308] sm:$0xf0] }
  0xff   : > { %1832 = vmatpush.bf16.msra.mxu3 %v2351_v45  ;;  %v2734_v45 = vld [vmem:[%s3277_s29 + $0x244] sm:$0xf] }
 0x100   : > { %1791 = vmatpush.bf16.msra.mxu0 %v2151_v52  ;;  %v2431_v52 = vor.u32 %v2734_v45, %v2428_v46 }
 0x101   : > { %1805 = vmatpush.bf16.msra.mxu1 %v2215_v55  ;;  %v2732_v55 = vld [vmem:[%s3277_s29 + $0x234] sm:$0xf] }
 0x102   : > { %1819 = vmatpush.bf16.msra.mxu2 %v2279_v56  ;;  %v2420_v56 = vld [vmem:[%s3277_s29 + $0x238] sm:$0xf0] }
 0x103   : > { %1833 = vmatpush.bf16.msra.mxu3 %v2343_v61  ;;  %v2764_v61 = vld [vmem:[%s3277_s29 + $0x334] sm:$0xf]  ;;  %v2423_v2 = vor.u32 %v2732_v55, %v2420_v56 }
 0x104   : > { %1792 = vmatpush.bf16.msra.mxu0 %v2143_v5  ;;  %v2551_v4 = vor.u32 %v2764_v61, %v2548_v62  ;;  %v2730_v5 = vld [vmem:[%s3277_s29 + $0x224] sm:$0xf] }
 0x105   : > { %1806 = vmatpush.bf16.msra.mxu1 %v2207_v9  ;;  %v2476_v9 = vld [vmem:[%s3277_s29 + $0x2a8] sm:$0xf0] }
 0x106   : > { %1820 = vmatpush.bf16.msra.mxu2 %v2271_v11  ;;  %v2762_v11 = vld [vmem:[%s3277_s29 + $0x324] sm:$0xf] }
 0x107   : > { %1834 = vmatpush.bf16.msra.mxu3 %v2335_v14  ;;  %1793 = vmatmul.bf16.vlgmr.msra.gmra.mxu0 %v3377_v58  ;;  %v2631_v58 = vor.u32 %v2784_v38, %v2628_v40  ;;  %v2604_v14 = vld [vmem:[%s3277_s29 + $0x3a8] sm:$0xf0]  ;;  %v2774_v38 = vld [vmem:[%s3277_s29 + $0x384] sm:$0xf] }
 0x108   : > { %1841 = vmatpush.bf16.msrb.mxu0 %v2455_v15  ;;  %1807 = vmatmul.bf16.vlgmr.msra.gmra.mxu1 %v3401_v10  ;;  %v2620_v10 = vld [vmem:[%s3277_s29 + $0x3c8] sm:$0xf0]  ;;  %v2415_v15 = vor.u32 %v2730_v5, %v2412_v6 }
 0x109   : > { %1855 = vmatpush.bf16.msrb.mxu1 %v2519_v16  ;;  %1821 = vmatmul.bf16.vlgmr.msra.gmra.mxu2 %v3385_v1  ;;  %v2503_v1 = vor.u32 %v2752_v33, %v2500_v35  ;;  %v2623_v59 = vor.u32 %v2782_v51, %v2620_v10  ;;  %v2479_v16 = vor.u32 %v2746_v7, %v2476_v9  ;;  %v2742_v33 = vld [vmem:[%s3277_s29 + $0x284] sm:$0xf]  ;;  %v2460_v35 = vld [vmem:[%s3277_s29 + $0x288] sm:$0xf0] }
 0x10a   : > { %1869 = vmatpush.bf16.msrb.mxu2 %v2583_v18  ;;  %1835 = vmatmul.bf16.vlgmr.msra.gmra.mxu3 %v3409_v17  ;;  %v2766_v17 = vld [vmem:[%s3277_s29 + $0x344] sm:$0xf]  ;;  %v2543_v18 = vor.u32 %v2762_v11, %v2540_v12  ;;  %v2588_v40 = vld [vmem:[%s3277_s29 + $0x388] sm:$0xf0]  ;;  %s2103_s29 = sshll.u32 %s3273_s26, 4  ;;  %s2790_s26 = sshll.u32 (%p2991_p9), %s2911_s15, 3 }
 0x10b   : > { %1883 = vmatpush.bf16.msrb.mxu3 %v2647_v22  ;;  %v2559_v54 = vor.u32 %v2766_v17, %v2556_v50  ;;  %v2607_v22 = vor.u32 %v2778_v13, %v2604_v14  ;;  %v2591_v45 = vor.u32 %v2774_v38, %v2588_v40  ;;  %s1919_s5 = scalar_lea.vmem (%p2991_p9), %s3651_s3, %s2790_s26 }
 0x10c   : > { %1842 = vmatpush.bf16.msrb.mxu0 %v2447_v28  ;;  %v2407_v28 = vor.u32 %v2728_v19, %v2404_v20 }
 0x10d   : > { %1856 = vmatpush.bf16.msrb.mxu1 %v2511_v29  ;;  %v2471_v29 = vor.u32 %v2744_v21, %v2468_v23 }
 0x10e   : > { %1870 = vmatpush.bf16.msrb.mxu2 %v2575_v30  ;;  %v2535_v30 = vor.u32 %v2760_v24, %v2532_v25 }
 0x10f   : > { %1884 = vmatpush.bf16.msrb.mxu3 %v2639_v34  ;;  %v2599_v34 = vor.u32 %v2776_v26, %v2596_v27 }
 0x110   : > { %1843 = vmatpush.bf16.msrb.mxu0 %v2439_v41  ;;  %v2399_v41 = vor.u32 %v2726_v31, %v2396_v32 }
 0x111   : > { %1857 = vmatpush.bf16.msrb.mxu1 %v2503_v1  ;;  %v2463_v1 = vor.u32 %v2742_v33, %v2460_v35 }
 0x112   : > { %1871 = vmatpush.bf16.msrb.mxu2 %v2567_v42  ;;  %v2527_v42 = vor.u32 %v2758_v36, %v2524_v37 }
 0x113   : > { %1885 = vmatpush.bf16.msrb.mxu3 %v2631_v58 }
 0x114   : > { %1844 = vmatpush.bf16.msrb.mxu0 %v2431_v52 }
 0x115   : > { %1858 = vmatpush.bf16.msrb.mxu1 %v2495_v53 }
 0x116   : > { %1872 = vmatpush.bf16.msrb.mxu2 %v2559_v54 }
 0x117   : > { %1886 = vmatpush.bf16.msrb.mxu3 %v2623_v59 }
 0x118   : > { %1845 = vmatpush.bf16.msrb.mxu0 %v2423_v2 }
 0x119   : > { %1859 = vmatpush.bf16.msrb.mxu1 %v2487_v3 }
 0x11a   : > { %1873 = vmatpush.bf16.msrb.mxu2 %v2551_v4 }
 0x11b   : > { %1887 = vmatpush.bf16.msrb.mxu3 %v2615_v8 }
 0x11c   : > { %1846 = vmatpush.bf16.msrb.mxu0 %v2415_v15 }
 0x11d   : > { %1860 = vmatpush.bf16.msrb.mxu1 %v2479_v16 }
 0x11e   : > { %1874 = vmatpush.bf16.msrb.mxu2 %v2543_v18 }
 0x11f   : > { %1888 = vmatpush.bf16.msrb.mxu3 %v2607_v22 }
 0x120   : > { %1847 = vmatpush.bf16.msrb.mxu0 %v2407_v28 }
 0x121   : > { %1861 = vmatpush.bf16.msrb.mxu1 %v2471_v29 }
 0x122   : > { %1875 = vmatpush.bf16.msrb.mxu2 %v2535_v30 }
 0x123   : > { %1889 = vmatpush.bf16.msrb.mxu3 %v2599_v34 }
 0x124   : > { %1848 = vmatpush.bf16.msrb.mxu0 %v2399_v41 }
 0x125   : > { %1862 = vmatpush.bf16.msrb.mxu1 %v2463_v1 }
 0x126   : > { %1876 = vmatpush.bf16.msrb.mxu2 %v2527_v42 }
 0x127   : > { %1890 = vmatpush.bf16.msrb.mxu3 %v2591_v45  ;;  %1849 = vmatmul.bf16.vlgmr.msrb.gmra.mxu0 %v3485_v39  ;;  %v987_v39 = vld [vmem:[%s3280_s30] sm:$0x3]  ;;  %s829_s30 = scalar_lea.vmem [#allocation5], %s2103_s29 }
 0x128   : > { %1863 = vmatmul.bf16.vlgmr.msrb.gmra.mxu1 %v3492_v44  ;;  %v989_v57 = vperm.slane %v987_v39, 0  ;;  %v990_v62 = vperm.slane %v987_v39, 1 }
 0x129   : > { %1877 = vmatmul.bf16.vlgmr.msrb.gmra.mxu2 %v3490_v43 }
 0x12a   : > { %1891 = vmatmul.bf16.vlgmr.msrb.gmra.mxu3 %v3496_v47 }
 0x144   : > { %v1682_v46 = vpop.f32.mrf.mxu0 }
 0x145   : > { %v1696_v48 = vpop.f32.mrf.mxu1  ;;  %v1683_v59 = vadd.f32 %v1682_v46, %v989_v57 }
 0x147   : > { %v1697_v61 = vadd.f32 %v1696_v48, %v1683_v59 }
 0x14c   : > { %v1710_v58 = vpop.f32.mrf.mxu2  ;;  %v1684_v17 = vpop.f32.mrf.mxu0 }
 0x14d   : > { %v1724_v49 = vpop.f32.mrf.mxu3  ;;  %v1698_v50 = vpop.f32.mrf.mxu1  ;;  %v1711_v0 = vadd.f32 %v1710_v58, %v1697_v61  ;;  %v1685_v4 = vadd.f32 %v1684_v17, %v989_v57 }
 0x14f   : > { %v1725_v6 = vadd.f32 %v1724_v49, %v1711_v0  ;;  %v1699_v9 = vadd.f32 %v1698_v50, %v1685_v4 }
 0x154   : > { %v1712_v51 = vpop.f32.mrf.mxu2 }
 0x155   : > { %v1726_v10 = vpop.f32.mrf.mxu3  ;;  %v1713_v15 = vadd.f32 %v1712_v51, %v1699_v9 }
 0x157   : > { %v1727_v23 = vadd.f32 %v1726_v10, %v1713_v15 }
 0x164   : > { %v1738_v52 = vpop.f32.mrf.mxu0 }
 0x165   : > { %v1752_v53 = vpop.f32.mrf.mxu1  ;;  %v1739_v12 = vadd.f32 %v1738_v52, %v1725_v6 }
 0x167   : > { %v1753_v18 = vadd.f32 %v1752_v53, %v1739_v12 }
 0x16c   : > { %v1766_v54 = vpop.f32.mrf.mxu2  ;;  %v1740_v56 = vpop.f32.mrf.mxu0 }
 0x16d   : > { %v1780_v55 = vpop.f32.mrf.mxu3  ;;  %v1754_v44 = vpop.f32.mrf.mxu1  ;;  %v1767_v26 = vadd.f32 %v1766_v54, %v1753_v18  ;;  %v1741_v28 = vadd.f32 %v1740_v56, %v1727_v23 }
 0x16f   : > { %v1781_v31 = vadd.f32 %v1780_v55, %v1767_v26  ;;  %v1755_v36 = vadd.f32 %v1754_v44, %v1741_v28 }
 0x171   : > { %v1897_v40 = vmax.f32 %v1781_v31, 0.0 }
 0x174   : > { %v1768_v43 = vpop.f32.mrf.mxu2 }
 0x175   : > { %v1782_v60 = vpop.f32.mrf.mxu3  ;;  %v1769_v41 = vadd.f32 %v1768_v43, %v1755_v36 }
 0x177   : > { %v1783_v58 = vadd.f32 %v1782_v60, %v1769_v41 }
 0x179   : > { %v1899_v51 = vmax.f32 %v1783_v58, 0.0 }
 0x184   : > { %v1794_v47 = vpop.f32.mrf.mxu0 }
 0x185   : > { %v1808_v63 = vpop.f32.mrf.mxu1  ;;  %v1795_v2 = vadd.f32 %v1794_v47, %v990_v62 }
 0x187   : > { %v1809_v7 = vadd.f32 %v1808_v63, %v1795_v2 }
 0x18c   : > { %v1822_v3 = vpop.f32.mrf.mxu2  ;;  %v1796_v8 = vpop.f32.mrf.mxu0 }
 0x18d   : > { %v1836_v5 = vpop.f32.mrf.mxu3  ;;  %v1810_v11 = vpop.f32.mrf.mxu1  ;;  %v1823_v13 = vadd.f32 %v1822_v3, %v1809_v7  ;;  %v1797_v14 = vadd.f32 %v1796_v8, %v990_v62 }
 0x18f   : > { %v1837_v19 = vadd.f32 %v1836_v5, %v1823_v13  ;;  %v1811_v20 = vadd.f32 %v1810_v11, %v1797_v14 }
 0x194   : > { %v1824_v16 = vpop.f32.mrf.mxu2 }
 0x195   : > { %v1838_v21 = vpop.f32.mrf.mxu3  ;;  %v1825_v27 = vadd.f32 %v1824_v16, %v1811_v20 }
 0x197   : > { %v1839_v32 = vadd.f32 %v1838_v21, %v1825_v27 }
 0x1a4   : > { %v1850_v22 = vpop.f32.mrf.mxu0 }
 0x1a5   : > { %v1851_v24 = vadd.f32 %v1850_v22, %v1837_v19  ;;  %v1864_v25 = vpop.f32.mrf.mxu1 }
 0x1a7   : > { %v1865_v29 = vadd.f32 %v1864_v25, %v1851_v24 }
 0x1ac   : > { %v1878_v30 = vpop.f32.mrf.mxu2  ;;  %v1852_v35 = vpop.f32.mrf.mxu0 }
 0x1ad   : > { %v1879_v33 = vadd.f32 %v1878_v30, %v1865_v29  ;;  %v1892_v34 = vpop.f32.mrf.mxu3  ;;  %v1853_v38 = vadd.f32 %v1852_v35, %v1839_v32  ;;  %v1866_v42 = vpop.f32.mrf.mxu1 }
 0x1af   : > { %v1893_v37 = vadd.f32 %v1892_v34, %v1879_v33  ;;  %v1867_v46 = vadd.f32 %v1866_v42, %v1853_v38 }
 0x1b1   : > { %v1898_v1 = vmax.f32 %v1893_v37, 0.0 }
 0x1b3   : > { %v1901_v45 = vpack.c.bf16 %v1898_v1, %v1897_v40 }
 0x1b4   : > { %v1880_v48 = vpop.f32.mrf.mxu2 }
 0x1b5   : > { %1903 = vst [vmem:[%s829_s30] sm:$0xff] %v1901_v45  ;;  %v1881_v49 = vadd.f32 %v1880_v48, %v1867_v46  ;;  %v1894_v17 = vpop.f32.mrf.mxu3 }
 0x1b7   : > { %v1895_v50 = vadd.f32 %v1894_v17, %v1881_v49 }
 0x1b9   : > { %v1900_v10 = vmax.f32 %v1895_v50, 0.0  ;;  %1911 = sbr.rel (!%p2991_p9) target bundleno = 454 (0x1c6), region = 78 }
 0x1bb   : > { %v1902_v52 = vpack.c.bf16 %v1900_v10, %v1899_v51 }
 0x1bc   : > { %v1950_v53 = vld [vmem:[%s829_s30] sm:$0xff] (%p2991_p9) }
 0x1bd   : > { %1904 = vst [vmem:[%s829_s30 + $0x8] sm:$0xff] %v1902_v52 }
 0x1be   : > { %1951 = vst [vmem:[%s1919_s5] sm:$0xff] %v1950_v53 }
 0x1c4   : > { %v1952_v54 = vld [vmem:[%s829_s30 + $0x8] sm:$0xff] }
 0x1c5   : > { %1953 = vst [vmem:[%s1919_s5 + $0x20] sm:$0xff] %v1952_v54 }
 0x1c6 PF: > { %s16_s17 = sadd.s32 1, %s2919_s17   ;;  %s3655_s12 = smov %s2903_s13 }
 0x1c7   : > { %p13_p0 = scmp.ge.s32.totalorder %s16_s17, 6   ;;  %s3656_s13 = smov %s2907_s14 }
 0x1c8   : > { %s3657_s14 = smov %s2989_s24  ;;  %s3658_s15 = smov %s2915_s16 }
 0x1c9   : > { %s3659_s16 = smov %s3661_s19  ;;  %15 = sbr.rel (!%p13_p0) target bundleno = 4 (0x4), region = 159 }
 0x1ce   :  { %1969 = vsyncpa [#allocation4], 1 }
 0x1cf   :  { %1971 = vsyncpa [#allocation4 + $0x1], 1 }

// kernel: _lambda_.109
= control target key start
LH: loop header
LB: loop body
LE: loop exit
PB: predicated region body
PF: predicated region fallthrough
CT: control target
= control target key end

     0   :  { %8 = vsyncpa [#allocation3], 0  ;;  %s313_s15 = smov [#allocation2]   ;;  %s385_s0 = inlined_call_operand.vmem [shape: bf16[1,64,128], index: 0, kind: input, shape index: {}]   ;;  %s386_s1 = inlined_call_operand.vmem [shape: bf16[1,128,128], index: 1, kind: input, shape index: {}]   ;;  %s387_s2 = inlined_call_operand.hbm [shape: f32[1,1,128], index: 2, kind: input, shape index: {}]   ;;  %s388_s3 = inlined_call_operand.vmem [shape: bf16[1,64,128], index: 3, kind: output, shape index: {}]  }
   0x1   :  { %s18_s14 = sshll.u32 %s387_s2, 4  ;;  %s20_s16 = sshll.u32 %s313_s15, 4  ;;  %s19_s14 = int_to_ptr.hbm [resolvable:$true] %s18_s14  ;;  %s21_s16 = int_to_ptr.vmem [resolvable:$true] %s20_s16 }
   0x2   :  { %23 = dma.hbm_to_vmem [thread:$0]  %s19_s14, 16, %s21_s16, [#allocation3]  }
   0x3   :  { %311 = dma.done.wait [#allocation3], 16  }
   0x4   :  { %312 = vsyncadd [#allocation3], 4294967280  ;;  %v237_v0 = vld [vmem:[%s386_s1 + $0x38] sm:$0xff]  ;;  %v236_v1 = vld [vmem:[%s386_s1 + $0x30] sm:$0xff] }
   0x5   :  { %128 = vmatpush.bf16.msra.mxu0 %v237_v0  ;;  %261 = vmatpush.bf16.msra.mxu1 %v237_v0  ;;  %v235_v2 = vld [vmem:[%s386_s1 + $0x28] sm:$0xff]  ;;  %v234_v3 = vld [vmem:[%s386_s1 + $0x20] sm:$0xff]  ;;  %v233_v4 = vld [vmem:[%s386_s1 + $0x18] sm:$0xff] }
   0x6   :  { %262 = vmatpush.bf16.msra.mxu2 %v237_v0  ;;  %263 = vmatpush.bf16.msra.mxu3 %v237_v0  ;;  %v232_v5 = vld [vmem:[%s386_s1 + $0x10] sm:$0xff]  ;;  %v231_v6 = vld [vmem:[%s386_s1 + $0x8] sm:$0xff]  ;;  %v230_v7 = vld [vmem:[%s386_s1] sm:$0xff] }
   0x7   :  { %v226_v8 = vld [vmem:[%s385_s0] sm:$0xff]  ;;  %v227_v9 = vld [vmem:[%s385_s0 + $0x8] sm:$0xff]  ;;  %v228_v10 = vld [vmem:[%s385_s0 + $0x10] sm:$0xff] }
   0x8   :  { %v229_v11 = vld [vmem:[%s385_s0 + $0x18] sm:$0xff]  ;;  %v286_v14 = vld [vmem:[#allocation2] ss:$0 sm:$0xff] }
   0x9   :  { %129 = vmatpush.bf16.msra.mxu0 %v236_v1  ;;  %264 = vmatpush.bf16.msra.mxu1 %v236_v1 }
   0xa   :  { %265 = vmatpush.bf16.msra.mxu2 %v236_v1  ;;  %266 = vmatpush.bf16.msra.mxu3 %v236_v1 }
   0xd   :  { %130 = vmatpush.bf16.msra.mxu0 %v235_v2  ;;  %267 = vmatpush.bf16.msra.mxu1 %v235_v2 }
   0xe   :  { %268 = vmatpush.bf16.msra.mxu2 %v235_v2  ;;  %269 = vmatpush.bf16.msra.mxu3 %v235_v2 }
  0x11   :  { %131 = vmatpush.bf16.msra.mxu0 %v234_v3  ;;  %270 = vmatpush.bf16.msra.mxu1 %v234_v3 }
  0x12   :  { %271 = vmatpush.bf16.msra.mxu2 %v234_v3  ;;  %272 = vmatpush.bf16.msra.mxu3 %v234_v3 }
  0x15   :  { %132 = vmatpush.bf16.msra.mxu0 %v233_v4  ;;  %273 = vmatpush.bf16.msra.mxu1 %v233_v4 }
  0x16   :  { %274 = vmatpush.bf16.msra.mxu2 %v233_v4  ;;  %275 = vmatpush.bf16.msra.mxu3 %v233_v4 }
  0x19   :  { %133 = vmatpush.bf16.msra.mxu0 %v232_v5  ;;  %276 = vmatpush.bf16.msra.mxu1 %v232_v5 }
  0x1a   :  { %277 = vmatpush.bf16.msra.mxu2 %v232_v5  ;;  %278 = vmatpush.bf16.msra.mxu3 %v232_v5 }
  0x1d   :  { %134 = vmatpush.bf16.msra.mxu0 %v231_v6  ;;  %279 = vmatpush.bf16.msra.mxu1 %v231_v6 }
  0x1e   :  { %280 = vmatpush.bf16.msra.mxu2 %v231_v6  ;;  %281 = vmatpush.bf16.msra.mxu3 %v231_v6 }
  0x21   :  { %135 = vmatpush.bf16.msra.mxu0 %v230_v7  ;;  %282 = vmatpush.bf16.msra.mxu1 %v230_v7 }
  0x22   :  { %283 = vmatpush.bf16.msra.mxu2 %v230_v7  ;;  %284 = vmatpush.bf16.msra.mxu3 %v230_v7 }
  0x24   :  { %136 = vmatmul.bf16.vlgmr.msra.gmra.mxu0 %v226_v8  ;;  %141 = vmatmul.bf16.vlgmr.msra.gmra.mxu1 %v227_v9 }
  0x25   :  { %146 = vmatmul.bf16.vlgmr.msra.gmra.mxu2 %v228_v10  ;;  %151 = vmatmul.bf16.vlgmr.msra.gmra.mxu3 %v229_v11 }
  0xa1   :  { %v137_v12 = vpop.f32.mrf.mxu0  ;;  %v142_v13 = vpop.f32.mrf.mxu1 }
  0xa2   :  { %v138_v19 = vadd.f32 %v286_v14, %v137_v12  ;;  %v143_v20 = vadd.f32 %v286_v14, %v142_v13 }
  0xa8   :  { %v147_v15 = vpop.f32.mrf.mxu2  ;;  %v152_v16 = vpop.f32.mrf.mxu3 }
  0xa9   :  { %v139_v17 = vpop.f32.mrf.mxu0  ;;  %v144_v18 = vpop.f32.mrf.mxu1  ;;  %v148_v27 = vadd.f32 %v286_v14, %v147_v15  ;;  %v153_v28 = vadd.f32 %v286_v14, %v152_v16 }
  0xaa   :  { %v140_v21 = vadd.f32 %v286_v14, %v139_v17  ;;  %v145_v22 = vadd.f32 %v286_v14, %v144_v18 }
  0xac   :  { %v241_v23 = vpack.c.bf16 %v140_v21, %v138_v19  ;;  %v246_v24 = vpack.c.bf16 %v145_v22, %v143_v20 }
  0xae   :  { %242 = vst [vmem:[%s388_s3] sm:$0xff] %v241_v23  }
  0xaf   :  { %258 = vst [vmem:[%s388_s3 + $0x8] sm:$0xff] %v246_v24  }
  0xb0   :  { %v149_v25 = vpop.f32.mrf.mxu2  ;;  %v154_v26 = vpop.f32.mrf.mxu3 }
  0xb1   :  { %v150_v29 = vadd.f32 %v286_v14, %v149_v25  ;;  %v155_v30 = vadd.f32 %v286_v14, %v154_v26 }
  0xb3   :  { %v251_v31 = vpack.c.bf16 %v150_v29, %v148_v27  ;;  %v256_v32 = vpack.c.bf16 %v155_v30, %v153_v28 }
  0xb5   :  { %259 = vst [vmem:[%s388_s3 + $0x10] sm:$0xff] %v251_v31  }
  0xb6   :  { %260 = vst [vmem:[%s388_s3 + $0x18] sm:$0xff] %v256_v32  }
  0xb7   :  { %177 = vsyncpa [#allocation3], 1 }

</bundles_post_ra>
